<compile_context>
chip_gen: v5e
topology: v5e:2x2
jax: 0.10.0
libtpu: 0.0.40
codegen_flags: <defaults>
</compile_context>

<pallas_src>
import functools
import math

import jax
import jax.numpy as jnp
from jax.experimental import pallas as pl
from jax.experimental.pallas import tpu as pltpu

EPS = 1e-5
LANE = 128


def _round_up(x, m):
    return (x + m - 1) // m * m


# ---------------------------------------------------------------------------
# Fused UPBlock kernel.
# Activation layout: "wide" rows r = y*Wp + x (Wp = padded width, multiple of 8), columns
# x >= W are dummies (used as conv2's left/right zero padding, masked before reuse).
# conv1 input is a K-packed im2col: row r holds all taps' channels on the 128-lane axis.
# ---------------------------------------------------------------------------

def _upblock_kernel(x_ref, w1_ref, s1_ref, b1_ref, w2_ref, s2_ref, b2_ref,
                    o_ref, hpad_ref, *, taps2, mw, wp, w_valid, p_store, l2,
                    cout_sub, identity_from_input):
    cout_p = s1_ref.shape[-1]
    k1_chunks = w1_ref.shape[0]

    # ---- stage 1: conv1 (3x3 K-packed im2col, or upsample-path 1x1) + folded BatchNorm ----
    acc = jnp.zeros((mw, cout_p), jnp.float32)
    for c in range(k1_chunks):                          # usually a single 128-wide K chunk
        acc = acc + jnp.dot(x_ref[:, c * LANE:(c + 1) * LANE], w1_ref[c],
                            preferred_element_type=jnp.float32)
    pre = acc * s1_ref[...] + b1_ref[...]               # BN output (pre-ReLU)

    if identity_from_input:
        # Centre tap is packed first, so lanes [0, Cout) hold x itself; lanes >= Cout pick up
        # other taps' data but those output lanes are sliced away in the wrapper.
        ident = x_ref[:, 0:cout_p].astype(jnp.float32)
    else:
        ident = pre                                     # identity = BN(conv1x1(upsample(x)))

    hact = jnp.maximum(pre, 0.0)                        # ReLU

    # zero the dummy wide columns (x >= W): they double as conv2's left/right zero padding
    col = jax.lax.broadcasted_iota(jnp.int32, (mw, cout_p), 0) % wp
    hact = jnp.where(col < w_valid, hact, 0.0)

    # ---- stash ReLU output as conv2's padded input; only the halo rows are zero-filled ----
    hpad_ref[0:p_store, :] = jnp.zeros((p_store, cout_p), hpad_ref.dtype)
    hpad_ref[p_store:p_store + mw, :] = hact
    hpad_ref[p_store + mw:l2, :] = jnp.zeros((l2 - p_store - mw, cout_p), hpad_ref.dtype)

    # ---- stage 2: conv2 (3x3) as 9 shifted-slice matmuls + folded BN + residual + ReLU ----
    acc2 = jnp.zeros((mw, cout_p), jnp.float32)
    for t, off in enumerate(taps2):                     # static unroll over taps
        a2 = hpad_ref[off:off + mw, :].astype(jnp.bfloat16)
        acc2 = acc2 + jnp.dot(a2, w2_ref[t], preferred_element_type=jnp.float32)
    res = jnp.maximum(acc2 * s2_ref[...] + b2_ref[...] + ident, 0.0)

    # ---- lane-dense writeback: channels -> sublanes, spatial rows -> dense lanes ----
    o_ref[...] = jnp.transpose(res)[0:cout_sub, :]


# ---------------------------------------------------------------------------
# Wrapper: layout prep, weight/BN folding, pallas_call
# ---------------------------------------------------------------------------

def _fold_bn(bn, c_p):
    gamma, beta, mean, var = bn                         # eval-mode (running) statistics
    scale = gamma / jnp.sqrt(var + EPS)
    bias = beta - mean * scale
    scale = jnp.pad(scale, (0, c_p - scale.shape[0])).reshape(1, c_p)
    bias = jnp.pad(bias, (0, c_p - bias.shape[0])).reshape(1, c_p)
    return scale.astype(jnp.float32), bias.astype(jnp.float32)


def _prep_weight_taps(w_oihw, ci_p, co_p):
    co, ci, kh, kw = w_oihw.shape
    m = jnp.transpose(w_oihw, (2, 3, 1, 0)).reshape(kh * kw, ci, co)   # (taps, Cin, Cout)
    m = jnp.pad(m, ((0, 0), (0, ci_p - ci), (0, co_p - co)))
    return m.astype(jnp.bfloat16)


def _prep_weight_kpacked(w_oihw, tap_order, k_p, co_p):
    co, ci, kh, kw = w_oihw.shape
    wt = jnp.transpose(w_oihw, (2, 3, 1, 0))            # (kh, kw, Cin, Cout)
    mats = [wt[dy, dx] for (dy, dx) in tap_order]       # each (Cin, Cout)
    wk = jnp.concatenate(mats, axis=0)                  # (taps*Cin, Cout)
    wk = jnp.pad(wk, ((0, k_p - wk.shape[0]), (0, co_p - co)))
    return wk.reshape(k_p // LANE, LANE, co_p).astype(jnp.bfloat16)


def _bilinear_up2x_align_corners(x_nhwc):
    # TODO(synk): bilinear 2x upsample (align_corners=True) is computed with XLA gather/lerp in
    #             the wrapper, not a Pallas kernel (pure data movement, negligible at these sizes).
    def lerp_axis(v, size, axis):
        out = 2 * size
        if size == 1:
            reps = [1, 1, 1, 1]
            reps[axis] = out
            return jnp.tile(v, reps)
        pos = jnp.arange(out, dtype=jnp.float32) * ((size - 1) / (out - 1))
        lo = jnp.clip(jnp.floor(pos).astype(jnp.int32), 0, size - 2)
        frac = pos - lo.astype(jnp.float32)
        shape = [1, 1, 1, 1]
        shape[axis] = out
        frac = frac.reshape(shape)
        return jnp.take(v, lo, axis=axis) * (1.0 - frac) + jnp.take(v, lo + 1, axis=axis) * frac

    n, h, w, c = x_nhwc.shape
    y = lerp_axis(x_nhwc, h, 1)
    return lerp_axis(y, w, 2)


def upblock_forward(params, x_nchw, *, upsample):
    x = jnp.transpose(x_nchw, (0, 2, 3, 1)).astype(jnp.float32)        # NCHW -> NHWC
    if upsample:
        x = _bilinear_up2x_align_corners(x)
        w1, bn1 = params["up_conv_w"], params["up_bn"]
    else:
        w1, bn1 = params["conv1_w"], params["bn1"]
    w2, bn2 = params["conv2_w"], params["bn2"]

    n, h, w, cin = x.shape
    cout = w2.shape[0]
    if not upsample:
        assert cin == cout, "non-upsample UPBlock requires ich == och for the residual add"

    cout_p = _round_up(cout, LANE)
    cout_sub = _round_up(cout, 8)
    wp = _round_up(w + 2, 8)          # padded "wide" width (>= W+2), sublane aligned
    mw = h * wp                       # rows of the wide layout (columns >= W are dummies)

    xb = x.astype(jnp.bfloat16)       # bf16 activations: half the HBM->VMEM DMA bytes

    if upsample:
        # 1x1 conv: the K-packed "im2col" is just x in the wide layout.
        tap_order = [(0, 0)]
        k1 = cin
        k1p = _round_up(k1, LANE)
        im = jnp.pad(xb, ((0, 0), (0, 0), (0, wp - w), (0, k1p - cin)))
        im = im.reshape(n, mw, k1p)
    else:
        # 3x3 conv: pack all 9 taps along the contraction axis, centre tap first so the identity
        # can be read straight out of lanes [0, Cin) inside the kernel.
        tap_order = [(1, 1)] + [(dy, dx) for dy in range(3) for dx in range(3)
                                if (dy, dx) != (1, 1)]
        k1 = 9 * cin
        k1p = _round_up(k1, LANE)
        xpad = jnp.pad(xb, ((0, 0), (1, 1), (1, wp - w + 1), (0, 0)))   # (n, H+2, Wp+2, Cin)
        taps = [xpad[:, dy:dy + h, dx:dx + wp, :] for (dy, dx) in tap_order]
        im = jnp.concatenate(taps, axis=-1)                              # (n, H, Wp, 9*Cin)
        im = jnp.pad(im, ((0, 0), (0, 0), (0, 0), (0, k1p - k1)))
        im = im.reshape(n, mw, k1p)

    w1m = _prep_weight_kpacked(w1, tap_order, k1p, cout_p)
    w2m = _prep_weight_taps(w2, cout_p, cout_p)
    s1, b1 = _fold_bn(bn1, cout_p)
    s2, b2 = _fold_bn(bn2, cout_p)

    p_store = _round_up(wp + 1, 16)   # aligned base row for the conv2-input slab in the scratch
    l2 = p_store + (h + 1) * wp + 8   # scratch rows (covers the dy=+1, dx=+1 tap overrun)
    taps2 = tuple(p_store - (wp + 1) + dy * wp + dx
                  for dy in range(3) for dx in range(3))

    kernel = functools.partial(
        _upblock_kernel, taps2=taps2, mw=mw, wp=wp, w_valid=w, p_store=p_store,
        l2=l2, cout_sub=cout_sub, identity_from_input=not upsample)

    # VMEM footprint at these shapes is ~1 MiB (double-buffered bf16 inputs + f32 scratch), far
    # below every chip's default scoped limit, so no vmem_limit_bytes override is needed.
    out = pl.pallas_call(
        kernel,
        out_shape=jax.ShapeDtypeStruct((n, cout_sub, mw), jnp.float32),
        grid=(n,),
        in_specs=[
            pl.BlockSpec((None, mw, k1p), lambda i: (i, 0, 0)),              # im2col act (bf16)
            pl.BlockSpec((k1p // LANE, LANE, cout_p), lambda i: (0, 0, 0)),  # w1 (resident)
            pl.BlockSpec((1, cout_p), lambda i: (0, 0)),                     # bn1 scale
            pl.BlockSpec((1, cout_p), lambda i: (0, 0)),                     # bn1 bias
            pl.BlockSpec((9, cout_p, cout_p), lambda i: (0, 0, 0)),          # w2 (resident)
            pl.BlockSpec((1, cout_p), lambda i: (0, 0)),                     # bn2 scale
            pl.BlockSpec((1, cout_p), lambda i: (0, 0)),                     # bn2 bias
        ],
        out_specs=pl.BlockSpec((None, cout_sub, mw), lambda i: (i, 0, 0)),
        scratch_shapes=[pltpu.VMEM((l2, cout_p), jnp.float32)],              # padded conv2 input
        compiler_params=pltpu.CompilerParams(dimension_semantics=("parallel",)),
    )(im, w1m, s1, b1, w2m, s2, b2)

    # transposed lane-dense output: (n, Csub, H*Wp) is already channel-major -> NCHW by slicing
    out = out.reshape(n, cout_sub, h, wp)[:, :cout, :, :w]
    return out


# ---------------------------------------------------------------------------
# Pure-JAX reference (for a correctness check), deterministic synthetic params
# ---------------------------------------------------------------------------

def upblock_reference(params, x_nchw, *, upsample):
    x = jnp.transpose(x_nchw, (0, 2, 3, 1)).astype(jnp.float32)

    def conv(v, w_oihw, pad):
        return jax.lax.conv_general_dilated(
            v, jnp.transpose(w_oihw, (2, 3, 1, 0)), (1, 1), [(pad, pad), (pad, pad)],
            dimension_numbers=("NHWC", "HWIO", "NHWC"))

    def bn(v, p):
        gamma, beta, mean, var = p
        return (v - mean) / jnp.sqrt(var + EPS) * gamma + beta

    if upsample:
        xu = _bilinear_up2x_align_corners(x)
        identity = bn(conv(xu, params["up_conv_w"], 0), params["up_bn"])
        out = identity
    else:
        identity = x
        out = bn(conv(x, params["conv1_w"], 1), params["bn1"])
    out = jnp.maximum(out, 0.0)
    out = bn(conv(out, params["conv2_w"], 1), params["bn2"])
    out = jnp.maximum(out + identity, 0.0)
    return jnp.transpose(out, (0, 3, 1, 2))


def _conv_w(key, cout, cin, k):
    std = math.sqrt(2.0 / (cin * k * k))
    return std * jax.random.normal(key, (cout, cin, k, k), jnp.float32)


def _bn_params(key, c):
    k1, k2, k3, k4 = jax.random.split(key, 4)
    gamma = 1.0 + 0.1 * jax.random.normal(k1, (c,), jnp.float32)
    beta = 0.1 * jax.random.normal(k2, (c,), jnp.float32)
    mean = 0.1 * jax.random.normal(k3, (c,), jnp.float32)
    var = jnp.abs(jax.random.normal(k4, (c,), jnp.float32)) + 0.5
    return gamma, beta, mean, var


def init_upblock_params(key, ich, och, upsample):
    keys = jax.random.split(key, 6)
    p = {
        "conv1_w": _conv_w(keys[0], och, ich, 3),
        "bn1": _bn_params(keys[1], och),
        "conv2_w": _conv_w(keys[2], och, och, 3),
        "bn2": _bn_params(keys[3], och),
    }
    if upsample:
        p["up_conv_w"] = _conv_w(keys[4], och, ich, 1)
        p["up_bn"] = _bn_params(keys[5], och)
    return p


if __name__ == "__main__":
    key = jax.random.PRNGKey(0)
    kp1, kx1, kp2, kx2 = jax.random.split(key, 4)

    # UPBlock(ich=8, och=8, upsample=False): residual is the raw input
    params_a = init_upblock_params(kp1, ich=8, och=8, upsample=False)
    x_a = jax.random.normal(kx1, (2, 8, 16, 16), jnp.float32)
    fwd_a = jax.jit(functools.partial(upblock_forward, params_a, upsample=False))
    y_a = fwd_a(x_a)

    # UPBlock(ich=16, och=8, upsample=True): bilinear 2x + 1x1 conv + BN is the residual
    params_b = init_upblock_params(kp2, ich=16, och=8, upsample=True)
    x_b = jax.random.normal(kx2, (2, 16, 8, 8), jnp.float32)
    fwd_b = jax.jit(functools.partial(upblock_forward, params_b, upsample=True))
    y_b = fwd_b(x_b)

    jax.block_until_ready((y_a, y_b))
    assert y_a.shape == (2, 8, 16, 16), y_a.shape
    assert y_b.shape == (2, 8, 16, 16), y_b.shape
    assert bool(jnp.all(jnp.isfinite(y_a))) and bool(jnp.all(jnp.isfinite(y_b)))
    assert bool(jnp.all(y_a >= 0)) and bool(jnp.all(y_b >= 0))   # final ReLU

    # numerical check against the pure-JAX reference (bf16 MXU operands -> loose tolerance)
    r_a = upblock_reference(params_a, x_a, upsample=False)
    r_b = upblock_reference(params_b, x_b, upsample=True)
    err_a = float(jnp.max(jnp.abs(y_a - r_a)))
    err_b = float(jnp.max(jnp.abs(y_b - r_b)))
    assert err_a < 0.35 and err_b < 0.35, (err_a, err_b)
    print("KERNEL_OK")
</pallas_src>

<mosaic_0001>
module attributes {stable_mosaic.version = 11 : i64} {
  func.func @_upblock_kernel(%arg0: i32, %arg1: memref<1x384x128xbf16, #tpu.memory_space<vmem>>, %arg2: memref<1x128x128xbf16, #tpu.memory_space<vmem>>, %arg3: memref<1x128xf32, #tpu.memory_space<vmem>>, %arg4: memref<1x128xf32, #tpu.memory_space<vmem>>, %arg5: memref<9x128x128xbf16, #tpu.memory_space<vmem>>, %arg6: memref<1x128xf32, #tpu.memory_space<vmem>>, %arg7: memref<1x128xf32, #tpu.memory_space<vmem>>, %arg8: memref<1x8x384xf32, #tpu.memory_space<vmem>>, %arg9: memref<448x128xf32, #tpu.memory_space<vmem>>) attributes {dimension_semantics = [#tpu.dimension_semantics<parallel>], iteration_bounds = array<i64: 2>, scalar_prefetch = 0 : i64, scratch_operands = 1 : i64, tpu.core_type = #tpu.core_type<tc>, window_params = [{transform_indices = @transform_0, window_bounds = array<i64: 1, 384, 128>}, {pipeline_mode = #tpu.pipeline_mode<synchronous>, transform_indices = @transform_1, window_bounds = array<i64: 1, 128, 128>}, {pipeline_mode = #tpu.pipeline_mode<synchronous>, transform_indices = @transform_2, window_bounds = array<i64: 1, 128>}, {pipeline_mode = #tpu.pipeline_mode<synchronous>, transform_indices = @transform_3, window_bounds = array<i64: 1, 128>}, {pipeline_mode = #tpu.pipeline_mode<synchronous>, transform_indices = @transform_4, window_bounds = array<i64: 9, 128, 128>}, {pipeline_mode = #tpu.pipeline_mode<synchronous>, transform_indices = @transform_5, window_bounds = array<i64: 1, 128>}, {pipeline_mode = #tpu.pipeline_mode<synchronous>, transform_indices = @transform_6, window_bounds = array<i64: 1, 128>}, {transform_indices = @transform_7, window_bounds = array<i64: 1, 8, 384>}]} {
    %cst = arith.constant 0.000000e+00 : f32
    %0 = vector.broadcast %cst : f32 to vector<384x128xf32>
    %c0 = arith.constant 0 : index
    %c0_0 = arith.constant 0 : index
    %c0_1 = arith.constant 0 : index
    %1 = vector.load %arg1[%c0, %c0_0, %c0_1] : memref<1x384x128xbf16, #tpu.memory_space<vmem>>, vector<1x384x128xbf16>
    %2 = vector.shape_cast %1 : vector<1x384x128xbf16> to vector<384x128xbf16>
    %c0_2 = arith.constant 0 : index
    %c0_3 = arith.constant 0 : index
    %c0_4 = arith.constant 0 : index
    %3 = vector.load %arg2[%c0_2, %c0_3, %c0_4] : memref<1x128x128xbf16, #tpu.memory_space<vmem>>, vector<1x128x128xbf16>
    %4 = vector.shape_cast %3 : vector<1x128x128xbf16> to vector<128x128xbf16>
    %cst_5 = arith.constant dense<0.000000e+00> : vector<384x128xf32>
    %5 = tpu.matmul %2, %4, %cst_5 {dimension_numbers = #tpu.dot_dimension_numbers<[1], [0], [0], [1], [0, 0, 1, 1], [], []>} : vector<384x128xbf16>, vector<128x128xbf16>, vector<384x128xf32> -> vector<384x128xf32>
    %6 = arith.addf %0, %5 : vector<384x128xf32>
    %c0_6 = arith.constant 0 : index
    %c0_7 = arith.constant 0 : index
    %7 = vector.load %arg3[%c0_6, %c0_7] : memref<1x128xf32, #tpu.memory_space<vmem>>, vector<1x128xf32>
    %8 = vector.broadcast %7 : vector<1x128xf32> to vector<384x128xf32>
    %9 = arith.mulf %6, %8 : vector<384x128xf32>
    %c0_8 = arith.constant 0 : index
    %c0_9 = arith.constant 0 : index
    %10 = vector.load %arg4[%c0_8, %c0_9] : memref<1x128xf32, #tpu.memory_space<vmem>>, vector<1x128xf32>
    %11 = vector.broadcast %10 : vector<1x128xf32> to vector<384x128xf32>
    %12 = arith.addf %9, %11 : vector<384x128xf32>
    %c0_10 = arith.constant 0 : index
    %c0_11 = arith.constant 0 : index
    %c0_12 = arith.constant 0 : index
    %13 = vector.load %arg1[%c0_10, %c0_11, %c0_12] : memref<1x384x128xbf16, #tpu.memory_space<vmem>>, vector<1x384x128xbf16>
    %14 = vector.shape_cast %13 : vector<1x384x128xbf16> to vector<384x128xbf16>
    %15 = arith.extf %14 : vector<384x128xbf16> to vector<384x128xf32>
    %cst_13 = arith.constant 0.000000e+00 : f32
    %16 = vector.broadcast %cst_13 : f32 to vector<384x128xf32>
    %17 = arith.maximumf %12, %16 : vector<384x128xf32>
    %18 = tpu.iota {dimensions = array<i32: 0>} : vector<384x128xi32>
    %c24_i32 = arith.constant 24 : i32
    %c0_i32 = arith.constant 0 : i32
    %19 = arith.cmpi eq, %c24_i32, %c0_i32 : i32
    %c1_i32 = arith.constant 1 : i32
    %20 = arith.select %19, %c1_i32, %c24_i32 : i32
    %21 = vector.broadcast %20 : i32 to vector<384x128xi32>
    %22 = arith.remsi %18, %21 : vector<384x128xi32>
    %c0_i32_14 = arith.constant 0 : i32
    %23 = vector.broadcast %c0_i32_14 : i32 to vector<384x128xi32>
    %24 = arith.cmpi ne, %22, %23 : vector<384x128xi32>
    %c0_i32_15 = arith.constant 0 : i32
    %25 = vector.broadcast %c0_i32_15 : i32 to vector<384x128xi32>
    %26 = arith.cmpi slt, %22, %25 : vector<384x128xi32>
    %c0_i32_16 = arith.constant 0 : i32
    %27 = arith.cmpi slt, %20, %c0_i32_16 : i32
    %28 = vector.broadcast %27 : i1 to vector<384x128xi1>
    %29 = vector.broadcast %28 : vector<384x128xi1> to vector<384x128xi1>
    %30 = arith.xori %26, %29 : vector<384x128xi1>
    %31 = arith.andi %30, %24 : vector<384x128xi1>
    %32 = vector.broadcast %20 : i32 to vector<384x128xi32>
    %33 = arith.addi %22, %32 : vector<384x128xi32>
    %34 = arith.select %31, %33, %22 : vector<384x128xi1>, vector<384x128xi32>
    %c16_i32 = arith.constant 16 : i32
    %35 = vector.broadcast %c16_i32 : i32 to vector<384x128xi32>
    %36 = arith.cmpi slt, %34, %35 : vector<384x128xi32>
    %cst_17 = arith.constant 0.000000e+00 : f32
    %37 = vector.broadcast %cst_17 : f32 to vector<384x128xf32>
    %38 = arith.select %36, %17, %37 : vector<384x128xi1>, vector<384x128xf32>
    %cst_18 = arith.constant 0.000000e+00 : f32
    %39 = vector.broadcast %cst_18 : f32 to vector<32x128xf32>
    %c0_19 = arith.constant 0 : index
    %c0_20 = arith.constant 0 : index
    %40 = vector.load %arg9[%c0_19, %c0_20] : memref<448x128xf32, #tpu.memory_space<vmem>>, vector<32x128xf32>
    tpu.vector_store %arg9[%c0_19, %c0_20], %39 {strides = array<i32>} : memref<448x128xf32, #tpu.memory_space<vmem>>, vector<32x128xf32>,
    %c32 = arith.constant 32 : index
    %c0_21 = arith.constant 0 : index
    %41 = vector.load %arg9[%c32, %c0_21] : memref<448x128xf32, #tpu.memory_space<vmem>>, vector<384x128xf32>
    tpu.vector_store %arg9[%c32, %c0_21], %38 {strides = array<i32>} : memref<448x128xf32, #tpu.memory_space<vmem>>, vector<384x128xf32>,
    %cst_22 = arith.constant 0.000000e+00 : f32
    %42 = vector.broadcast %cst_22 : f32 to vector<32x128xf32>
    %c416 = arith.constant 416 : index
    %c0_23 = arith.constant 0 : index
    %43 = vector.load %arg9[%c416, %c0_23] : memref<448x128xf32, #tpu.memory_space<vmem>>, vector<32x128xf32>
    tpu.vector_store %arg9[%c416, %c0_23], %42 {strides = array<i32>} : memref<448x128xf32, #tpu.memory_space<vmem>>, vector<32x128xf32>,
    %cst_24 = arith.constant 0.000000e+00 : f32
    %44 = vector.broadcast %cst_24 : f32 to vector<384x128xf32>
    %c7 = arith.constant 7 : index
    %c0_25 = arith.constant 0 : index
    %45 = vector.load %arg9[%c7, %c0_25] : memref<448x128xf32, #tpu.memory_space<vmem>>, vector<384x128xf32>
    %46 = arith.truncf %45 : vector<384x128xf32> to vector<384x128xbf16>
    %c0_26 = arith.constant 0 : index
    %c0_27 = arith.constant 0 : index
    %c0_28 = arith.constant 0 : index
    %47 = vector.load %arg5[%c0_26, %c0_27, %c0_28] : memref<9x128x128xbf16, #tpu.memory_space<vmem>>, vector<1x128x128xbf16>
    %48 = vector.shape_cast %47 : vector<1x128x128xbf16> to vector<128x128xbf16>
    %cst_29 = arith.constant dense<0.000000e+00> : vector<384x128xf32>
    %49 = tpu.matmul %46, %48, %cst_29 {dimension_numbers = #tpu.dot_dimension_numbers<[1], [0], [0], [1], [0, 0, 1, 1], [], []>} : vector<384x128xbf16>, vector<128x128xbf16>, vector<384x128xf32> -> vector<384x128xf32>
    %50 = arith.addf %44, %49 : vector<384x128xf32>
    %c8 = arith.constant 8 : index
    %c0_30 = arith.constant 0 : index
    %51 = vector.load %arg9[%c8, %c0_30] : memref<448x128xf32, #tpu.memory_space<vmem>>, vector<384x128xf32>
    %52 = arith.truncf %51 : vector<384x128xf32> to vector<384x128xbf16>
    %c1 = arith.constant 1 : index
    %c0_31 = arith.constant 0 : index
    %c0_32 = arith.constant 0 : index
    %53 = vector.load %arg5[%c1, %c0_31, %c0_32] : memref<9x128x128xbf16, #tpu.memory_space<vmem>>, vector<1x128x128xbf16>
    %54 = vector.shape_cast %53 : vector<1x128x128xbf16> to vector<128x128xbf16>
    %cst_33 = arith.constant dense<0.000000e+00> : vector<384x128xf32>
    %55 = tpu.matmul %52, %54, %cst_33 {dimension_numbers = #tpu.dot_dimension_numbers<[1], [0], [0], [1], [0, 0, 1, 1], [], []>} : vector<384x128xbf16>, vector<128x128xbf16>, vector<384x128xf32> -> vector<384x128xf32>
    %56 = arith.addf %50, %55 : vector<384x128xf32>
    %c9 = arith.constant 9 : index
    %c0_34 = arith.constant 0 : index
    %57 = vector.load %arg9[%c9, %c0_34] : memref<448x128xf32, #tpu.memory_space<vmem>>, vector<384x128xf32>
    %58 = arith.truncf %57 : vector<384x128xf32> to vector<384x128xbf16>
    %c2 = arith.constant 2 : index
    %c0_35 = arith.constant 0 : index
    %c0_36 = arith.constant 0 : index
    %59 = vector.load %arg5[%c2, %c0_35, %c0_36] : memref<9x128x128xbf16, #tpu.memory_space<vmem>>, vector<1x128x128xbf16>
    %60 = vector.shape_cast %59 : vector<1x128x128xbf16> to vector<128x128xbf16>
    %cst_37 = arith.constant dense<0.000000e+00> : vector<384x128xf32>
    %61 = tpu.matmul %58, %60, %cst_37 {dimension_numbers = #tpu.dot_dimension_numbers<[1], [0], [0], [1], [0, 0, 1, 1], [], []>} : vector<384x128xbf16>, vector<128x128xbf16>, vector<384x128xf32> -> vector<384x128xf32>
    %62 = arith.addf %56, %61 : vector<384x128xf32>
    %c31 = arith.constant 31 : index
    %c0_38 = arith.constant 0 : index
    %63 = vector.load %arg9[%c31, %c0_38] : memref<448x128xf32, #tpu.memory_space<vmem>>, vector<384x128xf32>
    %64 = arith.truncf %63 : vector<384x128xf32> to vector<384x128xbf16>
    %c3 = arith.constant 3 : index
    %c0_39 = arith.constant 0 : index
    %c0_40 = arith.constant 0 : index
    %65 = vector.load %arg5[%c3, %c0_39, %c0_40] : memref<9x128x128xbf16, #tpu.memory_space<vmem>>, vector<1x128x128xbf16>
    %66 = vector.shape_cast %65 : vector<1x128x128xbf16> to vector<128x128xbf16>
    %cst_41 = arith.constant dense<0.000000e+00> : vector<384x128xf32>
    %67 = tpu.matmul %64, %66, %cst_41 {dimension_numbers = #tpu.dot_dimension_numbers<[1], [0], [0], [1], [0, 0, 1, 1], [], []>} : vector<384x128xbf16>, vector<128x128xbf16>, vector<384x128xf32> -> vector<384x128xf32>
    %68 = arith.addf %62, %67 : vector<384x128xf32>
    %c32_42 = arith.constant 32 : index
    %c0_43 = arith.constant 0 : index
    %69 = vector.load %arg9[%c32_42, %c0_43] : memref<448x128xf32, #tpu.memory_space<vmem>>, vector<384x128xf32>
    %70 = arith.truncf %69 : vector<384x128xf32> to vector<384x128xbf16>
    %c4 = arith.constant 4 : index
    %c0_44 = arith.constant 0 : index
    %c0_45 = arith.constant 0 : index
    %71 = vector.load %arg5[%c4, %c0_44, %c0_45] : memref<9x128x128xbf16, #tpu.memory_space<vmem>>, vector<1x128x128xbf16>
    %72 = vector.shape_cast %71 : vector<1x128x128xbf16> to vector<128x128xbf16>
    %cst_46 = arith.constant dense<0.000000e+00> : vector<384x128xf32>
    %73 = tpu.matmul %70, %72, %cst_46 {dimension_numbers = #tpu.dot_dimension_numbers<[1], [0], [0], [1], [0, 0, 1, 1], [], []>} : vector<384x128xbf16>, vector<128x128xbf16>, vector<384x128xf32> -> vector<384x128xf32>
    %74 = arith.addf %68, %73 : vector<384x128xf32>
    %c33 = arith.constant 33 : index
    %c0_47 = arith.constant 0 : index
    %75 = vector.load %arg9[%c33, %c0_47] : memref<448x128xf32, #tpu.memory_space<vmem>>, vector<384x128xf32>
    %76 = arith.truncf %75 : vector<384x128xf32> to vector<384x128xbf16>
    %c5 = arith.constant 5 : index
    %c0_48 = arith.constant 0 : index
    %c0_49 = arith.constant 0 : index
    %77 = vector.load %arg5[%c5, %c0_48, %c0_49] : memref<9x128x128xbf16, #tpu.memory_space<vmem>>, vector<1x128x128xbf16>
    %78 = vector.shape_cast %77 : vector<1x128x128xbf16> to vector<128x128xbf16>
    %cst_50 = arith.constant dense<0.000000e+00> : vector<384x128xf32>
    %79 = tpu.matmul %76, %78, %cst_50 {dimension_numbers = #tpu.dot_dimension_numbers<[1], [0], [0], [1], [0, 0, 1, 1], [], []>} : vector<384x128xbf16>, vector<128x128xbf16>, vector<384x128xf32> -> vector<384x128xf32>
    %80 = arith.addf %74, %79 : vector<384x128xf32>
    %c55 = arith.constant 55 : index
    %c0_51 = arith.constant 0 : index
    %81 = vector.load %arg9[%c55, %c0_51] : memref<448x128xf32, #tpu.memory_space<vmem>>, vector<384x128xf32>
    %82 = arith.truncf %81 : vector<384x128xf32> to vector<384x128xbf16>
    %c6 = arith.constant 6 : index
    %c0_52 = arith.constant 0 : index
    %c0_53 = arith.constant 0 : index
    %83 = vector.load %arg5[%c6, %c0_52, %c0_53] : memref<9x128x128xbf16, #tpu.memory_space<vmem>>, vector<1x128x128xbf16>
    %84 = vector.shape_cast %83 : vector<1x128x128xbf16> to vector<128x128xbf16>
    %cst_54 = arith.constant dense<0.000000e+00> : vector<384x128xf32>
    %85 = tpu.matmul %82, %84, %cst_54 {dimension_numbers = #tpu.dot_dimension_numbers<[1], [0], [0], [1], [0, 0, 1, 1], [], []>} : vector<384x128xbf16>, vector<128x128xbf16>, vector<384x128xf32> -> vector<384x128xf32>
    %86 = arith.addf %80, %85 : vector<384x128xf32>
    %c56 = arith.constant 56 : index
    %c0_55 = arith.constant 0 : index
    %87 = vector.load %arg9[%c56, %c0_55] : memref<448x128xf32, #tpu.memory_space<vmem>>, vector<384x128xf32>
    %88 = arith.truncf %87 : vector<384x128xf32> to vector<384x128xbf16>
    %c7_56 = arith.constant 7 : index
    %c0_57 = arith.constant 0 : index
    %c0_58 = arith.constant 0 : index
    %89 = vector.load %arg5[%c7_56, %c0_57, %c0_58] : memref<9x128x128xbf16, #tpu.memory_space<vmem>>, vector<1x128x128xbf16>
    %90 = vector.shape_cast %89 : vector<1x128x128xbf16> to vector<128x128xbf16>
    %cst_59 = arith.constant dense<0.000000e+00> : vector<384x128xf32>
    %91 = tpu.matmul %88, %90, %cst_59 {dimension_numbers = #tpu.dot_dimension_numbers<[1], [0], [0], [1], [0, 0, 1, 1], [], []>} : vector<384x128xbf16>, vector<128x128xbf16>, vector<384x128xf32> -> vector<384x128xf32>
    %92 = arith.addf %86, %91 : vector<384x128xf32>
    %c57 = arith.constant 57 : index
    %c0_60 = arith.constant 0 : index
    %93 = vector.load %arg9[%c57, %c0_60] : memref<448x128xf32, #tpu.memory_space<vmem>>, vector<384x128xf32>
    %94 = arith.truncf %93 : vector<384x128xf32> to vector<384x128xbf16>
    %c8_61 = arith.constant 8 : index
    %c0_62 = arith.constant 0 : index
    %c0_63 = arith.constant 0 : index
    %95 = vector.load %arg5[%c8_61, %c0_62, %c0_63] : memref<9x128x128xbf16, #tpu.memory_space<vmem>>, vector<1x128x128xbf16>
    %96 = vector.shape_cast %95 : vector<1x128x128xbf16> to vector<128x128xbf16>
    %cst_64 = arith.constant dense<0.000000e+00> : vector<384x128xf32>
    %97 = tpu.matmul %94, %96, %cst_64 {dimension_numbers = #tpu.dot_dimension_numbers<[1], [0], [0], [1], [0, 0, 1, 1], [], []>} : vector<384x128xbf16>, vector<128x128xbf16>, vector<384x128xf32> -> vector<384x128xf32>
    %98 = arith.addf %92, %97 : vector<384x128xf32>
    %c0_65 = arith.constant 0 : index
    %c0_66 = arith.constant 0 : index
    %99 = vector.load %arg6[%c0_65, %c0_66] : memref<1x128xf32, #tpu.memory_space<vmem>>, vector<1x128xf32>
    %100 = vector.broadcast %99 : vector<1x128xf32> to vector<384x128xf32>
    %101 = arith.mulf %98, %100 : vector<384x128xf32>
    %c0_67 = arith.constant 0 : index
    %c0_68 = arith.constant 0 : index
    %102 = vector.load %arg7[%c0_67, %c0_68] : memref<1x128xf32, #tpu.memory_space<vmem>>, vector<1x128xf32>
    %103 = vector.broadcast %102 : vector<1x128xf32> to vector<384x128xf32>
    %104 = arith.addf %101, %103 : vector<384x128xf32>
    %105 = arith.addf %104, %15 : vector<384x128xf32>
    %cst_69 = arith.constant 0.000000e+00 : f32
    %106 = vector.broadcast %cst_69 : f32 to vector<384x128xf32>
    %107 = arith.maximumf %105, %106 : vector<384x128xf32>
    %108 = tpu.transpose %107, [1, 0] : vector<384x128xf32> -> vector<128x384xf32>
    %109 = vector.extract_strided_slice %108 {offsets = [0, 0], sizes = [8, 384], strides = [1, 1]} : vector<128x384xf32> to vector<8x384xf32>
    %c0_70 = arith.constant 0 : index
    %c0_71 = arith.constant 0 : index
    %c0_72 = arith.constant 0 : index
    %110 = vector.load %arg8[%c0_70, %c0_71, %c0_72] : memref<1x8x384xf32, #tpu.memory_space<vmem>>, vector<1x8x384xf32>
    %111 = vector.shape_cast %110 : vector<1x8x384xf32> to vector<8x384xf32>
    %112 = vector.shape_cast %109 : vector<8x384xf32> to vector<1x8x384xf32>
    tpu.vector_store %arg8[%c0_70, %c0_71, %c0_72], %112 {strides = array<i32>} : memref<1x8x384xf32, #tpu.memory_space<vmem>>, vector<1x8x384xf32>,
    return
  }
  func.func @transform_0(%arg0: i32) -> (i32, i32, i32) {
    %c0_i32 = arith.constant 0 : i32
    %c0_i32_0 = arith.constant 0 : i32
    %c0_i32_1 = arith.constant 0 : i32
    return %arg0, %c0_i32, %c0_i32_0 : i32, i32, i32
  }
  func.func @transform_1(%arg0: i32) -> (i32, i32, i32) {
    %c0_i32 = arith.constant 0 : i32
    %c0_i32_0 = arith.constant 0 : i32
    %c0_i32_1 = arith.constant 0 : i32
    %c0_i32_2 = arith.constant 0 : i32
    return %c0_i32, %c0_i32_0, %c0_i32_1 : i32, i32, i32
  }
  func.func @transform_2(%arg0: i32) -> (i32, i32) {
    %c0_i32 = arith.constant 0 : i32
    %c0_i32_0 = arith.constant 0 : i32
    %c0_i32_1 = arith.constant 0 : i32
    return %c0_i32, %c0_i32_0 : i32, i32
  }
  func.func @transform_3(%arg0: i32) -> (i32, i32) {
    %c0_i32 = arith.constant 0 : i32
    %c0_i32_0 = arith.constant 0 : i32
    %c0_i32_1 = arith.constant 0 : i32
    return %c0_i32, %c0_i32_0 : i32, i32
  }
  func.func @transform_4(%arg0: i32) -> (i32, i32, i32) {
    %c0_i32 = arith.constant 0 : i32
    %c0_i32_0 = arith.constant 0 : i32
    %c0_i32_1 = arith.constant 0 : i32
    %c0_i32_2 = arith.constant 0 : i32
    return %c0_i32, %c0_i32_0, %c0_i32_1 : i32, i32, i32
  }
  func.func @transform_5(%arg0: i32) -> (i32, i32) {
    %c0_i32 = arith.constant 0 : i32
    %c0_i32_0 = arith.constant 0 : i32
    %c0_i32_1 = arith.constant 0 : i32
    return %c0_i32, %c0_i32_0 : i32, i32
  }
  func.func @transform_6(%arg0: i32) -> (i32, i32) {
    %c0_i32 = arith.constant 0 : i32
    %c0_i32_0 = arith.constant 0 : i32
    %c0_i32_1 = arith.constant 0 : i32
    return %c0_i32, %c0_i32_0 : i32, i32
  }
  func.func @transform_7(%arg0: i32) -> (i32, i32, i32) {
    %c0_i32 = arith.constant 0 : i32
    %c0_i32_0 = arith.constant 0 : i32
    %c0_i32_1 = arith.constant 0 : i32
    return %arg0, %c0_i32, %c0_i32_0 : i32, i32, i32
  }
}

</mosaic_0001>

<bundles_post_ra>
// kernel: upblock_forward.1
= control target key start
LH: loop header
LB: loop body
LE: loop exit
PB: predicated region body
PF: predicated region fallthrough
CT: control target
= control target key end

     0   :  { %s6575_s24 = smov 0   ;;  %s9645_s0 = inlined_call_operand.vmem [shape: bf16[2,384,128], index: 0, kind: input, shape index: {}]   ;;  %s9646_s1 = inlined_call_operand.vmem [shape: bf16[1,128,128], index: 1, kind: input, shape index: {}]   ;;  %s9647_s2 = inlined_call_operand.vmem [shape: f32[1,128], index: 2, kind: input, shape index: {}]   ;;  %s9648_s3 = inlined_call_operand.vmem [shape: f32[1,128], index: 3, kind: input, shape index: {}]   ;;  %s9649_s4 = inlined_call_operand.vmem [shape: bf16[9,128,128], index: 4, kind: input, shape index: {}]   ;;  %s9650_s5 = inlined_call_operand.vmem [shape: f32[1,128], index: 5, kind: input, shape index: {}]   ;;  %s9651_s6 = inlined_call_operand.vmem [shape: f32[1,128], index: 6, kind: input, shape index: {}]   ;;  %s9652_s7 = inlined_call_operand.vmem [shape: f32[2,8,384], index: 7, kind: output, shape index: {}]  }
   0x1 LB: > { %s5780_s25 = sadd.s32 4294967295, %s6529_s24   ;;  %p5784_p0 = scmp.ge.s32.totalorder %s6529_s24, 1  ;;  %s6529_s24 = sphi %s6575_s24, %s17_s24  }
   0x2   : > { %p237_p1 = scmp.lt.s32.totalorder %s6529_s24, 3 }
   0x4   : > { %p238_p2 = pnand %p5784_p0, %p237_p1 }
   0x6   : > { %241 = sbr.rel (%p238_p2) target bundleno = 1636 (0x664), region = 48 }
   0xb   : > { %v6364_v0 = vld [vmem:[%s9646_s1 + $0x38] sm:$0xff]  ;;  %v6363_v1 = vld [vmem:[%s9646_s1 + $0x30] sm:$0xff]  ;;  %v6362_v2 = vld [vmem:[%s9646_s1 + $0x28] sm:$0xff]  ;;  %p269_p3 = scmp.lt.s32.totalorder %s5780_s25, 1  ;;  %v864_v23 = vlaneseq  ;;  %v6531_v38 = vmov 0   ;;  %v6532_v48 = vmov 0.0  }
   0xc   : > { %535 = vmatpush.bf16.msra.mxu0 %v6364_v0  ;;  %6437 = vmatpush.bf16.msra.mxu2 %v6364_v0  ;;  %v6361_v3 = vld [vmem:[%s9646_s1 + $0x20] sm:$0xff]  ;;  %v6360_v4 = vld [vmem:[%s9646_s1 + $0x18] sm:$0xff]  ;;  %v6359_v5 = vld [vmem:[%s9646_s1 + $0x10] sm:$0xff]  ;;  %2642 = vst [vmem:[#allocation2 + $0x8] sm:$0xff] %v6532_v48  ;;  %v6533_v55 = vmov 0.0|0.0  }
   0xd   : > { %s10099_s25 = smov (!%p269_p3, %s5780_s25), 1  ;;  %v6358_v6 = vld [vmem:[%s9646_s1 + $0x8] sm:$0xff]  ;;  %v6357_v7 = vld [vmem:[%s9646_s1] sm:$0xff]  ;;  %v6380_v16 = vld [vmem:[%s9649_s4 + $0x78] sm:$0xff]  ;;  %v6640_v24 = vshrl.u32 %v864_v23, 7  ;;  %2643 = vst [vmem:[#allocation2 + $0x10] sm:$0xff] %v6532_v48 }
   0xe   : > { %s6453_s17 = smul.u32 192, %s10099_s25  ;;  %2922 = vmatpush.bf16.msra.mxu1 %v6380_v16  ;;  %6445 = vmatpush.bf16.msra.mxu3 %v6380_v16  ;;  %v6379_v17 = vld [vmem:[%s9649_s4 + $0x70] sm:$0xff]  ;;  %v6378_v20 = vld [vmem:[%s9649_s4 + $0x68] sm:$0xff]  ;;  %v6377_v21 = vld [vmem:[%s9649_s4 + $0x60] sm:$0xff]  ;;  %2641 = vst [vmem:[#allocation2] sm:$0xff] %v6532_v48 }
   0xf   : > { %v6376_v22 = vld [vmem:[%s9649_s4 + $0x58] sm:$0xff]  ;;  %v6375_v25 = vld [vmem:[%s9649_s4 + $0x50] sm:$0xff]  ;;  %v916_v26 = vand.u32 65535, %v6640_v24  ;;  %v917_v29 = vshrl.u32 %v6640_v24, 16  ;;  %v6374_v31 = vld [vmem:[%s9649_s4 + $0x48] sm:$0xff]  ;;  %v6657_v41 = vadd.s32 8, %v6640_v24 }
  0x10   : > { %536 = vmatpush.bf16.msra.mxu0 %v6363_v1  ;;  %6438 = vmatpush.bf16.msra.mxu2 %v6363_v1  ;;  %s6613_s22 = scalar_lea.vmem %s9645_s0, %s6453_s17  ;;  %v6373_v37 = vld [vmem:[%s9649_s4 + $0x40] sm:$0xff]  ;;  %2644 = vst [vmem:[#allocation2 + $0x18] sm:$0xff] %v6532_v48  ;;  %v6667_v58 = vadd.s32 16, %v6640_v24  ;;  %v6683_v16 = vadd.s32 24, %v6640_v24 }
  0x11   : > { %v6333_v8 = vld [vmem:[%s6613_s22] sm:$0xff]  ;;  %v6334_v10 = vld [vmem:[%s6613_s22 + $0x8] sm:$0xff]  ;;  %v6335_v12 = vld [vmem:[%s6613_s22 + $0x10] sm:$0xff]  ;;  %v920_v30 = vmul.u32 43690, %v916_v26  ;;  %v919_v32 = vmul.u32 43691, %v916_v26  ;;  %v921_v33 = vmul.u32 43691, %v917_v29 }
  0x12   : > { %v6345_v9 = vld [vmem:[%s6613_s22 + $0x60] sm:$0xff]  ;;  %v6346_v11 = vld [vmem:[%s6613_s22 + $0x68] sm:$0xff]  ;;  %v6347_v13 = vld [vmem:[%s6613_s22 + $0x70] sm:$0xff]  ;;  %2923 = vmatpush.bf16.msra.mxu1 %v6379_v17  ;;  %6446 = vmatpush.bf16.msra.mxu3 %v6379_v17  ;;  %v922_v35 = vmul.u32 43690, %v917_v29  ;;  %v945_v43 = vand.u32 65535, %v6657_v41  ;;  %v946_v46 = vshrl.u32 %v6657_v41, 16 }
  0x13   : > { %v6336_v14 = vld [vmem:[%s6613_s22 + $0x18] sm:$0xff]  ;;  %v6337_v18 = vld [vmem:[%s6613_s22 + $0x20] sm:$0xff]  ;;  %v6338_v27 = vld [vmem:[%s6613_s22 + $0x28] sm:$0xff]  ;;  %v923_v34 = vshll.u32 %v920_v30, 16  ;;  %v925_v36 = vshll.u32 %v921_v33, 16  ;;  %v924_v44 = vshrl.u32 %v920_v30, 16 }
  0x14   : > { %537 = vmatpush.bf16.msra.mxu0 %v6362_v2  ;;  %6439 = vmatpush.bf16.msra.mxu2 %v6362_v2  ;;  %v6348_v15 = vld [vmem:[%s6613_s22 + $0x78] sm:$0xff]  ;;  %v6349_v19 = vld [vmem:[%s6613_s22 + $0x80] sm:$0xff]  ;;  %v6350_v28 = vld [vmem:[%s6613_s22 + $0x88] sm:$0xff]  ;;  %v949_v49 = vmul.u32 43690, %v945_v43  ;;  %v926_v50 = vshrl.u32 %v921_v33, 16  ;;  %v948_v51 = vmul.u32 43691, %v945_v43 }
  0x15   : > { %vm927_vm0 = vc.u32 %v919_v32, %v923_v34  ;;  %v929_v40 = vadd.s32 %v923_v34, %v919_v32  ;;  %v950_v52 = vmul.u32 43691, %v946_v46  ;;  %v951_v56 = vmul.u32 43690, %v946_v46  ;;  %2693 = vst [vmem:[#allocation2 + $0x1a0] sm:$0xff] %v6532_v48  ;;  %v6339_v1 = vld [vmem:[%s6613_s22 + $0x30] sm:$0xff] }
  0x16   : > { %2924 = vmatpush.bf16.msra.mxu1 %v6378_v20  ;;  %6447 = vmatpush.bf16.msra.mxu3 %v6378_v20  ;;  %v928_v39 = vsel %vm927_vm0, 1, %v6531_v38  ;;  %v952_v54 = vshll.u32 %v949_v49, 16  ;;  %2694 = vst [vmem:[#allocation2 + $0x1a8] sm:$0xff] %v6532_v48  ;;  %v974_v62 = vand.u32 65535, %v6667_v58  ;;  %v6351_v2 = vld [vmem:[%s6613_s22 + $0x90] sm:$0xff]  ;;  %v1003_v20 = vand.u32 65535, %v6683_v16 }
  0x17   : > { %v930_v42 = vadd.s32 %v928_v39, %v922_v35  ;;  %vm931_vm1 = vc.u32 %v929_v40, %v925_v36  ;;  %v954_v57 = vshll.u32 %v950_v52, 16  ;;  %2695 = vst [vmem:[#allocation2 + $0x1b0] sm:$0xff] %v6532_v48  ;;  %v1004_v29 = vshrl.u32 %v6683_v16, 16 }
  0x18   : > { %538 = vmatpush.bf16.msra.mxu0 %v6361_v3  ;;  %6440 = vmatpush.bf16.msra.mxu2 %v6361_v3  ;;  %v932_v45 = vsel %vm931_vm1, 1, %v6531_v38  ;;  %vm956_vm2 = vc.u32 %v948_v51, %v952_v54  ;;  %v958_v60 = vadd.s32 %v952_v54, %v948_v51  ;;  %2696 = vst [vmem:[#allocation2 + $0x1b8] sm:$0xff] %v6532_v48  ;;  %v953_v3 = vshrl.u32 %v949_v49, 16  ;;  %v6352_v51 = vld [vmem:[%s6613_s22 + $0x98] sm:$0xff] }
  0x19   : > { %v934_v47 = vadd.s32 %v932_v45, %v930_v42  ;;  %v957_v61 = vsel %vm956_vm2, 1, %v6531_v38  ;;  %v6694_v30 = vmul.u32 43690, %v1003_v20  ;;  %v1006_v34 = vmul.u32 43691, %v1003_v20 }
  0x1a   : > { %2925 = vmatpush.bf16.msra.mxu1 %v6377_v21  ;;  %6448 = vmatpush.bf16.msra.mxu3 %v6377_v21  ;;  %v959_v0 = vadd.s32 %v957_v61, %v951_v56  ;;  %vm960_vm3 = vc.u32 %v958_v60, %v954_v57  ;;  %v6703_v36 = vmul.u32 43691, %v1004_v29  ;;  %v6707_v39 = vadd.s32 192, %v6640_v24 }
  0x1b   : > { %v935_v53 = vadd.s32 %v934_v47, %v924_v44  ;;  %v1009_v43 = vmul.u32 43690, %v1004_v29 }
  0x1c   : > { %539 = vmatpush.bf16.msra.mxu0 %v6360_v4  ;;  %6441 = vmatpush.bf16.msra.mxu2 %v6360_v4  ;;  %v961_v4 = vsel %vm960_vm3, 1, %v6531_v38  ;;  %v1612_v44 = vand.u32 65535, %v6707_v39  ;;  %v1012_v46 = vshll.u32 %v6703_v36, 16 }
  0x1d   : > { %v936_v59 = vadd.s32 %v935_v53, %v926_v50  ;;  %v6340_v50 = vld [vmem:[%s6613_s22 + $0x38] sm:$0xff] }
  0x1e   : > { %2926 = vmatpush.bf16.msra.mxu1 %v6376_v22  ;;  %6449 = vmatpush.bf16.msra.mxu3 %v6376_v22  ;;  %v1616_v53 = vmul.u32 43690, %v1612_v44 }
  0x1f   : > { %v937_v63 = vshrl.u32 %v936_v59, 4  ;;  %v6725_v59 = vadd.s32 32, %v6640_v24 }
  0x20   : > { %540 = vmatpush.bf16.msra.mxu0 %v6359_v5  ;;  %6442 = vmatpush.bf16.msra.mxu2 %v6359_v5  ;;  %v975_v5 = vshrl.u32 %v6667_v58, 16  ;;  %v1619_v61 = vshll.u32 %v1616_v53, 16 }
  0x22   : > { %2927 = vmatpush.bf16.msra.mxu1 %v6375_v25  ;;  %6450 = vmatpush.bf16.msra.mxu3 %v6375_v25 }
  0x24   : > { %541 = vmatpush.bf16.msra.mxu0 %v6358_v6  ;;  %6443 = vmatpush.bf16.msra.mxu2 %v6358_v6  ;;  %v938_v6 = vmul.u32 24, %v937_v63  ;;  %v1011_v63 = vshrl.u32 %v6694_v30, 16 }
  0x26   : > { %2928 = vmatpush.bf16.msra.mxu1 %v6374_v31  ;;  %6451 = vmatpush.bf16.msra.mxu3 %v6374_v31 }
  0x28   : > { %542 = vmatpush.bf16.msra.mxu0 %v6357_v7  ;;  %6444 = vmatpush.bf16.msra.mxu2 %v6357_v7  ;;  %v963_v7 = vadd.s32 %v961_v4, %v959_v0  ;;  %v1620_v0 = vshrl.u32 %v1616_v53, 16  ;;  %v6729_v4 = vadd.s32 200, %v6640_v24 }
  0x2a   : > { %2929 = vmatpush.bf16.msra.mxu1 %v6373_v37  ;;  %6452 = vmatpush.bf16.msra.mxu3 %v6373_v37  ;;  %v1010_v37 = vshll.u32 %v6694_v30, 16 }
  0x2b   : > { %543 = vmatmul.bf16.vlgmr.msra.gmra.mxu0 %v6333_v8  ;;  %603 = vmatmul.bf16.vlgmr.msra.gmra.mxu2 %v6345_v9  ;;  %v978_v8 = vmul.u32 43690, %v974_v62  ;;  %v955_v9 = vshrl.u32 %v950_v52, 16  ;;  %v1615_v52 = vmul.u32 43691, %v1612_v44 }
  0x2c   : > { %vm1014_vm9 = vc.u32 %v1006_v34, %v1010_v37  ;;  %v1016_v49 = vadd.s32 %v1010_v37, %v1006_v34 }
  0x2d   : > { %2930 = vmatmul.bf16.vlgmr.msra.gmra.mxu1 %v6533_v55  ;;  %v982_v25 = vshrl.u32 %v978_v8, 16  ;;  %v1015_v47 = vsel %vm1014_vm9, 1, %v6531_v38  ;;  %vm1623_vm13 = vc.u32 %v1615_v52, %v1619_v61 }
  0x2e   : > { %v1017_v57 = vadd.s32 %v1015_v47, %v1009_v43  ;;  %vm1018_vm12 = vc.u32 %v1016_v49, %v1012_v46  ;;  %v6770_v43 = vadd.s32 208, %v6640_v24  ;;  %v6787_v49 = vld [vmem:[%s9647_s2] ss:$0 sm:$0xff] }
  0x3b   : > { %548 = vmatmul.bf16.gmra.mxu0 %v6334_v10  ;;  %608 = vmatmul.bf16.gmra.mxu2 %v6346_v11  ;;  %v977_v10 = vmul.u32 43691, %v974_v62  ;;  %v6680_v11 = vsub.s32 %v6640_v24, %v938_v6  ;;  %v1624_v6 = vsel %vm1623_vm13, 1, %v6531_v38 }
  0x3d   : > { %vm2305_vm5 = vcmp.ne.s32.totalorder %v6680_v11, 0  ;;  %vm2353_vm6 = vcmp.lt.s32.totalorder %v6680_v11, 0  ;;  %v6690_v23 = vadd.s32 24, %v6680_v11 }
  0x3e   : > { %vm6696_vm8 = vmand %vm2353_vm6, %vm2305_vm5 }
  0x3f   : > { %v2497_v42 = vsel %vm6696_vm8, %v6690_v23, %v6680_v11  ;;  %v1670_v11 = vand.u32 65535, %v6770_v43  ;;  %v6793_v23 = vld [vmem:[%s9648_s3] ss:$0 sm:$0xff] }
  0x4b   : > { %553 = vmatmul.bf16.gmra.mxu0 %v6335_v12  ;;  %613 = vmatmul.bf16.gmra.mxu2 %v6347_v13  ;;  %v964_v12 = vadd.s32 %v963_v7, %v953_v3  ;;  %v979_v13 = vmul.u32 43691, %v975_v5  ;;  %v1625_v3 = vadd.s32 %v1619_v61, %v1615_v52 }
  0x4d   : > { %v965_v17 = vadd.s32 %v964_v12, %v955_v9  ;;  %v984_v32 = vshrl.u32 %v979_v13, 16 }
  0x4f   : > { %v966_v21 = vshrl.u32 %v965_v17, 4 }
  0x5b   : > { %558 = vmatmul.bf16.gmra.mxu0 %v6336_v14  ;;  %618 = vmatmul.bf16.gmra.mxu2 %v6348_v15  ;;  %v981_v14 = vshll.u32 %v978_v8, 16  ;;  %v980_v15 = vmul.u32 43690, %v975_v5  ;;  %v1019_v5 = vsel %vm1018_vm12, 1, %v6531_v38  ;;  %v1013_v8 = vshrl.u32 %v6703_v36, 16 }
  0x5c   : > { %v1021_v9 = vadd.s32 %v1019_v5, %v1017_v57 }
  0x5d   : > { %vm985_vm4 = vc.u32 %v977_v10, %v981_v14 }
  0x5e   : > { %v986_v22 = vsel %vm985_vm4, 1, %v6531_v38  ;;  %vm6777_vm4 = vcmp.lt.s32.totalorder %v2497_v42, 16 }
  0x5f   : > { %v988_v26 = vadd.s32 %v986_v22, %v980_v15 }
  0x6b   : > { %563 = vmatmul.bf16.gmra.mxu0 %v6337_v18  ;;  %623 = vmatmul.bf16.gmra.mxu2 %v6349_v19  ;;  %v983_v18 = vshll.u32 %v979_v13, 16  ;;  %v987_v19 = vadd.s32 %v981_v14, %v977_v10  ;;  %v1641_v13 = vand.u32 65535, %v6729_v4  ;;  %v1642_v14 = vshrl.u32 %v6729_v4, 16 }
  0x6d   : > { %vm989_vm7 = vc.u32 %v987_v19, %v983_v18  ;;  %v1644_v18 = vmul.u32 43691, %v1641_v13  ;;  %v1645_v19 = vmul.u32 43690, %v1641_v13  ;;  %v1646_v20 = vmul.u32 43691, %v1642_v14 }
  0x6e   : > { %v1647_v29 = vmul.u32 43690, %v1642_v14  ;;  %v6354_v14 = vld [vmem:[%s6613_s22 + $0xa8] sm:$0xff] }
  0x6f   : > { %v1648_v30 = vshll.u32 %v1645_v19, 16 }
  0x71   : > { %vm1652_vm3 = vc.u32 %v1644_v18, %v1648_v30 }
  0x7b   : > { %568 = vmatmul.bf16.gmra.mxu0 %v6338_v27  ;;  %628 = vmatmul.bf16.gmra.mxu2 %v6350_v28  ;;  %v967_v27 = vmul.u32 24, %v966_v21  ;;  %v990_v28 = vsel %vm989_vm7, 1, %v6531_v38 }
  0x7c   : > { %v992_v33 = vadd.s32 %v990_v28, %v988_v26  ;;  %v1032_v26 = vand.u32 65535, %v6725_v59 }
  0x7d   : > { %v6701_v35 = vsub.s32 %v6657_v41, %v967_v27  ;;  %v1613_v41 = vshrl.u32 %v6707_v39, 16  ;;  %v1033_v27 = vshrl.u32 %v6725_v59, 16 }
  0x7e   : > { %v993_v40 = vadd.s32 %v992_v33, %v982_v25  ;;  %v1022_v25 = vadd.s32 %v1021_v9, %v1011_v63  ;;  %v1649_v33 = vshrl.u32 %v1645_v19, 16  ;;  %v6767_v37 = vmul.u32 43691, %v1032_v26 }
  0x7f   : > { %vm2306_vm10 = vcmp.ne.s32.totalorder %v6701_v35, 0  ;;  %v1617_v54 = vmul.u32 43691, %v1613_v41  ;;  %vm2354_vm11 = vcmp.lt.s32.totalorder %v6701_v35, 0  ;;  %v6722_v55 = vadd.s32 24, %v6701_v35 }
  0x80   : > { %v994_v45 = vadd.s32 %v993_v40, %v984_v32  ;;  %v1618_v60 = vmul.u32 43690, %v1613_v41  ;;  %vm6741_vm15 = vmand %vm2354_vm11, %vm2306_vm10  ;;  %v1650_v32 = vshll.u32 %v1646_v20, 16  ;;  %v1023_v36 = vadd.s32 %v1022_v25, %v1013_v8 }
  0x81   : > { %v1621_v62 = vshll.u32 %v1617_v54, 16  ;;  %v2498_v22 = vsel %vm6741_vm15, %v6722_v55, %v6701_v35  ;;  %v1654_v35 = vadd.s32 %v1648_v30, %v1644_v18  ;;  %v1651_v41 = vshrl.u32 %v1646_v20, 16  ;;  %v6353_v55 = vld [vmem:[%s6613_s22 + $0xa0] sm:$0xff] }
  0x82   : > { %v995_v56 = vshrl.u32 %v994_v45, 4  ;;  %v1626_v10 = vadd.s32 %v1624_v6, %v1618_v60  ;;  %v1653_v45 = vsel %vm1652_vm3, 1, %v6531_v38  ;;  %v1024_v46 = vshrl.u32 %v1023_v36, 4 }
  0x83   : > { %vm1627_vm14 = vc.u32 %v1625_v3, %v1621_v62  ;;  %v6782_v47 = vmul.u32 43690, %v1032_v26  ;;  %vm1656_vm5 = vc.u32 %v1654_v35, %v1650_v32  ;;  %v6797_v53 = vmul.u32 43691, %v1033_v27  ;;  %v6396_v26 = vld [vmem:[%s9649_s4 + $0xf8] sm:$0xff] }
  0x84   : > { %v1657_v42 = vsel %vm1656_vm5, 1, %v6531_v38  ;;  %v1025_v52 = vmul.u32 24, %v1024_v46  ;;  %v1674_v60 = vmul.u32 43690, %v1670_v11  ;;  %v6801_v61 = vmul.u32 43690, %v1033_v27  ;;  %3679 = vmatpush.bf16.msrb.mxu0 %v6396_v26 }
  0x85   : > { %v1673_v63 = vmul.u32 43691, %v1670_v11  ;;  %v1040_v12 = vshrl.u32 %v6782_v47, 16  ;;  %vm6819_vm10 = vcmp.lt.s32.totalorder %v2498_v22, 16  ;;  %v6372_v22 = vld [vmem:[%s9649_s4 + $0x38] sm:$0xff] }
  0x86   : > { %v1677_v8 = vshll.u32 %v1674_v60, 16  ;;  %3099 = vmatpush.bf16.msrb.mxu2 %v6372_v22 }
  0x88   : > { %vm1681_vm11 = vc.u32 %v1673_v63, %v1677_v8 }
  0x89   : > { %v1682_v20 = vsel %vm1681_vm11, 1, %v6531_v38 }
  0x8b   : > { %573 = vmatmul.bf16.gmra.mxu0 %v6339_v1  ;;  %633 = vmatmul.bf16.gmra.mxu2 %v6351_v2  ;;  %v1622_v1 = vshrl.u32 %v1617_v54, 16  ;;  %v996_v2 = vmul.u32 24, %v995_v56  ;;  %v6341_v54 = vld [vmem:[%s6613_s22 + $0x40] sm:$0xff] }
  0x8d   : > { %v6734_v7 = vsub.s32 %v6667_v58, %v996_v2  ;;  %v1628_v58 = vsel %vm1627_vm14, 1, %v6531_v38  ;;  %v1039_v2 = vshll.u32 %v6782_v47, 16 }
  0x8e   : > { %v1630_v17 = vadd.s32 %v1628_v58, %v1626_v10 }
  0x8f   : > { %vm2307_vm0 = vcmp.ne.s32.totalorder %v6734_v7, 0  ;;  %vm2355_vm1 = vcmp.lt.s32.totalorder %v6734_v7, 0  ;;  %v6751_v15 = vadd.s32 24, %v6734_v7  ;;  %vm6869_vm3 = vc.u32 %v6767_v37, %v1039_v2 }
  0x90   : > { %vm6753_vm2 = vmand %vm2355_vm1, %vm2307_vm0  ;;  %v1631_v28 = vadd.s32 %v1630_v17, %v1620_v0  ;;  %v1683_v17 = vadd.s32 %v1677_v8, %v1673_v63  ;;  %vm6534_vm0 = vmmov 1   ;;  %v1045_v32 = vadd.s32 %v1039_v2, %v6767_v37 }
  0x91   : > { %v2499_v34 = vsel %vm6753_vm2, %v6751_v15, %v6734_v7  ;;  %vm6478_vm1 = vmpackc.low %vm6777_vm4, %vm6534_vm0 }
  0x92   : > { %v1632_v40 = vadd.s32 %v1631_v28, %v1622_v1  ;;  %v6806_v1 = vsub.s32 %v6683_v16, %v1025_v52 }
  0x94   : > { %v1633_v31 = vshrl.u32 %v1632_v40, 4  ;;  %vm2308_vm6 = vcmp.ne.s32.totalorder %v6806_v1, 0  ;;  %vm2356_vm12 = vcmp.lt.s32.totalorder %v6806_v1, 0  ;;  %v6828_v25 = vadd.s32 24, %v6806_v1 }
  0x95   : > { %vm6838_vm14 = vmand %vm2356_vm12, %vm2308_vm6  ;;  %vm6883_vm6 = vcmp.lt.s32.totalorder %v2499_v34, 16 }
  0x96   : > { %v1634_v56 = vmul.u32 24, %v1633_v31 }
  0x98   : > { %v1635_v5 = vsub.s32 %v6707_v39, %v1634_v56  ;;  %v1041_v56 = vshll.u32 %v6797_v53, 16 }
  0x9a   : > { %vm2329_vm7 = vcmp.ne.s32.totalorder %v1635_v5, 0  ;;  %vm2377_vm8 = vcmp.lt.s32.totalorder %v1635_v5, 0  ;;  %v2473_v16 = vadd.s32 24, %v1635_v5 }
  0x9b   : > { %578 = vmatmul.bf16.gmra.mxu0 %v6340_v50  ;;  %638 = vmatmul.bf16.gmra.mxu2 %v6352_v51  ;;  %v1655_v50 = vadd.s32 %v1653_v45, %v1647_v29  ;;  %v1671_v51 = vshrl.u32 %v6770_v43, 16  ;;  %vm6815_vm9 = vmand %vm2377_vm8, %vm2329_vm7  ;;  %v1678_v29 = vshrl.u32 %v1674_v60, 16 }
  0x9c   : > { %v2521_v19 = vsel %vm6815_vm9, %v2473_v16, %v1635_v5  ;;  %v6342_v16 = vld [vmem:[%s6613_s22 + $0x48] sm:$0xff] }
  0x9d   : > { %v1659_v57 = vadd.s32 %v1657_v42, %v1655_v50  ;;  %v6803_v0 = vmul.u32 43691, %v1671_v51  ;;  %v1676_v9 = vmul.u32 43690, %v1671_v51  ;;  %vm6847_vm15 = vcmp.lt.s32.totalorder %v2521_v19, 16 }
  0x9e   : > { %v2500_v42 = vsel %vm6838_vm14, %v6828_v25, %v6806_v1  ;;  %v6858_v51 = vadd.s32 216, %v6640_v24 }
  0x9f   : > { %v1660_v6 = vadd.s32 %v1659_v57, %v1649_v33  ;;  %v1679_v10 = vshll.u32 %v6803_v0, 16  ;;  %v1684_v30 = vadd.s32 %v1682_v20, %v1676_v9  ;;  %v1680_v40 = vshrl.u32 %v6803_v0, 16 }
  0xa0   : > { %v1699_v44 = vand.u32 65535, %v6858_v51 }
  0xa1   : > { %v1661_v58 = vadd.s32 %v1660_v6, %v1651_v41  ;;  %vm1685_vm13 = vc.u32 %v1683_v17, %v1679_v10 }
  0xa2   : > { %v1686_v35 = vsel %vm1685_vm13, 1, %v6531_v38  ;;  %v1702_v5 = vmul.u32 43691, %v1699_v44  ;;  %v1703_v6 = vmul.u32 43690, %v1699_v44  ;;  %vm6918_vm13 = vcmp.lt.s32.totalorder %v2500_v42, 16 }
  0xa3   : > { %v1662_v28 = vshrl.u32 %v1661_v58, 4  ;;  %v1688_v31 = vadd.s32 %v1686_v35, %v1684_v30  ;;  %v1044_v30 = vsel %vm6869_vm3, 1, %v6531_v38  ;;  %v6395_v35 = vld [vmem:[%s9649_s4 + $0xf0] sm:$0xff]  ;;  %v6942_v44 = vadd.s32 40, %v6640_v24  ;;  %vm6481_vm3 = vmpackc.low %vm6883_vm6, %vm6819_vm10 }
  0xa4   : > { %v1706_v58 = vshll.u32 %v1703_v6, 16  ;;  %v1707_v19 = vshrl.u32 %v1703_v6, 16  ;;  %3680 = vmatpush.bf16.msrb.mxu0 %v6395_v35 }
  0xa5   : > { %v1663_v46 = vmul.u32 24, %v1662_v28 }
  0xa6   : > { %vm1710_vm8 = vc.u32 %v1702_v5, %v1706_v58 }
  0xa7   : > { %v1664_v52 = vsub.s32 %v6729_v4, %v1663_v46 }
  0xa8   : > { %v544_v62 = vpop.f32.mrf.mxu0 }
  0xa9   : > { %v668_v3 = vmul.f32 %v6787_v49, %v544_v62  ;;  %v1700_v62 = vshrl.u32 %v6858_v51, 16  ;;  %vm2378_vm5 = vcmp.lt.s32.totalorder %v1664_v52, 0 }
  0xab   : > { %v720_v13 = vadd.f32 %v6793_v23, %v668_v3  ;;  %583 = vmatmul.bf16.gmra.mxu0 %v6341_v54  ;;  %643 = vmatmul.bf16.gmra.mxu2 %v6353_v55  ;;  %v1689_v55 = vadd.s32 %v1688_v31, %v1678_v29  ;;  %v1704_v7 = vmul.u32 43691, %v1700_v62  ;;  %v1705_v15 = vmul.u32 43690, %v1700_v62  ;;  %v6370_v62 = vld [vmem:[%s9649_s4 + $0x28] sm:$0xff] }
  0xac   : > { %v1711_v29 = vsel %vm1710_vm8, 1, %v6531_v38 }
  0xad   : > { %v816_v18 = vmax.f32 %v720_v13, 0.0  ;;  %v1690_v0 = vadd.s32 %v1689_v55, %v1680_v40  ;;  %v1708_v20 = vshll.u32 %v1704_v7, 16  ;;  %v1709_v25 = vshrl.u32 %v1704_v7, 16 }
  0xae   : > { %v604_v27 = vpop.f32.mrf.mxu2  ;;  %v1713_v40 = vadd.s32 %v1711_v29, %v1705_v15  ;;  %v6936_v55 = vadd.s32 224, %v6640_v24 }
  0xaf   : > { %v2593_v33 = vsel %vm6777_vm4, %v816_v18, 0.0  ;;  %v692_v36 = vmul.f32 %v6787_v49, %v604_v27  ;;  %v6479_v54 = vpack.c.bf16 %v816_v18, %v6532_v48  ;;  %vm2330_vm4 = vcmp.ne.s32.totalorder %v1664_v52, 0 }
  0xb0   : > { %2645 = vst [vmem:[#allocation2 + $0x20] sm:$0xff] %v2593_v33  ;;  %v546_v45 = vpop.f32.mrf.mxu0  ;;  %v2474_v48 = vadd.s32 24, %v1664_v52  ;;  %vm2426_vm7 = vmand %vm2378_vm5, %vm2330_vm4  ;;  %v1691_v9 = vshrl.u32 %v1690_v0, 4  ;;  %v1712_v27 = vadd.s32 %v1706_v58, %v1702_v5  ;;  %v1728_v0 = vand.u32 65535, %v6936_v55 }
  0xb1   : > { %v744_v50 = vadd.f32 %v6793_v23, %v692_v36  ;;  %v669_v11 = vmul.f32 %v6787_v49, %v546_v45  ;;  %6480 = vmatmul.msk.bf16.gmra.mxu1 %vm6478_vm1, %v6479_v54  ;;  %v1042_v54 = vshrl.u32 %v6797_v53, 16  ;;  %v6394_v53 = vld [vmem:[%s9649_s4 + $0xe8] sm:$0xff] }
  0xb2   : > { %v2522_v8 = vsel %vm2426_vm7, %v2474_v48, %v1664_v52  ;;  %v1692_v18 = vmul.u32 24, %v1691_v9  ;;  %vm1714_vm9 = vc.u32 %v1712_v27, %v1708_v20  ;;  %v1731_v15 = vmul.u32 43691, %v1728_v0  ;;  %3681 = vmatpush.bf16.msrb.mxu0 %v6394_v53 }
  0xb3   : > { %v840_v60 = vmax.f32 %v744_v50, 0.0  ;;  %v6874_v4 = vadd.f32 %v6793_v23, %v669_v11  ;;  %vm6895_vm2 = vcmp.lt.s32.totalorder %v2522_v8, 16  ;;  %v1715_v2 = vsel %vm1714_vm9, 1, %v6531_v38 }
  0xb4   : > { %v1693_v28 = vsub.s32 %v6770_v43, %v1692_v18  ;;  %v6371_v43 = vld [vmem:[%s9649_s4 + $0x30] sm:$0xff]  ;;  %v1717_v50 = vadd.s32 %v1715_v2, %v1713_v40  ;;  %v1046_v11 = vadd.s32 %v1044_v30, %v6801_v61 }
  0xb5   : > { %v2617_v1 = vsel %vm6847_vm15, %v840_v60, 0.0  ;;  %v817_v3 = vmax.f32 %v6874_v4, 0.0  ;;  %3100 = vmatpush.bf16.msrb.mxu2 %v6371_v43  ;;  %vm1047_vm15 = vc.u32 %v1045_v32, %v1041_v56  ;;  %v6343_v30 = vld [vmem:[%s6613_s22 + $0x50] sm:$0xff] }
  0xb6   : > { %2669 = vst [vmem:[#allocation2 + $0xe0] sm:$0xff] %v2617_v1  ;;  %v606_v21 = vpop.f32.mrf.mxu2  ;;  %vm2331_vm11 = vcmp.ne.s32.totalorder %v1693_v28, 0  ;;  %vm2379_vm12 = vcmp.lt.s32.totalorder %v1693_v28, 0  ;;  %v2475_v41 = vadd.s32 24, %v1693_v28  ;;  %v1718_v60 = vadd.s32 %v1717_v50, %v1707_v19  ;;  %v6355_v32 = vld [vmem:[%s6613_s22 + $0xb0] sm:$0xff] }
  0xb7   : > { %v2594_v34 = vsel %vm6819_vm10, %v817_v3, 0.0  ;;  %v693_v10 = vmul.f32 %v6787_v49, %v606_v21  ;;  %vm6925_vm14 = vmand %vm2379_vm12, %vm2331_vm11  ;;  %v1048_v48 = vsel %vm1047_vm15, 1, %v6531_v38  ;;  %v1729_v1 = vshrl.u32 %v6936_v55, 16 }
  0xb8   : > { %2646 = vst [vmem:[#allocation2 + $0x28] sm:$0xff] %v2594_v34  ;;  %v549_v17 = vpop.f32.mrf.mxu0  ;;  %v2523_v52 = vsel %vm6925_vm14, %v2475_v41, %v1693_v28  ;;  %v1719_v21 = vadd.s32 %v1718_v60, %v1709_v25  ;;  %v1050_v8 = vadd.s32 %v1048_v48, %v1046_v11  ;;  %v6965_v34 = vmul.u32 43690, %v1728_v0  ;;  %v6393_v60 = vld [vmem:[%s9649_s4 + $0xe0] sm:$0xff] }
  0xb9   : > { %v745_v22 = vadd.f32 %v6793_v23, %v693_v10  ;;  %v670_v26 = vmul.f32 %v6787_v49, %v549_v17  ;;  %3101 = vmatpush.bf16.msrb.mxu2 %v6370_v62  ;;  %vm6955_vm1 = vcmp.lt.s32.totalorder %v2523_v52, 16  ;;  %v6967_v10 = vmul.u32 43691, %v1729_v1  ;;  %3682 = vmatpush.bf16.msrb.mxu0 %v6393_v60 }
  0xba   : > { %v1051_v39 = vadd.s32 %v1050_v8, %v1040_v12  ;;  %v1734_v63 = vmul.u32 43690, %v1729_v1  ;;  %v1735_v58 = vshll.u32 %v6965_v34, 16  ;;  %v1736_v4 = vshrl.u32 %v6965_v34, 16 }
  0xbb   : > { %v841_v33 = vmax.f32 %v745_v22, 0.0  ;;  %v722_v36 = vadd.f32 %v6793_v23, %v670_v26  ;;  %588 = vmatmul.bf16.gmra.mxu0 %v6342_v16  ;;  %648 = vmatmul.bf16.gmra.mxu2 %v6354_v14  ;;  %v1720_v14 = vshrl.u32 %v1719_v21, 4  ;;  %v1061_v12 = vand.u32 65535, %v6942_v44 }
  0xbc   : > { %v1052_v20 = vadd.s32 %v1051_v39, %v1042_v54  ;;  %vm1739_vm10 = vc.u32 %v1731_v15, %v1735_v58  ;;  %v1741_v47 = vadd.s32 %v1735_v58, %v1731_v15  ;;  %v1062_v22 = vshrl.u32 %v6942_v44, 16 }
  0xbd   : > { %v2618_v45 = vsel %vm6895_vm2, %v841_v33, 0.0  ;;  %v818_v46 = vmax.f32 %v722_v36, 0.0  ;;  %v1721_v19 = vmul.u32 24, %v1720_v14  ;;  %v1738_v36 = vshrl.u32 %v6967_v10, 16 }
  0xbe   : > { %2670 = vst [vmem:[#allocation2 + $0xe8] sm:$0xff] %v2618_v45  ;;  %v609_v42 = vpop.f32.mrf.mxu2  ;;  %v1053_v29 = vshrl.u32 %v1052_v20, 4  ;;  %v1740_v40 = vsel %vm1739_vm10, 1, %v6531_v38  ;;  %v6992_v43 = vmul.u32 43690, %v1061_v12  ;;  %v1064_v11 = vmul.u32 43691, %v1061_v12 }
  0xbf   : > { %v2595_v57 = vsel %vm6883_vm6, %v818_v46, 0.0  ;;  %v694_v61 = vmul.f32 %v6787_v49, %v609_v42  ;;  %v6482_v7 = vpack.c.bf16 %v818_v46, %v817_v3  ;;  %v1737_v3 = vshll.u32 %v6967_v10, 16  ;;  %v6368_v10 = vld [vmem:[%s9649_s4 + $0x18] sm:$0xff] }
  0xc0   : > { %2647 = vst [vmem:[#allocation2 + $0x30] sm:$0xff] %v2595_v57  ;;  %v551_v56 = vpop.f32.mrf.mxu0  ;;  %v1722_v28 = vsub.s32 %v6858_v51, %v1721_v19  ;;  %v1054_v2 = vmul.u32 24, %v1053_v29  ;;  %v1742_v45 = vadd.s32 %v1740_v40, %v1734_v63  ;;  %v6997_v42 = vmul.u32 43691, %v1062_v22 }
  0xc1   : > { %v746_v5 = vadd.f32 %v6793_v23, %v694_v61  ;;  %v671_v6 = vmul.f32 %v6787_v49, %v551_v56  ;;  %6483 = vmatmul.msk.bf16.gmra.mxu1 %vm6481_vm3, %v6482_v7  ;;  %vm1743_vm4 = vc.u32 %v1741_v47, %v1737_v3  ;;  %v6369_v61 = vld [vmem:[%s9649_s4 + $0x20] sm:$0xff]  ;;  %v1067_v53 = vmul.u32 43690, %v1062_v22 }
  0xc2   : > { %vm2332_vm5 = vcmp.ne.s32.totalorder %v1722_v28, 0  ;;  %vm2380_vm6 = vcmp.lt.s32.totalorder %v1722_v28, 0  ;;  %v2476_v41 = vadd.s32 24, %v1722_v28  ;;  %v1744_v46 = vsel %vm1743_vm4, 1, %v6531_v38  ;;  %3102 = vmatpush.bf16.msrb.mxu2 %v6369_v61 }
  0xc3   : > { %v842_v13 = vmax.f32 %v746_v5, 0.0  ;;  %v6970_v16 = vadd.f32 %v6793_v23, %v671_v6  ;;  %vm2428_vm7 = vmand %vm2380_vm6, %vm2332_vm5  ;;  %v1055_v54 = vsub.s32 %v6725_v59, %v1054_v2  ;;  %v1746_v57 = vadd.s32 %v1744_v46, %v1742_v45  ;;  %v6344_v2 = vld [vmem:[%s6613_s22 + $0x58] sm:$0xff] }
  0xc4   : > { %v2524_v50 = vsel %vm2428_vm7, %v2476_v41, %v1722_v28  ;;  %v1068_v56 = vshll.u32 %v6992_v43, 16  ;;  %v1070_v48 = vshll.u32 %v6997_v42, 16  ;;  %v1069_v21 = vshrl.u32 %v6992_v43, 16  ;;  %v6356_v45 = vld [vmem:[%s6613_s22 + $0xb8] sm:$0xff] }
  0xc5   : > { %v2619_v17 = vsel %vm6955_vm1, %v842_v13, 0.0  ;;  %v819_v18 = vmax.f32 %v6970_v16, 0.0  ;;  %vm2572_vm2 = vcmp.lt.s32.totalorder %v2524_v50, 16  ;;  %vm2309_vm8 = vcmp.ne.s32.totalorder %v1055_v54, 0  ;;  %v6392_v13 = vld [vmem:[%s9649_s4 + $0xd8] sm:$0xff] }
  0xc6   : > { %2671 = vst [vmem:[#allocation2 + $0xf0] sm:$0xff] %v2619_v17  ;;  %v611_v25 = vpop.f32.mrf.mxu2  ;;  %vm2357_vm9 = vcmp.lt.s32.totalorder %v1055_v54, 0  ;;  %v2453_v59 = vadd.s32 24, %v1055_v54  ;;  %v1747_v6 = vadd.s32 %v1746_v57, %v1736_v4  ;;  %vm1072_vm12 = vc.u32 %v1064_v11, %v1068_v56  ;;  %3103 = vmatpush.bf16.msrb.mxu2 %v6368_v10  ;;  %3683 = vmatpush.bf16.msrb.mxu0 %v6392_v13 }
  0xc7   : > { %v2596_v26 = vsel %vm6918_vm13, %v819_v18, 0.0  ;;  %v695_v27 = vmul.f32 %v6787_v49, %v611_v25  ;;  %vm2405_vm11 = vmand %vm2357_vm9, %vm2309_vm8  ;;  %v1073_v7 = vsel %vm1072_vm12, 1, %v6531_v38  ;;  %v1074_v15 = vadd.s32 %v1068_v56, %v1064_v11 }
  0xc8   : > { %2648 = vst [vmem:[#allocation2 + $0x38] sm:$0xff] %v2596_v26  ;;  %v554_v33 = vpop.f32.mrf.mxu0  ;;  %v2501_v8 = vsel %vm2405_vm11, %v2453_v59, %v1055_v54  ;;  %v7013_v34 = vadd.s32 232, %v6640_v24  ;;  %v1748_v39 = vadd.s32 %v1747_v6, %v1738_v36  ;;  %v1071_v58 = vshrl.u32 %v6997_v42, 16 }
  0xc9   : > { %v747_v35 = vadd.f32 %v6793_v23, %v695_v27  ;;  %v672_v51 = vmul.f32 %v6787_v49, %v554_v33  ;;  %vm7021_vm14 = vcmp.lt.s32.totalorder %v2501_v8, 16  ;;  %v1075_v3 = vadd.s32 %v1073_v7, %v1067_v53 }
  0xca   : > { %vm1076_vm15 = vc.u32 %v1074_v15, %v1070_v48  ;;  %v1757_v17 = vand.u32 65535, %v7013_v34  ;;  %v1749_v20 = vshrl.u32 %v1748_v39, 4  ;;  %v1758_v22 = vshrl.u32 %v7013_v34, 16  ;;  %vm6484_vm1 = vmpackc.low %vm7021_vm14, %vm6918_vm13 }
  0xcb   : > { %v843_v31 = vmax.f32 %v747_v35, 0.0  ;;  %593 = vmatmul.bf16.gmra.mxu0 %v6343_v30  ;;  %653 = vmatmul.bf16.gmra.mxu2 %v6355_v32  ;;  %v724_v52 = vadd.f32 %v6793_v23, %v672_v51  ;;  %v1077_v47 = vsel %vm1076_vm15, 1, %v6531_v38  ;;  %v7037_v29 = vadd.s32 48, %v6640_v24 }
  0xcc   : > { %v1079_v12 = vadd.s32 %v1077_v47, %v1075_v3  ;;  %v1760_v26 = vmul.u32 43691, %v1757_v17  ;;  %v1761_v27 = vmul.u32 43690, %v1757_v17  ;;  %v1750_v28 = vmul.u32 24, %v1749_v20  ;;  %v6366_v3 = vld [vmem:[%s9649_s4 + $0x8] sm:$0xff] }
  0xcd   : > { %v2620_v62 = vsel %vm2572_vm2, %v843_v31, 0.0  ;;  %v820_v0 = vmax.f32 %v724_v52, 0.0  ;;  %v7039_v33 = vmul.u32 43691, %v1758_v22  ;;  %v1763_v41 = vmul.u32 43690, %v1758_v22  ;;  %v6390_v17 = vld [vmem:[%s9649_s4 + $0xc8] sm:$0xff] }
  0xce   : > { %2672 = vst [vmem:[#allocation2 + $0xf8] sm:$0xff] %v2620_v62  ;;  %v614_v1 = vpop.f32.mrf.mxu2  ;;  %v1080_v30 = vadd.s32 %v1079_v12, %v1069_v21  ;;  %v1764_v36 = vshll.u32 %v1761_v27, 16  ;;  %v1751_v43 = vsub.s32 %v6936_v55, %v1750_v28  ;;  %v1090_v37 = vand.u32 65535, %v7037_v29 }
  0xcf   : > { %v696_v5 = vmul.f32 %v6787_v49, %v614_v1  ;;  %v2597_v4 = vsel %vm7021_vm14, %v820_v0, 0.0  ;;  %v6485_v51 = vpack.c.bf16 %v820_v0, %v819_v18  ;;  %v1766_v50 = vshll.u32 %v7039_v33, 16  ;;  %v6367_v1 = vld [vmem:[%s9649_s4 + $0x10] sm:$0xff] }
  0xd0   : > { %v556_v9 = vpop.f32.mrf.mxu0  ;;  %2649 = vst [vmem:[#allocation2 + $0x40] sm:$0xff] %v2597_v4  ;;  %v1081_v46 = vadd.s32 %v1080_v30, %v1071_v58  ;;  %vm1768_vm3 = vc.u32 %v1760_v26, %v1764_v36  ;;  %vm2333_vm10 = vcmp.ne.s32.totalorder %v1751_v43, 0  ;;  %vm2381_vm4 = vcmp.lt.s32.totalorder %v1751_v43, 0  ;;  %3104 = vmatpush.bf16.msrb.mxu2 %v6367_v1 }
  0xd1   : > { %v673_v63 = vmul.f32 %v6787_v49, %v556_v9  ;;  %v748_v19 = vadd.f32 %v6793_v23, %v696_v5  ;;  %6486 = vmatmul.msk.bf16.gmra.mxu1 %vm6484_vm1, %v6485_v51  ;;  %v2477_v11 = vadd.s32 24, %v1751_v43  ;;  %vm2429_vm5 = vmand %vm2381_vm4, %vm2333_vm10  ;;  %v1765_v52 = vshrl.u32 %v1761_v27, 16  ;;  %v6391_v5 = vld [vmem:[%s9649_s4 + $0xd0] sm:$0xff] }
  0xd2   : > { %v1082_v42 = vshrl.u32 %v1081_v46, 4  ;;  %v1769_v16 = vsel %vm1768_vm3, 1, %v6531_v38  ;;  %v1770_v18 = vadd.s32 %v1764_v36, %v1760_v26  ;;  %v1091_v60 = vshrl.u32 %v7037_v29, 16  ;;  %3684 = vmatpush.bf16.msrb.mxu0 %v6391_v5 }
  0xd3   : > { %v7032_v25 = vadd.f32 %v6793_v23, %v673_v63  ;;  %v844_v40 = vmax.f32 %v748_v19, 0.0  ;;  %v2525_v54 = vsel %vm2429_vm5, %v2477_v11, %v1751_v43  ;;  %v1771_v57 = vadd.s32 %v1769_v16, %v1763_v41 }
  0xd4   : > { %vm2573_vm13 = vcmp.lt.s32.totalorder %v2525_v54, 16  ;;  %v1083_v62 = vmul.u32 24, %v1082_v42  ;;  %v1767_v53 = vshrl.u32 %v7039_v33, 16  ;;  %vm1772_vm6 = vc.u32 %v1770_v18, %v1766_v50  ;;  %3105 = vmatpush.bf16.msrb.mxu2 %v6366_v3 }
  0xd5   : > { %v821_v35 = vmax.f32 %v7032_v25, 0.0  ;;  %v2621_v56 = vsel %vm2573_vm13, %v844_v40, 0.0  ;;  %v1773_v48 = vsel %vm1772_vm6, 1, %v6531_v38  ;;  %v1093_v0 = vmul.u32 43691, %v1090_v37 }
  0xd6   : > { %v616_v32 = vpop.f32.mrf.mxu2  ;;  %v1094_v59 = vmul.u32 43690, %v1090_v37  ;;  %2673 = vst [vmem:[#allocation2 + $0x100] sm:$0xff] %v2621_v56  ;;  %v1084_v6 = vsub.s32 %v6942_v44, %v1083_v62  ;;  %v1775_v8 = vadd.s32 %v1773_v48, %v1771_v57  ;;  %v1095_v9 = vmul.u32 43691, %v1091_v60  ;;  %3685 = vmatpush.bf16.msrb.mxu0 %v6390_v17 }
  0xd7   : > { %v697_v31 = vmul.f32 %v6787_v49, %v616_v32  ;;  %v1096_v10 = vmul.u32 43690, %v1091_v60  ;;  %v7088_v27 = vadd.s32 240, %v6640_v24  ;;  %v7103_v50 = vadd.s32 56, %v6640_v24 }
  0xd8   : > { %v559_v55 = vpop.f32.mrf.mxu0  ;;  %v1097_v13 = vshll.u32 %v1094_v59, 16  ;;  %vm2310_vm7 = vcmp.ne.s32.totalorder %v1084_v6, 0  ;;  %vm2358_vm2 = vcmp.lt.s32.totalorder %v1084_v6, 0  ;;  %v2454_v39 = vadd.s32 24, %v1084_v6 }
  0xd9   : > { %v674_v61 = vmul.f32 %v6787_v49, %v559_v55  ;;  %v7067_v21 = vadd.f32 %v6793_v23, %v697_v31  ;;  %v1776_v63 = vadd.s32 %v1775_v8, %v1765_v52  ;;  %vm2406_vm8 = vmand %vm2358_vm2, %vm2310_vm7  ;;  %v1098_v44 = vshrl.u32 %v1094_v59, 16  ;;  %v7105_v52 = vld [vmem:[#allocation2 + $0x1f] sm:$0xff] }
  0xda   : > { %v1099_v58 = vshll.u32 %v1095_v9, 16  ;;  %vm1101_vm9 = vc.u32 %v1093_v0, %v1097_v13  ;;  %v1103_v4 = vadd.s32 %v1097_v13, %v1093_v0  ;;  %v2502_v19 = vsel %vm2406_vm8, %v2454_v39, %v1084_v6  ;;  %v6365_v8 = vld [vmem:[%s9649_s4] sm:$0xff] }
  0xdb   : > { %598 = vmatmul.bf16.gmra.mxu0 %v6344_v2  ;;  %658 = vmatmul.bf16.gmra.mxu2 %v6356_v45  ;;  %v7070_v15 = vadd.f32 %v6793_v23, %v674_v61  ;;  %v1777_v20 = vadd.s32 %v1776_v63, %v1767_v53  ;;  %v1102_v47 = vsel %vm1101_vm9, 1, %v6531_v38  ;;  %vm7083_vm11 = vcmp.lt.s32.totalorder %v2502_v19, 16  ;;  %v7098_v2 = vld [vmem:[#allocation2 + $0x27] sm:$0xff] }
  0xdc   : > { %v1104_v26 = vadd.s32 %v1102_v47, %v1096_v10  ;;  %vm1105_vm12 = vc.u32 %v1103_v4, %v1099_v58  ;;  %v2598_v28 = vsel %vm7083_vm11, %v821_v35, 0.0  ;;  %v845_v30 = vmax.f32 %v7067_v21, 0.0  ;;  %3106 = vmatpush.bf16.msrb.mxu2 %v6365_v8 }
  0xdd   : > { %v1778_v32 = vshrl.u32 %v1777_v20, 4  ;;  %v1106_v33 = vsel %vm1105_vm12, 1, %v6531_v38  ;;  %2650 = vst [vmem:[#allocation2 + $0x48] sm:$0xff] %v2598_v28  ;;  %v1100_v36 = vshrl.u32 %v1095_v9, 16  ;;  %v1786_v43 = vand.u32 65535, %v7088_v27  ;;  %v6389_v9 = vld [vmem:[%s9649_s4 + $0xc0] sm:$0xff] }
  0xde   : > { %v619_v7 = vpop.f32.mrf.mxu2  ;;  %v1108_v40 = vadd.s32 %v1106_v33, %v1104_v26  ;;  %v1787_v41 = vshrl.u32 %v7088_v27, 16  ;;  %v822_v46 = vmax.f32 %v7070_v15, 0.0  ;;  %v7110_v54 = vadd.s32 64, %v6640_v24  ;;  %3686 = vmatpush.bf16.msrb.mxu0 %v6389_v9 }
  0xdf   : > { %v698_v14 = vmul.f32 %v6787_v49, %v619_v7  ;;  %v1779_v45 = vmul.u32 24, %v1778_v32  ;;  %v1789_v11 = vmul.u32 43691, %v1786_v43  ;;  %v1790_v37 = vmul.u32 43690, %v1786_v43 }
  0xe0   : > { %v561_v51 = vpop.f32.mrf.mxu0  ;;  %v1109_v55 = vadd.s32 %v1108_v40, %v1098_v44  ;;  %v1791_v42 = vmul.u32 43691, %v1787_v41  ;;  %v3590_v57 = vpack.c.bf16 %v7098_v2, %v7105_v52  ;;  %v1792_v60 = vmul.u32 43690, %v1787_v41 }
  0xe1   : > { %v7081_v12 = vadd.f32 %v6793_v23, %v698_v14  ;;  %v1780_v16 = vsub.s32 %v7013_v34, %v1779_v45  ;;  %v675_v18 = vmul.f32 %v6787_v49, %v561_v51  ;;  %v1793_v62 = vshll.u32 %v1790_v37, 16 }
  0xe2   : > { %v1110_v61 = vadd.s32 %v1109_v55, %v1100_v36  ;;  %v1795_v53 = vshll.u32 %v1791_v42, 16  ;;  %v1119_v48 = vand.u32 65535, %v7103_v50  ;;  %v1794_v34 = vshrl.u32 %v1790_v37, 16 }
  0xe3   : > { %v846_v31 = vmax.f32 %v7081_v12, 0.0  ;;  %vm2334_vm14 = vcmp.ne.s32.totalorder %v1780_v16, 0  ;;  %vm2382_vm15 = vcmp.lt.s32.totalorder %v1780_v16, 0  ;;  %v2478_v56 = vadd.s32 24, %v1780_v16 }
  0xe4   : > { %vm2430_vm1 = vmand %vm2382_vm15, %vm2334_vm14  ;;  %v1111_v0 = vshrl.u32 %v1110_v61, 4  ;;  %vm1797_vm3 = vc.u32 %v1789_v11, %v1793_v62  ;;  %v1799_v59 = vadd.s32 %v1793_v62, %v1789_v11  ;;  %v1120_v6 = vshrl.u32 %v7103_v50, 16 }
  0xe5   : > { %v2526_v1 = vsel %vm2430_vm1, %v2478_v56, %v1780_v16  ;;  %v1798_v5 = vsel %vm1797_vm3, 1, %v6531_v38  ;;  %v1122_v21 = vmul.u32 43691, %v1119_v48  ;;  %v1123_v39 = vmul.u32 43690, %v1119_v48 }
  0xe6   : > { %vm2574_vm10 = vcmp.lt.s32.totalorder %v2526_v1, 16  ;;  %v1112_v7 = vmul.u32 24, %v1111_v0  ;;  %v1800_v10 = vadd.s32 %v1798_v5, %v1792_v60  ;;  %vm1801_vm4 = vc.u32 %v1799_v59, %v1795_v53  ;;  %v621_v44 = vpop.f32.mrf.mxu2 }
  0xe7   : > { %v2622_v13 = vsel %vm2574_vm10, %v845_v30, 0.0  ;;  %v1802_v14 = vsel %vm1801_vm4, 1, %v6531_v38  ;;  %v1124_v63 = vmul.u32 43691, %v1120_v6  ;;  %v1796_v4 = vshrl.u32 %v1791_v42, 16 }
  0xe8   : > { %2674 = vst [vmem:[#allocation2 + $0x108] sm:$0xff] %v2622_v13  ;;  %v1113_v58 = vsub.s32 %v7037_v29, %v1112_v7  ;;  %v1804_v3 = vadd.s32 %v1802_v14, %v1800_v10  ;;  %v699_v17 = vmul.f32 %v6787_v49, %v621_v44  ;;  %v7127_v19 = vadd.f32 %v6793_v23, %v675_v18  ;;  %v564_v32 = vpop.f32.mrf.mxu0 }
  0xe9   : > { %v1125_v20 = vmul.u32 43690, %v1120_v6  ;;  %v1126_v47 = vshll.u32 %v1123_v39, 16  ;;  %v1128_v26 = vshll.u32 %v1124_v63, 16  ;;  %v1127_v33 = vshrl.u32 %v1123_v39, 16 }
  0xea   : > { %vm2311_vm5 = vcmp.ne.s32.totalorder %v1113_v58, 0  ;;  %vm2359_vm13 = vcmp.lt.s32.totalorder %v1113_v58, 0  ;;  %v2455_v28 = vadd.s32 24, %v1113_v58  ;;  %v1805_v30 = vadd.s32 %v1804_v3, %v1794_v34 }
  0xeb   : > { %3687 = vmatmul.bf16.vlgmr.msrb.gmra.mxu0 %v3590_v57  ;;  %vm2407_vm6 = vmand %vm2359_vm13, %vm2311_vm5  ;;  %vm1130_vm7 = vc.u32 %v1122_v21, %v1126_v47  ;;  %v1132_v29 = vadd.s32 %v1126_v47, %v1122_v21  ;;  %v7130_v36 = vadd.s32 248, %v6640_v24  ;;  %v7134_v51 = vadd.f32 %v6793_v23, %v699_v17 }
  0xec   : > { %v2503_v40 = vsel %vm2407_vm6, %v2455_v28, %v1113_v58  ;;  %v1806_v43 = vadd.s32 %v1805_v30, %v1796_v4  ;;  %v1131_v41 = vsel %vm1130_vm7, 1, %v6531_v38  ;;  %v676_v11 = vmul.f32 %v6787_v49, %v564_v32  ;;  %v2697_v28 = vld [vmem:[#allocation2 + $0x7] sm:$0xff]  ;;  %v2698_v30 = vld [vmem:[#allocation2 + $0xf] sm:$0xff] }
  0xed   : > { %vm7136_vm2 = vcmp.lt.s32.totalorder %v2503_v40, 16  ;;  %v1133_v55 = vadd.s32 %v1131_v41, %v1125_v20  ;;  %vm1134_vm8 = vc.u32 %v1132_v29, %v1128_v26  ;;  %v1815_v18 = vand.u32 65535, %v7130_v36 }
  0xee   : > { %v2599_v37 = vsel %vm7136_vm2, %v822_v46, 0.0  ;;  %v1807_v42 = vshrl.u32 %v1806_v43, 4  ;;  %v1135_v16 = vsel %vm1134_vm8, 1, %v6531_v38  ;;  %v1129_v57 = vshrl.u32 %v1124_v63, 16  ;;  %vm6487_vm7 = vmpackc.low %vm7136_vm2, %vm7083_vm11 }
  0xef   : > { %2651 = vst [vmem:[#allocation2 + $0x50] sm:$0xff] %v2599_v37  ;;  %v1137_v61 = vadd.s32 %v1135_v16, %v1133_v55  ;;  %v1816_v60 = vshrl.u32 %v7130_v36, 16  ;;  %v1148_v62 = vand.u32 65535, %v7110_v54  ;;  %v823_v56 = vmax.f32 %v7127_v19, 0.0 }
  0xf0   : > { %v1808_v53 = vmul.u32 24, %v1807_v42  ;;  %v1818_v48 = vmul.u32 43691, %v1815_v18  ;;  %v1819_v0 = vmul.u32 43690, %v1815_v18  ;;  %v847_v59 = vmax.f32 %v7134_v51, 0.0  ;;  %v566_v15 = vpop.f32.mrf.mxu0 }
  0xf1   : > { %v1138_v34 = vadd.s32 %v1137_v61, %v1127_v33  ;;  %v1820_v1 = vmul.u32 43691, %v1816_v60  ;;  %v1149_v5 = vshrl.u32 %v7110_v54, 16  ;;  %v1821_v21 = vmul.u32 43690, %v1816_v60 }
  0xf2   : > { %v1809_v6 = vsub.s32 %v7088_v27, %v1808_v53  ;;  %v1822_v8 = vshll.u32 %v1819_v0, 16  ;;  %v7154_v9 = vadd.f32 %v6793_v23, %v676_v11  ;;  %v1151_v13 = vmul.u32 43691, %v1148_v62  ;;  %v624_v11 = vpop.f32.mrf.mxu2 }
  0xf3   : > { %v1139_v7 = vadd.s32 %v1138_v34, %v1129_v57  ;;  %v1824_v10 = vshll.u32 %v1820_v1, 16  ;;  %v1152_v14 = vmul.u32 43690, %v1148_v62  ;;  %v1153_v4 = vmul.u32 43691, %v1149_v5 }
  0xf4   : > { %vm2335_vm9 = vcmp.ne.s32.totalorder %v1809_v6, 0  ;;  %vm2383_vm12 = vcmp.lt.s32.totalorder %v1809_v6, 0  ;;  %v2479_v39 = vadd.s32 24, %v1809_v6  ;;  %vm1826_vm14 = vc.u32 %v1818_v48, %v1822_v8 }
  0xf5   : > { %vm2431_vm15 = vmand %vm2383_vm12, %vm2335_vm9  ;;  %v1140_v63 = vshrl.u32 %v1139_v7, 4  ;;  %v1827_v44 = vsel %vm1826_vm14, 1, %v6531_v38  ;;  %v1828_v58 = vadd.s32 %v1822_v8, %v1818_v48  ;;  %v1823_v3 = vshrl.u32 %v1819_v0, 16 }
  0xf6   : > { %v2527_v27 = vsel %vm2431_vm15, %v2479_v39, %v1809_v6  ;;  %v1829_v17 = vadd.s32 %v1827_v44, %v1821_v21  ;;  %v1155_v20 = vshll.u32 %v1152_v14, 16  ;;  %v1825_v26 = vshrl.u32 %v1820_v1, 16 }
  0xf7   : > { %vm2575_vm1 = vcmp.lt.s32.totalorder %v2527_v27, 16  ;;  %v1141_v47 = vmul.u32 24, %v1140_v63  ;;  %vm1830_vm3 = vc.u32 %v1828_v58, %v1824_v10  ;;  %v1154_v29 = vmul.u32 43690, %v1149_v5 }
  0xf8   : > { %v2623_v32 = vsel %vm2575_vm1, %v846_v31, 0.0  ;;  %v1831_v33 = vsel %vm1830_vm3, 1, %v6531_v38  ;;  %v1157_v40 = vshll.u32 %v1153_v4, 16  ;;  %vm1159_vm10 = vc.u32 %v1151_v13, %v1155_v20 }
  0xf9   : > { %2675 = vst [vmem:[#allocation2 + $0x110] sm:$0xff] %v2623_v32  ;;  %v1142_v43 = vsub.s32 %v7103_v50, %v1141_v47  ;;  %v1833_v41 = vadd.s32 %v1831_v33, %v1829_v17  ;;  %v1161_v55 = vadd.s32 %v1155_v20, %v1151_v13  ;;  %v1160_v37 = vsel %vm1159_vm10, 1, %v6531_v38 }
  0xfa   : > { %v2745_v42 = vpack.c.bf16 %v2698_v30, %v2697_v28  ;;  %v700_v16 = vmul.f32 %v6787_v49, %v624_v11  ;;  %v1156_v18 = vshrl.u32 %v1152_v14, 16  ;;  %v1162_v57 = vadd.s32 %v1160_v37, %v1154_v29  ;;  %v7205_v37 = vld [vmem:[%s9648_s3] ss:$0 sm:$0xff] }
  0xfb   : > { %vm2312_vm4 = vcmp.ne.s32.totalorder %v1142_v43, 0  ;;  %vm2360_vm5 = vcmp.lt.s32.totalorder %v1142_v43, 0  ;;  %v2456_v12 = vadd.s32 24, %v1142_v43  ;;  %v1834_v31 = vadd.s32 %v1833_v41, %v1823_v3 }
  0xfc   : > { %vm2408_vm13 = vmand %vm2360_vm5, %vm2312_vm4  ;;  %vm1163_vm6 = vc.u32 %v1161_v55, %v1157_v40  ;;  %v6488_v50 = vpack.c.bf16 %v822_v46, %v821_v35  ;;  %3107 = vmatmul.bf16.vlgmr.msrb.gmra.mxu2 %v2745_v42  ;;  %v7172_v61 = vadd.s32 256, %v6640_v24  ;;  %v7176_v48 = vadd.f32 %v6793_v23, %v700_v16 }
  0xfd   : > { %v2504_v60 = vsel %vm2408_vm13, %v2456_v12, %v1142_v43  ;;  %v1835_v62 = vadd.s32 %v1834_v31, %v1825_v26  ;;  %v1164_v53 = vsel %vm1163_vm6, 1, %v6531_v38  ;;  %v1158_v25 = vshrl.u32 %v1153_v4, 16 }
  0xfe   : > { %6489 = vmatmul.msk.bf16.gmra.mxu1 %vm6487_vm7, %v6488_v50  ;;  %vm7178_vm8 = vcmp.lt.s32.totalorder %v2504_v60, 16  ;;  %v1166_v45 = vadd.s32 %v1164_v53, %v1162_v57  ;;  %v1844_v35 = vand.u32 65535, %v7172_v61  ;;  %v824_v34 = vmax.f32 %v7154_v9, 0.0 }
  0xff   : > { %v2600_v46 = vsel %vm7178_vm8, %v823_v56, 0.0  ;;  %v1836_v0 = vshrl.u32 %v1835_v62, 4  ;;  %v1845_v23 = vshrl.u32 %v7172_v61, 16  ;;  %v7190_v21 = vadd.s32 72, %v6640_v24 }
 0x100   : > { %2652 = vst [vmem:[#allocation2 + $0x58] sm:$0xff] %v2600_v46  ;;  %v1167_v1 = vadd.s32 %v1166_v45, %v1156_v18  ;;  %v1847_v5 = vmul.u32 43691, %v1844_v35  ;;  %v1848_v6 = vmul.u32 43690, %v1844_v35  ;;  %v848_v7 = vmax.f32 %v7176_v48, 0.0  ;;  %v569_v18 = vpop.f32.mrf.mxu0 }
 0x101   : > { %v1837_v8 = vmul.u32 24, %v1836_v0  ;;  %v1849_v10 = vmul.u32 43691, %v1845_v23  ;;  %v677_v13 = vmul.f32 %v6787_v49, %v566_v15  ;;  %v1850_v39 = vmul.u32 43690, %v1845_v23 }
 0x102   : > { %v1168_v14 = vadd.s32 %v1167_v1, %v1158_v25  ;;  %v1851_v63 = vshll.u32 %v1848_v6, 16  ;;  %v1177_v44 = vand.u32 65535, %v7190_v21  ;;  %v1852_v4 = vshrl.u32 %v1848_v6, 16  ;;  %v7217_v25 = vld [vmem:[%s9647_s2] ss:$0 sm:$0xff] }
 0x103   : > { %v1838_v58 = vsub.s32 %v7130_v36, %v1837_v8  ;;  %v1853_v27 = vshll.u32 %v1849_v10, 16  ;;  %v1178_v3 = vshrl.u32 %v7190_v21, 16  ;;  %v1854_v20 = vshrl.u32 %v1849_v10, 16 }
 0x104   : > { %v1169_v17 = vshrl.u32 %v1168_v14, 4  ;;  %vm1855_vm11 = vc.u32 %v1847_v5, %v1851_v63  ;;  %v1857_v47 = vadd.s32 %v1851_v63, %v1847_v5  ;;  %v1181_v32 = vmul.u32 43690, %v1177_v44 }
 0x105   : > { %vm2336_vm2 = vcmp.ne.s32.totalorder %v1838_v58, 0  ;;  %vm2384_vm9 = vcmp.lt.s32.totalorder %v1838_v58, 0  ;;  %v2480_v26 = vadd.s32 24, %v1838_v58  ;;  %v1856_v49 = vsel %vm1855_vm11, 1, %v6531_v38 }
 0x106   : > { %vm2432_vm12 = vmand %vm2384_vm9, %vm2336_vm2  ;;  %v1170_v28 = vmul.u32 24, %v1169_v17  ;;  %v1858_v30 = vadd.s32 %v1856_v49, %v1850_v39  ;;  %vm1859_vm14 = vc.u32 %v1857_v47, %v1853_v27  ;;  %v1180_v29 = vmul.u32 43691, %v1177_v44 }
 0x107   : > { %v2528_v33 = vsel %vm2432_vm12, %v2480_v26, %v1838_v58  ;;  %v1860_v36 = vsel %vm1859_vm14, 1, %v6531_v38  ;;  %v1182_v40 = vmul.u32 43691, %v1178_v3  ;;  %v1184_v55 = vshll.u32 %v1181_v32, 16 }
 0x108   : > { %vm2576_vm15 = vcmp.lt.s32.totalorder %v2528_v33, 16  ;;  %v1171_v43 = vsub.s32 %v7110_v54, %v1170_v28  ;;  %v1862_v41 = vadd.s32 %v1860_v36, %v1858_v30  ;;  %v7208_v42 = vadd.f32 %v7205_v37, %v677_v13 }
 0x109   : > { %v2624_v11 = vsel %vm2576_vm15, %v847_v59, 0.0  ;;  %v1183_v16 = vmul.u32 43690, %v1178_v3  ;;  %v1186_v12 = vshll.u32 %v1182_v40, 16  ;;  %v1185_v57 = vshrl.u32 %v1181_v32, 16  ;;  %v626_v59 = vpop.f32.mrf.mxu2 }
 0x10a   : > { %2676 = vst [vmem:[#allocation2 + $0x118] sm:$0xff] %v2624_v11  ;;  %vm2313_vm1 = vcmp.ne.s32.totalorder %v1171_v43, 0  ;;  %vm2361_vm3 = vcmp.lt.s32.totalorder %v1171_v43, 0  ;;  %v2457_v31 = vadd.s32 24, %v1171_v43  ;;  %v1863_v54 = vadd.s32 %v1862_v41, %v1852_v4 }
 0x10b   : > { %vm2409_vm10 = vmand %vm2361_vm3, %vm2313_vm1  ;;  %vm1188_vm4 = vc.u32 %v1180_v29, %v1184_v55  ;;  %v1190_v51 = vadd.s32 %v1184_v55, %v1180_v29  ;;  %v7211_v50 = vadd.s32 264, %v6640_v24  ;;  %v701_v45 = vmul.f32 %v7217_v25, %v626_v59 }
 0x10c   : > { %v2505_v60 = vsel %vm2409_vm10, %v2457_v31, %v1171_v43  ;;  %v1864_v62 = vadd.s32 %v1863_v54, %v1854_v20  ;;  %v1189_v53 = vsel %vm1188_vm4, 1, %v6531_v38  ;;  %v678_v46 = vmul.f32 %v7217_v25, %v569_v18  ;;  %v2699_v31 = vld [vmem:[#allocation2 + $0x17] sm:$0xff] }
 0x10d   : > { %vm7220_vm5 = vcmp.lt.s32.totalorder %v2505_v60, 16  ;;  %v1191_v15 = vadd.s32 %v1189_v53, %v1183_v16  ;;  %vm1192_vm13 = vc.u32 %v1190_v51, %v1186_v12  ;;  %v1873_v5 = vand.u32 65535, %v7211_v50 }
 0x10e   : > { %v2601_v0 = vsel %vm7220_vm5, %v824_v34, 0.0  ;;  %v1865_v23 = vshrl.u32 %v1864_v62, 4  ;;  %v1193_v1 = vsel %vm1192_vm13, 1, %v6531_v38  ;;  %v825_v6 = vmax.f32 %v7208_v42, 0.0  ;;  %vm6490_vm4 = vmpackc.low %vm7220_vm5, %vm7178_vm8 }
 0x10f   : > { %2653 = vst [vmem:[#allocation2 + $0x60] sm:$0xff] %v2601_v0  ;;  %v1187_v8 = vshrl.u32 %v1182_v40, 16  ;;  %v1195_v10 = vadd.s32 %v1193_v1, %v1191_v15  ;;  %v1874_v13 = vshrl.u32 %v7211_v50, 16  ;;  %v1876_v39 = vmul.u32 43691, %v1873_v5  ;;  %v7256_v0 = vld [vmem:[#allocation2 + $0x2f] sm:$0xff] }
 0x110   : > { %v1866_v14 = vmul.u32 24, %v1865_v23  ;;  %v1877_v63 = vmul.u32 43690, %v1873_v5  ;;  %v7234_v44 = vadd.s32 80, %v6640_v24  ;;  %v7237_v4 = vadd.f32 %v7205_v37, %v701_v45  ;;  %v7253_v45 = vld [vmem:[#allocation2 + $0x37] sm:$0xff] }
 0x111   : > { %v1196_v58 = vadd.s32 %v1195_v10, %v1185_v57  ;;  %v1878_v27 = vmul.u32 43691, %v1874_v13  ;;  %v7240_v3 = vadd.f32 %v7205_v37, %v678_v46  ;;  %v1879_v20 = vmul.u32 43690, %v1874_v13  ;;  %v629_v23 = vpop.f32.mrf.mxu2 }
 0x112   : > { %v1867_v17 = vsub.s32 %v7172_v61, %v1866_v14  ;;  %v1880_v47 = vshll.u32 %v1877_v63, 16  ;;  %v1206_v26 = vand.u32 65535, %v7234_v44  ;;  %v1881_v28 = vshrl.u32 %v1877_v63, 16 }
 0x113   : > { %v1197_v49 = vadd.s32 %v1196_v58, %v1187_v8  ;;  %v1882_v30 = vshll.u32 %v1878_v27, 16  ;;  %v1207_v32 = vshrl.u32 %v7234_v44, 16  ;;  %v1883_v12 = vshrl.u32 %v1878_v27, 16 }
 0x114   : > { %vm2337_vm6 = vcmp.ne.s32.totalorder %v1867_v17, 0  ;;  %vm2385_vm7 = vcmp.lt.s32.totalorder %v1867_v17, 0  ;;  %v2481_v33 = vadd.s32 24, %v1867_v17  ;;  %vm1884_vm11 = vc.u32 %v1876_v39, %v1880_v47 }
 0x115   : > { %vm2433_vm2 = vmand %vm2385_vm7, %vm2337_vm6  ;;  %v1198_v36 = vshrl.u32 %v1197_v49, 4  ;;  %v1885_v29 = vsel %vm1884_vm11, 1, %v6531_v38  ;;  %v1886_v40 = vadd.s32 %v1880_v47, %v1876_v39  ;;  %v1209_v43 = vmul.u32 43691, %v1206_v26 }
 0x116   : > { %v2529_v61 = vsel %vm2433_vm2, %v2481_v33, %v1867_v17  ;;  %v1887_v41 = vadd.s32 %v1885_v29, %v1879_v20  ;;  %v1210_v55 = vmul.u32 43690, %v1206_v26  ;;  %v7246_v11 = vmul.u32 43691, %v1207_v32 }
 0x117   : > { %vm2577_vm9 = vcmp.lt.s32.totalorder %v2529_v61, 16  ;;  %v1199_v16 = vmul.u32 24, %v1198_v36  ;;  %vm1888_vm12 = vc.u32 %v1886_v40, %v1882_v30  ;;  %v1212_v57 = vmul.u32 43690, %v1207_v32 }
 0x118   : > { %v2625_v54 = vsel %vm2577_vm9, %v848_v7, 0.0  ;;  %v1889_v18 = vsel %vm1888_vm12, 1, %v6531_v38  ;;  %v1213_v51 = vshll.u32 %v1210_v55, 16  ;;  %v1214_v62 = vshrl.u32 %v1210_v55, 16 }
 0x119   : > { %2677 = vst [vmem:[#allocation2 + $0x120] sm:$0xff] %v2625_v54  ;;  %v1200_v59 = vsub.s32 %v7190_v21, %v1199_v16  ;;  %v1891_v60 = vadd.s32 %v1889_v18, %v1887_v41  ;;  %v1215_v53 = vshll.u32 %v7246_v11, 16  ;;  %v2746_v46 = vpack.c.bf16 %v7105_v52, %v2699_v31 }
 0x11a   : > { %vm1217_vm14 = vc.u32 %v1209_v43, %v1213_v51  ;;  %v1219_v15 = vadd.s32 %v1213_v51, %v1209_v43  ;;  %v6491_v52 = vpack.c.bf16 %v824_v34, %v823_v56  ;;  %v3591_v1 = vpack.c.bf16 %v7253_v45, %v7256_v0  ;;  %v571_v34 = vpop.f32.mrf.mxu0 }
 0x11b   : > { %vm2314_vm15 = vcmp.ne.s32.totalorder %v1200_v59, 0  ;;  %vm2362_vm1 = vcmp.lt.s32.totalorder %v1200_v59, 0  ;;  %v2458_v48 = vadd.s32 24, %v1200_v59  ;;  %v1892_v7 = vadd.s32 %v1891_v60, %v1881_v28  ;;  %3112 = vmatmul.bf16.gmra.mxu2 %v2746_v46 }
 0x11c   : > { %vm2410_vm3 = vmand %vm2362_vm1, %vm2314_vm15  ;;  %v1218_v21 = vsel %vm1217_vm14, 1, %v6531_v38  ;;  %vm1221_vm10 = vc.u32 %v1219_v15, %v1215_v53  ;;  %6492 = vmatmul.msk.bf16.gmra.mxu1 %vm6490_vm4, %v6491_v52  ;;  %v702_v5 = vmul.f32 %v7217_v25, %v629_v23  ;;  %v1216_v19 = vshrl.u32 %v7246_v11, 16  ;;  %3692 = vmatmul.bf16.gmra.mxu0 %v3591_v1 }
 0x11d   : > { %v2506_v8 = vsel %vm2410_vm3, %v2458_v48, %v1200_v59  ;;  %v1893_v10 = vadd.s32 %v1892_v7, %v1883_v12  ;;  %v1220_v13 = vadd.s32 %v1218_v21, %v1212_v57  ;;  %v1222_v22 = vsel %vm1221_vm10, 1, %v6531_v38 }
 0x11e   : > { %vm7271_vm13 = vcmp.lt.s32.totalorder %v2506_v8, 16  ;;  %v7277_v56 = vadd.f32 %v7205_v37, %v702_v5  ;;  %v7280_v9 = vadd.s32 272, %v6640_v24  ;;  %v7287_v58 = vadd.s32 88, %v6640_v24 }
 0x11f   : > { %v2602_v14 = vsel %vm7271_vm13, %v825_v6, 0.0  ;;  %v1894_v39 = vshrl.u32 %v1893_v10, 4  ;;  %v1224_v63 = vadd.s32 %v1222_v22, %v1220_v13  ;;  %v849_v27 = vmax.f32 %v7237_v4, 0.0 }
 0x120   : > { %2654 = vst [vmem:[#allocation2 + $0x68] sm:$0xff] %v2602_v14  ;;  %v826_v17 = vmax.f32 %v7240_v3, 0.0  ;;  %v1902_v20 = vand.u32 65535, %v7280_v9  ;;  %v1903_v47 = vshrl.u32 %v7280_v9, 16  ;;  %v679_v28 = vmul.f32 %v7217_v25, %v571_v34 }
 0x121   : > { %v1895_v26 = vmul.u32 24, %v1894_v39  ;;  %v1225_v49 = vadd.s32 %v1224_v63, %v1214_v62  ;;  %v1235_v30 = vand.u32 65535, %v7287_v58  ;;  %v1236_v29 = vshrl.u32 %v7287_v58, 16 }
 0x122   : > { %v1905_v32 = vmul.u32 43691, %v1902_v20  ;;  %v1906_v33 = vmul.u32 43690, %v1902_v20  ;;  %v1907_v36 = vmul.u32 43691, %v1903_v47  ;;  %v850_v43 = vmax.f32 %v7277_v56, 0.0  ;;  %v574_v8 = vpop.f32.mrf.mxu0 }
 0x123   : > { %v1896_v40 = vsub.s32 %v7211_v50, %v1895_v26  ;;  %v1226_v4 = vadd.s32 %v1225_v49, %v1216_v19  ;;  %v1908_v61 = vmul.u32 43690, %v1903_v47  ;;  %v1238_v16 = vmul.u32 43691, %v1235_v30  ;;  %v631_v19 = vpop.f32.mrf.mxu2 }
 0x124   : > { %v1909_v41 = vshll.u32 %v1906_v33, 16  ;;  %v1910_v55 = vshrl.u32 %v1906_v33, 16  ;;  %v1911_v11 = vshll.u32 %v1907_v36, 16  ;;  %v1239_v18 = vmul.u32 43690, %v1235_v30 }
 0x125   : > { %vm2338_vm8 = vcmp.ne.s32.totalorder %v1896_v40, 0  ;;  %vm2386_vm5 = vcmp.lt.s32.totalorder %v1896_v40, 0  ;;  %v2482_v12 = vadd.s32 24, %v1896_v40  ;;  %v1227_v31 = vshrl.u32 %v1226_v4, 4 }
 0x126   : > { %vm2434_vm6 = vmand %vm2386_vm5, %vm2338_vm8  ;;  %vm1913_vm7 = vc.u32 %v1905_v32, %v1909_v41  ;;  %v1915_v54 = vadd.s32 %v1909_v41, %v1905_v32  ;;  %v1240_v57 = vmul.u32 43691, %v1236_v29  ;;  %v1241_v60 = vmul.u32 43690, %v1236_v29 }
 0x127   : > { %v2530_v51 = vsel %vm2434_vm6, %v2482_v12, %v1896_v40  ;;  %v1228_v59 = vmul.u32 24, %v1227_v31  ;;  %v1914_v50 = vsel %vm1913_vm7, 1, %v6531_v38  ;;  %v1242_v53 = vshll.u32 %v1239_v18, 16 }
 0x128   : > { %vm2578_vm11 = vcmp.lt.s32.totalorder %v2530_v51, 16  ;;  %v1916_v62 = vadd.s32 %v1914_v50, %v1908_v61  ;;  %vm1917_vm2 = vc.u32 %v1915_v54, %v1911_v11  ;;  %v7302_v7 = vadd.f32 %v7205_v37, %v679_v28 }
 0x129   : > { %v2626_v15 = vsel %vm2578_vm11, %v849_v27, 0.0  ;;  %v1229_v46 = vsub.s32 %v7234_v44, %v1228_v59  ;;  %v1918_v48 = vsel %vm1917_vm2, 1, %v6531_v38  ;;  %v1912_v23 = vshrl.u32 %v1907_v36, 16 }
 0x12a   : > { %2678 = vst [vmem:[#allocation2 + $0x128] sm:$0xff] %v2626_v15  ;;  %v1920_v21 = vadd.s32 %v1918_v48, %v1916_v62  ;;  %v1244_v52 = vshll.u32 %v1240_v57, 16  ;;  %vm1246_vm9 = vc.u32 %v1238_v16, %v1242_v53  ;;  %v1243_v13 = vshrl.u32 %v1239_v18, 16 }
 0x12b   : > { %vm2315_vm12 = vcmp.ne.s32.totalorder %v1229_v46, 0  ;;  %vm2363_vm14 = vcmp.lt.s32.totalorder %v1229_v46, 0  ;;  %v2459_v1 = vadd.s32 24, %v1229_v46  ;;  %v1247_v5 = vsel %vm1246_vm9, 1, %v6531_v38 }
 0x12c   : > { %vm2411_vm15 = vmand %vm2363_vm14, %vm2315_vm12  ;;  %v1921_v10 = vadd.s32 %v1920_v21, %v1910_v55  ;;  %v1248_v44 = vadd.s32 %v1242_v53, %v1238_v16  ;;  %v1249_v22 = vadd.s32 %v1247_v5, %v1241_v60  ;;  %v703_v14 = vmul.f32 %v7217_v25, %v631_v19 }
 0x12d   : > { %v2507_v34 = vsel %vm2411_vm15, %v2459_v1, %v1229_v46  ;;  %v7307_v39 = vadd.s32 280, %v6640_v24  ;;  %v680_v63 = vmul.f32 %v7217_v25, %v574_v8  ;;  %v7315_v47 = vadd.s32 96, %v6640_v24 }
 0x12e   : > { %vm7310_vm1 = vcmp.lt.s32.totalorder %v2507_v34, 16  ;;  %v1922_v20 = vadd.s32 %v1921_v10, %v1912_v23  ;;  %vm1250_vm3 = vc.u32 %v1248_v44, %v1244_v52  ;;  %v827_v33 = vmax.f32 %v7302_v7, 0.0  ;;  %v7346_v10 = vld [vmem:[#allocation2 + $0x47] sm:$0xff] }
 0x12f   : > { %v2603_v26 = vsel %vm7310_vm1, %v826_v17, 0.0  ;;  %v1251_v49 = vsel %vm1250_vm3, 1, %v6531_v38  ;;  %v1931_v28 = vand.u32 65535, %v7307_v39  ;;  %v1932_v30 = vshrl.u32 %v7307_v39, 16  ;;  %vm6493_vm7 = vmpackc.low %vm7310_vm1, %vm7271_vm13 }
 0x130   : > { %2655 = vst [vmem:[#allocation2 + $0x70] sm:$0xff] %v2603_v26  ;;  %v1923_v32 = vshrl.u32 %v1922_v20, 4  ;;  %v1245_v36 = vshrl.u32 %v1240_v57, 16  ;;  %v1253_v29 = vadd.s32 %v1251_v49, %v1249_v22  ;;  %v7326_v40 = vadd.f32 %v7205_v37, %v703_v14  ;;  %v576_v20 = vpop.f32.mrf.mxu0 }
 0x131   : > { %v1934_v4 = vmul.u32 43691, %v1931_v28  ;;  %v1935_v61 = vmul.u32 43690, %v1931_v28  ;;  %v1936_v41 = vmul.u32 43691, %v1932_v30  ;;  %v7329_v16 = vadd.f32 %v7205_v37, %v680_v63  ;;  %v634_v28 = vpop.f32.mrf.mxu2 }
 0x132   : > { %v1924_v55 = vmul.u32 24, %v1923_v32  ;;  %v1254_v11 = vadd.s32 %v1253_v29, %v1243_v13  ;;  %v1264_v12 = vand.u32 65535, %v7315_v47  ;;  %v1937_v31 = vmul.u32 43690, %v1932_v30 }
 0x133   : > { %v1938_v54 = vshll.u32 %v1935_v61, 16  ;;  %v1939_v18 = vshrl.u32 %v1935_v61, 16  ;;  %v1940_v51 = vshll.u32 %v1936_v41, 16  ;;  %v1941_v50 = vshrl.u32 %v1936_v41, 16 }
 0x134   : > { %v1925_v57 = vsub.s32 %v7280_v9, %v1924_v55  ;;  %v1255_v59 = vadd.s32 %v1254_v11, %v1245_v36  ;;  %v1265_v60 = vshrl.u32 %v7315_v47, 16  ;;  %v7334_v53 = vmul.u32 43690, %v1264_v12 }
 0x135   : > { %vm1942_vm10 = vc.u32 %v1934_v4, %v1938_v54  ;;  %v1944_v62 = vadd.s32 %v1938_v54, %v1934_v4  ;;  %v1267_v23 = vmul.u32 43691, %v1264_v12  ;;  %v6494_v9 = vpack.c.bf16 %v826_v17, %v825_v6  ;;  %v7353_v17 = vld [vmem:[#allocation2 + $0x3f] sm:$0xff] }
 0x136   : > { %vm2339_vm4 = vcmp.ne.s32.totalorder %v1925_v57, 0  ;;  %vm2387_vm8 = vcmp.lt.s32.totalorder %v1925_v57, 0  ;;  %v2483_v15 = vadd.s32 24, %v1925_v57  ;;  %v1256_v46 = vshrl.u32 %v1255_v59, 4 }
 0x137   : > { %vm2435_vm5 = vmand %vm2387_vm8, %vm2339_vm4  ;;  %v1943_v48 = vsel %vm1942_vm10, 1, %v6531_v38  ;;  %vm1946_vm6 = vc.u32 %v1944_v62, %v1940_v51  ;;  %v1269_v21 = vmul.u32 43691, %v1265_v60  ;;  %6495 = vmatmul.msk.bf16.gmra.mxu1 %vm6493_vm7, %v6494_v9  ;;  %v1270_v13 = vmul.u32 43690, %v1265_v60 }
 0x138   : > { %v2531_v52 = vsel %vm2435_vm5, %v2483_v15, %v1925_v57  ;;  %v1257_v1 = vmul.u32 24, %v1256_v46  ;;  %v1945_v5 = vadd.s32 %v1943_v48, %v1937_v31  ;;  %v1947_v8 = vsel %vm1946_vm6, 1, %v6531_v38 }
 0x139   : > { %vm2579_vm11 = vcmp.lt.s32.totalorder %v2531_v52, 16  ;;  %v1271_v35 = vshll.u32 %v7334_v53, 16  ;;  %v1273_v44 = vshll.u32 %v1269_v21, 16  ;;  %v1272_v6 = vshrl.u32 %v7334_v53, 16 }
 0x13a   : > { %v2627_v22 = vsel %vm2579_vm11, %v850_v43, 0.0  ;;  %v1258_v42 = vsub.s32 %v7287_v58, %v1257_v1  ;;  %v1949_v3 = vadd.s32 %v1947_v8, %v1945_v5  ;;  %v2747_v34 = vpack.c.bf16 %v7256_v0, %v7098_v2 }
 0x13b   : > { %2679 = vst [vmem:[#allocation2 + $0x130] sm:$0xff] %v2627_v22  ;;  %vm1275_vm13 = vc.u32 %v1267_v23, %v1271_v35  ;;  %v1277_v19 = vadd.s32 %v1271_v35, %v1267_v23  ;;  %v3592_v14 = vpack.c.bf16 %v7346_v10, %v7353_v17  ;;  %v1274_v58 = vshrl.u32 %v1269_v21, 16 }
 0x13c   : > { %vm2316_vm2 = vcmp.ne.s32.totalorder %v1258_v42, 0  ;;  %vm2364_vm9 = vcmp.lt.s32.totalorder %v1258_v42, 0  ;;  %v2460_v56 = vadd.s32 24, %v1258_v42  ;;  %v1950_v43 = vadd.s32 %v1949_v3, %v1939_v18  ;;  %3117 = vmatmul.bf16.gmra.mxu2 %v2747_v34 }
 0x13d   : > { %vm2412_vm12 = vmand %vm2364_vm9, %vm2316_vm2  ;;  %v1276_v63 = vsel %vm1275_vm13, 1, %v6531_v38  ;;  %vm1279_vm14 = vc.u32 %v1277_v19, %v1273_v44  ;;  %3697 = vmatmul.bf16.gmra.mxu0 %v3592_v14  ;;  %v7361_v27 = vadd.s32 288, %v6640_v24  ;;  %v704_v32 = vmul.f32 %v7217_v25, %v634_v28 }
 0x13e   : > { %v2508_v26 = vsel %vm2412_vm12, %v2460_v56, %v1258_v42  ;;  %v1951_v2 = vadd.s32 %v1950_v43, %v1941_v50  ;;  %v1278_v0 = vadd.s32 %v1276_v63, %v1270_v13  ;;  %v1280_v49 = vsel %vm1279_vm14, 1, %v6531_v38 }
 0x13f   : > { %vm7364_vm15 = vcmp.lt.s32.totalorder %v2508_v26, 16  ;;  %v1960_v36 = vand.u32 65535, %v7361_v27  ;;  %v1961_v29 = vshrl.u32 %v7361_v27, 16  ;;  %v681_v55 = vmul.f32 %v7217_v25, %v576_v20 }
 0x140   : > { %v2604_v4 = vsel %vm7364_vm15, %v827_v33, 0.0  ;;  %v1952_v61 = vshrl.u32 %v1951_v2, 4  ;;  %v1282_v41 = vadd.s32 %v1280_v49, %v1278_v0  ;;  %v851_v54 = vmax.f32 %v7326_v40, 0.0 }
 0x141   : > { %2656 = vst [vmem:[#allocation2 + $0x78] sm:$0xff] %v2604_v4  ;;  %v1963_v11 = vmul.u32 43691, %v1960_v36  ;;  %v1964_v12 = vmul.u32 43690, %v1960_v36  ;;  %v1965_v31 = vmul.u32 43691, %v1961_v29  ;;  %v828_v51 = vmax.f32 %v7329_v16, 0.0 }
 0x142   : > { %v1953_v18 = vmul.u32 24, %v1952_v61  ;;  %v1283_v57 = vadd.s32 %v1282_v41, %v1272_v6  ;;  %v7379_v59 = vadd.f32 %v7205_v37, %v704_v32  ;;  %v1966_v50 = vmul.u32 43690, %v1961_v29 }
 0x143   : > { %v1967_v60 = vshll.u32 %v1964_v12, 16  ;;  %v1969_v62 = vshll.u32 %v1965_v31, 16  ;;  %v7383_v46 = vadd.f32 %v7205_v37, %v681_v55  ;;  %v7386_v48 = vadd.s32 104, %v6640_v24 }
 0x144   : > { %v1954_v53 = vsub.s32 %v7307_v39, %v1953_v18  ;;  %v1284_v15 = vadd.s32 %v1283_v57, %v1274_v58  ;;  %v1968_v40 = vshrl.u32 %v1964_v12, 16  ;;  %v7389_v21 = vadd.s32 296, %v6640_v24 }
 0x145   : > { %vm1971_vm1 = vc.u32 %v1963_v11, %v1967_v60  ;;  %v1973_v23 = vadd.s32 %v1967_v60, %v1963_v11  ;;  %v1293_v1 = vand.u32 65535, %v7386_v48  ;;  %v1294_v5 = vshrl.u32 %v7386_v48, 16  ;;  %v579_v60 = vpop.f32.mrf.mxu0 }
 0x146   : > { %vm2340_vm3 = vcmp.ne.s32.totalorder %v1954_v53, 0  ;;  %vm2388_vm10 = vcmp.lt.s32.totalorder %v1954_v53, 0  ;;  %v2484_v9 = vadd.s32 24, %v1954_v53  ;;  %v1285_v52 = vshrl.u32 %v1284_v15, 4 }
 0x147   : > { %vm2436_vm4 = vmand %vm2388_vm10, %vm2340_vm3  ;;  %v1972_v39 = vsel %vm1971_vm1, 1, %v6531_v38  ;;  %vm1975_vm8 = vc.u32 %v1973_v23, %v1969_v62  ;;  %v1296_v22 = vmul.u32 43691, %v1293_v1  ;;  %v1297_v42 = vmul.u32 43690, %v1293_v1 }
 0x148   : > { %v2532_v8 = vsel %vm2436_vm4, %v2484_v9, %v1954_v53  ;;  %v1286_v13 = vmul.u32 24, %v1285_v52  ;;  %v1974_v35 = vadd.s32 %v1972_v39, %v1966_v50  ;;  %v1976_v44 = vsel %vm1975_vm8, 1, %v6531_v38 }
 0x149   : > { %vm2580_vm5 = vcmp.lt.s32.totalorder %v2532_v8, 16  ;;  %v1298_v3 = vmul.u32 43691, %v1294_v5  ;;  %v1970_v34 = vshrl.u32 %v1965_v31, 16  ;;  %v852_v56 = vmax.f32 %v7379_v59, 0.0 }
 0x14a   : > { %v2628_v6 = vsel %vm2580_vm5, %v851_v54, 0.0  ;;  %v1287_v19 = vsub.s32 %v7315_v47, %v1286_v13  ;;  %v1978_v14 = vadd.s32 %v1976_v44, %v1974_v35  ;;  %v1299_v43 = vmul.u32 43690, %v1294_v5  ;;  %v636_v54 = vpop.f32.mrf.mxu2 }
 0x14b   : > { %2680 = vst [vmem:[#allocation2 + $0x138] sm:$0xff] %v2628_v6  ;;  %v1300_v58 = vshll.u32 %v1297_v42, 16  ;;  %v1302_v63 = vshll.u32 %v1298_v3, 16  ;;  %v829_v2 = vmax.f32 %v7383_v46, 0.0  ;;  %v1989_v49 = vand.u32 65535, %v7389_v21 }
 0x14c   : > { %vm2317_vm6 = vcmp.ne.s32.totalorder %v1287_v19, 0  ;;  %vm2365_vm7 = vcmp.lt.s32.totalorder %v1287_v19, 0  ;;  %v2461_v20 = vadd.s32 24, %v1287_v19  ;;  %v1979_v26 = vadd.s32 %v1978_v14, %v1968_v40 }
 0x14d   : > { %vm2413_vm11 = vmand %vm2365_vm7, %vm2317_vm6  ;;  %vm1304_vm13 = vc.u32 %v1296_v22, %v1300_v58  ;;  %v1306_v0 = vadd.s32 %v1300_v58, %v1296_v22  ;;  %v1990_v36 = vshrl.u32 %v7389_v21, 16  ;;  %v1301_v4 = vshrl.u32 %v1297_v42, 16 }
 0x14e   : > { %v2509_v47 = vsel %vm2413_vm11, %v2461_v20, %v1287_v19  ;;  %v1980_v28 = vadd.s32 %v1979_v26, %v1970_v34  ;;  %v1305_v32 = vsel %vm1304_vm13, 1, %v6531_v38  ;;  %v1303_v11 = vshrl.u32 %v1298_v3, 16 }
 0x14f   : > { %vm7401_vm2 = vcmp.lt.s32.totalorder %v2509_v47, 16  ;;  %v1307_v61 = vadd.s32 %v1305_v32, %v1299_v43  ;;  %vm1308_vm9 = vc.u32 %v1306_v0, %v1302_v63  ;;  %v1992_v18 = vmul.u32 43691, %v1989_v49  ;;  %v7428_v43 = vld [vmem:[#allocation2 + $0x57] sm:$0xff]  ;;  %v7439_v32 = vld [vmem:[#allocation2 + $0x4f] sm:$0xff] }
 0x150   : > { %v2605_v41 = vsel %vm7401_vm2, %v828_v51, 0.0  ;;  %v1981_v55 = vshrl.u32 %v1980_v28, 4  ;;  %v1309_v12 = vsel %vm1308_vm9, 1, %v6531_v38  ;;  %v1993_v57 = vmul.u32 43690, %v1989_v49  ;;  %vm6496_vm12 = vmpackc.low %vm7401_vm2, %vm7364_vm15 }
 0x151   : > { %2657 = vst [vmem:[#allocation2 + $0x80] sm:$0xff] %v2605_v41  ;;  %v1311_v31 = vadd.s32 %v1309_v12, %v1307_v61  ;;  %v1994_v50 = vmul.u32 43691, %v1990_v36  ;;  %v705_v53 = vmul.f32 %v7217_v25, %v636_v54  ;;  %v7412_v15 = vadd.s32 112, %v6640_v24 }
 0x152   : > { %v1982_v62 = vmul.u32 24, %v1981_v55  ;;  %v1995_v23 = vmul.u32 43690, %v1990_v36  ;;  %v1996_v9 = vshll.u32 %v1993_v57, 16  ;;  %v1997_v1 = vshrl.u32 %v1993_v57, 16  ;;  %v639_v12 = vpop.f32.mrf.mxu2 }
 0x153   : > { %v1312_v40 = vadd.s32 %v1311_v31, %v1301_v4  ;;  %v1998_v52 = vshll.u32 %v1994_v50, 16  ;;  %v682_v5 = vmul.f32 %v7217_v25, %v579_v60  ;;  %v1322_v8 = vand.u32 65535, %v7412_v15  ;;  %v7533_v31 = vld [vmem:[%s9647_s2] ss:$0 sm:$0xff] }
 0x154   : > { %v1983_v39 = vsub.s32 %v7361_v27, %v1982_v62  ;;  %v6497_v13 = vpack.c.bf16 %v828_v51, %v827_v33  ;;  %vm2000_vm14 = vc.u32 %v1992_v18, %v1996_v9  ;;  %v2002_v44 = vadd.s32 %v1996_v9, %v1992_v18 }
 0x155   : > { %v1313_v35 = vadd.s32 %v1312_v40, %v1303_v11  ;;  %v1323_v27 = vshrl.u32 %v7412_v15, 16  ;;  %v2001_v42 = vsel %vm2000_vm14, 1, %v6531_v38  ;;  %v1999_v3 = vshrl.u32 %v1994_v50, 16 }
 0x156   : > { %6498 = vmatmul.msk.bf16.gmra.mxu1 %vm6496_vm12, %v6497_v13  ;;  %vm2341_vm1 = vcmp.ne.s32.totalorder %v1983_v39, 0  ;;  %vm2389_vm3 = vcmp.lt.s32.totalorder %v1983_v39, 0  ;;  %v2485_v22 = vadd.s32 24, %v1983_v39  ;;  %v2003_v6 = vadd.s32 %v2001_v42, %v1995_v23 }
 0x157   : > { %vm2437_vm10 = vmand %vm2389_vm3, %vm2341_vm1  ;;  %v1314_v30 = vshrl.u32 %v1313_v35, 4  ;;  %vm2004_vm15 = vc.u32 %v2002_v44, %v1998_v52  ;;  %v1325_v33 = vmul.u32 43691, %v1322_v8  ;;  %v1326_v51 = vmul.u32 43690, %v1322_v8  ;;  %v581_v8 = vpop.f32.mrf.mxu0 }
 0x158   : > { %v2533_v7 = vsel %vm2437_vm10, %v2485_v22, %v1983_v39  ;;  %v2005_v16 = vsel %vm2004_vm15, 1, %v6531_v38  ;;  %v1327_v14 = vmul.u32 43691, %v1323_v27  ;;  %v7433_v63 = vadd.f32 %v7205_v37, %v705_v53 }
 0x159   : > { %vm2581_vm4 = vcmp.lt.s32.totalorder %v2533_v7, 16  ;;  %v1315_v19 = vmul.u32 24, %v1314_v30  ;;  %v2007_v34 = vadd.s32 %v2005_v16, %v2003_v6  ;;  %v7436_v20 = vadd.f32 %v7205_v37, %v682_v5 }
 0x15a   : > { %v2629_v58 = vsel %vm2581_vm4, %v852_v56, 0.0  ;;  %v1329_v26 = vshll.u32 %v1326_v51, 16  ;;  %v1328_v47 = vmul.u32 43690, %v1323_v27  ;;  %v1331_v28 = vshll.u32 %v1327_v14, 16 }
 0x15b   : > { %2681 = vst [vmem:[#allocation2 + $0x140] sm:$0xff] %v2629_v58  ;;  %v1316_v0 = vsub.s32 %v7386_v48, %v1315_v19  ;;  %v2008_v49 = vadd.s32 %v2007_v34, %v1997_v1  ;;  %v2748_v59 = vpack.c.bf16 %v7353_v17, %v7253_v45  ;;  %v3593_v56 = vpack.c.bf16 %v7428_v43, %v7439_v32 }
 0x15c   : > { %vm1333_vm8 = vc.u32 %v1325_v33, %v1329_v26  ;;  %v1335_v36 = vadd.s32 %v1329_v26, %v1325_v33  ;;  %v1330_v61 = vshrl.u32 %v1326_v51, 16  ;;  %v7447_v41 = vadd.s32 304, %v6640_v24 }
 0x15d   : > { %vm2318_vm5 = vcmp.ne.s32.totalorder %v1316_v0, 0  ;;  %vm2366_vm6 = vcmp.lt.s32.totalorder %v1316_v0, 0  ;;  %v2462_v29 = vadd.s32 24, %v1316_v0  ;;  %v2009_v4 = vadd.s32 %v2008_v49, %v1999_v3  ;;  %3122 = vmatmul.bf16.gmra.mxu2 %v2748_v59  ;;  %3702 = vmatmul.bf16.gmra.mxu0 %v3593_v56  ;;  %v641_v56 = vpop.f32.mrf.mxu2 }
 0x15e   : > { %vm2414_vm7 = vmand %vm2366_vm6, %vm2318_vm5  ;;  %v1334_v48 = vsel %vm1333_vm8, 1, %v6531_v38  ;;  %vm1337_vm11 = vc.u32 %v1335_v36, %v1331_v28  ;;  %v706_v54 = vmul.f32 %v7217_v25, %v639_v12  ;;  %v2018_v18 = vand.u32 65535, %v7447_v41 }
 0x15f   : > { %v2510_v55 = vsel %vm2414_vm7, %v2462_v29, %v1316_v0  ;;  %v2010_v11 = vshrl.u32 %v2009_v4, 4  ;;  %v1336_v45 = vadd.s32 %v1334_v48, %v1328_v47  ;;  %v1338_v17 = vsel %vm1337_vm11, 1, %v6531_v38 }
 0x160   : > { %vm7450_vm13 = vcmp.lt.s32.totalorder %v2510_v55, 16  ;;  %v2019_v57 = vshrl.u32 %v7447_v41, 16  ;;  %v1332_v62 = vshrl.u32 %v1327_v14, 16  ;;  %v2021_v40 = vmul.u32 43691, %v2018_v18 }
 0x161   : > { %v2606_v50 = vsel %vm7450_vm13, %v829_v2, 0.0  ;;  %v2011_v60 = vmul.u32 24, %v2010_v11  ;;  %v1340_v53 = vadd.s32 %v1338_v17, %v1336_v45  ;;  %v2022_v23 = vmul.u32 43690, %v2018_v18 }
 0x162   : > { %2658 = vst [vmem:[#allocation2 + $0x88] sm:$0xff] %v2606_v50  ;;  %v2023_v9 = vmul.u32 43691, %v2019_v57  ;;  %v853_v52 = vmax.f32 %v7433_v63, 0.0  ;;  %v830_v1 = vmax.f32 %v7436_v20, 0.0  ;;  %v7465_v13 = vadd.f32 %v7205_v37, %v706_v54 }
 0x163   : > { %v2012_v39 = vsub.s32 %v7389_v21, %v2011_v60  ;;  %v1341_v5 = vadd.s32 %v1340_v53, %v1330_v61  ;;  %v2024_v35 = vmul.u32 43690, %v2019_v57  ;;  %v2025_v44 = vshll.u32 %v2022_v23, 16 }
 0x164   : > { %v2027_v27 = vshll.u32 %v2023_v9, 16  ;;  %v683_v3 = vmul.f32 %v7217_v25, %v581_v8  ;;  %v7469_v21 = vadd.s32 120, %v6640_v24  ;;  %v2026_v16 = vshrl.u32 %v2022_v23, 16 }
 0x165   : > { %vm2342_vm2 = vcmp.ne.s32.totalorder %v2012_v39, 0  ;;  %vm2390_vm9 = vcmp.lt.s32.totalorder %v2012_v39, 0  ;;  %v2486_v22 = vadd.s32 24, %v2012_v39  ;;  %v1342_v42 = vadd.s32 %v1341_v5, %v1332_v62 }
 0x166   : > { %vm2438_vm12 = vmand %vm2390_vm9, %vm2342_vm2  ;;  %vm2029_vm14 = vc.u32 %v2021_v40, %v2025_v44  ;;  %v2031_v30 = vadd.s32 %v2025_v44, %v2021_v40  ;;  %v1351_v19 = vand.u32 65535, %v7469_v21  ;;  %v1352_v63 = vshrl.u32 %v7469_v21, 16 }
 0x167   : > { %v2534_v6 = vsel %vm2438_vm12, %v2486_v22, %v2012_v39  ;;  %v1343_v7 = vshrl.u32 %v1342_v42, 4  ;;  %v2030_v33 = vsel %vm2029_vm14, 1, %v6531_v38  ;;  %v2028_v26 = vshrl.u32 %v2023_v9, 16 }
 0x168   : > { %vm2582_vm1 = vcmp.lt.s32.totalorder %v2534_v6, 16  ;;  %v2032_v51 = vadd.s32 %v2030_v33, %v2024_v35  ;;  %vm2033_vm3 = vc.u32 %v2031_v30, %v2027_v27  ;;  %v1354_v49 = vmul.u32 43691, %v1351_v19 }
 0x169   : > { %v2630_v34 = vsel %vm2582_vm1, %v853_v52, 0.0  ;;  %v1344_v14 = vmul.u32 24, %v1343_v7  ;;  %v2034_v58 = vsel %vm2033_vm3, 1, %v6531_v38  ;;  %v1355_v47 = vmul.u32 43690, %v1351_v19 }
 0x16a   : > { %2682 = vst [vmem:[#allocation2 + $0x148] sm:$0xff] %v2630_v34  ;;  %v2036_v0 = vadd.s32 %v2034_v58, %v2032_v51  ;;  %v7477_v36 = vadd.f32 %v7205_v37, %v683_v3  ;;  %v1356_v59 = vmul.u32 43691, %v1352_v63  ;;  %v7480_v29 = vadd.s32 312, %v6640_v24 }
 0x16b   : > { %v1345_v28 = vsub.s32 %v7412_v15, %v1344_v14  ;;  %v1357_v61 = vmul.u32 43690, %v1352_v63  ;;  %v1358_v48 = vshll.u32 %v1355_v47, 16  ;;  %v707_v55 = vmul.f32 %v7217_v25, %v641_v56 }
 0x16c   : > { %v2037_v4 = vadd.s32 %v2036_v0, %v2026_v16  ;;  %v1360_v45 = vshll.u32 %v1356_v59, 16  ;;  %v1359_v15 = vshrl.u32 %v1355_v47, 16  ;;  %v2047_v57 = vand.u32 65535, %v7480_v29  ;;  %v584_v0 = vpop.f32.mrf.mxu0 }
 0x16d   : > { %vm2319_vm10 = vcmp.ne.s32.totalorder %v1345_v28, 0  ;;  %vm2367_vm15 = vcmp.lt.s32.totalorder %v1345_v28, 0  ;;  %v2463_v11 = vadd.s32 24, %v1345_v28  ;;  %vm1362_vm8 = vc.u32 %v1354_v49, %v1358_v48 }
 0x16e   : > { %vm2415_vm4 = vmand %vm2367_vm15, %vm2319_vm10  ;;  %v2038_v17 = vadd.s32 %v2037_v4, %v2028_v26  ;;  %v1364_v12 = vadd.s32 %v1358_v48, %v1354_v49  ;;  %v1363_v18 = vsel %vm1362_vm8, 1, %v6531_v38  ;;  %v2048_v50 = vshrl.u32 %v7480_v29, 16  ;;  %v7510_v48 = vld [vmem:[#allocation2 + $0x67] sm:$0xff] }
 0x16f   : > { %v2511_v54 = vsel %vm2415_vm4, %v2463_v11, %v1345_v28  ;;  %v1365_v53 = vadd.s32 %v1363_v18, %v1357_v61  ;;  %v2050_v9 = vmul.u32 43691, %v2047_v57  ;;  %v2051_v52 = vmul.u32 43690, %v2047_v57  ;;  %v7517_v18 = vld [vmem:[#allocation2 + $0x5f] sm:$0xff] }
 0x170   : > { %vm7486_vm5 = vcmp.lt.s32.totalorder %v2511_v54, 16  ;;  %v2039_v62 = vshrl.u32 %v2038_v17, 4  ;;  %vm1366_vm6 = vc.u32 %v1364_v12, %v1360_v45  ;;  %v1361_v5 = vshrl.u32 %v1356_v59, 16 }
 0x171   : > { %v2607_v40 = vsel %vm7486_vm5, %v830_v1, 0.0  ;;  %v1367_v23 = vsel %vm1366_vm6, 1, %v6531_v38  ;;  %v2052_v35 = vmul.u32 43691, %v2048_v50  ;;  %v854_v44 = vmax.f32 %v7465_v13, 0.0  ;;  %vm6499_vm15 = vmpackc.low %vm7486_vm5, %vm7450_vm13 }
 0x172   : > { %2659 = vst [vmem:[#allocation2 + $0x90] sm:$0xff] %v2607_v40  ;;  %v2040_v39 = vmul.u32 24, %v2039_v62  ;;  %v1369_v8 = vadd.s32 %v1367_v23, %v1365_v53  ;;  %v831_v27 = vmax.f32 %v7477_v36, 0.0  ;;  %v2054_v22 = vshll.u32 %v2051_v52, 16 }
 0x173   : > { %v7498_v42 = vadd.s32 128, %v6640_v24  ;;  %v2053_v6 = vmul.u32 43690, %v2048_v50  ;;  %v2056_v7 = vshll.u32 %v2052_v35, 16  ;;  %v7502_v16 = vadd.f32 %v7205_v37, %v707_v55 }
 0x174   : > { %v2041_v30 = vsub.s32 %v7447_v41, %v2040_v39  ;;  %v1370_v3 = vadd.s32 %v1369_v8, %v1359_v15  ;;  %vm2058_vm7 = vc.u32 %v2050_v9, %v2054_v22  ;;  %v2060_v33 = vadd.s32 %v2054_v22, %v2050_v9  ;;  %v586_v22 = vpop.f32.mrf.mxu0 }
 0x175   : > { %v1380_v51 = vand.u32 65535, %v7498_v42  ;;  %v2055_v34 = vshrl.u32 %v2051_v52, 16  ;;  %v2059_v14 = vsel %vm2058_vm7, 1, %v6531_v38  ;;  %v1381_v41 = vshrl.u32 %v7498_v42, 16 }
 0x176   : > { %vm2343_vm11 = vcmp.ne.s32.totalorder %v2041_v30, 0  ;;  %vm2391_vm2 = vcmp.lt.s32.totalorder %v2041_v30, 0  ;;  %v2487_v13 = vadd.s32 24, %v2041_v30  ;;  %v1371_v19 = vadd.s32 %v1370_v3, %v1361_v5 }
 0x177   : > { %vm2439_vm9 = vmand %vm2391_vm2, %vm2343_vm11  ;;  %vm2062_vm12 = vc.u32 %v2060_v33, %v2056_v7  ;;  %v2061_v26 = vadd.s32 %v2059_v14, %v2053_v6  ;;  %v1383_v49 = vmul.u32 43691, %v1380_v51  ;;  %v1384_v47 = vmul.u32 43690, %v1380_v51 }
 0x178   : > { %v2535_v58 = vsel %vm2439_vm9, %v2487_v13, %v2041_v30  ;;  %v1372_v63 = vshrl.u32 %v1371_v19, 4  ;;  %v2063_v37 = vsel %vm2062_vm12, 1, %v6531_v38  ;;  %v7508_v28 = vmul.u32 43691, %v1381_v41  ;;  %v7555_v30 = vld [vmem:[%s9648_s3] ss:$0 sm:$0xff] }
 0x179   : > { %vm2583_vm14 = vcmp.lt.s32.totalorder %v2535_v58, 16  ;;  %v2057_v4 = vshrl.u32 %v2052_v35, 16  ;;  %v2065_v61 = vadd.s32 %v2063_v37, %v2061_v26  ;;  %v684_v55 = vmul.f32 %v7217_v25, %v584_v0 }
 0x17a   : > { %v2631_v59 = vsel %vm2583_vm14, %v854_v44, 0.0  ;;  %v1373_v56 = vmul.u32 24, %v1372_v63  ;;  %v1386_v11 = vmul.u32 43690, %v1381_v41  ;;  %v1387_v45 = vshll.u32 %v1384_v47, 16 }
 0x17b   : > { %2683 = vst [vmem:[#allocation2 + $0x150] sm:$0xff] %v2631_v59  ;;  %v1389_v17 = vshll.u32 %v7508_v28, 16  ;;  %v2066_v12 = vadd.s32 %v2065_v61, %v2055_v34  ;;  %v2749_v54 = vpack.c.bf16 %v7439_v32, %v7346_v10  ;;  %v1388_v57 = vshrl.u32 %v1384_v47, 16  ;;  %v644_v32 = vpop.f32.mrf.mxu2 }
 0x17c   : > { %v1374_v15 = vsub.s32 %v7469_v21, %v1373_v56  ;;  %vm1391_vm1 = vc.u32 %v1383_v49, %v1387_v45  ;;  %v1393_v50 = vadd.s32 %v1387_v45, %v1383_v49  ;;  %v3594_v62 = vpack.c.bf16 %v7510_v48, %v7517_v18 }
 0x17d   : > { %v2067_v53 = vadd.s32 %v2066_v12, %v2057_v4  ;;  %v6500_v10 = vpack.c.bf16 %v830_v1, %v829_v2  ;;  %3127 = vmatmul.bf16.gmra.mxu2 %v2749_v54  ;;  %v1392_v21 = vsel %vm1391_vm1, 1, %v6531_v38  ;;  %v708_v60 = vmul.f32 %v7533_v31, %v644_v32 }
 0x17e   : > { %vm2320_vm3 = vcmp.ne.s32.totalorder %v1374_v15, 0  ;;  %vm2368_vm10 = vcmp.lt.s32.totalorder %v1374_v15, 0  ;;  %v2464_v25 = vadd.s32 24, %v1374_v15  ;;  %vm1395_vm8 = vc.u32 %v1393_v50, %v1389_v17  ;;  %3707 = vmatmul.bf16.gmra.mxu0 %v3594_v62 }
 0x17f   : > { %6501 = vmatmul.msk.bf16.gmra.mxu1 %vm6499_vm15, %v6500_v10  ;;  %vm2416_vm4 = vmand %vm2368_vm10, %vm2320_vm3  ;;  %v7537_v46 = vadd.s32 320, %v6640_v24  ;;  %v2068_v2 = vshrl.u32 %v2067_v53, 4  ;;  %v1394_v1 = vadd.s32 %v1392_v21, %v1386_v11  ;;  %v1396_v40 = vsel %vm1395_vm8, 1, %v6531_v38 }
 0x180   : > { %v2512_v20 = vsel %vm2416_vm4, %v2464_v25, %v1374_v15  ;;  %v855_v9 = vmax.f32 %v7502_v16, 0.0  ;;  %v1390_v35 = vshrl.u32 %v7508_v28, 16  ;;  %v7558_v3 = vadd.f32 %v7555_v30, %v684_v55 }
 0x181   : > { %vm7540_vm13 = vcmp.lt.s32.totalorder %v2512_v20, 16  ;;  %v2076_v52 = vand.u32 65535, %v7537_v46  ;;  %v2077_v39 = vshrl.u32 %v7537_v46, 16  ;;  %v2069_v8 = vmul.u32 24, %v2068_v2 }
 0x182   : > { %v2608_v5 = vsel %vm7540_vm13, %v831_v27, 0.0  ;;  %v1398_v44 = vadd.s32 %v1396_v40, %v1394_v1  ;;  %v7562_v13 = vadd.f32 %v7555_v30, %v708_v60  ;;  %v7565_v19 = vadd.s32 136, %v6640_v24 }
 0x183   : > { %2660 = vst [vmem:[#allocation2 + $0x98] sm:$0xff] %v2608_v5  ;;  %v2079_v6 = vmul.u32 43691, %v2076_v52  ;;  %v2080_v7 = vmul.u32 43690, %v2076_v52  ;;  %v2081_v16 = vmul.u32 43691, %v2077_v39  ;;  %v2070_v33 = vsub.s32 %v7480_v29, %v2069_v8 }
 0x184   : > { %v1399_v51 = vadd.s32 %v1398_v44, %v1388_v57  ;;  %v2082_v34 = vmul.u32 43690, %v2077_v39  ;;  %v685_v58 = vmul.f32 %v7533_v31, %v586_v22  ;;  %v1409_v0 = vand.u32 65535, %v7565_v19  ;;  %v589_v44 = vpop.f32.mrf.mxu0 }
 0x185   : > { %v2083_v14 = vshll.u32 %v2080_v7, 16  ;;  %v2085_v41 = vshll.u32 %v2081_v16, 16  ;;  %vm2344_vm5 = vcmp.ne.s32.totalorder %v2070_v33, 0  ;;  %vm2392_vm6 = vcmp.lt.s32.totalorder %v2070_v33, 0 }
 0x186   : > { %v2488_v63 = vadd.s32 24, %v2070_v33  ;;  %v1400_v26 = vadd.s32 %v1399_v51, %v1390_v35  ;;  %vm2440_vm7 = vmand %vm2392_vm6, %vm2344_vm5  ;;  %v2084_v37 = vshrl.u32 %v2080_v7, 16  ;;  %v1410_v59 = vshrl.u32 %v7565_v19, 16 }
 0x187   : > { %vm2087_vm11 = vc.u32 %v2079_v6, %v2083_v14  ;;  %v2089_v29 = vadd.s32 %v2083_v14, %v2079_v6  ;;  %v1412_v4 = vmul.u32 43691, %v1409_v0  ;;  %v1413_v45 = vmul.u32 43690, %v1409_v0 }
 0x188   : > { %v2536_v49 = vsel %vm2440_vm7, %v2488_v63, %v2070_v33  ;;  %v1401_v47 = vshrl.u32 %v1400_v26, 4  ;;  %v2088_v28 = vsel %vm2087_vm11, 1, %v6531_v38  ;;  %v2086_v17 = vshrl.u32 %v2081_v16, 16 }
 0x189   : > { %vm2584_vm2 = vcmp.lt.s32.totalorder %v2536_v49, 16  ;;  %v2090_v56 = vadd.s32 %v2088_v28, %v2082_v34  ;;  %vm2091_vm9 = vc.u32 %v2089_v29, %v2085_v41  ;;  %v7573_v12 = vadd.f32 %v7555_v30, %v685_v58  ;;  %v646_v34 = vpop.f32.mrf.mxu2 }
 0x18a   : > { %v2632_v61 = vsel %vm2584_vm2, %v855_v9, 0.0  ;;  %v1402_v55 = vmul.u32 24, %v1401_v47  ;;  %v2092_v11 = vsel %vm2091_vm9, 1, %v6531_v38  ;;  %v1414_v54 = vmul.u32 43691, %v1410_v59 }
 0x18b   : > { %2684 = vst [vmem:[#allocation2 + $0x158] sm:$0xff] %v2632_v61  ;;  %v2094_v15 = vadd.s32 %v2092_v11, %v2090_v56  ;;  %v1415_v50 = vmul.u32 43690, %v1410_v59  ;;  %v1416_v62 = vshll.u32 %v1413_v45, 16  ;;  %v7577_v25 = vadd.s32 328, %v6640_v24 }
 0x18c   : > { %v1403_v57 = vsub.s32 %v7498_v42, %v1402_v55  ;;  %v832_v53 = vmax.f32 %v7558_v3, 0.0  ;;  %v856_v10 = vmax.f32 %v7562_v13, 0.0  ;;  %v1418_v21 = vshll.u32 %v1414_v54, 16 }
 0x18d   : > { %v2095_v32 = vadd.s32 %v2094_v15, %v2084_v37  ;;  %vm1420_vm1 = vc.u32 %v1412_v4, %v1416_v62  ;;  %v833_v2 = vmax.f32 %v7573_v12, 0.0  ;;  %v1422_v1 = vadd.s32 %v1416_v62, %v1412_v4  ;;  %v7606_v62 = vld [vmem:[#allocation2 + $0x77] sm:$0xff] }
 0x18e   : > { %vm2321_vm12 = vcmp.ne.s32.totalorder %v1403_v57, 0  ;;  %vm2369_vm14 = vcmp.lt.s32.totalorder %v1403_v57, 0  ;;  %v2465_v60 = vadd.s32 24, %v1403_v57  ;;  %v1421_v42 = vsel %vm1420_vm1, 1, %v6531_v38 }
 0x18f   : > { %vm2417_vm3 = vmand %vm2369_vm14, %vm2321_vm12  ;;  %v2096_v20 = vadd.s32 %v2095_v32, %v2086_v17  ;;  %v1423_v9 = vadd.s32 %v1421_v42, %v1415_v50  ;;  %v2105_v52 = vand.u32 65535, %v7577_v25  ;;  %v2106_v39 = vshrl.u32 %v7577_v25, 16 }
 0x190   : > { %v2513_v40 = vsel %vm2417_vm3, %v2465_v60, %v1403_v57  ;;  %v1417_v35 = vshrl.u32 %v1413_v45, 16  ;;  %vm1424_vm15 = vc.u32 %v1422_v1, %v1418_v21  ;;  %v1419_v51 = vshrl.u32 %v1414_v54, 16 }
 0x191   : > { %vm7585_vm10 = vcmp.lt.s32.totalorder %v2513_v40, 16  ;;  %v2097_v8 = vshrl.u32 %v2096_v20, 4  ;;  %v1425_v6 = vsel %vm1424_vm15, 1, %v6531_v38  ;;  %v2108_v7 = vmul.u32 43691, %v2105_v52 }
 0x192   : > { %v2609_v22 = vsel %vm7585_vm10, %v832_v53, 0.0  ;;  %v2109_v16 = vmul.u32 43690, %v2105_v52  ;;  %v1427_v13 = vadd.s32 %v1425_v6, %v1423_v9  ;;  %v2110_v14 = vmul.u32 43691, %v2106_v39  ;;  %v7612_v9 = vld [vmem:[#allocation2 + $0x6f] sm:$0xff]  ;;  %vm6502_vm2 = vmpackc.low %vm7585_vm10, %vm7540_vm13 }
 0x193   : > { %2661 = vst [vmem:[#allocation2 + $0xa0] sm:$0xff] %v2609_v22  ;;  %v2098_v33 = vmul.u32 24, %v2097_v8  ;;  %v709_v41 = vmul.f32 %v7533_v31, %v646_v34  ;;  %v686_v63 = vmul.f32 %v7533_v31, %v589_v44  ;;  %v7597_v26 = vadd.s32 144, %v6640_v24  ;;  %v7627_v44 = vpop.f32.mrf.mxu1 }
 0x194   : > { %v2112_v58 = vshll.u32 %v2109_v16, 16  ;;  %v1428_v29 = vadd.s32 %v1427_v13, %v1417_v35  ;;  %v2111_v0 = vmul.u32 43690, %v2106_v39  ;;  %v2114_v49 = vshll.u32 %v2110_v14, 16 }
 0x195   : > { %v2099_v37 = vsub.s32 %v7537_v46, %v2098_v33  ;;  %v2113_v47 = vshrl.u32 %v2109_v16, 16  ;;  %v1438_v59 = vand.u32 65535, %v7597_v26  ;;  %v2115_v61 = vshrl.u32 %v2110_v14, 16 }
 0x196   : > { %vm2116_vm4 = vc.u32 %v2108_v7, %v2112_v58  ;;  %v2118_v28 = vadd.s32 %v2112_v58, %v2108_v7  ;;  %v1429_v4 = vadd.s32 %v1428_v29, %v1419_v51  ;;  %v1439_v11 = vshrl.u32 %v7597_v26, 16  ;;  %v649_v29 = vpop.f32.mrf.mxu2 }
 0x197   : > { %vm2345_vm8 = vcmp.ne.s32.totalorder %v2099_v37, 0  ;;  %vm2393_vm5 = vcmp.lt.s32.totalorder %v2099_v37, 0  ;;  %v2489_v56 = vadd.s32 24, %v2099_v37  ;;  %v2117_v55 = vsel %vm2116_vm4, 1, %v6531_v38 }
 0x198   : > { %vm2441_vm6 = vmand %vm2393_vm5, %vm2345_vm8  ;;  %vm2120_vm7 = vc.u32 %v2118_v28, %v2114_v49  ;;  %v1430_v45 = vshrl.u32 %v1429_v4, 4  ;;  %v2119_v17 = vadd.s32 %v2117_v55, %v2111_v0  ;;  %v1441_v54 = vmul.u32 43691, %v1438_v59 }
 0x199   : > { %v2537_v46 = vsel %vm2441_vm6, %v2489_v56, %v2099_v37  ;;  %v2121_v15 = vsel %vm2120_vm7, 1, %v6531_v38  ;;  %v1442_v57 = vmul.u32 43690, %v1438_v59  ;;  %v7604_v50 = vmul.u32 43691, %v1439_v11 }
 0x19a   : > { %vm2585_vm11 = vcmp.lt.s32.totalorder %v2537_v46, 16  ;;  %v1431_v21 = vmul.u32 24, %v1430_v45  ;;  %v2123_v60 = vadd.s32 %v2121_v15, %v2119_v17  ;;  %v7609_v20 = vadd.f32 %v7555_v30, %v709_v41 }
 0x19b   : > { %v2633_v32 = vsel %vm2585_vm11, %v856_v10, 0.0  ;;  %v1444_v42 = vmul.u32 43690, %v1439_v11  ;;  %v1445_v1 = vshll.u32 %v1442_v57, 16  ;;  %v1447_v40 = vshll.u32 %v7604_v50, 16  ;;  %v7657_v15 = vpop.f32.mrf.mxu1 }
 0x19c   : > { %2685 = vst [vmem:[#allocation2 + $0x160] sm:$0xff] %v2633_v32  ;;  %v1432_v52 = vsub.s32 %v7565_v19, %v1431_v21  ;;  %v2124_v39 = vadd.s32 %v2123_v60, %v2113_v47  ;;  %v6503_v10 = vpack.c.bf16 %v832_v53, %v831_v27  ;;  %v2750_v8 = vpack.c.bf16 %v7517_v18, %v7428_v43 }
 0x19d   : > { %v3595_v35 = vpack.c.bf16 %v7606_v62, %v7612_v9  ;;  %v7630_v19 = vadd.f32 %v7555_v30, %v686_v63  ;;  %vm1449_vm9 = vc.u32 %v1441_v54, %v1445_v1  ;;  %v1451_v23 = vadd.s32 %v1445_v1, %v1441_v54  ;;  %v591_v63 = vpop.f32.mrf.mxu0 }
 0x19e   : > { %6504 = vmatmul.msk.bf16.gmra.mxu1 %vm6502_vm2, %v6503_v10  ;;  %v7633_v5 = vadd.s32 336, %v6640_v24  ;;  %vm2322_vm13 = vcmp.ne.s32.totalorder %v1432_v52, 0  ;;  %vm2370_vm12 = vcmp.lt.s32.totalorder %v1432_v52, 0  ;;  %v2466_v36 = vadd.s32 24, %v1432_v52  ;;  %3132 = vmatmul.bf16.gmra.mxu2 %v2750_v8 }
 0x19f   : > { %v2125_v27 = vadd.s32 %v2124_v39, %v2115_v61  ;;  %3712 = vmatmul.bf16.gmra.mxu0 %v3595_v35  ;;  %vm2418_vm14 = vmand %vm2370_vm12, %vm2322_vm13  ;;  %v1446_v43 = vshrl.u32 %v1442_v57, 16  ;;  %v1450_v18 = vsel %vm1449_vm9, 1, %v6531_v38  ;;  %vm1453_vm1 = vc.u32 %v1451_v23, %v1447_v40 }
 0x1a0   : > { %v2134_v3 = vand.u32 65535, %v7633_v5  ;;  %v2514_v53 = vsel %vm2418_vm14, %v2466_v36, %v1432_v52  ;;  %v1452_v6 = vadd.s32 %v1450_v18, %v1444_v42  ;;  %v1454_v7 = vsel %vm1453_vm1, 1, %v6531_v38 }
 0x1a1   : > { %v2126_v22 = vshrl.u32 %v2125_v27, 4  ;;  %vm7638_vm3 = vcmp.lt.s32.totalorder %v2514_v53, 16  ;;  %v857_v33 = vmax.f32 %v7609_v20, 0.0  ;;  %v1448_v51 = vshrl.u32 %v7604_v50, 16 }
 0x1a2   : > { %v2135_v13 = vshrl.u32 %v7633_v5, 16  ;;  %v2610_v34 = vsel %vm7638_vm3, %v833_v2, 0.0  ;;  %v1456_v41 = vadd.s32 %v1454_v7, %v1452_v6  ;;  %v2138_v58 = vmul.u32 43690, %v2134_v3 }
 0x1a3   : > { %v2127_v14 = vmul.u32 24, %v2126_v22  ;;  %2662 = vst [vmem:[#allocation2 + $0xa8] sm:$0xff] %v2610_v34  ;;  %v834_v37 = vmax.f32 %v7630_v19, 0.0  ;;  %v2137_v0 = vmul.u32 43691, %v2134_v3  ;;  %v7651_v47 = vadd.s32 152, %v6640_v24 }
 0x1a4   : > { %v2139_v49 = vmul.u32 43691, %v2135_v13  ;;  %v1457_v59 = vadd.s32 %v1456_v41, %v1446_v43  ;;  %v710_v56 = vmul.f32 %v7533_v31, %v649_v29  ;;  %v2141_v4 = vshll.u32 %v2138_v58, 16 }
 0x1a5   : > { %v2128_v28 = vsub.s32 %v7577_v25, %v2127_v14  ;;  %v2140_v61 = vmul.u32 43690, %v2135_v13  ;;  %v687_v11 = vmul.f32 %v7533_v31, %v591_v63  ;;  %v1467_v46 = vand.u32 65535, %v7651_v47 }
 0x1a6   : > { %v2143_v55 = vshll.u32 %v2139_v49, 16  ;;  %v1458_v17 = vadd.s32 %v1457_v59, %v1448_v51  ;;  %v2142_v54 = vshrl.u32 %v2138_v58, 16  ;;  %vm2145_vm8 = vc.u32 %v2137_v0, %v2141_v4  ;;  %v7676_v58 = vpop.f32.mrf.mxu1 }
 0x1a7   : > { %vm2346_vm10 = vcmp.ne.s32.totalorder %v2128_v28, 0  ;;  %vm2394_vm15 = vcmp.lt.s32.totalorder %v2128_v28, 0  ;;  %v2490_v45 = vadd.s32 24, %v2128_v28  ;;  %v2147_v25 = vadd.s32 %v2141_v4, %v2137_v0 }
 0x1a8   : > { %vm2442_vm4 = vmand %vm2394_vm15, %vm2346_vm10  ;;  %v1468_v57 = vshrl.u32 %v7651_v47, 16  ;;  %v1459_v32 = vshrl.u32 %v1458_v17, 4  ;;  %v2146_v21 = vsel %vm2145_vm8, 1, %v6531_v38  ;;  %v1470_v60 = vmul.u32 43691, %v1467_v46  ;;  %v6404_v17 = vld [vmem:[%s9649_s4 + $0x138] sm:$0xff] }
 0x1a9   : > { %v2538_v50 = vsel %vm2442_vm4, %v2490_v45, %v2128_v28  ;;  %v2148_v20 = vadd.s32 %v2146_v21, %v2140_v61  ;;  %vm2149_vm6 = vc.u32 %v2147_v25, %v2143_v55  ;;  %v1471_v42 = vmul.u32 43690, %v1467_v46  ;;  %v651_v45 = vpop.f32.mrf.mxu2  ;;  %3993 = vmatpush.bf16.msrb.mxu1 %v6404_v17 }
 0x1aa   : > { %vm2586_vm5 = vcmp.lt.s32.totalorder %v2538_v50, 16  ;;  %v1460_v40 = vmul.u32 24, %v1459_v32  ;;  %v2150_v52 = vsel %vm2149_vm6, 1, %v6531_v38  ;;  %v1472_v39 = vmul.u32 43691, %v1468_v57 }
 0x1ab   : > { %v2634_v1 = vsel %vm2586_vm5, %v857_v33, 0.0  ;;  %v2144_v10 = vshrl.u32 %v2139_v49, 16  ;;  %v2152_v8 = vadd.s32 %v2150_v52, %v2148_v20  ;;  %v1473_v35 = vmul.u32 43690, %v1468_v57 }
 0x1ac   : > { %2686 = vst [vmem:[#allocation2 + $0x168] sm:$0xff] %v2634_v1  ;;  %v1474_v23 = vshll.u32 %v1471_v42, 16  ;;  %v1461_v36 = vsub.s32 %v7597_v26, %v1460_v40  ;;  %v7664_v27 = vadd.f32 %v7555_v30, %v710_v56  ;;  %v7667_v43 = vadd.f32 %v7555_v30, %v687_v11 }
 0x1ad   : > { %v1476_v18 = vshll.u32 %v1472_v39, 16  ;;  %v2153_v3 = vadd.s32 %v2152_v8, %v2142_v54  ;;  %v7670_v22 = vadd.s32 344, %v6640_v24  ;;  %v1475_v33 = vshrl.u32 %v1471_v42, 16 }
 0x1ae   : > { %vm1478_vm7 = vc.u32 %v1470_v60, %v1474_v23  ;;  %v1480_v53 = vadd.s32 %v1474_v23, %v1470_v60  ;;  %vm2323_vm11 = vcmp.ne.s32.totalorder %v1461_v36, 0  ;;  %vm2371_vm2 = vcmp.lt.s32.totalorder %v1461_v36, 0 }
 0x1af   : > { %v2467_v6 = vadd.s32 24, %v1461_v36  ;;  %v1479_v7 = vsel %vm1478_vm7, 1, %v6531_v38  ;;  %vm2419_vm9 = vmand %vm2371_vm2, %vm2323_vm11  ;;  %v2154_v26 = vadd.s32 %v2153_v3, %v2144_v10  ;;  %v2163_v14 = vand.u32 65535, %v7670_v22  ;;  %v594_v10 = vpop.f32.mrf.mxu0 }
 0x1b0   : > { %v1481_v51 = vadd.s32 %v1479_v7, %v1473_v35  ;;  %vm1482_vm13 = vc.u32 %v1480_v53, %v1476_v18  ;;  %v2164_v41 = vshrl.u32 %v7670_v22, 16  ;;  %v1477_v0 = vshrl.u32 %v1472_v39, 16  ;;  %v7716_v53 = vld [vmem:[#allocation2 + $0x7f] sm:$0xff] }
 0x1b1   : > { %v2515_v13 = vsel %vm2419_vm9, %v2467_v6, %v1461_v36  ;;  %v1483_v34 = vsel %vm1482_vm13, 1, %v6531_v38  ;;  %v2155_v29 = vshrl.u32 %v2154_v26, 4  ;;  %v2166_v59 = vmul.u32 43691, %v2163_v14  ;;  %v7718_v6 = vpop.f32.mrf.mxu1 }
 0x1b2   : > { %vm7678_vm12 = vcmp.lt.s32.totalorder %v2515_v13, 16  ;;  %v1485_v49 = vadd.s32 %v1483_v34, %v1481_v51  ;;  %v2167_v56 = vmul.u32 43690, %v2163_v14  ;;  %v7686_v4 = vmul.u32 43691, %v2164_v41 }
 0x1b3   : > { %v2611_v28 = vsel %vm7678_vm12, %v834_v37, 0.0  ;;  %v858_v61 = vmax.f32 %v7664_v27, 0.0  ;;  %v2156_v55 = vmul.u32 24, %v2155_v29  ;;  %v835_v11 = vmax.f32 %v7667_v43, 0.0  ;;  %vm6505_vm8 = vmpackc.low %vm7678_vm12, %vm7638_vm3 }
 0x1b4   : > { %2663 = vst [vmem:[#allocation2 + $0xb0] sm:$0xff] %v2611_v28  ;;  %v1486_v46 = vadd.s32 %v1485_v49, %v1475_v33  ;;  %v711_v54 = vmul.f32 %v7533_v31, %v651_v45  ;;  %v2169_v25 = vmul.u32 43690, %v2164_v41  ;;  %v2170_v57 = vshll.u32 %v2167_v56, 16 }
 0x1b5   : > { %v2172_v50 = vshll.u32 %v7686_v4, 16  ;;  %v2157_v32 = vsub.s32 %v7633_v5, %v2156_v55  ;;  %v2171_v60 = vshrl.u32 %v2167_v56, 16  ;;  %v7697_v20 = vadd.s32 160, %v6640_v24 }
 0x1b6   : > { %v1487_v21 = vadd.s32 %v1486_v46, %v1477_v0  ;;  %vm2174_vm14 = vc.u32 %v2166_v59, %v2170_v57  ;;  %v2176_v42 = vadd.s32 %v2170_v57, %v2166_v59  ;;  %v2751_v1 = vpack.c.bf16 %v7612_v9, %v7510_v48  ;;  %v7712_v9 = vld [vmem:[#allocation2 + $0x87] sm:$0xff] }
 0x1b7   : > { %vm2347_vm1 = vcmp.ne.s32.totalorder %v2157_v32, 0  ;;  %vm2395_vm10 = vcmp.lt.s32.totalorder %v2157_v32, 0  ;;  %v2491_v40 = vadd.s32 24, %v2157_v32  ;;  %v2173_v39 = vshrl.u32 %v7686_v4, 16  ;;  %v596_v57 = vpop.f32.mrf.mxu0 }
 0x1b8   : > { %v1488_v52 = vshrl.u32 %v1487_v21, 4  ;;  %vm2443_vm15 = vmand %vm2395_vm10, %vm2347_vm1  ;;  %v2175_v5 = vsel %vm2174_vm14, 1, %v6531_v38  ;;  %vm2178_vm4 = vc.u32 %v2176_v42, %v2172_v50  ;;  %v1496_v8 = vand.u32 65535, %v7697_v20  ;;  %3137 = vmatmul.bf16.gmra.mxu2 %v2751_v1  ;;  %v654_v1 = vpop.f32.mrf.mxu2 }
 0x1b9   : > { %v6506_v48 = vpack.c.bf16 %v834_v37, %v833_v2  ;;  %v2539_v35 = vsel %vm2443_vm15, %v2491_v40, %v2157_v32  ;;  %v2177_v36 = vadd.s32 %v2175_v5, %v2169_v25  ;;  %v2179_v27 = vsel %vm2178_vm4, 1, %v6531_v38  ;;  %v6402_v5 = vld [vmem:[%s9649_s4 + $0x128] sm:$0xff] }
 0x1ba   : > { %v1489_v23 = vmul.u32 24, %v1488_v52  ;;  %vm2587_vm5 = vcmp.lt.s32.totalorder %v2539_v35, 16  ;;  %v1497_v16 = vshrl.u32 %v7697_v20, 16  ;;  %v1499_v18 = vmul.u32 43691, %v1496_v8 }
 0x1bb   : > { %6507 = vmatmul.msk.bf16.gmra.mxu1 %vm6505_vm8, %v6506_v48  ;;  %v1500_v3 = vmul.u32 43690, %v1496_v8  ;;  %v2635_v12 = vsel %vm2587_vm5, %v858_v61, 0.0  ;;  %v2181_v19 = vadd.s32 %v2179_v27, %v2177_v36  ;;  %v3596_v37 = vpack.c.bf16 %v7712_v9, %v7716_v53  ;;  %v7756_v8 = vpop.f32.mrf.mxu1 }
 0x1bc   : > { %v1490_v2 = vsub.s32 %v7651_v47, %v1489_v23  ;;  %2687 = vst [vmem:[#allocation2 + $0x170] sm:$0xff] %v2635_v12  ;;  %v7724_v7 = vadd.f32 %v7555_v30, %v711_v54  ;;  %v1501_v26 = vmul.u32 43691, %v1497_v16  ;;  %v1502_v33 = vmul.u32 43690, %v1497_v16  ;;  %v6403_v47 = vld [vmem:[%s9649_s4 + $0x130] sm:$0xff] }
 0x1bd   : > { %v1503_v51 = vshll.u32 %v1500_v3, 16  ;;  %v2182_v34 = vadd.s32 %v2181_v19, %v2171_v60  ;;  %3717 = vmatmul.bf16.gmra.mxu0 %v3596_v37  ;;  %v688_v14 = vmul.f32 %v7533_v31, %v594_v10  ;;  %v1504_v49 = vshrl.u32 %v1500_v3, 16  ;;  %3994 = vmatpush.bf16.msrb.mxu1 %v6403_v47  ;;  %9719 = vst [vmem:[#allocation3_spill] sm:$0xff] %v7756_v8 }
 0x1be   : > { %vm2324_vm3 = vcmp.ne.s32.totalorder %v1490_v2, 0  ;;  %vm2372_vm6 = vcmp.lt.s32.totalorder %v1490_v2, 0  ;;  %v2468_v13 = vadd.s32 24, %v1490_v2  ;;  %v1505_v41 = vshll.u32 %v1501_v26, 16 }
 0x1bf   : > { %vm2420_vm7 = vmand %vm2372_vm6, %vm2324_vm3  ;;  %vm1507_vm11 = vc.u32 %v1499_v18, %v1503_v51  ;;  %v1509_v63 = vadd.s32 %v1503_v51, %v1499_v18  ;;  %v2183_v0 = vadd.s32 %v2182_v34, %v2173_v39  ;;  %v7736_v4 = vadd.s32 352, %v6640_v24 }
 0x1c0   : > { %v2516_v29 = vsel %vm2420_vm7, %v2468_v13, %v1490_v2  ;;  %v1508_v28 = vsel %vm1507_vm11, 1, %v6531_v38  ;;  %v1506_v45 = vshrl.u32 %v1501_v26, 16  ;;  %v859_v50 = vmax.f32 %v7724_v7, 0.0 }
 0x1c1   : > { %vm7731_vm2 = vcmp.lt.s32.totalorder %v2516_v29, 16  ;;  %v1510_v56 = vadd.s32 %v1508_v28, %v1502_v33  ;;  %vm1511_vm9 = vc.u32 %v1509_v63, %v1505_v41  ;;  %v2184_v55 = vshrl.u32 %v2183_v0, 4  ;;  %3995 = vmatpush.bf16.msrb.mxu1 %v6402_v5 }
 0x1c2   : > { %v2612_v61 = vsel %vm7731_vm2, %v835_v11, 0.0  ;;  %v1512_v46 = vsel %vm1511_vm9, 1, %v6531_v38  ;;  %v2192_v54 = vand.u32 65535, %v7736_v4  ;;  %v2193_v25 = vshrl.u32 %v7736_v4, 16 }
 0x1c3   : > { %2664 = vst [vmem:[#allocation2 + $0xb8] sm:$0xff] %v2612_v61  ;;  %v1514_v17 = vadd.s32 %v1512_v46, %v1510_v56  ;;  %v2185_v32 = vmul.u32 24, %v2184_v55  ;;  %v7747_v21 = vadd.f32 %v7555_v30, %v688_v14  ;;  %v7750_v60 = vadd.s32 168, %v6640_v24  ;;  %v6401_v46 = vld [vmem:[%s9649_s4 + $0x120] sm:$0xff] }
 0x1c4   : > { %v2195_v40 = vmul.u32 43691, %v2192_v54  ;;  %v2196_v52 = vmul.u32 43690, %v2192_v54  ;;  %v2197_v39 = vmul.u32 43691, %v2193_v25  ;;  %v712_v48 = vmul.f32 %v7533_v31, %v654_v1  ;;  %v656_v54 = vpop.f32.mrf.mxu2 }
 0x1c5   : > { %v1515_v42 = vadd.s32 %v1514_v17, %v1504_v49  ;;  %v2186_v10 = vsub.s32 %v7670_v22, %v2185_v32  ;;  %v689_v35 = vmul.f32 %v7533_v31, %v596_v57  ;;  %v2752_v23 = vpack.c.bf16 %v7716_v53, %v7606_v62  ;;  %3996 = vmatpush.bf16.msrb.mxu1 %v6401_v46 }
 0x1c6   : > { %v2198_v27 = vmul.u32 43690, %v2193_v25  ;;  %v2199_v16 = vshll.u32 %v2196_v52, 16  ;;  %v2201_v18 = vshll.u32 %v2197_v39, 16  ;;  %v1525_v12 = vand.u32 65535, %v7750_v60 }
 0x1c7   : > { %v1516_v36 = vadd.s32 %v1515_v42, %v1506_v45  ;;  %vm2348_vm13 = vcmp.ne.s32.totalorder %v2186_v10, 0  ;;  %vm2396_vm12 = vcmp.lt.s32.totalorder %v2186_v10, 0  ;;  %v2492_v3 = vadd.s32 24, %v2186_v10  ;;  %v7774_v45 = vpop.f32.mrf.mxu1  ;;  %v7824_v42 = vld [vmem:[#allocation2 + $0x8f] sm:$0xff] }
 0x1c8   : > { %vm2444_vm14 = vmand %vm2396_vm12, %vm2348_vm13  ;;  %v2200_v2 = vshrl.u32 %v2196_v52, 16  ;;  %vm2203_vm1 = vc.u32 %v2195_v40, %v2199_v16  ;;  %v2205_v19 = vadd.s32 %v2199_v16, %v2195_v40  ;;  %3142 = vmatmul.bf16.gmra.mxu2 %v2752_v23  ;;  %v1526_v62 = vshrl.u32 %v7750_v60, 16  ;;  %9720 = vst [vmem:[#allocation4_spill] sm:$0xff] %v7774_v45 }
 0x1c9   : > { %v1517_v22 = vshrl.u32 %v1516_v36, 4  ;;  %v2540_v37 = vsel %vm2444_vm14, %v2492_v3, %v2186_v10  ;;  %v2204_v7 = vsel %vm2203_vm1, 1, %v6531_v38  ;;  %v1528_v53 = vmul.u32 43691, %v1525_v12  ;;  %v6400_v3 = vld [vmem:[%s9649_s4 + $0x118] sm:$0xff] }
 0x1ca   : > { %vm2588_vm10 = vcmp.lt.s32.totalorder %v2540_v37, 16  ;;  %v2206_v33 = vadd.s32 %v2204_v7, %v2198_v27  ;;  %vm2207_vm15 = vc.u32 %v2205_v19, %v2201_v18  ;;  %v1529_v34 = vmul.u32 43690, %v1525_v12  ;;  %3997 = vmatpush.bf16.msrb.mxu1 %v6400_v3 }
 0x1cb   : > { %v1518_v26 = vmul.u32 24, %v1517_v22  ;;  %v2636_v51 = vsel %vm2588_vm10, %v859_v50, 0.0  ;;  %v2208_v13 = vsel %vm2207_vm15, 1, %v6531_v38  ;;  %v1530_v47 = vmul.u32 43691, %v1526_v62 }
 0x1cc   : > { %2688 = vst [vmem:[#allocation2 + $0x178] sm:$0xff] %v2636_v51  ;;  %v836_v14 = vmax.f32 %v7747_v21, 0.0  ;;  %v2202_v63 = vshrl.u32 %v2197_v39, 16  ;;  %v2210_v29 = vadd.s32 %v2208_v13, %v2206_v33  ;;  %v7769_v0 = vadd.f32 %v7555_v30, %v712_v48 }
 0x1cd   : > { %v1519_v41 = vsub.s32 %v7697_v20, %v1518_v26  ;;  %v1531_v49 = vmul.u32 43690, %v1526_v62  ;;  %v1532_v28 = vshll.u32 %v1529_v34, 16  ;;  %v1534_v56 = vshll.u32 %v1530_v47, 16 }
 0x1ce   : > { %v2211_v55 = vadd.s32 %v2210_v29, %v2200_v2  ;;  %v741_v20 = vadd.f32 %v7555_v30, %v689_v35  ;;  %v7778_v25 = vadd.s32 360, %v6640_v24  ;;  %v713_v21 = vmul.f32 %v7533_v31, %v656_v54  ;;  %v599_v29 = vpop.f32.mrf.mxu0 }
 0x1cf   : > { %vm2325_vm4 = vcmp.ne.s32.totalorder %v1519_v41, 0  ;;  %vm2373_vm8 = vcmp.lt.s32.totalorder %v1519_v41, 0  ;;  %v2469_v61 = vadd.s32 24, %v1519_v41  ;;  %vm1536_vm3 = vc.u32 %v1528_v53, %v1532_v28  ;;  %v7813_v43 = vpop.f32.mrf.mxu1 }
 0x1d0   : > { %vm2421_vm5 = vmand %vm2373_vm8, %vm2325_vm4  ;;  %v1538_v17 = vadd.s32 %v1532_v28, %v1528_v53  ;;  %v2212_v50 = vadd.s32 %v2211_v55, %v2202_v63  ;;  %v1537_v32 = vsel %vm1536_vm3, 1, %v6531_v38  ;;  %v1533_v1 = vshrl.u32 %v1529_v34, 16  ;;  %9723 = vst [vmem:[#allocation5_spill] sm:$0xff] %v7813_v43  ;;  %v7817_v28 = vpop.f32.mrf.mxu2  ;;  %v7819_v55 = vld [vmem:[#allocation2 + $0x97] sm:$0xff] }
 0x1d1   : > { %v2517_v57 = vsel %vm2421_vm5, %v2469_v61, %v1519_v41  ;;  %v1539_v40 = vadd.s32 %v1537_v32, %v1531_v49  ;;  %v2221_v10 = vand.u32 65535, %v7778_v25  ;;  %v1535_v48 = vshrl.u32 %v1530_v47, 16 }
 0x1d2   : > { %vm7782_vm6 = vcmp.lt.s32.totalorder %v2517_v57, 16  ;;  %vm1540_vm7 = vc.u32 %v1538_v17, %v1534_v56  ;;  %v2213_v39 = vshrl.u32 %v2212_v50, 4  ;;  %v2222_v23 = vshrl.u32 %v7778_v25, 16 }
 0x1d3   : > { %v2613_v52 = vsel %vm7782_vm6, %v836_v14, 0.0  ;;  %v1541_v5 = vsel %vm1540_vm7, 1, %v6531_v38  ;;  %v7792_v36 = vadd.s32 176, %v6640_v24  ;;  %v2224_v16 = vmul.u32 43691, %v2221_v10  ;;  %vm6508_vm11 = vmpackc.low %vm7782_vm6, %vm7731_vm2 }
 0x1d4   : > { %2665 = vst [vmem:[#allocation2 + $0xc0] sm:$0xff] %v2613_v52  ;;  %v1543_v35 = vadd.s32 %v1541_v5, %v1539_v40  ;;  %v2214_v27 = vmul.u32 24, %v2213_v39  ;;  %v2225_v18 = vmul.u32 43690, %v2221_v10  ;;  %v860_v12 = vmax.f32 %v7769_v0, 0.0  ;;  %v6399_v39 = vld [vmem:[%s9649_s4 + $0x110] sm:$0xff] }
 0x1d5   : > { %v7798_v22 = vmax.f32 %v741_v20, 0.0  ;;  %v2226_v19 = vmul.u32 43691, %v2222_v23  ;;  %v2227_v7 = vmul.u32 43690, %v2222_v23  ;;  %v1554_v53 = vand.u32 65535, %v7792_v36  ;;  %3998 = vmatpush.bf16.msrb.mxu1 %v6399_v39 }
 0x1d6   : > { %v1544_v2 = vadd.s32 %v1543_v35, %v1533_v1  ;;  %v2215_v37 = vsub.s32 %v7736_v4, %v2214_v27  ;;  %v2228_v62 = vshll.u32 %v2225_v18, 16  ;;  %v6509_v26 = vpack.c.bf16 %v836_v14, %v835_v11 }
 0x1d7   : > { %v7809_v51 = vadd.f32 %v7555_v30, %v713_v21  ;;  %v2230_v13 = vshll.u32 %v2226_v19, 16  ;;  %v1555_v4 = vshrl.u32 %v7792_v36, 16  ;;  %v1557_v11 = vmul.u32 43691, %v1554_v53 }
 0x1d8   : > { %6510 = vmatmul.msk.bf16.gmra.mxu1 %vm6508_vm11, %v6509_v26  ;;  %v1545_v33 = vadd.s32 %v1544_v2, %v1535_v48  ;;  %vm2349_vm9 = vcmp.ne.s32.totalorder %v2215_v37, 0  ;;  %vm2397_vm13 = vcmp.lt.s32.totalorder %v2215_v37, 0  ;;  %v2493_v34 = vadd.s32 24, %v2215_v37 }
 0x1d9   : > { %vm2232_vm12 = vc.u32 %v2224_v16, %v2228_v62  ;;  %vm2445_vm14 = vmand %vm2397_vm13, %vm2349_vm9  ;;  %v2234_v41 = vadd.s32 %v2228_v62, %v2224_v16  ;;  %v1558_v0 = vmul.u32 43690, %v1554_v53  ;;  %v7815_v49 = vmul.u32 43691, %v1555_v4  ;;  %v7848_v53 = vpop.f32.mrf.mxu1 }
 0x1da   : > { %v1546_v59 = vshrl.u32 %v1545_v33, 4  ;;  %v2233_v47 = vsel %vm2232_vm12, 1, %v6531_v38  ;;  %v2541_v14 = vsel %vm2445_vm14, %v2493_v34, %v2215_v37  ;;  %v2229_v61 = vshrl.u32 %v2225_v18, 16  ;;  %v7857_v34 = vpop.f32.mrf.mxu2 }
 0x1db   : > { %v2235_v63 = vadd.s32 %v2233_v47, %v2227_v7  ;;  %vm2589_vm2 = vcmp.lt.s32.totalorder %v2541_v14, 16  ;;  %vm2236_vm1 = vc.u32 %v2234_v41, %v2230_v13  ;;  %v2231_v20 = vshrl.u32 %v2226_v19, 16 }
 0x1dc   : > { %v1547_v56 = vmul.u32 24, %v1546_v59  ;;  %v2637_v46 = vsel %vm2589_vm2, %v860_v12, 0.0  ;;  %v2237_v17 = vsel %vm2236_vm1, 1, %v6531_v38  ;;  %v1561_v54 = vshll.u32 %v1558_v0, 16 }
 0x1dd   : > { %2689 = vst [vmem:[#allocation2 + $0x180] sm:$0xff] %v2637_v46  ;;  %v2239_v50 = vadd.s32 %v2237_v17, %v2235_v63  ;;  %v1560_v32 = vmul.u32 43690, %v1555_v4  ;;  %v1563_v21 = vshll.u32 %v7815_v49, 16  ;;  %v690_v1 = vmul.f32 %v7533_v31, %v599_v29  ;;  %v6398_v4 = vld [vmem:[%s9649_s4 + $0x108] sm:$0xff] }
 0x1de   : > { %v1548_v57 = vsub.s32 %v7750_v60, %v1547_v56  ;;  %vm1565_vm10 = vc.u32 %v1557_v11, %v1561_v54  ;;  %v1567_v40 = vadd.s32 %v1561_v54, %v1557_v11  ;;  %v3597_v52 = vpack.c.bf16 %v7819_v55, %v7824_v42  ;;  %3999 = vmatpush.bf16.msrb.mxu1 %v6398_v4  ;;  %v6387_v4 = vld [vmem:[%s9649_s4 + $0xb0] sm:$0xff] }
 0x1df   : > { %v2240_v5 = vadd.s32 %v2239_v50, %v2229_v61  ;;  %v1562_v10 = vshrl.u32 %v1558_v0, 16  ;;  %v1566_v48 = vsel %vm1565_vm10, 1, %v6531_v38  ;;  %v7834_v31 = vadd.s32 368, %v6640_v24 }
 0x1e0   : > { %vm2326_vm15 = vcmp.ne.s32.totalorder %v1548_v57, 0  ;;  %vm2374_vm4 = vcmp.lt.s32.totalorder %v1548_v57, 0  ;;  %v2470_v60 = vadd.s32 24, %v1548_v57  ;;  %vm1569_vm5 = vc.u32 %v1567_v40, %v1563_v21  ;;  %3722 = vmatmul.bf16.gmra.mxu0 %v3597_v52  ;;  %v6397_v52 = vld [vmem:[%s9649_s4 + $0x100] sm:$0xff] }
 0x1e1   : > { %vm2422_vm8 = vmand %vm2374_vm4, %vm2326_vm15  ;;  %v2241_v23 = vadd.s32 %v2240_v5, %v2231_v20  ;;  %v1568_v27 = vadd.s32 %v1566_v48, %v1560_v32  ;;  %v1570_v16 = vsel %vm1569_vm5, 1, %v6531_v38  ;;  %v742_v3 = vadd.f32 %v7555_v30, %v690_v1  ;;  %v7852_v30 = vpop.f32.mrf.mxu0 }
 0x1e2   : > { %v2518_v35 = vsel %vm2422_vm8, %v2470_v60, %v1548_v57  ;;  %v2250_v12 = vand.u32 65535, %v7834_v31  ;;  %v2251_v2 = vshrl.u32 %v7834_v31, 16  ;;  %v1564_v7 = vshrl.u32 %v7815_v49, 16  ;;  %4000 = vmatpush.bf16.msrb.mxu1 %v6397_v52 }
 0x1e3   : > { %vm7837_vm3 = vcmp.lt.s32.totalorder %v2518_v35, 16  ;;  %v2242_v37 = vshrl.u32 %v2241_v23, 4  ;;  %v1572_v62 = vadd.s32 %v1570_v16, %v1568_v27  ;;  %v7860_v41 = vadd.s32 184, %v6640_v24  ;;  %v7878_v27 = vpop.f32.mrf.mxu1  ;;  %v7883_v16 = vld [vmem:[%s9647_s2] ss:$0 sm:$0xff] }
 0x1e4   : > { %v2614_v19 = vsel %vm7837_vm3, %v7798_v22, 0.0  ;;  %v2253_v26 = vmul.u32 43691, %v2250_v12  ;;  %v2254_v33 = vmul.u32 43690, %v2250_v12  ;;  %v7850_v13 = vmul.u32 43691, %v2251_v2 }
 0x1e5   : > { %2666 = vst [vmem:[#allocation2 + $0xc8] sm:$0xff] %v2614_v19  ;;  %v2243_v59 = vmul.u32 24, %v2242_v37  ;;  %v1573_v47 = vadd.s32 %v1572_v62, %v1562_v10  ;;  %v861_v11 = vmax.f32 %v7809_v51, 0.0  ;;  %v7863_v14 = vmax.f32 %v742_v3, 0.0  ;;  %v7893_v37 = vpop.f32.mrf.mxu2 }
 0x1e6   : > { %v2257_v63 = vshll.u32 %v2254_v33, 16  ;;  %v2259_v29 = vshll.u32 %v7850_v13, 16  ;;  %v2256_v56 = vmul.u32 43690, %v2251_v2  ;;  %v1583_v61 = vand.u32 65535, %v7860_v41 }
 0x1e7   : > { %v2244_v0 = vsub.s32 %v7778_v25, %v2243_v59  ;;  %v1574_v49 = vadd.s32 %v1573_v47, %v1564_v7  ;;  %v2258_v46 = vshrl.u32 %v2254_v33, 16  ;;  %v1584_v17 = vshrl.u32 %v7860_v41, 16 }
 0x1e8   : > { %vm2261_vm6 = vc.u32 %v2253_v26, %v2257_v63  ;;  %v2263_v20 = vadd.s32 %v2257_v63, %v2253_v26  ;;  %v1586_v50 = vmul.u32 43691, %v1583_v61  ;;  %v1587_v32 = vmul.u32 43690, %v1583_v61 }
 0x1e9   : > { %vm2350_vm7 = vcmp.ne.s32.totalorder %v2244_v0, 0  ;;  %vm2398_vm11 = vcmp.lt.s32.totalorder %v2244_v0, 0  ;;  %v2494_v51 = vadd.s32 24, %v2244_v0  ;;  %v1575_v54 = vshrl.u32 %v1574_v49, 4  ;;  %v7888_v19 = vpop.f32.mrf.mxu0 }
 0x1ea   : > { %vm2446_vm9 = vmand %vm2398_vm11, %vm2350_vm7  ;;  %v2262_v57 = vsel %vm2261_vm6, 1, %v6531_v38  ;;  %vm2265_vm13 = vc.u32 %v2263_v20, %v2259_v29  ;;  %v2260_v39 = vshrl.u32 %v7850_v13, 16  ;;  %v7875_v60 = vmul.u32 43691, %v1584_v17  ;;  %9726 = vst [vmem:[#allocation6_spill] sm:$0xff] %v7888_v19  ;;  %v3857_v13 = vld [vmem:[#allocation2 + $0x28] sm:$0xff] }
 0x1eb   : > { %v2542_v25 = vsel %vm2446_vm9, %v2494_v51, %v2244_v0  ;;  %v1576_v21 = vmul.u32 24, %v1575_v54  ;;  %v2264_v1 = vadd.s32 %v2262_v57, %v2256_v56  ;;  %v2266_v40 = vsel %vm2265_vm13, 1, %v6531_v38  ;;  %v3856_v56 = vld [vmem:[#allocation2 + $0x20] sm:$0xff]  ;;  %v7923_v52 = vpop.f32.mrf.mxu1 }
 0x1ec   : > { %vm2590_vm12 = vcmp.lt.s32.totalorder %v2542_v25, 16  ;;  %v1590_v5 = vshll.u32 %v1587_v32, 16  ;;  %v1589_v23 = vmul.u32 43690, %v1584_v17  ;;  %v714_v3 = vmul.f32 %v7883_v16, %v7817_v28  ;;  %v7916_v51 = vld [vmem:[%s9648_s3] ss:$0 sm:$0xff]  ;;  %v7919_v25 = vld [vmem:[#allocation2 + $0xa7] sm:$0xff] }
 0x1ed   : > { %v2638_v10 = vsel %vm2590_vm12, %v861_v11, 0.0  ;;  %v1577_v48 = vsub.s32 %v7792_v36, %v1576_v21  ;;  %v2268_v35 = vadd.s32 %v2266_v40, %v2264_v1  ;;  %v1592_v12 = vshll.u32 %v7875_v60, 16  ;;  %v6388_v36 = vld [vmem:[%s9649_s4 + $0xb8] sm:$0xff] }
 0x1ee   : > { %2690 = vst [vmem:[#allocation2 + $0x188] sm:$0xff] %v2638_v10  ;;  %vm1594_vm14 = vc.u32 %v1586_v50, %v1590_v5  ;;  %v1596_v2 = vadd.s32 %v1590_v5, %v1586_v50  ;;  %v1591_v26 = vshrl.u32 %v1587_v32, 16  ;;  %v7897_v33 = vadd.s32 376, %v6640_v24  ;;  %3365 = vmatpush.bf16.msrb.mxu3 %v6388_v36  ;;  %v7927_v10 = vld [vmem:[#allocation2 + $0x9f] sm:$0xff] }
 0x1ef   : > { %vm2327_vm2 = vcmp.ne.s32.totalorder %v1577_v48, 0  ;;  %vm2375_vm1 = vcmp.lt.s32.totalorder %v1577_v48, 0  ;;  %v2471_v7 = vadd.s32 24, %v1577_v48  ;;  %v2269_v62 = vadd.s32 %v2268_v35, %v2258_v46  ;;  %v7931_v35 = vpop.f32.mrf.mxu2 }
 0x1f0   : > { %vm2423_vm10 = vmand %vm2375_vm1, %vm2327_vm2  ;;  %v1595_v28 = vsel %vm1594_vm14, 1, %v6531_v38  ;;  %vm1598_vm15 = vc.u32 %v1596_v2, %v1592_v12  ;;  %v1593_v0 = vshrl.u32 %v7875_v60, 16  ;;  %v2279_v24 = vand.u32 65535, %v7897_v33 }
 0x1f1   : > { %v2519_v59 = vsel %vm2423_vm10, %v2471_v7, %v1577_v48  ;;  %v2270_v47 = vadd.s32 %v2269_v62, %v2260_v39  ;;  %v1597_v11 = vadd.s32 %v1595_v28, %v1589_v23  ;;  %v1599_v63 = vsel %vm1598_vm15, 1, %v6531_v38  ;;  %v7929_v48 = vpop.f32.mrf.mxu0 }
 0x1f2   : > { %vm7903_vm4 = vcmp.lt.s32.totalorder %v2519_v59, 16  ;;  %v2280_v49 = vshrl.u32 %v7897_v33, 16  ;;  %v3904_v17 = vpack.c.bf16 %v3857_v13, %v3856_v56  ;;  %v766_v54 = vadd.f32 %v7916_v51, %v714_v3  ;;  %3366 = vmatpush.bf16.msrb.mxu3 %v6387_v4  ;;  %9729 = vst [vmem:[#allocation7_spill] sm:$0xff] %v7929_v48 }
 0x1f3   : > { %v2615_v61 = vsel %vm7903_vm4, %v7863_v14, 0.0  ;;  %v2271_v46 = vshrl.u32 %v2270_v47, 4  ;;  %v1601_v20 = vadd.s32 %v1599_v63, %v1597_v11  ;;  %v2282_v57 = vmul.u32 43691, %v2279_v24  ;;  %vm6511_vm8 = vmpackc.low %vm7903_vm4, %vm7837_vm3 }
 0x1f4   : > { %2667 = vst [vmem:[#allocation2 + $0xd0] sm:$0xff] %v2615_v61  ;;  %v2283_v50 = vmul.u32 43690, %v2279_v24  ;;  %v2284_v32 = vmul.u32 43691, %v2280_v49  ;;  %4001 = vmatmul.bf16.vlgmr.msrb.gmra.mxu1 %v3904_v17  ;;  %v2753_v40 = vpack.c.bf16 %v7824_v42, %v7712_v9  ;;  %v691_v39 = vmul.f32 %v7883_v16, %v7852_v30  ;;  %v7946_v24 = vpop.f32.mrf.mxu1  ;;  %v7956_v17 = vld [vmem:[#allocation2 + $0x38] sm:$0xff] }
 0x1f5   : > { %v2272_v21 = vmul.u32 24, %v2271_v46  ;;  %v1602_v1 = vadd.s32 %v1601_v20, %v1591_v26  ;;  %v2285_v12 = vmul.u32 43690, %v2280_v49  ;;  %v6512_v9 = vpack.c.bf16 %v7863_v14, %v7798_v22  ;;  %v7948_v49 = vld [vmem:[#allocation2 + $0x40] sm:$0xff] }
 0x1f6   : > { %v2286_v60 = vshll.u32 %v2283_v50, 16  ;;  %v2288_v5 = vshll.u32 %v2284_v32, 16  ;;  %3147 = vmatmul.bf16.gmra.mxu2 %v2753_v40  ;;  %v3598_v42 = vpack.c.bf16 %v7919_v25, %v7927_v10  ;;  %v862_v30 = vmax.f32 %v766_v54, 0.0 }
 0x1f7   : > { %v2273_v23 = vsub.s32 %v7834_v31, %v2272_v21  ;;  %v1603_v3 = vadd.s32 %v1602_v1, %v1593_v0  ;;  %6513 = vmatmul.msk.bf16.vlgmr.msra.gmra.mxu3 %vm6511_vm8, %v6512_v9  ;;  %v743_v7 = vadd.f32 %v7916_v51, %v691_v39  ;;  %v2287_v62 = vshrl.u32 %v2283_v50, 16  ;;  %v7954_v46 = vpop.f32.mrf.mxu2  ;;  %v7966_v21 = vld [vmem:[#allocation2 + $0xe0] sm:$0xff]  ;;  %v3858_v1 = vld [vmem:[#allocation2 + $0x30] sm:$0xff]  ;;  %v7981_v9 = vld [vmem:[#allocation2 + $0x48] sm:$0xff] }
 0x1f8   : > { %vm2290_vm5 = vc.u32 %v2282_v57, %v2286_v60  ;;  %v2292_v2 = vadd.s32 %v2286_v60, %v2282_v57  ;;  %3727 = vmatmul.bf16.gmra.mxu0 %v3598_v42  ;;  %v2289_v63 = vshrl.u32 %v2284_v32, 16  ;;  %v715_v57 = vmul.f32 %v7883_v16, %v7857_v34  ;;  %v3560_v42 = vld [vmem:[#allocation2 + $0xaf] sm:$0xff] }
 0x1f9   : > { %vm2351_vm6 = vcmp.ne.s32.totalorder %v2273_v23, 0  ;;  %vm2399_vm7 = vcmp.lt.s32.totalorder %v2273_v23, 0  ;;  %v2495_v31 = vadd.s32 24, %v2273_v23  ;;  %v1604_v36 = vshrl.u32 %v1603_v3, 4  ;;  %v7952_v61 = vpop.f32.mrf.mxu0  ;;  %v3228_v32 = vld [vmem:[#allocation2 + $0x9] sm:$0xff] }
 0x1fa   : > { %vm2447_vm11 = vmand %vm2399_vm7, %vm2351_vm6  ;;  %v2291_v26 = vsel %vm2290_vm5, 1, %v6531_v38  ;;  %vm2294_vm9 = vc.u32 %v2292_v2, %v2288_v5  ;;  %v7950_v56 = vmax.f32 %v743_v7, 0.0  ;;  %9730 = vst [vmem:[#allocation8_spill] sm:$0xff] %v7952_v61  ;;  %v3905_v60 = vpack.c.bf16 %v7956_v17, %v3858_v1  ;;  %v7972_v5 = vld [vmem:[#allocation2 + $0x50] sm:$0xff] }
 0x1fb   : > { %v2543_v28 = vsel %vm2447_vm11, %v2495_v31, %v2273_v23  ;;  %v1605_v13 = vmul.u32 24, %v1604_v36  ;;  %v2293_v4 = vadd.s32 %v2291_v26, %v2285_v12  ;;  %v2295_v59 = vsel %vm2294_vm9, 1, %v6531_v38  ;;  %v7974_v23 = vld [vmem:[#allocation2 + $0xb7] sm:$0xff]  ;;  %vm6517_vm7 = vmpackc.low %vm7837_vm3, %vm6534_vm0 }
 0x1fc   : > { %vm2591_vm13 = vcmp.lt.s32.totalorder %v2543_v28, 16  ;;  %v767_v34 = vadd.f32 %v7916_v51, %v715_v57  ;;  %v2754_v3 = vpack.c.bf16 %v7927_v10, %v7819_v55  ;;  %v7979_v12 = vpop.f32.mrf.mxu1  ;;  %v6515_v55 = vpack.c.bf16 %v7966_v21, %v7950_v56  ;;  %v6386_v10 = vld [vmem:[%s9649_s4 + $0xa8] sm:$0xff]  ;;  %v8018_v57 = vld [vmem:[#allocation2 + $0x58] sm:$0xff] }
 0x1fd   : > { %v2639_v47 = vsel %vm2591_vm13, %v862_v30, 0.0  ;;  %v1606_v11 = vsub.s32 %v7860_v41, %v1605_v13  ;;  %v2297_v0 = vadd.s32 %v2295_v59, %v2293_v4  ;;  %v3599_v51 = vpack.c.bf16 %v7974_v23, %v3560_v42  ;;  %3367 = vmatpush.bf16.msrb.mxu3 %v6386_v10  ;;  %v8005_v59 = vld [vmem:[#allocation2 + $0xe8] sm:$0xff] }
 0x1fe   : > { %2691 = vst [vmem:[#allocation2 + $0x190] sm:$0xff] %v2639_v47  ;;  %v863_v7 = vmax.f32 %v767_v34, 0.0  ;;  %v8007_v47 = vld [vmem:[#allocation2 + $0xf0] sm:$0xff]  ;;  %v8064_v41 = vld [vmem:[#allocation2 + $0x108] sm:$0xff] }
 0x1ff   : > { %vm2328_vm12 = vcmp.ne.s32.totalorder %v1606_v11, 0  ;;  %vm2376_vm14 = vcmp.lt.s32.totalorder %v1606_v11, 0  ;;  %v2472_v38 = vadd.s32 24, %v1606_v11  ;;  %v2298_v20 = vadd.s32 %v2297_v0, %v2287_v62  ;;  %v7985_v2 = vpop.f32.mrf.mxu2  ;;  %v3563_v0 = vld [vmem:[#allocation2 + $0xc7] sm:$0xff] }
 0x200   : > { %vm2424_vm2 = vmand %vm2376_vm14, %vm2328_vm12  ;;  %9734 = vst [vmem:[#allocation10_spill] sm:$0xff] %v7985_v2 }
 0x201   : > { %v2520_v54 = vsel %vm2424_vm2, %v2472_v38, %v1606_v11  ;;  %v2299_v50 = vadd.s32 %v2298_v20, %v2289_v63  ;;  %v7983_v30 = vpop.f32.mrf.mxu0  ;;  %v3906_v11 = vpack.c.bf16 %v7981_v9, %v7948_v49  ;;  %v8011_v63 = vld [vmem:[#allocation2 + $0x60] sm:$0xff]  ;;  %v2847_v38 = vpack.c.bf16 %v8007_v47, %v8005_v59 }
 0x202   : > { %vm7962_vm1 = vcmp.lt.s32.totalorder %v2520_v54, 16  ;;  %9733 = vst [vmem:[#allocation9_spill] sm:$0xff] %v7983_v30  ;;  %v2755_v20 = vpack.c.bf16 %v3560_v42, %v7919_v25  ;;  %v6385_v25 = vld [vmem:[%s9649_s4 + $0xa0] sm:$0xff]  ;;  %v8035_v42 = vld [vmem:[#allocation2 + $0xf8] sm:$0xff] }
 0x203   : > { %v2616_v40 = vsel %vm7962_vm1, %v7950_v56, 0.0  ;;  %v2300_v39 = vshrl.u32 %v2299_v50, 4  ;;  %vm6514_vm10 = vmpackc.low %vm6534_vm0, %vm7962_vm1  ;;  %v3562_v50 = vld [vmem:[#allocation2 + $0xbf] sm:$0xff]  ;;  %3368 = vmatpush.bf16.msrb.mxu3 %v6385_v25 }
 0x204   : > { %2668 = vst [vmem:[#allocation2 + $0xd8] sm:$0xff] %v2616_v40  ;;  %4006 = vmatmul.bf16.gmra.mxu1 %v3905_v60  ;;  %v7999_v28 = vpop.f32.mrf.mxu1  ;;  %v3600_v60 = vpack.c.bf16 %v3563_v0, %v3562_v50  ;;  %vm6520_vm0 = vmpackc.low %vm7962_vm1, %vm7903_vm4 }
 0x205   : > { %v2301_v16 = vmul.u32 24, %v2300_v39 }
 0x206   : > { %3152 = vmatmul.bf16.gmra.mxu2 %v2754_v3 }
 0x207   : > { %v2302_v36 = vsub.s32 %v7897_v33, %v2301_v16  ;;  %6516 = vmatmul.msk.bf16.gmra.mxu3 %vm6514_vm10, %v6515_v55  ;;  %v8003_v4 = vpop.f32.mrf.mxu2  ;;  %v3907_v55 = vpack.c.bf16 %v8018_v57, %v7972_v5 }
 0x208   : > { %3732 = vmatmul.bf16.gmra.mxu0 %v3599_v51  ;;  %9736 = vst [vmem:[#allocation12_spill] sm:$0xff] %v8003_v4  ;;  %v8041_v51 = vld [vmem:[#allocation2 + $0x70] sm:$0xff] }
 0x209   : > { %vm2352_vm15 = vcmp.ne.s32.totalorder %v2302_v36, 0  ;;  %vm2400_vm8 = vcmp.lt.s32.totalorder %v2302_v36, 0  ;;  %v2496_v62 = vadd.s32 24, %v2302_v36  ;;  %v8001_v13 = vpop.f32.mrf.mxu0 }
 0x20a   : > { %vm2448_vm5 = vmand %vm2400_vm8, %vm2352_vm15  ;;  %9735 = vst [vmem:[#allocation11_spill] sm:$0xff] %v8001_v13 }
 0x20b   : > { %v2544_v33 = vsel %vm2448_vm5, %v2496_v62, %v2302_v36  ;;  %v8037_v36 = vld [vmem:[#allocation2 + $0x100] sm:$0xff]  ;;  %v3565_v10 = vld [vmem:[#allocation2 + $0xd7] sm:$0xff]  ;;  %v2756_v62 = vpack.c.bf16 %v3562_v50, %v7974_v23 }
 0x20c   : > { %vm2592_vm6 = vcmp.lt.s32.totalorder %v2544_v33, 16  ;;  %v8016_v54 = vpop.f32.mrf.mxu1 }
 0x20d   : > { %v2640_v26 = vsel %vm2592_vm6, %v863_v7, 0.0  ;;  %v2848_v7 = vpack.c.bf16 %v8037_v36, %v8035_v42 }
 0x20e   : > { %2692 = vst [vmem:[#allocation2 + $0x198] sm:$0xff] %v2640_v26  ;;  %v8048_v26 = vld [vmem:[#allocation2 + $0x68] sm:$0xff] }
 0x20f   : > { %v8022_v40 = vpop.f32.mrf.mxu2 }
 0x210   : > { %9738 = vst [vmem:[#allocation14_spill] sm:$0xff] %v8022_v40 }
 0x211   : > { %v8020_v1 = vpop.f32.mrf.mxu0 }
 0x212   : > { %9737 = vst [vmem:[#allocation13_spill] sm:$0xff] %v8020_v1 }
 0x214   : > { %4011 = vmatmul.bf16.gmra.mxu1 %v3906_v11  ;;  %v8029_v34 = vpop.f32.mrf.mxu1  ;;  %v3564_v11 = vld [vmem:[#allocation2 + $0xcf] sm:$0xff] }
 0x215   : > { %v3601_v25 = vpack.c.bf16 %v3565_v10, %v3564_v11 }
 0x216   : > { %3157 = vmatmul.bf16.gmra.mxu2 %v2755_v20 }
 0x217   : > { %3000 = vmatmul.bf16.gmra.mxu3 %v2847_v38  ;;  %v8033_v3 = vpop.f32.mrf.mxu2 }
 0x218   : > { %3737 = vmatmul.bf16.gmra.mxu0 %v3600_v60  ;;  %9740 = vst [vmem:[#allocation16_spill] sm:$0xff] %v8033_v3  ;;  %v2757_v60 = vpack.c.bf16 %v3564_v11, %v3563_v0  ;;  %v6384_v0 = vld [vmem:[%s9649_s4 + $0x98] sm:$0xff] }
 0x219   : > { %v8031_v16 = vpop.f32.mrf.mxu0  ;;  %3369 = vmatpush.bf16.msrb.mxu3 %v6384_v0 }
 0x21a   : > { %9739 = vst [vmem:[#allocation15_spill] sm:$0xff] %v8031_v16  ;;  %v3568_v16 = vld [vmem:[#allocation2 + $0xef] sm:$0xff] }
 0x21c   : > { %v8046_v33 = vpop.f32.mrf.mxu1 }
 0x21f   : > { %v3125_v20 = vpop.f32.mrf.mxu2 }
 0x220   : > { %v8055_v39 = vadd.f32 %v3125_v20, %v7848_v53  ;;  %v3566_v53 = vld [vmem:[#allocation2 + $0xdf] sm:$0xff]  ;;  %v3567_v20 = vld [vmem:[#allocation2 + $0xe7] sm:$0xff] }
 0x221   : > { %v8050_v38 = vpop.f32.mrf.mxu0  ;;  %v3602_v1 = vpack.c.bf16 %v3567_v20, %v3566_v53 }
 0x222   : > { %9741 = vst [vmem:[#allocation17_spill] sm:$0xff] %v8050_v38  ;;  %v8066_v38 = vld [vmem:[#allocation2 + $0x110] sm:$0xff] }
 0x223   : > { %9742 = vst [vmem:[#allocation18_spill] sm:$0xff] %v8055_v39  ;;  %v6381_v39 = vld [vmem:[%s9649_s4 + $0x80] sm:$0xff] }
 0x224   : > { %4016 = vmatmul.bf16.gmra.mxu1 %v3907_v55  ;;  %v8057_v55 = vpop.f32.mrf.mxu1 }
 0x225   : > { %9743 = vst [vmem:[#allocation19_spill] sm:$0xff] %v8057_v55 }
 0x226   : > { %3162 = vmatmul.bf16.gmra.mxu2 %v2756_v62  ;;  %v8070_v62 = vld [vmem:[#allocation2 + $0x80] sm:$0xff] }
 0x227   : > { %3005 = vmatmul.bf16.gmra.mxu3 %v2848_v7  ;;  %v3128_v50 = vpop.f32.mrf.mxu2  ;;  %v3908_v7 = vpack.c.bf16 %v8048_v26, %v8011_v63 }
 0x228   : > { %3742 = vmatmul.bf16.gmra.mxu0 %v3601_v25  ;;  %v8062_v31 = vadd.f32 %v3128_v50, %v7878_v27  ;;  %v2849_v25 = vpack.c.bf16 %v8066_v38, %v8064_v41  ;;  %v8076_v27 = vld [vmem:[#allocation2 + $0x78] sm:$0xff] }
 0x229   : > { %v8059_v23 = vpop.f32.mrf.mxu0 }
 0x22a   : > { %9744 = vst [vmem:[#allocation20_spill] sm:$0xff] %v8059_v23 }
 0x22b   : > { %9745 = vst [vmem:[#allocation21_spill] sm:$0xff] %v8062_v31 }
 0x22c   : > { %v8074_v55 = vpop.f32.mrf.mxu1 }
 0x22d   : > { %9746 = vst [vmem:[#allocation22_spill] sm:$0xff] %v8074_v55 }
 0x22f   : > { %v3130_v23 = vpop.f32.mrf.mxu2 }
 0x230   : > { %v8083_v13 = vadd.f32 %v3130_v23, %v7923_v52  ;;  %v3909_v52 = vpack.c.bf16 %v8076_v27, %v8041_v51  ;;  %v8101_v23 = vld [vmem:[#allocation2 + $0x90] sm:$0xff] }
 0x231   : > { %v8078_v50 = vpop.f32.mrf.mxu0 }
 0x232   : > { %9747 = vst [vmem:[#allocation23_spill] sm:$0xff] %v8078_v50 }
 0x233   : > { %9748 = vst [vmem:[#allocation24_spill] sm:$0xff] %v8083_v13 }
 0x234   : > { %4021 = vmatmul.bf16.gmra.mxu1 %v3908_v7  ;;  %v8088_v11 = vpop.f32.mrf.mxu1 }
 0x235   : > { %9749 = vst [vmem:[#allocation25_spill] sm:$0xff] %v8088_v11  ;;  %v2758_v11 = vpack.c.bf16 %v3566_v53, %v3565_v10  ;;  %v6383_v10 = vld [vmem:[%s9649_s4 + $0x90] sm:$0xff] }
 0x236   : > { %3167 = vmatmul.bf16.gmra.mxu2 %v2757_v60  ;;  %v8097_v60 = vld [vmem:[#allocation2 + $0x120] sm:$0xff]  ;;  %3370 = vmatpush.bf16.msrb.mxu3 %v6383_v10 }
 0x237   : > { %3010 = vmatmul.bf16.gmra.mxu3 %v2849_v25  ;;  %v3133_v55 = vpop.f32.mrf.mxu2  ;;  %v8095_v25 = vld [vmem:[#allocation2 + $0x118] sm:$0xff] }
 0x238   : > { %3747 = vmatmul.bf16.gmra.mxu0 %v3602_v1  ;;  %v8093_v50 = vadd.f32 %v3133_v55, %v7946_v24  ;;  %v3569_v1 = vld [vmem:[#allocation2 + $0xf7] sm:$0xff]  ;;  %v2850_v0 = vpack.c.bf16 %v8097_v60, %v8095_v25  ;;  %v8107_v24 = vld [vmem:[#allocation2 + $0x88] sm:$0xff] }
 0x239   : > { %v8090_v7 = vpop.f32.mrf.mxu0  ;;  %v3603_v61 = vpack.c.bf16 %v3569_v1, %v3568_v16 }
 0x23a   : > { %9750 = vst [vmem:[#allocation26_spill] sm:$0xff] %v8090_v7 }
 0x23b   : > { %9751 = vst [vmem:[#allocation27_spill] sm:$0xff] %v8093_v50  ;;  %v3571_v50 = vld [vmem:[#allocation2 + $0x107] sm:$0xff] }
 0x23c   : > { %v8105_v7 = vpop.f32.mrf.mxu1 }
 0x23d   : > { %9752 = vst [vmem:[#allocation28_spill] sm:$0xff] %v8105_v7 }
 0x23f   : > { %v3135_v30 = vpop.f32.mrf.mxu2 }
 0x240   : > { %v8114_v13 = vadd.f32 %v3135_v30, %v7979_v12  ;;  %v8132_v12 = vld [vmem:[#allocation2 + $0xa0] sm:$0xff] }
 0x241   : > { %v8109_v55 = vpop.f32.mrf.mxu0  ;;  %9758 = vst [vmem:[#allocation34_spill] sm:$0xff] %v8132_v12  ;;  %v3570_v30 = vld [vmem:[#allocation2 + $0xff] sm:$0xff] }
 0x242   : > { %9753 = vst [vmem:[#allocation29_spill] sm:$0xff] %v8109_v55 }
 0x243   : > { %9754 = vst [vmem:[#allocation30_spill] sm:$0xff] %v8114_v13  ;;  %v3604_v13 = vpack.c.bf16 %v3571_v50, %v3570_v30 }
 0x244   : > { %4026 = vmatmul.bf16.gmra.mxu1 %v3909_v52  ;;  %v8119_v53 = vpop.f32.mrf.mxu1 }
 0x245   : > { %9755 = vst [vmem:[#allocation31_spill] sm:$0xff] %v8119_v53  ;;  %v2759_v53 = vpack.c.bf16 %v3568_v16, %v3567_v20 }
 0x246   : > { %3172 = vmatmul.bf16.gmra.mxu2 %v2758_v11  ;;  %v8128_v11 = vld [vmem:[#allocation2 + $0x130] sm:$0xff] }
 0x247   : > { %3015 = vmatmul.bf16.gmra.mxu3 %v2850_v0  ;;  %v3138_v7 = vpop.f32.mrf.mxu2  ;;  %v8126_v0 = vld [vmem:[#allocation2 + $0x128] sm:$0xff] }
 0x248   : > { %3752 = vmatmul.bf16.gmra.mxu0 %v3603_v61  ;;  %v8124_v55 = vadd.f32 %v3138_v7, %v7999_v28  ;;  %v3910_v61 = vpack.c.bf16 %v8107_v24, %v8070_v62  ;;  %v2851_v10 = vpack.c.bf16 %v8128_v11, %v8126_v0  ;;  %v8138_v28 = vld [vmem:[#allocation2 + $0x98] sm:$0xff] }
 0x249   : > { %v8121_v52 = vpop.f32.mrf.mxu0  ;;  %9760 = vst [vmem:[#allocation36_spill] sm:$0xff] %v8138_v28 }
 0x24a   : > { %9756 = vst [vmem:[#allocation32_spill] sm:$0xff] %v8121_v52 }
 0x24b   : > { %9757 = vst [vmem:[#allocation33_spill] sm:$0xff] %v8124_v55  ;;  %v8156_v55 = vld [vmem:[#allocation2 + $0x140] sm:$0xff] }
 0x24c   : > { %v8136_v52 = vpop.f32.mrf.mxu1 }
 0x24d   : > { %9759 = vst [vmem:[#allocation35_spill] sm:$0xff] %v8136_v52  ;;  %v8154_v52 = vld [vmem:[#allocation2 + $0x138] sm:$0xff] }
 0x24f   : > { %v3140_v7 = vpop.f32.mrf.mxu2 }
 0x250   : > { %v8143_v48 = vadd.f32 %v3140_v7, %v8016_v54  ;;  %v3572_v54 = vld [vmem:[#allocation2 + $0x10f] sm:$0xff]  ;;  %v2760_v7 = vpack.c.bf16 %v3570_v30, %v3569_v1 }
 0x251   : > { %v8145_v31 = vpop.f32.mrf.mxu0  ;;  %v8174_v1 = vld [vmem:[#allocation2 + $0x148] sm:$0xff]  ;;  %v8176_v30 = vld [vmem:[#allocation2 + $0x150] sm:$0xff] }
 0x252   : > { %9761 = vst [vmem:[#allocation37_spill] sm:$0xff] %v8143_v48  ;;  %v3873_v48 = vld [vmem:[#allocation2 + $0xa8] sm:$0xff] }
 0x253   : > { %9762 = vst [vmem:[#allocation38_spill] sm:$0xff] %v8145_v31 }
 0x254   : > { %4031 = vmatmul.bf16.gmra.mxu1 %v3910_v61 }
 0x255   : > { %v8147_v19 = vpop.f32.mrf.mxu1 }
 0x256   : > { %3177 = vmatmul.bf16.gmra.mxu2 %v2759_v53  ;;  %9763 = vst [vmem:[#allocation39_spill] sm:$0xff] %v8147_v19  ;;  %v3911_v53 = vpack.c.bf16 %v8138_v28, %v8101_v23 }
 0x257   : > { %3020 = vmatmul.bf16.gmra.mxu3 %v2851_v10  ;;  %v3143_v16 = vpop.f32.mrf.mxu2  ;;  %v3573_v10 = vld [vmem:[#allocation2 + $0x117] sm:$0xff] }
 0x258   : > { %3757 = vmatmul.bf16.gmra.mxu0 %v3604_v13  ;;  %v8150_v20 = vadd.f32 %v3143_v16, %v8029_v34  ;;  %v2852_v13 = vpack.c.bf16 %v8156_v55, %v8154_v52  ;;  %v3605_v34 = vpack.c.bf16 %v3573_v10, %v3572_v54 }
 0x25a   : > { %9764 = vst [vmem:[#allocation40_spill] sm:$0xff] %v8150_v20 }
 0x25d   : > { %v8152_v61 = vpop.f32.mrf.mxu0  ;;  %v8168_v31 = vpop.f32.mrf.mxu1 }
 0x25e   : > { %9765 = vst [vmem:[#allocation41_spill] sm:$0xff] %v8152_v61  ;;  %v6382_v61 = vld [vmem:[%s9649_s4 + $0x88] sm:$0xff] }
 0x25f   : > { %v3145_v19 = vpop.f32.mrf.mxu2  ;;  %9767 = vst [vmem:[#allocation43_spill] sm:$0xff] %v8168_v31  ;;  %3371 = vmatpush.bf16.msrb.mxu3 %v6382_v61  ;;  %v2761_v31 = vpack.c.bf16 %v3572_v54, %v3571_v50 }
 0x260   : > { %v8163_v16 = vadd.f32 %v3145_v19, %v8046_v33  ;;  %v3912_v19 = vpack.c.bf16 %v3873_v48, %v8132_v12  ;;  %v3574_v33 = vld [vmem:[#allocation2 + $0x11f] sm:$0xff] }
 0x261   : > { %v6420_v12 = vld [vmem:[%s9649_s4 + $0x1b8] sm:$0xff] }
 0x262   : > { %9766 = vst [vmem:[#allocation42_spill] sm:$0xff] %v8163_v16 }
 0x263   : > { %3372 = vmatpush.bf16.msrb.mxu3 %v6381_v39  ;;  %v2762_v39 = vpack.c.bf16 %v3574_v33, %v3573_v10  ;;  %v8225_v10 = vld [vmem:[#allocation2 + $0x168] sm:$0xff] }
 0x264   : > { %4036 = vmatmul.bf16.gmra.mxu1 %v3911_v53 }
 0x265   : > { %v8170_v20 = vpop.f32.mrf.mxu0 }
 0x266   : > { %3182 = vmatmul.bf16.gmra.mxu2 %v2760_v7  ;;  %9768 = vst [vmem:[#allocation44_spill] sm:$0xff] %v8170_v20  ;;  %v2853_v7 = vpack.c.bf16 %v8176_v30, %v8174_v1 }
 0x267   : > { %3025 = vmatmul.bf16.gmra.mxu3 %v2852_v13  ;;  %v3575_v13 = vld [vmem:[#allocation2 + $0x127] sm:$0xff] }
 0x268   : > { %3762 = vmatmul.bf16.gmra.mxu0 %v3605_v34  ;;  %v3606_v61 = vpack.c.bf16 %v3575_v13, %v3574_v33  ;;  %4621 = vmatpush.bf16.msra.mxu3 %v6420_v12 }
 0x271   : > { %v8172_v53 = vpop.f32.mrf.mxu1 }
 0x272   : > { %9769 = vst [vmem:[#allocation45_spill] sm:$0xff] %v8172_v53 }
 0x274   : > { %4041 = vmatmul.bf16.gmra.mxu1 %v3912_v19  ;;  %v3875_v19 = vld [vmem:[#allocation2 + $0xb8] sm:$0xff] }
 0x275   : > { %v8181_v34 = vpop.f32.mrf.mxu0 }
 0x276   : > { %9770 = vst [vmem:[#allocation46_spill] sm:$0xff] %v8181_v34  ;;  %3187 = vmatmul.bf16.gmra.mxu2 %v2761_v31  ;;  %v8198_v31 = vld [vmem:[#allocation2 + $0x158] sm:$0xff] }
 0x277   : > { %3030 = vmatmul.bf16.gmra.mxu3 %v2853_v7  ;;  %v8200_v7 = vld [vmem:[#allocation2 + $0x160] sm:$0xff] }
 0x278   : > { %3767 = vmatmul.bf16.gmra.mxu0 %v3606_v61  ;;  %v8202_v61 = vld [vmem:[#allocation2 + $0xb0] sm:$0xff]  ;;  %v2854_v3 = vpack.c.bf16 %v8200_v7, %v8198_v31 }
 0x279   : > { %v8185_v16 = vpop.f32.mrf.mxu2  ;;  %v8187_v53 = vpop.f32.mrf.mxu1  ;;  %9775 = vst [vmem:[#allocation51_spill] sm:$0xff] %v8202_v61 }
 0x27a   : > { %v8183_v20 = vpop.f32.mrf.mxu3  ;;  %9771 = vst [vmem:[#allocation47_spill] sm:$0xff] %v8185_v16  ;;  %v3576_v16 = vld [vmem:[#allocation2 + $0x12f] sm:$0xff] }
 0x27b   : > { %9772 = vst [vmem:[#allocation48_spill] sm:$0xff] %v8187_v53  ;;  %v3577_v53 = vld [vmem:[#allocation2 + $0x137] sm:$0xff] }
 0x27d   : > { %v8189_v48 = vpop.f32.mrf.mxu0 }
 0x27e   : > { %9773 = vst [vmem:[#allocation49_spill] sm:$0xff] %v8189_v48  ;;  %v3913_v48 = vpack.c.bf16 %v3875_v19, %v8202_v61  ;;  %v8219_v61 = vld [vmem:[#allocation2 + $0xc0] sm:$0xff] }
 0x27f   : > { %9781 = vst [vmem:[#allocation57_spill] sm:$0xff] %v8219_v61 }
 0x281   : > { %v8196_v54 = vpop.f32.mrf.mxu2  ;;  %v8204_v34 = vpop.f32.mrf.mxu1 }
 0x282   : > { %v8194_v50 = vpop.f32.mrf.mxu3  ;;  %9774 = vst [vmem:[#allocation50_spill] sm:$0xff] %v8196_v54  ;;  %v3607_v54 = vpack.c.bf16 %v3577_v53, %v3576_v16 }
 0x283   : > { %9776 = vst [vmem:[#allocation52_spill] sm:$0xff] %v8204_v34 }
 0x284   : > { %4046 = vmatmul.bf16.gmra.mxu1 %v3913_v48 }
 0x285   : > { %v8209_v43 = vpop.f32.mrf.mxu0 }
 0x286   : > { %9777 = vst [vmem:[#allocation53_spill] sm:$0xff] %v8209_v43  ;;  %3192 = vmatmul.bf16.gmra.mxu2 %v2762_v39  ;;  %v3579_v39 = vld [vmem:[#allocation2 + $0x147] sm:$0xff] }
 0x287   : > { %3035 = vmatmul.bf16.gmra.mxu3 %v2854_v3  ;;  %v8227_v3 = vld [vmem:[#allocation2 + $0x170] sm:$0xff] }
 0x288   : > { %3772 = vmatmul.bf16.gmra.mxu0 %v3607_v54  ;;  %v3578_v54 = vld [vmem:[#allocation2 + $0x13f] sm:$0xff]  ;;  %v2855_v43 = vpack.c.bf16 %v8227_v3, %v8225_v10 }
 0x289   : > { %v8213_v45 = vpop.f32.mrf.mxu2  ;;  %v8215_v34 = vpop.f32.mrf.mxu1 }
 0x28a   : > { %v8211_v40 = vpop.f32.mrf.mxu3  ;;  %9778 = vst [vmem:[#allocation54_spill] sm:$0xff] %v8213_v45 }
 0x28b   : > { %9779 = vst [vmem:[#allocation55_spill] sm:$0xff] %v8215_v34  ;;  %v3608_v34 = vpack.c.bf16 %v3579_v39, %v3578_v54 }
 0x28d   : > { %v8217_v19 = vpop.f32.mrf.mxu0 }
 0x28e   : > { %9780 = vst [vmem:[#allocation56_spill] sm:$0xff] %v8217_v19  ;;  %v6518_v19 = vpack.c.bf16 %v7798_v22, %v8219_v61 }
 0x291   : > { %v8223_v48 = vpop.f32.mrf.mxu2  ;;  %v8229_v33 = vpop.f32.mrf.mxu1 }
 0x292   : > { %v8221_v28 = vpop.f32.mrf.mxu3  ;;  %9782 = vst [vmem:[#allocation58_spill] sm:$0xff] %v8223_v48  ;;  %v2763_v48 = vpack.c.bf16 %v3576_v16, %v3575_v13 }
 0x293   : > { %9783 = vst [vmem:[#allocation59_spill] sm:$0xff] %v8229_v33  ;;  %v6412_v33 = vld [vmem:[%s9649_s4 + $0x178] sm:$0xff] }
 0x294   : > { %6519 = vmatmul.msk.bf16.gmra.mxu1 %vm6517_vm7, %v6518_v19  ;;  %4307 = vmatpush.bf16.msra.mxu2 %v6412_v33  ;;  %v6436_v19 = vld [vmem:[%s9649_s4 + $0x238] sm:$0xff]  ;;  %v8266_v33 = vld [vmem:[#allocation2 + $0x180] sm:$0xff] }
 0x295   : > { %v8238_v45 = vpop.f32.mrf.mxu0  ;;  %5249 = vmatpush.bf16.msra.mxu1 %v6436_v19  ;;  %9789 = vst [vmem:[#allocation65_spill] sm:$0xff] %v8266_v33  ;;  %v2764_v19 = vpack.c.bf16 %v3578_v54, %v3577_v53  ;;  %v3582_v54 = vld [vmem:[#allocation2 + $0x15f] sm:$0xff] }
 0x296   : > { %9784 = vst [vmem:[#allocation60_spill] sm:$0xff] %v8238_v45  ;;  %3197 = vmatmul.bf16.gmra.mxu2 %v2763_v48  ;;  %v8264_v48 = vld [vmem:[#allocation2 + $0x178] sm:$0xff] }
 0x297   : > { %3040 = vmatmul.bf16.gmra.mxu3 %v2855_v43  ;;  %v6428_v43 = vld [vmem:[%s9649_s4 + $0x1f8] sm:$0xff] }
 0x298   : > { %3777 = vmatmul.bf16.gmra.mxu0 %v3608_v34 }
 0x299   : > { %v8248_v22 = vpop.f32.mrf.mxu2  ;;  %v8250_v16 = vpop.f32.mrf.mxu1  ;;  %4935 = vmatpush.bf16.msra.mxu0 %v6428_v43  ;;  %v6521_v43 = vpack.c.bf16 %v7950_v56, %v7863_v14 }
 0x29a   : > { %v8246_v18 = vpop.f32.mrf.mxu3  ;;  %9785 = vst [vmem:[#allocation61_spill] sm:$0xff] %v8248_v22  ;;  %v3581_v22 = vld [vmem:[#allocation2 + $0x157] sm:$0xff] }
 0x29b   : > { %9786 = vst [vmem:[#allocation62_spill] sm:$0xff] %v8250_v16  ;;  %v2856_v16 = vpack.c.bf16 %v8266_v33, %v8264_v48  ;;  %v3229_v33 = vld [vmem:[#allocation2 + $0x11] sm:$0xff] }
 0x29c   : > { %v3276_v53 = vpack.c.bf16 %v3229_v33, %v3228_v32 }
 0x29d   : > { %v8252_v13 = vpop.f32.mrf.mxu0 }
 0x29e   : > { %9787 = vst [vmem:[#allocation63_spill] sm:$0xff] %v8252_v13  ;;  %v3580_v13 = vld [vmem:[#allocation2 + $0x14f] sm:$0xff] }
 0x2a1   : > { %v8262_v12 = vpop.f32.mrf.mxu2  ;;  %v8268_v45 = vpop.f32.mrf.mxu1 }
 0x2a2   : > { %v8260_v34 = vpop.f32.mrf.mxu3  ;;  %9788 = vst [vmem:[#allocation64_spill] sm:$0xff] %v8262_v12 }
 0x2a3   : > { %9790 = vst [vmem:[#allocation66_spill] sm:$0xff] %v8268_v45  ;;  %v3609_v45 = vpack.c.bf16 %v3581_v22, %v3580_v13 }
 0x2a4   : > { %6522 = vmatmul.msk.bf16.gmra.mxu1 %vm6520_vm0, %v6521_v43  ;;  %v2765_v43 = vpack.c.bf16 %v3580_v13, %v3579_v39  ;;  %v6427_v39 = vld [vmem:[%s9649_s4 + $0x1f0] sm:$0xff]  ;;  %v6410_v13 = vld [vmem:[%s9649_s4 + $0x168] sm:$0xff] }
 0x2a5   : > { %v8278_v12 = vpop.f32.mrf.mxu0  ;;  %4936 = vmatpush.bf16.msra.mxu0 %v6427_v39  ;;  %v3230_v39 = vld [vmem:[#allocation2 + $0x19] sm:$0xff] }
 0x2a6   : > { %9791 = vst [vmem:[#allocation67_spill] sm:$0xff] %v8278_v12  ;;  %3202 = vmatmul.bf16.gmra.mxu2 %v2764_v19 }
 0x2a7   : > { %3045 = vmatmul.bf16.gmra.mxu3 %v2856_v16  ;;  %v8296_v16 = vld [vmem:[#allocation2 + $0x167] sm:$0xff] }
 0x2a8   : > { %3782 = vmatmul.bf16.gmra.mxu0 %v3609_v45  ;;  %v3916_v45 = vpack.c.bf16 %v8005_v59, %v7966_v21  ;;  %v6411_v59 = vld [vmem:[%s9649_s4 + $0x170] sm:$0xff] }
 0x2a9   : > { %v8282_v4 = vpop.f32.mrf.mxu2  ;;  %v8284_v8 = vpop.f32.mrf.mxu1  ;;  %4308 = vmatpush.bf16.msra.mxu2 %v6411_v59  ;;  %v3917_v59 = vpack.c.bf16 %v8035_v42, %v8007_v47  ;;  %v6425_v47 = vld [vmem:[%s9649_s4 + $0x1e0] sm:$0xff] }
 0x2aa   : > { %v8280_v61 = vpop.f32.mrf.mxu3  ;;  %9792 = vst [vmem:[#allocation68_spill] sm:$0xff] %v8282_v4  ;;  %v2766_v4 = vpack.c.bf16 %v3582_v54, %v3581_v22  ;;  %v6408_v22 = vld [vmem:[%s9649_s4 + $0x158] sm:$0xff] }
 0x2ad   : > { %v8286_v29 = vpop.f32.mrf.mxu0  ;;  %4309 = vmatpush.bf16.msra.mxu2 %v6410_v13  ;;  %v6419_v13 = vld [vmem:[%s9649_s4 + $0x1b0] sm:$0xff] }
 0x2ae   : > { %9793 = vst [vmem:[#allocation69_spill] sm:$0xff] %v8286_v29  ;;  %v3610_v29 = vpack.c.bf16 %v8296_v16, %v3582_v54  ;;  %4622 = vmatpush.bf16.msra.mxu3 %v6419_v13  ;;  %v6424_v54 = vld [vmem:[%s9649_s4 + $0x1d8] sm:$0xff] }
 0x2b1   : > { %v8290_v14 = vpop.f32.mrf.mxu2  ;;  %v8292_v56 = vpop.f32.mrf.mxu1 }
 0x2b2   : > { %v8288_v2 = vpop.f32.mrf.mxu3  ;;  %9794 = vst [vmem:[#allocation70_spill] sm:$0xff] %v8290_v14 }
 0x2b4   : > { %4061 = vmatmul.bf16.gmra.mxu1 %v3916_v45 }
 0x2b5   : > { %v8298_v19 = vpop.f32.mrf.mxu0 }
 0x2b6   : > { %9795 = vst [vmem:[#allocation71_spill] sm:$0xff] %v8298_v19  ;;  %3207 = vmatmul.bf16.gmra.mxu2 %v2765_v43  ;;  %v8333_v19 = vld [vmem:[#allocation2 + $0x177] sm:$0xff] }
 0x2b7   : > { %3373 = vmatmul.bf16.vlgmr.msrb.gmra.mxu3 %v3276_v53  ;;  %v8324_v53 = vld [vmem:[#allocation2 + $0x21] sm:$0xff] }
 0x2b8   : > { %3787 = vmatmul.bf16.gmra.mxu0 %v3610_v29 }
 0x2b9   : > { %v3168_v14 = vpop.f32.mrf.mxu2  ;;  %v8306_v32 = vpop.f32.mrf.mxu1 }
 0x2ba   : > { %v8301_v12 = vpop.f32.mrf.mxu3  ;;  %v8304_v33 = vadd.f32 %v3168_v14, %v8183_v20  ;;  %9797 = vst [vmem:[#allocation73_spill] sm:$0xff] %v8306_v32  ;;  %v6426_v20 = vld [vmem:[%s9649_s4 + $0x1e8] sm:$0xff] }
 0x2bb   : > { %4937 = vmatpush.bf16.msra.mxu0 %v6426_v20 }
 0x2bc   : > { %9796 = vst [vmem:[#allocation72_spill] sm:$0xff] %v8304_v33  ;;  %v3277_v33 = vpack.c.bf16 %v8324_v53, %v3230_v39  ;;  %v6407_v39 = vld [vmem:[%s9649_s4 + $0x150] sm:$0xff] }
 0x2bd   : > { %v8308_v21 = vpop.f32.mrf.mxu0 }
 0x2be   : > { %9798 = vst [vmem:[#allocation74_spill] sm:$0xff] %v8308_v21  ;;  %v3584_v21 = vld [vmem:[#allocation2 + $0x16f] sm:$0xff] }
 0x2bf   : > { %v3611_v42 = vpack.c.bf16 %v8333_v19, %v3584_v21  ;;  %4938 = vmatpush.bf16.msra.mxu0 %v6425_v47  ;;  %v6435_v47 = vld [vmem:[%s9649_s4 + $0x230] sm:$0xff] }
 0x2c0   : > { %5250 = vmatpush.bf16.msra.mxu1 %v6435_v47 }
 0x2c1   : > { %v3170_v14 = vpop.f32.mrf.mxu2  ;;  %v8329_v43 = vpop.f32.mrf.mxu1 }
 0x2c2   : > { %v8322_v29 = vpop.f32.mrf.mxu3  ;;  %v8327_v45 = vadd.f32 %v3170_v14, %v8194_v50  ;;  %v6409_v50 = vld [vmem:[%s9649_s4 + $0x160] sm:$0xff] }
 0x2c3   : > { %4310 = vmatpush.bf16.msra.mxu2 %v6409_v50  ;;  %4939 = vmatpush.bf16.msra.mxu0 %v6424_v54  ;;  %v6423_v50 = vld [vmem:[%s9649_s4 + $0x1d0] sm:$0xff] }
 0x2c4   : > { %9799 = vst [vmem:[#allocation75_spill] sm:$0xff] %v8327_v45  ;;  %4066 = vmatmul.bf16.gmra.mxu1 %v3917_v59  ;;  %v8380_v54 = vld [vmem:[#allocation2 + $0x31] sm:$0xff]  ;;  %v2767_v45 = vpack.c.bf16 %v3584_v21, %v8296_v16 }
 0x2c5   : > { %v8336_v32 = vpop.f32.mrf.mxu0 }
 0x2c6   : > { %9800 = vst [vmem:[#allocation76_spill] sm:$0xff] %v8336_v32  ;;  %3212 = vmatmul.bf16.gmra.mxu2 %v2766_v4  ;;  %v3586_v32 = vld [vmem:[#allocation2 + $0x17f] sm:$0xff] }
 0x2c7   : > { %3378 = vmatmul.bf16.gmra.mxu3 %v3277_v33  ;;  %4311 = vmatpush.bf16.msra.mxu2 %v6408_v22 }
 0x2c8   : > { %3792 = vmatmul.bf16.gmra.mxu0 %v3611_v42  ;;  %v6422_v42 = vld [vmem:[%s9649_s4 + $0x1c8] sm:$0xff] }
 0x2c9   : > { %v3173_v4 = vpop.f32.mrf.mxu2  ;;  %v8359_v14 = vpop.f32.mrf.mxu1  ;;  %4940 = vmatpush.bf16.msra.mxu0 %v6423_v50  ;;  %v3232_v50 = vld [vmem:[#allocation2 + $0x29] sm:$0xff] }
 0x2ca   : > { %v8354_v33 = vpop.f32.mrf.mxu3  ;;  %v8357_v20 = vadd.f32 %v3173_v4, %v8211_v40  ;;  %9802 = vst [vmem:[#allocation78_spill] sm:$0xff] %v8359_v14  ;;  %v6406_v40 = vld [vmem:[%s9649_s4 + $0x148] sm:$0xff]  ;;  %v3278_v47 = vpack.c.bf16 %v8380_v54, %v3232_v50 }
 0x2cb   : > { %4312 = vmatpush.bf16.msra.mxu2 %v6407_v39  ;;  %v3918_v39 = vpack.c.bf16 %v8064_v41, %v8037_v36  ;;  %v6421_v41 = vld [vmem:[%s9649_s4 + $0x1c0] sm:$0xff] }
 0x2cc   : > { %9801 = vst [vmem:[#allocation77_spill] sm:$0xff] %v8357_v20  ;;  %v3587_v20 = vld [vmem:[#allocation2 + $0x187] sm:$0xff] }
 0x2cd   : > { %v8361_v59 = vpop.f32.mrf.mxu0  ;;  %4941 = vmatpush.bf16.msra.mxu0 %v6422_v42  ;;  %v3612_v36 = vpack.c.bf16 %v3587_v20, %v3586_v32 }
 0x2ce   : > { %9803 = vst [vmem:[#allocation79_spill] sm:$0xff] %v8361_v59 }
 0x2cf   : > { %4313 = vmatpush.bf16.msra.mxu2 %v6406_v40 }
 0x2d1   : > { %v3175_v22 = vpop.f32.mrf.mxu2  ;;  %v8385_v59 = vpop.f32.mrf.mxu1  ;;  %4942 = vmatpush.bf16.msra.mxu0 %v6421_v41  ;;  %v3589_v41 = vld [vmem:[#allocation2 + $0x197] sm:$0xff] }
 0x2d2   : > { %v8378_v13 = vpop.f32.mrf.mxu3  ;;  %v8383_v4 = vadd.f32 %v3175_v22, %v8221_v28  ;;  %v6405_v28 = vld [vmem:[%s9649_s4 + $0x140] sm:$0xff] }
 0x2d3   : > { %4314 = vmatpush.bf16.msra.mxu2 %v6405_v28  ;;  %v3234_v28 = vld [vmem:[#allocation2 + $0x39] sm:$0xff] }
 0x2d4   : > { %9804 = vst [vmem:[#allocation80_spill] sm:$0xff] %v8383_v4  ;;  %4071 = vmatmul.bf16.gmra.mxu1 %v3918_v39  ;;  %v8410_v4 = vld [vmem:[#allocation2 + $0x41] sm:$0xff] }
 0x2d5   : > { %v8391_v14 = vpop.f32.mrf.mxu0 }
 0x2d6   : > { %9805 = vst [vmem:[#allocation81_spill] sm:$0xff] %v8391_v14  ;;  %3217 = vmatmul.bf16.gmra.mxu2 %v2767_v45 }
 0x2d7   : > { %3383 = vmatmul.bf16.gmra.mxu3 %v3278_v47  ;;  %v3919_v47 = vpack.c.bf16 %v8095_v25, %v8066_v38 }
 0x2d8   : > { %3797 = vmatmul.bf16.gmra.mxu0 %v3612_v36  ;;  %v8420_v36 = vpack.c.bf16 %v8410_v4, %v3234_v28 }
 0x2d9   : > { %v3178_v42 = vpop.f32.mrf.mxu2  ;;  %v8404_v21 = vpop.f32.mrf.mxu1 }
 0x2da   : > { %v8399_v40 = vpop.f32.mrf.mxu3  ;;  %v8402_v16 = vadd.f32 %v3178_v42, %v8246_v18  ;;  %v3588_v18 = vld [vmem:[#allocation2 + $0x18f] sm:$0xff]  ;;  %v2768_v42 = vpack.c.bf16 %v3586_v32, %v8333_v19 }
 0x2db   : > { %v8437_v32 = vld [vmem:[#allocation2 + $0x51] sm:$0xff] }
 0x2dc   : > { %9806 = vst [vmem:[#allocation82_spill] sm:$0xff] %v8402_v16 }
 0x2dd   : > { %v8406_v22 = vpop.f32.mrf.mxu0 }
 0x2de   : > { %9807 = vst [vmem:[#allocation83_spill] sm:$0xff] %v8406_v22 }
 0x2e1   : > { %v3180_v14 = vpop.f32.mrf.mxu2  ;;  %v8415_v20 = vpop.f32.mrf.mxu1 }
 0x2e2   : > { %v8408_v39 = vpop.f32.mrf.mxu3  ;;  %v8413_v45 = vadd.f32 %v3180_v14, %v8260_v34  ;;  %v3613_v34 = vpack.c.bf16 %v3589_v41, %v3588_v18  ;;  %v3920_v41 = vpack.c.bf16 %v8126_v0, %v8097_v60 }
 0x2e4   : > { %9808 = vst [vmem:[#allocation84_spill] sm:$0xff] %v8413_v45  ;;  %4076 = vmatmul.bf16.gmra.mxu1 %v3919_v47 }
 0x2e5   : > { %v8423_v22 = vpop.f32.mrf.mxu0 }
 0x2e6   : > { %9809 = vst [vmem:[#allocation85_spill] sm:$0xff] %v8423_v22  ;;  %3222 = vmatmul.bf16.gmra.mxu2 %v2768_v42  ;;  %v3236_v42 = vld [vmem:[#allocation2 + $0x49] sm:$0xff] }
 0x2e7   : > { %3388 = vmatmul.bf16.gmra.mxu3 %v8420_v36 }
 0x2e8   : > { %3802 = vmatmul.bf16.gmra.mxu0 %v3613_v34 }
 0x2e9   : > { %v3183_v45 = vpop.f32.mrf.mxu2  ;;  %v8431_v25 = vpop.f32.mrf.mxu1 }
 0x2ea   : > { %v8426_v14 = vpop.f32.mrf.mxu3  ;;  %v8429_v38 = vadd.f32 %v3183_v45, %v8280_v61  ;;  %v8447_v61 = vpack.c.bf16 %v8437_v32, %v3236_v42  ;;  %v4218_v45 = vpack.c.bf16 %v3232_v50, %v8324_v53 }
 0x2ed   : > { %v8433_v16 = vpop.f32.mrf.mxu0 }
 0x2ee   : > { %9810 = vst [vmem:[#allocation86_spill] sm:$0xff] %v8433_v16 }
 0x2f1   : > { %v3185_v19 = vpop.f32.mrf.mxu2  ;;  %v8442_v18 = vpop.f32.mrf.mxu1 }
 0x2f2   : > { %v8435_v47 = vpop.f32.mrf.mxu3  ;;  %v8440_v22 = vadd.f32 %v3185_v19, %v8288_v2  ;;  %v6418_v2 = vld [vmem:[%s9649_s4 + $0x1a8] sm:$0xff]  ;;  %v9812_v19 = vpack.c.bf16 %v7948_v49, %v7956_v17 }
 0x2f3   : > { %4623 = vmatpush.bf16.msra.mxu3 %v6418_v2  ;;  %v8473_v17 = vld [vmem:[#allocation2 + $0x61] sm:$0xff] }
 0x2f4   : > { %4081 = vmatmul.bf16.gmra.mxu1 %v3920_v41 }
 0x2f5   : > { %v8450_v34 = vpop.f32.mrf.mxu0 }
 0x2f6   : > { %9811 = vst [vmem:[#allocation87_spill] sm:$0xff] %v8450_v34  ;;  %4315 = vmatmul.bf16.vlgmr.msra.gmra.mxu2 %v4218_v45  ;;  %v6434_v45 = vld [vmem:[%s9649_s4 + $0x228] sm:$0xff] }
 0x2f7   : > { %3393 = vmatmul.bf16.gmra.mxu3 %v8447_v61  ;;  %5251 = vmatpush.bf16.msra.mxu1 %v6434_v45  ;;  %v4219_v45 = vpack.c.bf16 %v3234_v28, %v8380_v54 }
 0x2f8   : > { %4943 = vmatmul.bf16.vlgmr.msra.gmra.mxu0 %v9812_v19 }
 0x2f9   : > { %v3188_v0 = vpop.f32.mrf.mxu2  ;;  %v8464_v53 = vpop.f32.mrf.mxu1 }
 0x2fa   : > { %v8459_v60 = vpop.f32.mrf.mxu3  ;;  %v8462_v41 = vadd.f32 %v3188_v0, %v8301_v12  ;;  %v3921_v12 = vpack.c.bf16 %v8154_v52, %v8128_v11  ;;  %v3238_v0 = vld [vmem:[#allocation2 + $0x59] sm:$0xff] }
 0x2fd   : > { %v8466_v50 = vpop.f32.mrf.mxu0 }
 0x2fe   : > { %9813 = vst [vmem:[#allocation88_spill] sm:$0xff] %v8466_v50  ;;  %v8483_v50 = vpack.c.bf16 %v8473_v17, %v3238_v0 }
 0x301   : > { %v3190_v49 = vpop.f32.mrf.mxu2  ;;  %v8478_v19 = vpop.f32.mrf.mxu1 }
 0x302   : > { %v8471_v34 = vpop.f32.mrf.mxu3  ;;  %v8476_v2 = vadd.f32 %v3190_v49, %v8322_v29  ;;  %v9816_v29 = vpack.c.bf16 %v7972_v5, %v7981_v9  ;;  %v3922_v9 = vpack.c.bf16 %v8174_v1, %v8156_v55 }
 0x304   : > { %9814 = vst [vmem:[#allocation89_spill] sm:$0xff] %v8476_v2  ;;  %4086 = vmatmul.bf16.gmra.mxu1 %v3921_v12 }
 0x305   : > { %v8486_v16 = vpop.f32.mrf.mxu0 }
 0x306   : > { %9815 = vst [vmem:[#allocation90_spill] sm:$0xff] %v8486_v16  ;;  %4320 = vmatmul.bf16.gmra.mxu2 %v4219_v45  ;;  %v8503_v16 = vld [vmem:[#allocation2 + $0x71] sm:$0xff] }
 0x307   : > { %3398 = vmatmul.bf16.gmra.mxu3 %v8483_v50 }
 0x308   : > { %4948 = vmatmul.bf16.gmra.mxu0 %v9816_v29  ;;  %v3240_v29 = vld [vmem:[#allocation2 + $0x69] sm:$0xff] }
 0x309   : > { %v3193_v2 = vpop.f32.mrf.mxu2  ;;  %v8497_v11 = vpop.f32.mrf.mxu1 }
 0x30a   : > { %v8492_v49 = vpop.f32.mrf.mxu3  ;;  %v8495_v52 = vadd.f32 %v3193_v2, %v8354_v33  ;;  %v8513_v33 = vpack.c.bf16 %v8503_v16, %v3240_v29  ;;  %v4220_v2 = vpack.c.bf16 %v3236_v42, %v8410_v4 }
 0x30d   : > { %v8499_v12 = vpop.f32.mrf.mxu0 }
 0x30e   : > { %9817 = vst [vmem:[#allocation91_spill] sm:$0xff] %v8499_v12 }
 0x311   : > { %v3195_v28 = vpop.f32.mrf.mxu2  ;;  %v8508_v5 = vpop.f32.mrf.mxu1 }
 0x312   : > { %v8501_v54 = vpop.f32.mrf.mxu3  ;;  %v8506_v45 = vadd.f32 %v3195_v28, %v8378_v13  ;;  %v9820_v13 = vpack.c.bf16 %v8011_v63, %v8018_v57  ;;  %v3923_v57 = vpack.c.bf16 %v8198_v31, %v8176_v30 }
 0x314   : > { %9818 = vst [vmem:[#allocation92_spill] sm:$0xff] %v8506_v45  ;;  %4091 = vmatmul.bf16.gmra.mxu1 %v3922_v9 }
 0x315   : > { %v8516_v12 = vpop.f32.mrf.mxu0 }
 0x316   : > { %9819 = vst [vmem:[#allocation93_spill] sm:$0xff] %v8516_v12  ;;  %4325 = vmatmul.bf16.gmra.mxu2 %v4220_v2  ;;  %v8533_v12 = vld [vmem:[#allocation2 + $0x81] sm:$0xff] }
 0x317   : > { %3403 = vmatmul.bf16.gmra.mxu3 %v8513_v33 }
 0x318   : > { %4953 = vmatmul.bf16.gmra.mxu0 %v9820_v13  ;;  %v3242_v13 = vld [vmem:[#allocation2 + $0x79] sm:$0xff] }
 0x319   : > { %v3198_v45 = vpop.f32.mrf.mxu2  ;;  %v8527_v1 = vpop.f32.mrf.mxu1 }
 0x31a   : > { %v8522_v28 = vpop.f32.mrf.mxu3  ;;  %v8525_v55 = vadd.f32 %v3198_v45, %v8399_v40  ;;  %v8543_v40 = vpack.c.bf16 %v8533_v12, %v3242_v13  ;;  %v4221_v45 = vpack.c.bf16 %v3238_v0, %v8437_v32 }
 0x31d   : > { %v8529_v9 = vpop.f32.mrf.mxu0 }
 0x31e   : > { %9821 = vst [vmem:[#allocation94_spill] sm:$0xff] %v8529_v9 }
 0x321   : > { %v3200_v42 = vpop.f32.mrf.mxu2  ;;  %v8538_v63 = vpop.f32.mrf.mxu1 }
 0x322   : > { %v8531_v4 = vpop.f32.mrf.mxu3  ;;  %v8536_v2 = vadd.f32 %v3200_v42, %v8408_v39  ;;  %v6417_v39 = vld [vmem:[%s9649_s4 + $0x1a0] sm:$0xff]  ;;  %v9823_v42 = vpack.c.bf16 %v8041_v51, %v8048_v26  ;;  %v8569_v26 = vld [vmem:[#allocation2 + $0x91] sm:$0xff] }
 0x323   : > { %4624 = vmatpush.bf16.msra.mxu3 %v6417_v39 }
 0x324   : > { %4096 = vmatmul.bf16.gmra.mxu1 %v3923_v57 }
 0x325   : > { %v8546_v9 = vpop.f32.mrf.mxu0 }
 0x326   : > { %9822 = vst [vmem:[#allocation95_spill] sm:$0xff] %v8546_v9  ;;  %4330 = vmatmul.bf16.gmra.mxu2 %v4221_v45  ;;  %v6433_v45 = vld [vmem:[%s9649_s4 + $0x220] sm:$0xff] }
 0x327   : > { %3408 = vmatmul.bf16.gmra.mxu3 %v8543_v40  ;;  %5252 = vmatpush.bf16.msra.mxu1 %v6433_v45  ;;  %v4222_v45 = vpack.c.bf16 %v3240_v29, %v8473_v17  ;;  %v3111_v29 = vadd.f32 %v7931_v35, %v7657_v15  ;;  %v4223_v35 = vpack.c.bf16 %v3242_v13, %v8503_v16 }
 0x328   : > { %4958 = vmatmul.bf16.gmra.mxu0 %v9823_v42 }
 0x329   : > { %v3203_v31 = vpop.f32.mrf.mxu2  ;;  %v8560_v32 = vpop.f32.mrf.mxu1 }
 0x32a   : > { %v8555_v30 = vpop.f32.mrf.mxu3  ;;  %v8558_v57 = vadd.f32 %v3203_v31, %v8426_v14  ;;  %v3924_v14 = vpack.c.bf16 %v8225_v10, %v8200_v7  ;;  %v3244_v31 = vld [vmem:[#allocation2 + $0x89] sm:$0xff] }
 0x32c   : > { %9824 = vst [vmem:[#allocation96_spill] sm:$0xff] %v8558_v57 }
 0x32d   : > { %v8562_v0 = vpop.f32.mrf.mxu0 }
 0x32e   : > { %9825 = vst [vmem:[#allocation97_spill] sm:$0xff] %v8562_v0  ;;  %v8579_v0 = vpack.c.bf16 %v8569_v26, %v3244_v31 }
 0x331   : > { %v3205_v51 = vpop.f32.mrf.mxu2  ;;  %v8574_v42 = vpop.f32.mrf.mxu1 }
 0x332   : > { %v8567_v9 = vpop.f32.mrf.mxu3  ;;  %v8572_v39 = vadd.f32 %v3205_v51, %v8435_v47  ;;  %9826 = vst [vmem:[#allocation98_spill] sm:$0xff] %v8574_v42  ;;  %v3109_v47 = vadd.f32 %v7893_v37, %v7627_v44  ;;  %v9828_v51 = vpack.c.bf16 %v8070_v62, %v8076_v27  ;;  %v8601_v37 = vld [vmem:[#allocation2 + $0xa1] sm:$0xff] }
 0x334   : > { %4101 = vmatmul.bf16.gmra.mxu1 %v3924_v14 }
 0x335   : > { %v8582_v57 = vpop.f32.mrf.mxu0 }
 0x336   : > { %9827 = vst [vmem:[#allocation99_spill] sm:$0xff] %v8582_v57  ;;  %4335 = vmatmul.bf16.gmra.mxu2 %v4222_v45 }
 0x337   : > { %3413 = vmatmul.bf16.gmra.mxu3 %v8579_v0 }
 0x338   : > { %4963 = vmatmul.bf16.gmra.mxu0 %v9828_v51  ;;  %v8612_v51 = vld [vmem:[#allocation2 + $0x99] sm:$0xff] }
 0x339   : > { %v3208_v10 = vpop.f32.mrf.mxu2  ;;  %v8595_v17 = vpop.f32.mrf.mxu1  ;;  %v8616_v15 = vpack.c.bf16 %v8601_v37, %v8612_v51 }
 0x33a   : > { %v3374_v7 = vpop.f32.mrf.mxu3  ;;  %v8593_v14 = vadd.f32 %v3208_v10, %v8459_v60  ;;  %9829 = vst [vmem:[#allocation100_spill] sm:$0xff] %v8595_v17  ;;  %v3925_v60 = vpack.c.bf16 %v8264_v48, %v8227_v3  ;;  %v6432_v3 = vld [vmem:[%s9649_s4 + $0x218] sm:$0xff] }
 0x33b   : > { %v8590_v42 = vadd.f32 %v3374_v7, %v3109_v47  ;;  %5253 = vmatpush.bf16.msra.mxu1 %v6432_v3 }
 0x33d   : > { %v8599_v45 = vpop.f32.mrf.mxu0 }
 0x33e   : > { %9830 = vst [vmem:[#allocation101_spill] sm:$0xff] %v8599_v45 }
 0x341   : > { %v3210_v44 = vpop.f32.mrf.mxu2  ;;  %v8608_v47 = vpop.f32.mrf.mxu1 }
 0x342   : > { %v3376_v57 = vpop.f32.mrf.mxu3  ;;  %v8606_v27 = vadd.f32 %v3210_v44, %v8471_v34  ;;  %9831 = vst [vmem:[#allocation102_spill] sm:$0xff] %v8608_v47  ;;  %v3114_v34 = vadd.f32 %v7954_v46, %v7676_v58  ;;  %v6431_v58 = vld [vmem:[%s9649_s4 + $0x210] sm:$0xff]  ;;  %v6430_v46 = vld [vmem:[%s9649_s4 + $0x208] sm:$0xff]  ;;  %v9849_v47 = vld [vmem:[#allocation14_spill] sm:$0xff] }
 0x343   : > { %v8603_v62 = vadd.f32 %v3376_v57, %v3111_v29  ;;  %v9832_v57 = vpack.c.bf16 %v8101_v23, %v8107_v24  ;;  %5254 = vmatpush.bf16.msra.mxu1 %v6431_v58  ;;  %v3901_v23 = vld [vmem:[#allocation2 + $0x188] sm:$0xff]  ;;  %v9835_v24 = vld [vmem:[#allocation10_spill] sm:$0xff] }
 0x344   : > { %4106 = vmatmul.bf16.gmra.mxu1 %v3925_v60  ;;  %v3116_v44 = vadd.f32 %v9835_v24, %v7718_v6  ;;  %v3248_v58 = vld [vmem:[#allocation2 + $0xa9] sm:$0xff]  ;;  %v4224_v6 = vpack.c.bf16 %v3244_v31, %v8533_v12  ;;  %v6429_v24 = vld [vmem:[%s9649_s4 + $0x200] sm:$0xff] }
 0x345   : > { %v8628_v10 = vpop.f32.mrf.mxu0 }
 0x346   : > { %4340 = vmatmul.bf16.gmra.mxu2 %v4223_v35  ;;  %9833 = vst [vmem:[#allocation103_spill] sm:$0xff] %v8628_v10 }
 0x347   : > { %3418 = vmatmul.bf16.gmra.mxu3 %v8616_v15  ;;  %5255 = vmatpush.bf16.msra.mxu1 %v6430_v46  ;;  %v9840_v46 = vld [vmem:[#allocation3_spill] sm:$0xff] }
 0x348   : > { %4968 = vmatmul.bf16.gmra.mxu0 %v9832_v57 }
 0x349   : > { %v3213_v7 = vpop.f32.mrf.mxu2  ;;  %v8635_v13 = vpop.f32.mrf.mxu1 }
 0x34a   : > { %v3379_v48 = vpop.f32.mrf.mxu3  ;;  %v8633_v16 = vadd.f32 %v3213_v7, %v8492_v49  ;;  %9834 = vst [vmem:[#allocation104_spill] sm:$0xff] %v8635_v13  ;;  %v8645_v49 = vld [vmem:[#allocation2 + $0xb1] sm:$0xff]  ;;  %v9848_v13 = vld [vmem:[#allocation4_spill] sm:$0xff] }
 0x34b   : > { %v8630_v29 = vadd.f32 %v3379_v48, %v3114_v34  ;;  %v9838_v48 = vld [vmem:[#allocation65_spill] sm:$0xff]  ;;  %v8658_v45 = vpack.c.bf16 %v8645_v49, %v3248_v58  ;;  %5256 = vmatpush.bf16.msra.mxu1 %v6429_v24  ;;  %v3903_v24 = vld [vmem:[#allocation2 + $0x198] sm:$0xff] }
 0x34c   : > { %v3926_v7 = vpack.c.bf16 %v3901_v23, %v9838_v48  ;;  %v9841_v23 = vld [vmem:[#allocation12_spill] sm:$0xff] }
 0x34d   : > { %v8655_v10 = vpop.f32.mrf.mxu0 }
 0x34e   : > { %9839 = vst [vmem:[#allocation65_spill] sm:$0xff] %v8655_v10 }
 0x351   : > { %v3215_v35 = vpop.f32.mrf.mxu2  ;;  %v8652_v3 = vpop.f32.mrf.mxu1 }
 0x352   : > { %v3381_v60 = vpop.f32.mrf.mxu3  ;;  %v8650_v57 = vadd.f32 %v3215_v35, %v8501_v54  ;;  %9837 = vst [vmem:[#allocation105_spill] sm:$0xff] %v8652_v3  ;;  %v6416_v54 = vld [vmem:[%s9649_s4 + $0x198] sm:$0xff]  ;;  %v9843_v35 = vld [vmem:[#allocation36_spill] sm:$0xff] }
 0x353   : > { %v8647_v34 = vadd.f32 %v3381_v60, %v3116_v44  ;;  %v3119_v44 = vadd.f32 %v9841_v23, %v9840_v46  ;;  %v9842_v60 = vld [vmem:[#allocation34_spill] sm:$0xff]  ;;  %4625 = vmatpush.bf16.msra.mxu3 %v6416_v54  ;;  %v3121_v46 = vadd.f32 %v9849_v47, %v9848_v13  ;;  %v8686_v54 = vld [vmem:[#allocation2 + $0x190] sm:$0xff]  ;;  %v4225_v47 = vpack.c.bf16 %v8612_v51, %v8569_v26  ;;  %v4812_v13 = vld [vmem:[#allocation2 + $0xa8] sm:$0xff] }
 0x354   : > { %9836 = vst [vmem:[#allocation10_spill] sm:$0xff] %v8650_v57  ;;  %4111 = vmatmul.bf16.gmra.mxu1 %v3926_v7  ;;  %v9844_v48 = vpack.c.bf16 %v9842_v60, %v9843_v35  ;;  %v8684_v60 = vld [vmem:[#allocation2 + $0xc1] sm:$0xff] }
 0x355   : > { %v8680_v3 = vpop.f32.mrf.mxu0 }
 0x356   : > { %4345 = vmatmul.bf16.gmra.mxu2 %v4224_v6  ;;  %9847 = vst [vmem:[#allocation34_spill] sm:$0xff] %v8680_v3 }
 0x357   : > { %3423 = vmatmul.bf16.gmra.mxu3 %v8658_v45 }
 0x358   : > { %4973 = vmatmul.bf16.gmra.mxu0 %v9844_v48  ;;  %v3927_v48 = vpack.c.bf16 %v3903_v24, %v8686_v54 }
 0x359   : > { %v3218_v31 = vpop.f32.mrf.mxu2  ;;  %v8678_v6 = vpop.f32.mrf.mxu1 }
 0x35a   : > { %v3384_v12 = vpop.f32.mrf.mxu3  ;;  %v8676_v10 = vadd.f32 %v3218_v31, %v8522_v28  ;;  %9846 = vst [vmem:[#allocation12_spill] sm:$0xff] %v8678_v6 }
 0x35b   : > { %v8673_v7 = vadd.f32 %v3384_v12, %v3119_v44  ;;  %v3250_v12 = vld [vmem:[#allocation2 + $0xb9] sm:$0xff] }
 0x35c   : > { %9845 = vst [vmem:[#allocation3_spill] sm:$0xff] %v8676_v10  ;;  %v8697_v31 = vpack.c.bf16 %v8684_v60, %v3250_v12 }
 0x361   : > { %v3220_v17 = vpop.f32.mrf.mxu2  ;;  %v8693_v28 = vpop.f32.mrf.mxu1 }
 0x362   : > { %v3386_v23 = vpop.f32.mrf.mxu3  ;;  %v8691_v44 = vadd.f32 %v3220_v17, %v8531_v4  ;;  %9851 = vst [vmem:[#allocation4_spill] sm:$0xff] %v8693_v28  ;;  %v9853_v4 = vld [vmem:[#allocation5_spill] sm:$0xff]  ;;  %v9854_v17 = vld [vmem:[#allocation16_spill] sm:$0xff]  ;;  %v8705_v28 = vpop.f32.mrf.mxu0 }
 0x363   : > { %v8688_v35 = vadd.f32 %v3386_v23, %v3121_v46  ;;  %v9852_v46 = vld [vmem:[#allocation51_spill] sm:$0xff]  ;;  %v3124_v3 = vadd.f32 %v9854_v17, %v9853_v4  ;;  %9855 = vst [vmem:[#allocation14_spill] sm:$0xff] %v8705_v28  ;;  %v4226_v28 = vpack.c.bf16 %v3248_v58, %v8601_v37 }
 0x364   : > { %9850 = vst [vmem:[#allocation36_spill] sm:$0xff] %v8691_v44  ;;  %4116 = vmatmul.bf16.gmra.mxu1 %v3927_v48  ;;  %v4853_v23 = vpack.c.bf16 %v9852_v46, %v4812_v13  ;;  %v9859_v46 = vld [vmem:[#allocation18_spill] sm:$0xff] }
 0x366   : > { %4350 = vmatmul.bf16.gmra.mxu2 %v4225_v47  ;;  %v8714_v47 = vld [vmem:[#allocation2 + $0xd1] sm:$0xff] }
 0x367   : > { %3428 = vmatmul.bf16.gmra.mxu3 %v8697_v31 }
 0x368   : > { %4978 = vmatmul.bf16.gmra.mxu0 %v4853_v23 }
 0x369   : > { %v3223_v6 = vpop.f32.mrf.mxu2  ;;  %v8712_v26 = vpop.f32.mrf.mxu1 }
 0x36a   : > { %v3389_v24 = vpop.f32.mrf.mxu3  ;;  %v8710_v48 = vadd.f32 %v3223_v6, %v8555_v30  ;;  %9857 = vst [vmem:[#allocation5_spill] sm:$0xff] %v8712_v26  ;;  %v8716_v13 = vpop.f32.mrf.mxu0  ;;  %v9862_v30 = vld [vmem:[#allocation6_spill] sm:$0xff] }
 0x36b   : > { %v8707_v44 = vadd.f32 %v3389_v24, %v3124_v3  ;;  %9858 = vst [vmem:[#allocation16_spill] sm:$0xff] %v8716_v13  ;;  %v3252_v3 = vld [vmem:[#allocation2 + $0xc9] sm:$0xff]  ;;  %v3808_v6 = vadd.f32 %v9862_v30, %v8590_v42  ;;  %v4814_v13 = vld [vmem:[#allocation2 + $0xb8] sm:$0xff] }
 0x36c   : > { %9856 = vst [vmem:[#allocation51_spill] sm:$0xff] %v8710_v48  ;;  %v8729_v24 = vpack.c.bf16 %v8714_v47, %v3252_v3 }
 0x371   : > { %v3225_v10 = vpop.f32.mrf.mxu2  ;;  %v8724_v17 = vpop.f32.mrf.mxu1 }
 0x372   : > { %v3391_v51 = vpop.f32.mrf.mxu3  ;;  %v8722_v23 = vadd.f32 %v3225_v10, %v8567_v9  ;;  %9861 = vst [vmem:[#allocation106_spill] sm:$0xff] %v8724_v17  ;;  %v9864_v10 = vld [vmem:[#allocation45_spill] sm:$0xff]  ;;  %v8745_v58 = vpop.f32.mrf.mxu0 }
 0x373   : > { %v8719_v4 = vadd.f32 %v3391_v51, %v9859_v46  ;;  %v9863_v51 = vld [vmem:[#allocation57_spill] sm:$0xff]  ;;  %v4122_v46 = vadd.f32 %v9864_v10, %v3808_v6  ;;  %9869 = vst [vmem:[#allocation45_spill] sm:$0xff] %v8745_v58  ;;  %v8750_v6 = vld [vmem:[#allocation2 + $0xe1] sm:$0xff] }
 0x374   : > { %9860 = vst [vmem:[#allocation18_spill] sm:$0xff] %v8722_v23  ;;  %5257 = vmatmul.bf16.vlgmr.msra.gmra.mxu1 %v8420_v36  ;;  %v4854_v9 = vpack.c.bf16 %v9863_v51, %v4814_v13  ;;  %v9865_v23 = vld [vmem:[#allocation21_spill] sm:$0xff]  ;;  %v9868_v36 = vld [vmem:[#allocation7_spill] sm:$0xff]  ;;  %v9871_v10 = vld [vmem:[#allocation24_spill] sm:$0xff] }
 0x375   : > { %v3809_v37 = vadd.f32 %v9868_v36, %v8603_v62  ;;  %v9874_v62 = vld [vmem:[#allocation8_spill] sm:$0xff] }
 0x376   : > { %4355 = vmatmul.bf16.gmra.mxu2 %v4226_v28  ;;  %v9870_v28 = vld [vmem:[#allocation48_spill] sm:$0xff]  ;;  %v3810_v36 = vadd.f32 %v9874_v62, %v8630_v29 }
 0x377   : > { %3433 = vmatmul.bf16.gmra.mxu3 %v8729_v24  ;;  %v4123_v57 = vadd.f32 %v9870_v28, %v3809_v37  ;;  %v4227_v28 = vpack.c.bf16 %v3250_v12, %v8645_v49  ;;  %v4816_v58 = vld [vmem:[#allocation2 + $0xc8] sm:$0xff] }
 0x378   : > { %4983 = vmatmul.bf16.gmra.mxu0 %v4854_v9  ;;  %v8748_v9 = vld [vmem:[#allocation2 + $0xd9] sm:$0xff]  ;;  %v9876_v29 = vld [vmem:[#allocation52_spill] sm:$0xff] }
 0x379   : > { %v4316_v26 = vpop.f32.mrf.mxu2  ;;  %v8741_v48 = vpop.f32.mrf.mxu1  ;;  %v8763_v37 = vpack.c.bf16 %v8750_v6, %v8748_v9 }
 0x37a   : > { %v3394_v17 = vpop.f32.mrf.mxu3  ;;  %v8739_v30 = vadd.f32 %v4316_v26, %v4122_v46  ;;  %9867 = vst [vmem:[#allocation57_spill] sm:$0xff] %v8741_v48  ;;  %v4817_v46 = vld [vmem:[#allocation2 + $0xd0] sm:$0xff]  ;;  %v8767_v48 = vpop.f32.mrf.mxu0 }
 0x37b   : > { %v8737_v42 = vadd.f32 %v3394_v17, %v9865_v23  ;;  %9875 = vst [vmem:[#allocation48_spill] sm:$0xff] %v8767_v48 }
 0x37c   : > { %9866 = vst [vmem:[#allocation6_spill] sm:$0xff] %v8739_v30 }
 0x381   : > { %v4318_v51 = vpop.f32.mrf.mxu2  ;;  %v8757_v17 = vpop.f32.mrf.mxu1 }
 0x382   : > { %v3396_v13 = vpop.f32.mrf.mxu3  ;;  %v8755_v26 = vadd.f32 %v4318_v51, %v4123_v57  ;;  %9873 = vst [vmem:[#allocation7_spill] sm:$0xff] %v8757_v17  ;;  %v4855_v57 = vpack.c.bf16 %v4817_v46, %v4816_v58  ;;  %v4124_v51 = vadd.f32 %v9876_v29, %v3810_v36  ;;  %v8783_v46 = vpop.f32.mrf.mxu0  ;;  %v8786_v36 = vld [vmem:[#allocation2 + $0xe9] sm:$0xff]  ;;  %v9883_v29 = vld [vmem:[#allocation30_spill] sm:$0xff] }
 0x383   : > { %v8753_v23 = vadd.f32 %v3396_v13, %v9871_v10  ;;  %v6415_v13 = vld [vmem:[%s9649_s4 + $0x190] sm:$0xff]  ;;  %9881 = vst [vmem:[#allocation52_spill] sm:$0xff] %v8783_v46 }
 0x384   : > { %9872 = vst [vmem:[#allocation21_spill] sm:$0xff] %v8755_v26  ;;  %5262 = vmatmul.bf16.gmra.mxu1 %v8447_v61  ;;  %4626 = vmatpush.bf16.msra.mxu3 %v6415_v13  ;;  %v9877_v61 = vld [vmem:[#allocation27_spill] sm:$0xff]  ;;  %v8788_v13 = vld [vmem:[#allocation2 + $0xf1] sm:$0xff] }
 0x385   : > { %v9882_v26 = vld [vmem:[#allocation55_spill] sm:$0xff] }
 0x386   : > { %4360 = vmatmul.bf16.gmra.mxu2 %v4227_v28  ;;  %v9880_v28 = vld [vmem:[#allocation9_spill] sm:$0xff] }
 0x387   : > { %3438 = vmatmul.bf16.gmra.mxu3 %v8763_v37  ;;  %v3811_v58 = vadd.f32 %v9880_v28, %v8647_v34  ;;  %v9886_v34 = vld [vmem:[#allocation11_spill] sm:$0xff] }
 0x388   : > { %4988 = vmatmul.bf16.gmra.mxu0 %v4855_v57  ;;  %v3812_v28 = vadd.f32 %v9886_v34, %v8673_v7  ;;  %v9889_v7 = vld [vmem:[#allocation33_spill] sm:$0xff] }
 0x389   : > { %v4321_v62 = vpop.f32.mrf.mxu2  ;;  %v8779_v12 = vpop.f32.mrf.mxu1  ;;  %v4125_v48 = vadd.f32 %v9882_v26, %v3811_v58  ;;  %v8801_v26 = vpack.c.bf16 %v8788_v13, %v8786_v36  ;;  %v4228_v58 = vpack.c.bf16 %v3252_v3, %v8684_v60  ;;  %v9893_v3 = vld [vmem:[#allocation62_spill] sm:$0xff] }
 0x38a   : > { %v3399_v10 = vpop.f32.mrf.mxu3  ;;  %v8777_v49 = vadd.f32 %v4321_v62, %v4124_v51  ;;  %9879 = vst [vmem:[#allocation8_spill] sm:$0xff] %v8779_v12  ;;  %v4819_v12 = vld [vmem:[#allocation2 + $0xe0] sm:$0xff] }
 0x38b   : > { %v8775_v17 = vadd.f32 %v3399_v10, %v9877_v61  ;;  %v4818_v61 = vld [vmem:[#allocation2 + $0xd8] sm:$0xff] }
 0x38c   : > { %9878 = vst [vmem:[#allocation24_spill] sm:$0xff] %v8777_v49 }
 0x391   : > { %v4323_v30 = vpop.f32.mrf.mxu2  ;;  %v8795_v62 = vpop.f32.mrf.mxu1 }
 0x392   : > { %v3401_v57 = vpop.f32.mrf.mxu3  ;;  %v8793_v51 = vadd.f32 %v4323_v30, %v4125_v48  ;;  %9885 = vst [vmem:[#allocation9_spill] sm:$0xff] %v8795_v62  ;;  %v4856_v48 = vpack.c.bf16 %v4819_v12, %v4818_v61  ;;  %v9887_v30 = vld [vmem:[#allocation59_spill] sm:$0xff] }
 0x393   : > { %v8791_v10 = vadd.f32 %v3401_v57, %v9883_v29  ;;  %v4126_v57 = vadd.f32 %v9887_v30, %v3812_v28  ;;  %v8821_v28 = vld [vmem:[#allocation2 + $0x101] sm:$0xff]  ;;  %v9894_v30 = vld [vmem:[#allocation37_spill] sm:$0xff] }
 0x394   : > { %9884 = vst [vmem:[#allocation27_spill] sm:$0xff] %v8793_v51  ;;  %5267 = vmatmul.bf16.gmra.mxu1 %v8483_v50  ;;  %v8807_v51 = vpop.f32.mrf.mxu0  ;;  %v9892_v50 = vld [vmem:[#allocation13_spill] sm:$0xff] }
 0x395   : > { %9888 = vst [vmem:[#allocation55_spill] sm:$0xff] %v8807_v51  ;;  %v3813_v60 = vadd.f32 %v9892_v50, %v8688_v35 }
 0x396   : > { %4365 = vmatmul.bf16.gmra.mxu2 %v4228_v58 }
 0x397   : > { %3443 = vmatmul.bf16.gmra.mxu3 %v8801_v26  ;;  %v4127_v58 = vadd.f32 %v9893_v3, %v3813_v60  ;;  %v4229_v3 = vpack.c.bf16 %v8748_v9, %v8714_v47 }
 0x398   : > { %4993 = vmatmul.bf16.gmra.mxu0 %v4856_v48  ;;  %v8819_v48 = vld [vmem:[#allocation2 + $0xf9] sm:$0xff] }
 0x399   : > { %v4326_v62 = vpop.f32.mrf.mxu2  ;;  %v8814_v46 = vpop.f32.mrf.mxu1  ;;  %v8836_v60 = vpack.c.bf16 %v8821_v28, %v8819_v48 }
 0x39a   : > { %v3404_v29 = vpop.f32.mrf.mxu3  ;;  %v8812_v49 = vadd.f32 %v4326_v62, %v4126_v57  ;;  %9891 = vst [vmem:[#allocation11_spill] sm:$0xff] %v8814_v46  ;;  %v4820_v57 = vld [vmem:[#allocation2 + $0xe8] sm:$0xff]  ;;  %v9897_v46 = vld [vmem:[#allocation15_spill] sm:$0xff] }
 0x39b   : > { %v8810_v34 = vadd.f32 %v3404_v29, %v9889_v7  ;;  %v4821_v7 = vld [vmem:[#allocation2 + $0xf0] sm:$0xff]  ;;  %v3814_v35 = vadd.f32 %v9897_v46, %v8707_v44  ;;  %v9900_v46 = vld [vmem:[#allocation40_spill] sm:$0xff] }
 0x39c   : > { %9890 = vst [vmem:[#allocation30_spill] sm:$0xff] %v8812_v49  ;;  %v8832_v50 = vpop.f32.mrf.mxu0 }
 0x39d   : > { %9898 = vst [vmem:[#allocation13_spill] sm:$0xff] %v8832_v50 }
 0x3a1   : > { %v4328_v61 = vpop.f32.mrf.mxu2  ;;  %v8828_v62 = vpop.f32.mrf.mxu1 }
 0x3a2   : > { %v3406_v12 = vpop.f32.mrf.mxu3  ;;  %v8826_v29 = vadd.f32 %v4328_v61, %v4127_v58  ;;  %9896 = vst [vmem:[#allocation33_spill] sm:$0xff] %v8828_v62  ;;  %v4857_v58 = vpack.c.bf16 %v4821_v7, %v4820_v57 }
 0x3a3   : > { %v8824_v51 = vadd.f32 %v3406_v12, %v9894_v30  ;;  %v9899_v12 = vld [vmem:[#allocation66_spill] sm:$0xff] }
 0x3a4   : > { %9895 = vst [vmem:[#allocation59_spill] sm:$0xff] %v8826_v29  ;;  %5272 = vmatmul.bf16.gmra.mxu1 %v8513_v33  ;;  %v4128_v61 = vadd.f32 %v9899_v12, %v3814_v35  ;;  %v9903_v33 = vld [vmem:[#allocation17_spill] sm:$0xff]  ;;  %v8852_v47 = vpop.f32.mrf.mxu0 }
 0x3a5   : > { %v3815_v50 = vadd.f32 %v9903_v33, %v8719_v4  ;;  %9904 = vst [vmem:[#allocation15_spill] sm:$0xff] %v8852_v47  ;;  %v8857_v35 = vld [vmem:[#allocation2 + $0x111] sm:$0xff]  ;;  %v9908_v4 = vld [vmem:[#allocation20_spill] sm:$0xff] }
 0x3a6   : > { %4370 = vmatmul.bf16.gmra.mxu2 %v4229_v3  ;;  %v8855_v3 = vld [vmem:[#allocation2 + $0x109] sm:$0xff]  ;;  %v3816_v33 = vadd.f32 %v9908_v4, %v8737_v42 }
 0x3a7   : > { %3448 = vmatmul.bf16.gmra.mxu3 %v8836_v60  ;;  %v4129_v9 = vadd.f32 %v8284_v8, %v3815_v50  ;;  %v8870_v8 = vpack.c.bf16 %v8857_v35, %v8855_v3  ;;  %v4230_v50 = vpack.c.bf16 %v8786_v36, %v8750_v6 }
 0x3a8   : > { %4998 = vmatmul.bf16.gmra.mxu0 %v4857_v58  ;;  %v9905_v58 = vld [vmem:[#allocation42_spill] sm:$0xff] }
 0x3a9   : > { %v4331_v44 = vpop.f32.mrf.mxu2  ;;  %v8848_v49 = vpop.f32.mrf.mxu1 }
 0x3aa   : > { %v3409_v30 = vpop.f32.mrf.mxu3  ;;  %v8846_v29 = vadd.f32 %v4331_v44, %v4128_v61  ;;  %9902 = vst [vmem:[#allocation37_spill] sm:$0xff] %v8848_v49  ;;  %v4822_v44 = vld [vmem:[#allocation2 + $0xf8] sm:$0xff] }
 0x3ab   : > { %v8844_v62 = vadd.f32 %v3409_v30, %v9900_v46  ;;  %v4823_v46 = vld [vmem:[#allocation2 + $0x100] sm:$0xff] }
 0x3ac   : > { %9901 = vst [vmem:[#allocation62_spill] sm:$0xff] %v8846_v29  ;;  %v8881_v4 = vpop.f32.mrf.mxu0  ;;  %v9915_v29 = vld [vmem:[#allocation50_spill] sm:$0xff] }
 0x3ad   : > { %9911 = vst [vmem:[#allocation17_spill] sm:$0xff] %v8881_v4 }
 0x3b1   : > { %v4333_v7 = vpop.f32.mrf.mxu2  ;;  %v8864_v30 = vpop.f32.mrf.mxu1 }
 0x3b2   : > { %v3411_v57 = vpop.f32.mrf.mxu3  ;;  %v8862_v61 = vadd.f32 %v4333_v7, %v4129_v9  ;;  %9907 = vst [vmem:[#allocation40_spill] sm:$0xff] %v8864_v30  ;;  %v4858_v9 = vpack.c.bf16 %v4823_v46, %v4822_v44  ;;  %v9909_v7 = vld [vmem:[#allocation19_spill] sm:$0xff]  ;;  %v4130_v30 = vadd.f32 %v8292_v56, %v3816_v33 }
 0x3b3   : > { %v8860_v12 = vadd.f32 %v3411_v57, %v9905_v58  ;;  %v6414_v57 = vld [vmem:[%s9649_s4 + $0x188] sm:$0xff]  ;;  %v9910_v58 = vld [vmem:[#allocation47_spill] sm:$0xff] }
 0x3b4   : > { %9906 = vst [vmem:[#allocation66_spill] sm:$0xff] %v8862_v61  ;;  %5277 = vmatmul.bf16.gmra.mxu1 %v8543_v40  ;;  %v3149_v42 = vadd.f32 %v9910_v58, %v9909_v7  ;;  %4627 = vmatpush.bf16.msra.mxu3 %v6414_v57  ;;  %v9912_v44 = vld [vmem:[#allocation23_spill] sm:$0xff]  ;;  %v9914_v61 = vld [vmem:[#allocation22_spill] sm:$0xff]  ;;  %v9916_v58 = vld [vmem:[#allocation73_spill] sm:$0xff]  ;;  %v8899_v57 = vpop.f32.mrf.mxu0 }
 0x3b5   : > { %v3817_v46 = vadd.f32 %v9912_v44, %v8753_v23  ;;  %v3151_v7 = vadd.f32 %v9915_v29, %v9914_v61  ;;  %v8895_v56 = vld [vmem:[#allocation2 + $0x119] sm:$0xff]  ;;  %v8897_v33 = vld [vmem:[#allocation2 + $0x121] sm:$0xff]  ;;  %v4231_v61 = vpack.c.bf16 %v8819_v48, %v8788_v13  ;;  %v9923_v13 = vld [vmem:[#allocation29_spill] sm:$0xff] }
 0x3b6   : > { %4375 = vmatmul.bf16.gmra.mxu2 %v4230_v50  ;;  %v4824_v23 = vld [vmem:[#allocation2 + $0x108] sm:$0xff]  ;;  %v8909_v29 = vpack.c.bf16 %v8897_v33, %v8895_v56  ;;  %v3819_v48 = vadd.f32 %v9923_v13, %v8791_v10  ;;  %v4826_v10 = vld [vmem:[#allocation2 + $0x118] sm:$0xff] }
 0x3b7   : > { %3453 = vmatmul.bf16.gmra.mxu3 %v8870_v8  ;;  %v4131_v4 = vadd.f32 %v9916_v58, %v3817_v46  ;;  %v9929_v13 = vld [vmem:[#allocation32_spill] sm:$0xff] }
 0x3b8   : > { %5003 = vmatmul.bf16.gmra.mxu0 %v4858_v9 }
 0x3b9   : > { %v4336_v49 = vpop.f32.mrf.mxu2  ;;  %v8890_v50 = vpop.f32.mrf.mxu1 }
 0x3ba   : > { %v3414_v40 = vpop.f32.mrf.mxu3  ;;  %v8886_v36 = vadd.f32 %v4336_v49, %v4130_v30  ;;  %9913 = vst [vmem:[#allocation42_spill] sm:$0xff] %v8890_v50 }
 0x3bb   : > { %v8884_v6 = vadd.f32 %v3414_v40, %v3149_v42  ;;  %v4825_v42 = vld [vmem:[#allocation2 + $0x110] sm:$0xff]  ;;  %v9918_v40 = vld [vmem:[#allocation26_spill] sm:$0xff] }
 0x3bc   : > { %v3818_v44 = vadd.f32 %v9918_v40, %v8775_v17 }
 0x3be   : > { %v4132_v17 = vadd.f32 %v8329_v43, %v3818_v44  ;;  %v8933_v44 = vld [vmem:[#allocation2 + $0x129] sm:$0xff] }
 0x3c1   : > { %v4338_v47 = vpop.f32.mrf.mxu2  ;;  %v8914_v46 = vpop.f32.mrf.mxu1 }
 0x3c2   : > { %v3416_v9 = vpop.f32.mrf.mxu3  ;;  %v8903_v30 = vadd.f32 %v4338_v47, %v4131_v4  ;;  %9919 = vst [vmem:[#allocation19_spill] sm:$0xff] %v8914_v46  ;;  %v4859_v47 = vpack.c.bf16 %v4825_v42, %v4824_v23  ;;  %v9920_v4 = vld [vmem:[#allocation25_spill] sm:$0xff]  ;;  %v8926_v46 = vpop.f32.mrf.mxu0 }
 0x3c3   : > { %v8901_v49 = vadd.f32 %v3416_v9, %v3151_v7  ;;  %v9921_v7 = vld [vmem:[#allocation54_spill] sm:$0xff] }
 0x3c4   : > { %9917 = vst [vmem:[#allocation20_spill] sm:$0xff] %v8903_v30  ;;  %5282 = vmatmul.bf16.gmra.mxu1 %v8579_v0  ;;  %v3154_v58 = vadd.f32 %v9921_v7, %v9920_v4  ;;  %v9924_v30 = vld [vmem:[#allocation28_spill] sm:$0xff]  ;;  %v9927_v4 = vld [vmem:[#allocation78_spill] sm:$0xff] }
 0x3c6   : > { %4380 = vmatmul.bf16.gmra.mxu2 %v4231_v61  ;;  %v9925_v61 = vld [vmem:[#allocation58_spill] sm:$0xff] }
 0x3c7   : > { %3458 = vmatmul.bf16.gmra.mxu3 %v8909_v29  ;;  %v3156_v23 = vadd.f32 %v9925_v61, %v9924_v30 }
 0x3c8   : > { %5008 = vmatmul.bf16.gmra.mxu0 %v4859_v47  ;;  %v4133_v47 = vadd.f32 %v9927_v4, %v3819_v48  ;;  %v4232_v48 = vpack.c.bf16 %v8855_v3, %v8821_v28  ;;  %v9931_v4 = vld [vmem:[#allocation31_spill] sm:$0xff]  ;;  %v9934_v28 = vld [vmem:[#allocation38_spill] sm:$0xff] }
 0x3c9   : > { %v4341_v40 = vpop.f32.mrf.mxu2  ;;  %v8930_v42 = vpop.f32.mrf.mxu1  ;;  %v3821_v3 = vadd.f32 %v9934_v28, %v8824_v51  ;;  %v9938_v51 = vld [vmem:[#allocation41_spill] sm:$0xff] }
 0x3ca   : > { %v3419_v9 = vpop.f32.mrf.mxu3  ;;  %v8922_v0 = vadd.f32 %v4341_v40, %v4132_v17  ;;  %9926 = vst [vmem:[#allocation23_spill] sm:$0xff] %v8930_v42  ;;  %v4827_v40 = vld [vmem:[#allocation2 + $0x120] sm:$0xff]  ;;  %v8950_v61 = vpop.f32.mrf.mxu0  ;;  %v3822_v28 = vadd.f32 %v9938_v51, %v8844_v62 }
 0x3cb   : > { %v8920_v50 = vadd.f32 %v3419_v9, %v3154_v58  ;;  %v8935_v58 = vld [vmem:[#allocation2 + $0x131] sm:$0xff]  ;;  %9930 = vst [vmem:[#allocation50_spill] sm:$0xff] %v8950_v61  ;;  %v9935_v61 = vld [vmem:[#allocation35_spill] sm:$0xff] }
 0x3cc   : > { %9922 = vst [vmem:[#allocation47_spill] sm:$0xff] %v8922_v0  ;;  %v3820_v0 = vadd.f32 %v9929_v13, %v8810_v34  ;;  %v8945_v30 = vpack.c.bf16 %v8935_v58, %v8933_v44  ;;  %v9940_v62 = vld [vmem:[#allocation39_spill] sm:$0xff] }
 0x3ce   : > { %v4134_v34 = vadd.f32 %v8385_v59, %v3820_v0  ;;  %v8969_v0 = vld [vmem:[#allocation2 + $0x139] sm:$0xff] }
 0x3d1   : > { %v4343_v43 = vpop.f32.mrf.mxu2  ;;  %v8956_v42 = vpop.f32.mrf.mxu1 }
 0x3d2   : > { %v3421_v7 = vpop.f32.mrf.mxu3  ;;  %v8939_v9 = vadd.f32 %v4343_v43, %v4133_v47  ;;  %v9932_v47 = vld [vmem:[#allocation61_spill] sm:$0xff]  ;;  %9933 = vst [vmem:[#allocation73_spill] sm:$0xff] %v8956_v42  ;;  %v9944_v42 = vld [vmem:[#allocation43_spill] sm:$0xff] }
 0x3d3   : > { %v8937_v17 = vadd.f32 %v3421_v7, %v3156_v23  ;;  %v4860_v23 = vpack.c.bf16 %v4827_v40, %v4826_v10  ;;  %v3159_v7 = vadd.f32 %v9932_v47, %v9931_v4  ;;  %v8966_v40 = vpop.f32.mrf.mxu0  ;;  %v8971_v47 = vld [vmem:[#allocation2 + $0x141] sm:$0xff] }
 0x3d4   : > { %9928 = vst [vmem:[#allocation22_spill] sm:$0xff] %v8939_v9  ;;  %5287 = vmatmul.bf16.gmra.mxu1 %v8616_v15 }
 0x3d6   : > { %4385 = vmatmul.bf16.gmra.mxu2 %v4232_v48  ;;  %v9936_v48 = vld [vmem:[#allocation64_spill] sm:$0xff] }
 0x3d7   : > { %3463 = vmatmul.bf16.gmra.mxu3 %v8945_v30  ;;  %v3161_v10 = vadd.f32 %v9936_v48, %v9935_v61 }
 0x3d8   : > { %5013 = vmatmul.bf16.gmra.mxu0 %v4860_v23  ;;  %v4135_v23 = vadd.f32 %v8404_v21, %v3821_v3  ;;  %v8983_v21 = vpack.c.bf16 %v8971_v47, %v8969_v0  ;;  %v4233_v3 = vpack.c.bf16 %v8895_v56, %v8857_v35 }
 0x3d9   : > { %v4346_v13 = vpop.f32.mrf.mxu2  ;;  %v8979_v61 = vpop.f32.mrf.mxu1 }
 0x3da   : > { %v3424_v43 = vpop.f32.mrf.mxu3  ;;  %v8960_v9 = vadd.f32 %v4346_v13, %v4134_v34  ;;  %v4829_v13 = vld [vmem:[#allocation2 + $0x130] sm:$0xff]  ;;  %9939 = vst [vmem:[#allocation25_spill] sm:$0xff] %v8979_v61 }
 0x3db   : > { %v8958_v15 = vadd.f32 %v3424_v43, %v3159_v7  ;;  %v4828_v43 = vld [vmem:[#allocation2 + $0x128] sm:$0xff]  ;;  %v8995_v61 = vpop.f32.mrf.mxu0 }
 0x3dc   : > { %v4861_v48 = vpack.c.bf16 %v4829_v13, %v4828_v43  ;;  %v9942_v43 = vld [vmem:[#allocation44_spill] sm:$0xff] }
 0x3dd   : > { %v3823_v13 = vadd.f32 %v9942_v43, %v8860_v12  ;;  %v9947_v12 = vld [vmem:[#allocation46_spill] sm:$0xff] }
 0x3de   : > { %v3824_v43 = vadd.f32 %v9947_v12, %v8884_v6 }
 0x3e0   : > { %v4138_v6 = vadd.f32 %v8442_v18, %v3824_v43  ;;  %v9952_v43 = vld [vmem:[#allocation75_spill] sm:$0xff] }
 0x3e1   : > { %v4348_v59 = vpop.f32.mrf.mxu2 }
 0x3e2   : > { %v3426_v4 = vpop.f32.mrf.mxu3  ;;  %v8975_v34 = vadd.f32 %v4348_v59, %v4135_v23  ;;  %v9941_v23 = vld [vmem:[#allocation68_spill] sm:$0xff]  ;;  %v4136_v59 = vadd.f32 %v8415_v20, %v3822_v28 }
 0x3e3   : > { %v8973_v7 = vadd.f32 %v3426_v4, %v3161_v10  ;;  %v6413_v10 = vld [vmem:[%s9649_s4 + $0x180] sm:$0xff]  ;;  %v3164_v4 = vadd.f32 %v9941_v23, %v9940_v62  ;;  %v9010_v23 = vld [vmem:[#allocation2 + $0x151] sm:$0xff] }
 0x3e4   : > { %9937 = vst [vmem:[#allocation26_spill] sm:$0xff] %v8975_v34  ;;  %5292 = vmatmul.bf16.gmra.mxu1 %v8658_v45  ;;  %4628 = vmatpush.bf16.msra.mxu3 %v6413_v10  ;;  %v9945_v34 = vld [vmem:[#allocation70_spill] sm:$0xff]  ;;  %v9008_v10 = vld [vmem:[#allocation2 + $0x149] sm:$0xff] }
 0x3e5   : > { %v3166_v62 = vadd.f32 %v9945_v34, %v9944_v42  ;;  %v4234_v42 = vpack.c.bf16 %v8933_v44, %v8897_v33 }
 0x3e6   : > { %4390 = vmatmul.bf16.gmra.mxu2 %v4233_v3  ;;  %v9003_v3 = vpop.f32.mrf.mxu1 }
 0x3e7   : > { %3468 = vmatmul.bf16.gmra.mxu3 %v8983_v21  ;;  %9943 = vst [vmem:[#allocation54_spill] sm:$0xff] %v9003_v3  ;;  %v9018_v3 = vpop.f32.mrf.mxu0 }
 0x3e8   : > { %5018 = vmatmul.bf16.gmra.mxu0 %v4861_v48  ;;  %v4137_v48 = vadd.f32 %v8431_v25, %v3823_v13  ;;  %v9022_v25 = vpack.c.bf16 %v9010_v23, %v9008_v10 }
 0x3e9   : > { %v4351_v45 = vpop.f32.mrf.mxu2 }
 0x3ea   : > { %v3429_v51 = vpop.f32.mrf.mxu3  ;;  %v8999_v56 = vadd.f32 %v4351_v45, %v4136_v59  ;;  %v4831_v45 = vld [vmem:[#allocation2 + $0x140] sm:$0xff] }
 0x3eb   : > { %v8997_v35 = vadd.f32 %v3429_v51, %v3164_v4  ;;  %v4830_v51 = vld [vmem:[#allocation2 + $0x138] sm:$0xff] }
 0x3ec   : > { %v4862_v34 = vpack.c.bf16 %v4831_v45, %v4830_v51 }
 0x3ee   : > { %v9028_v13 = vpop.f32.mrf.mxu1 }
 0x3ef   : > { %9948 = vst [vmem:[#allocation28_spill] sm:$0xff] %v9028_v13  ;;  %v9038_v33 = vpop.f32.mrf.mxu0 }
 0x3f1   : > { %v4353_v28 = vpop.f32.mrf.mxu2 }
 0x3f2   : > { %v3431_v20 = vpop.f32.mrf.mxu3  ;;  %v9014_v59 = vadd.f32 %v4353_v28, %v4137_v48 }
 0x3f3   : > { %v9012_v4 = vadd.f32 %v3431_v20, %v3166_v62  ;;  %v9949_v20 = vld [vmem:[#allocation72_spill] sm:$0xff] }
 0x3f4   : > { %9946 = vst [vmem:[#allocation29_spill] sm:$0xff] %v9014_v59  ;;  %5297 = vmatmul.bf16.gmra.mxu1 %v8697_v31  ;;  %v9951_v31 = vld [vmem:[#allocation49_spill] sm:$0xff] }
 0x3f5   : > { %v3825_v59 = vadd.f32 %v9951_v31, %v8901_v49  ;;  %v9954_v49 = vld [vmem:[#allocation53_spill] sm:$0xff] }
 0x3f6   : > { %4395 = vmatmul.bf16.gmra.mxu2 %v4234_v42  ;;  %v9041_v42 = vld [vmem:[#allocation2 + $0x159] sm:$0xff]  ;;  %v9045_v18 = vpop.f32.mrf.mxu1  ;;  %v3826_v31 = vadd.f32 %v9954_v49, %v8920_v50  ;;  %v9955_v49 = vld [vmem:[#allocation77_spill] sm:$0xff] }
 0x3f7   : > { %3473 = vmatmul.bf16.gmra.mxu3 %v9022_v25  ;;  %v4139_v44 = vadd.f32 %v8464_v53, %v3825_v59  ;;  %v4235_v59 = vpack.c.bf16 %v8969_v0, %v8935_v58 }
 0x3f8   : > { %5023 = vmatmul.bf16.gmra.mxu0 %v4862_v34  ;;  %v9043_v34 = vld [vmem:[#allocation2 + $0x161] sm:$0xff] }
 0x3f9   : > { %v4356_v48 = vpop.f32.mrf.mxu2  ;;  %v9056_v53 = vpack.c.bf16 %v9043_v34, %v9041_v42 }
 0x3fa   : > { %v3434_v62 = vpop.f32.mrf.mxu3  ;;  %v9034_v12 = vadd.f32 %v4356_v48, %v4138_v6  ;;  %v4832_v48 = vld [vmem:[#allocation2 + $0x148] sm:$0xff] }
 0x3fb   : > { %v9032_v28 = vadd.f32 %v3434_v62, %v9949_v20  ;;  %v4833_v20 = vld [vmem:[#allocation2 + $0x150] sm:$0xff] }
 0x3fd   : > { %9950 = vst [vmem:[#allocation58_spill] sm:$0xff] %v9032_v28 }
 0x3fe   : > { %v9072_v58 = vpop.f32.mrf.mxu1 }
 0x401   : > { %v4358_v45 = vpop.f32.mrf.mxu2 }
 0x402   : > { %v3436_v51 = vpop.f32.mrf.mxu3  ;;  %v9050_v6 = vadd.f32 %v4358_v45, %v4139_v44  ;;  %v9062_v44 = vpop.f32.mrf.mxu0  ;;  %v4140_v45 = vadd.f32 %v8478_v19, %v3826_v31  ;;  %v9959_v31 = vld [vmem:[#allocation80_spill] sm:$0xff] }
 0x403   : > { %v9048_v62 = vadd.f32 %v3436_v51, %v9952_v43  ;;  %v4863_v51 = vpack.c.bf16 %v4833_v20, %v4832_v48 }
 0x404   : > { %5302 = vmatmul.bf16.gmra.mxu1 %v8729_v24  ;;  %v9958_v24 = vld [vmem:[#allocation56_spill] sm:$0xff] }
 0x405   : > { %9953 = vst [vmem:[#allocation78_spill] sm:$0xff] %v9048_v62  ;;  %v3827_v28 = vadd.f32 %v9958_v24, %v8937_v17  ;;  %v9962_v17 = vld [vmem:[#allocation60_spill] sm:$0xff] }
 0x406   : > { %4400 = vmatmul.bf16.gmra.mxu2 %v4235_v59  ;;  %v9075_v59 = vld [vmem:[#allocation2 + $0x169] sm:$0xff]  ;;  %v3828_v24 = vadd.f32 %v9962_v17, %v8958_v15 }
 0x407   : > { %3478 = vmatmul.bf16.gmra.mxu3 %v9056_v53  ;;  %v4141_v0 = vadd.f32 %v8497_v11, %v3827_v28  ;;  %v4236_v28 = vpack.c.bf16 %v9008_v10, %v8971_v47 }
 0x408   : > { %5028 = vmatmul.bf16.gmra.mxu0 %v4863_v51  ;;  %v9077_v51 = vld [vmem:[#allocation2 + $0x171] sm:$0xff] }
 0x409   : > { %v4361_v50 = vpop.f32.mrf.mxu2  ;;  %v9090_v11 = vpack.c.bf16 %v9077_v51, %v9075_v59 }
 0x40a   : > { %v3439_v43 = vpop.f32.mrf.mxu3  ;;  %v9068_v62 = vadd.f32 %v4361_v50, %v4140_v45  ;;  %v9079_v19 = vpop.f32.mrf.mxu0  ;;  %v4834_v50 = vld [vmem:[#allocation2 + $0x158] sm:$0xff] }
 0x40b   : > { %v9066_v13 = vadd.f32 %v3439_v43, %v9955_v49  ;;  %v4835_v49 = vld [vmem:[#allocation2 + $0x160] sm:$0xff] }
 0x40c   : > { %9957 = vst [vmem:[#allocation31_spill] sm:$0xff] %v9068_v62 }
 0x40d   : > { %9956 = vst [vmem:[#allocation32_spill] sm:$0xff] %v9066_v13  ;;  %v9095_v13 = vpop.f32.mrf.mxu1 }
 0x411   : > { %v4363_v20 = vpop.f32.mrf.mxu2 }
 0x412   : > { %v3441_v48 = vpop.f32.mrf.mxu3  ;;  %v9084_v45 = vadd.f32 %v4363_v20, %v4141_v0  ;;  %v4864_v0 = vpack.c.bf16 %v4835_v49, %v4834_v50  ;;  %v9106_v47 = vpop.f32.mrf.mxu0 }
 0x413   : > { %v9082_v43 = vadd.f32 %v3441_v48, %v9959_v31  ;;  %v4142_v48 = vadd.f32 %v8508_v5, %v3828_v24  ;;  %v9963_v31 = vld [vmem:[#allocation82_spill] sm:$0xff]  ;;  %v9111_v5 = vld [vmem:[#allocation2 + $0x181] sm:$0xff] }
 0x414   : > { %9961 = vst [vmem:[#allocation38_spill] sm:$0xff] %v9084_v45  ;;  %5307 = vmatmul.bf16.gmra.mxu1 %v8763_v37  ;;  %v9965_v37 = vld [vmem:[#allocation63_spill] sm:$0xff]  ;;  %v9966_v24 = vld [vmem:[#allocation84_spill] sm:$0xff] }
 0x415   : > { %9960 = vst [vmem:[#allocation61_spill] sm:$0xff] %v9082_v43  ;;  %v3829_v45 = vadd.f32 %v9965_v37, %v8973_v7  ;;  %v9108_v10 = vpop.f32.mrf.mxu1  ;;  %v9968_v7 = vld [vmem:[#allocation67_spill] sm:$0xff] }
 0x416   : > { %4405 = vmatmul.bf16.gmra.mxu2 %v4236_v28 }
 0x417   : > { %3483 = vmatmul.bf16.gmra.mxu3 %v9090_v11  ;;  %v4143_v28 = vadd.f32 %v8527_v1, %v3829_v45  ;;  %v4237_v1 = vpack.c.bf16 %v9041_v42, %v9010_v23  ;;  %v9971_v23 = vld [vmem:[#allocation69_spill] sm:$0xff] }
 0x418   : > { %5033 = vmatmul.bf16.gmra.mxu0 %v4864_v0  ;;  %v3274_v0 = vld [vmem:[#allocation2 + $0x179] sm:$0xff]  ;;  %v3831_v42 = vadd.f32 %v9971_v23, %v9012_v4  ;;  %v4238_v4 = vpack.c.bf16 %v9075_v59, %v9043_v34 }
 0x419   : > { %v4366_v15 = vpop.f32.mrf.mxu2  ;;  %v9121_v37 = vpack.c.bf16 %v9111_v5, %v3274_v0 }
 0x41a   : > { %v3444_v20 = vpop.f32.mrf.mxu3  ;;  %v9102_v43 = vadd.f32 %v4366_v15, %v4142_v48  ;;  %v4836_v48 = vld [vmem:[#allocation2 + $0x168] sm:$0xff]  ;;  %v4837_v15 = vld [vmem:[#allocation2 + $0x170] sm:$0xff]  ;;  %v9126_v45 = vpop.f32.mrf.mxu0 }
 0x41b   : > { %v9100_v17 = vadd.f32 %v3444_v20, %v9963_v31  ;;  %v3830_v31 = vadd.f32 %v9968_v7, %v8997_v35 }
 0x41d   : > { %9964 = vst [vmem:[#allocation35_spill] sm:$0xff] %v9100_v17  ;;  %v9130_v35 = vpop.f32.mrf.mxu1  ;;  %v4484_v17 = vld [vmem:[#allocation2 + $0x37] sm:$0xff] }
 0x421   : > { %v4368_v49 = vpop.f32.mrf.mxu2 }
 0x422   : > { %v3446_v50 = vpop.f32.mrf.mxu3  ;;  %v9116_v20 = vadd.f32 %v4368_v49, %v4143_v28  ;;  %v4865_v28 = vpack.c.bf16 %v4837_v15, %v4836_v48 }
 0x423   : > { %v9114_v62 = vadd.f32 %v3446_v50, %v9966_v24  ;;  %v4144_v50 = vadd.f32 %v8538_v63, %v3830_v31 }
 0x424   : > { %5312 = vmatmul.bf16.gmra.mxu1 %v8801_v26 }
 0x425   : > { %9967 = vst [vmem:[#allocation64_spill] sm:$0xff] %v9114_v62  ;;  %v9139_v62 = vpop.f32.mrf.mxu0 }
 0x426   : > { %4410 = vmatmul.bf16.gmra.mxu2 %v4237_v1  ;;  %v4145_v1 = vadd.f32 %v8560_v32, %v3831_v42 }
 0x427   : > { %3488 = vmatmul.bf16.gmra.mxu3 %v9121_v37 }
 0x428   : > { %5038 = vmatmul.bf16.gmra.mxu0 %v4865_v28  ;;  %v4485_v28 = vld [vmem:[#allocation2 + $0x3f] sm:$0xff] }
 0x429   : > { %v4371_v24 = vpop.f32.mrf.mxu2 }
 0x42a   : > { %v3449_v49 = vpop.f32.mrf.mxu3  ;;  %v9135_v26 = vadd.f32 %v4371_v24, %v4144_v50  ;;  %v9147_v50 = vpop.f32.mrf.mxu1  ;;  %v4532_v24 = vpack.c.bf16 %v4485_v28, %v4484_v17  ;;  %v9975_v17 = vld [vmem:[#allocation89_spill] sm:$0xff] }
 0x42b   : > { %v9133_v7 = vadd.f32 %v3449_v49, %v8429_v38  ;;  %v4838_v38 = vld [vmem:[#allocation2 + $0x178] sm:$0xff]  ;;  %v4839_v49 = vld [vmem:[#allocation2 + $0x180] sm:$0xff] }
 0x42c   : > { %9970 = vst [vmem:[#allocation39_spill] sm:$0xff] %v9135_v26  ;;  %v4866_v32 = vpack.c.bf16 %v4839_v49, %v4838_v38  ;;  %v4239_v38 = vpack.c.bf16 %v3274_v0, %v9077_v51  ;;  %v9978_v51 = vld [vmem:[#allocation92_spill] sm:$0xff] }
 0x42d   : > { %9969 = vst [vmem:[#allocation41_spill] sm:$0xff] %v9133_v7 }
 0x431   : > { %v4373_v15 = vpop.f32.mrf.mxu2 }
 0x432   : > { %v3451_v48 = vpop.f32.mrf.mxu3  ;;  %v9145_v31 = vadd.f32 %v4373_v15, %v4145_v1  ;;  %v9157_v1 = vpop.f32.mrf.mxu1  ;;  %v4487_v15 = vld [vmem:[#allocation2 + $0x4f] sm:$0xff] }
 0x433   : > { %v9143_v63 = vadd.f32 %v3451_v48, %v8440_v22  ;;  %v9152_v22 = vpop.f32.mrf.mxu0 }
 0x434   : > { %9973 = vst [vmem:[#allocation44_spill] sm:$0xff] %v9145_v31  ;;  %5317 = vmatmul.bf16.gmra.mxu1 %v8836_v60  ;;  %v4486_v60 = vld [vmem:[#allocation2 + $0x47] sm:$0xff] }
 0x435   : > { %9972 = vst [vmem:[#allocation68_spill] sm:$0xff] %v9143_v63  ;;  %v4840_v63 = vld [vmem:[#allocation2 + $0x188] sm:$0xff]  ;;  %v4533_v59 = vpack.c.bf16 %v4487_v15, %v4486_v60 }
 0x436   : > { %4415 = vmatmul.bf16.gmra.mxu2 %v4238_v4  ;;  %v9174_v15 = vld [vmem:[#allocation2 + $0x189] sm:$0xff] }
 0x437   : > { %4629 = vmatmul.bf16.vlgmr.msra.gmra.mxu3 %v4532_v24  ;;  %v9184_v60 = vld [vmem:[#allocation2 + $0x8] sm:$0xff] }
 0x438   : > { %5043 = vmatmul.bf16.gmra.mxu0 %v4866_v32  ;;  %9980 = vst [vmem:[#allocation49_spill] sm:$0xff] %v9184_v60 }
 0x43a   : > { %v3454_v23 = vpop.f32.mrf.mxu3  ;;  %v9167_v49 = vpop.f32.mrf.mxu1 }
 0x43b   : > { %v9155_v42 = vadd.f32 %v3454_v23, %v8462_v41  ;;  %v9162_v34 = vpop.f32.mrf.mxu0  ;;  %v4867_v41 = vpack.c.bf16 %v8686_v54, %v4840_v63  ;;  %v4842_v54 = vld [vmem:[#allocation2 + $0x198] sm:$0xff] }
 0x43d   : > { %9974 = vst [vmem:[#allocation43_spill] sm:$0xff] %v9155_v42 }
 0x442   : > { %v3456_v48 = vpop.f32.mrf.mxu3 }
 0x443   : > { %v9160_v28 = vadd.f32 %v3456_v48, %v9975_v17  ;;  %v9172_v32 = vpop.f32.mrf.mxu0  ;;  %v4489_v48 = vld [vmem:[#allocation2 + $0x5f] sm:$0xff]  ;;  %v4488_v17 = vld [vmem:[#allocation2 + $0x57] sm:$0xff] }
 0x444   : > { %5322 = vmatmul.bf16.gmra.mxu1 %v8870_v8  ;;  %v9176_v8 = vpop.f32.mrf.mxu1  ;;  %v4534_v63 = vpack.c.bf16 %v4489_v48, %v4488_v17  ;;  %v4490_v17 = vld [vmem:[#allocation2 + $0x67] sm:$0xff] }
 0x445   : > { %9976 = vst [vmem:[#allocation70_spill] sm:$0xff] %v9160_v28 }
 0x446   : > { %4420 = vmatmul.bf16.gmra.mxu2 %v4239_v38 }
 0x447   : > { %4634 = vmatmul.bf16.gmra.mxu3 %v4533_v59  ;;  %v4868_v59 = vpack.c.bf16 %v9184_v60, %v4842_v54 }
 0x448   : > { %5048 = vmatmul.bf16.gmra.mxu0 %v4867_v41 }
 0x44a   : > { %v3459_v24 = vpop.f32.mrf.mxu3 }
 0x44b   : > { %v9170_v4 = vadd.f32 %v3459_v24, %v8495_v52  ;;  %v4240_v52 = vpack.c.bf16 %v9174_v15, %v9111_v5  ;;  %v9187_v38 = vpop.f32.mrf.mxu0 }
 0x44d   : > { %9977 = vst [vmem:[#allocation46_spill] sm:$0xff] %v9170_v4 }
 0x452   : > { %v3461_v23 = vpop.f32.mrf.mxu3 }
 0x453   : > { %v9179_v0 = vadd.f32 %v3461_v23, %v9978_v51  ;;  %v9192_v23 = vpop.f32.mrf.mxu1  ;;  %v9194_v51 = vld [vmem:[#allocation2 + $0x199] sm:$0xff] }
 0x454   : > { %5327 = vmatmul.bf16.gmra.mxu1 %v8909_v29  ;;  %v4491_v29 = vld [vmem:[#allocation2 + $0x6f] sm:$0xff] }
 0x455   : > { %9979 = vst [vmem:[#allocation72_spill] sm:$0xff] %v9179_v0  ;;  %v4535_v54 = vpack.c.bf16 %v4491_v29, %v4490_v17  ;;  %v4492_v29 = vld [vmem:[#allocation2 + $0x77] sm:$0xff] }
 0x456   : > { %4425 = vmatmul.bf16.gmra.mxu2 %v4240_v52 }
 0x457   : > { %4639 = vmatmul.bf16.gmra.mxu3 %v4534_v63  ;;  %v9199_v63 = vld [vmem:[#allocation2 + $0x191] sm:$0xff] }
 0x458   : > { %5053 = vmatmul.bf16.gmra.mxu0 %v4868_v59  ;;  %v4241_v52 = vpack.c.bf16 %v9194_v51, %v9199_v63 }
 0x45a   : > { %v3464_v41 = vpop.f32.mrf.mxu3 }
 0x45b   : > { %v9190_v24 = vadd.f32 %v3464_v41, %v8525_v55  ;;  %v9204_v55 = vpop.f32.mrf.mxu1  ;;  %v9983_v41 = vld [vmem:[#allocation96_spill] sm:$0xff] }
 0x45d   : > { %9981 = vst [vmem:[#allocation75_spill] sm:$0xff] %v9190_v24 }
 0x462   : > { %v3466_v48 = vpop.f32.mrf.mxu3 }
 0x463   : > { %v9197_v5 = vadd.f32 %v3466_v48, %v8536_v2  ;;  %v9209_v0 = vpop.f32.mrf.mxu1  ;;  %v4493_v48 = vld [vmem:[#allocation2 + $0x7f] sm:$0xff] }
 0x464   : > { %5332 = vmatmul.bf16.gmra.mxu1 %v8945_v30  ;;  %v4536_v30 = vpack.c.bf16 %v4493_v48, %v4492_v29  ;;  %v4497_v29 = vld [vmem:[#allocation2 + $0x9f] sm:$0xff] }
 0x465   : > { %9982 = vst [vmem:[#allocation53_spill] sm:$0xff] %v9197_v5 }
 0x466   : > { %4430 = vmatmul.bf16.gmra.mxu2 %v4241_v52 }
 0x467   : > { %4644 = vmatmul.bf16.gmra.mxu3 %v4535_v54 }
 0x46a   : > { %v3469_v59 = vpop.f32.mrf.mxu3 }
 0x46b   : > { %v9207_v24 = vadd.f32 %v3469_v59, %v9983_v41  ;;  %v9215_v4 = vpop.f32.mrf.mxu1  ;;  %v4495_v59 = vld [vmem:[#allocation2 + $0x8f] sm:$0xff] }
 0x46d   : > { %9984 = vst [vmem:[#allocation77_spill] sm:$0xff] %v9207_v24  ;;  %v4494_v24 = vld [vmem:[#allocation2 + $0x87] sm:$0xff] }
 0x472   : > { %v3471_v2 = vpop.f32.mrf.mxu3 }
 0x473   : > { %v9212_v5 = vadd.f32 %v3471_v2, %v8572_v39  ;;  %v9223_v28 = vpop.f32.mrf.mxu1  ;;  %v4537_v39 = vpack.c.bf16 %v4495_v59, %v4494_v24  ;;  %v9991_v59 = vld [vmem:[#allocation3_spill] sm:$0xff] }
 0x474   : > { %5337 = vmatmul.bf16.gmra.mxu1 %v8983_v21 }
 0x475   : > { %9985 = vst [vmem:[#allocation56_spill] sm:$0xff] %v9212_v5  ;;  %v4500_v5 = vld [vmem:[#allocation2 + $0xb7] sm:$0xff] }
 0x477   : > { %4649 = vmatmul.bf16.gmra.mxu3 %v4536_v30  ;;  %v9989_v30 = vld [vmem:[#allocation10_spill] sm:$0xff] }
 0x47a   : > { %v3474_v17 = vpop.f32.mrf.mxu3 }
 0x47b   : > { %v9218_v54 = vadd.f32 %v3474_v17, %v8593_v14  ;;  %v9229_v48 = vpop.f32.mrf.mxu1 }
 0x47d   : > { %9986 = vst [vmem:[#allocation80_spill] sm:$0xff] %v9218_v54 }
 0x482   : > { %v3476_v52 = vpop.f32.mrf.mxu3 }
 0x483   : > { %v9221_v41 = vadd.f32 %v3476_v52, %v8606_v27  ;;  %v4496_v27 = vld [vmem:[#allocation2 + $0x97] sm:$0xff]  ;;  %v9235_v24 = vpop.f32.mrf.mxu1 }
 0x484   : > { %5342 = vmatmul.bf16.gmra.mxu1 %v9022_v25  ;;  %v4538_v52 = vpack.c.bf16 %v4497_v29, %v4496_v27  ;;  %v9995_v29 = vld [vmem:[#allocation51_spill] sm:$0xff] }
 0x485   : > { %9987 = vst [vmem:[#allocation60_spill] sm:$0xff] %v9221_v41  ;;  %v9993_v41 = vld [vmem:[#allocation36_spill] sm:$0xff] }
 0x487   : > { %4654 = vmatmul.bf16.gmra.mxu3 %v4537_v39 }
 0x48a   : > { %v3479_v21 = vpop.f32.mrf.mxu3 }
 0x48b   : > { %v9227_v2 = vadd.f32 %v3479_v21, %v8633_v16  ;;  %v4499_v21 = vld [vmem:[#allocation2 + $0xaf] sm:$0xff] }
 0x48d   : > { %9988 = vst [vmem:[#allocation82_spill] sm:$0xff] %v9227_v2  ;;  %v9240_v2 = vpop.f32.mrf.mxu1 }
 0x492   : > { %v3481_v14 = vpop.f32.mrf.mxu3 }
 0x493   : > { %v9232_v17 = vadd.f32 %v3481_v14, %v9989_v30  ;;  %v4498_v14 = vld [vmem:[#allocation2 + $0xa7] sm:$0xff] }
 0x494   : > { %5347 = vmatmul.bf16.gmra.mxu1 %v9056_v53  ;;  %v4539_v30 = vpack.c.bf16 %v4499_v21, %v4498_v14  ;;  %v9999_v21 = vld [vmem:[#allocation6_spill] sm:$0xff] }
 0x495   : > { %9990 = vst [vmem:[#allocation63_spill] sm:$0xff] %v9232_v17 }
 0x497   : > { %4659 = vmatmul.bf16.gmra.mxu3 %v4538_v52  ;;  %v9249_v52 = vpop.f32.mrf.mxu1 }
 0x49a   : > { %v3484_v25 = vpop.f32.mrf.mxu3 }
 0x49b   : > { %v9238_v39 = vadd.f32 %v3484_v25, %v9991_v59  ;;  %v4501_v59 = vld [vmem:[#allocation2 + $0xbf] sm:$0xff] }
 0x49d   : > { %9992 = vst [vmem:[#allocation84_spill] sm:$0xff] %v9238_v39  ;;  %v9997_v39 = vld [vmem:[#allocation18_spill] sm:$0xff] }
 0x4a2   : > { %v3486_v16 = vpop.f32.mrf.mxu3 }
 0x4a3   : > { %v9243_v54 = vadd.f32 %v3486_v16, %v9993_v41  ;;  %v4540_v41 = vpack.c.bf16 %v4501_v59, %v4500_v5  ;;  %v9255_v16 = vpop.f32.mrf.mxu1 }
 0x4a4   : > { %5352 = vmatmul.bf16.gmra.mxu1 %v9090_v11 }
 0x4a5   : > { %9994 = vst [vmem:[#allocation67_spill] sm:$0xff] %v9243_v54 }
 0x4a7   : > { %4664 = vmatmul.bf16.gmra.mxu3 %v4539_v30  ;;  %v10000_v30 = vld [vmem:[#allocation48_spill] sm:$0xff] }
 0x4aa   : > { %v3489_v53 = vpop.f32.mrf.mxu3 }
 0x4ab   : > { %v9247_v27 = vadd.f32 %v3489_v53, %v9995_v29  ;;  %v9262_v29 = vld [vmem:[%s9650_s5] ss:$0 sm:$0xff]  ;;  %v9271_v5 = vpop.f32.mrf.mxu1 }
 0x4ad   : > { %9996 = vst [vmem:[#allocation69_spill] sm:$0xff] %v9247_v27  ;;  %v279_v27 = vld [vmem:[%s6613_s22] sm:$0xff]  }
 0x4ae   : > { %v769_v31 = vunpack.c.h.bf16 %v279_v27 }
 0x4b2   : > { %v3491_v25 = vpop.f32.mrf.mxu3 }
 0x4b3   : > { %v9252_v17 = vadd.f32 %v3491_v25, %v9997_v39  ;;  %v768_v25 = vunpack.c.l.bf16 %v279_v27  ;;  %v9281_v26 = vpop.f32.mrf.mxu1  ;;  %v4504_v27 = vld [vmem:[#allocation2 + $0xd7] sm:$0xff] }
 0x4b4   : > { %5357 = vmatmul.bf16.gmra.mxu1 %v9121_v37  ;;  %v9269_v37 = vld [vmem:[%s9651_s6] ss:$0 sm:$0xff] }
 0x4b5   : > { %9998 = vst [vmem:[#allocation89_spill] sm:$0xff] %v9252_v17 }
 0x4b7   : > { %4669 = vmatmul.bf16.gmra.mxu3 %v4540_v41 }
 0x4ba   : > { %v4630_v11 = vpop.f32.mrf.mxu3 }
 0x4bb   : > { %v4750_v14 = vadd.f32 %v4630_v11, %v9999_v21  ;;  %v4503_v11 = vld [vmem:[#allocation2 + $0xcf] sm:$0xff] }
 0x4bc   : > { %v10001_v21 = vld [vmem:[#allocation21_spill] sm:$0xff] }
 0x4bd   : > { %v5064_v53 = vadd.f32 %v10000_v30, %v4750_v14  ;;  %v5181_v30 = vpack.c.bf16 %v9199_v63, %v9174_v15  ;;  %v10003_v15 = vld [vmem:[#allocation24_spill] sm:$0xff] }
 0x4bf   : > { %v5378_v39 = vadd.f32 %v9045_v18, %v5064_v53  ;;  %v4502_v18 = vld [vmem:[#allocation2 + $0xc7] sm:$0xff] }
 0x4c0   : > { %v10002_v53 = vld [vmem:[#allocation52_spill] sm:$0xff]  ;;  %v4541_v42 = vpack.c.bf16 %v4503_v11, %v4502_v18  ;;  %v10005_v18 = vld [vmem:[#allocation27_spill] sm:$0xff] }
 0x4c1   : > { %v5430_v59 = vmul.f32 %v9262_v29, %v5378_v39 }
 0x4c2   : > { %v4632_v41 = vpop.f32.mrf.mxu3 }
 0x4c3   : > { %v4751_v14 = vadd.f32 %v4632_v41, %v10001_v21  ;;  %v5482_v17 = vadd.f32 %v9269_v37, %v5430_v59 }
 0x4c4   : > { %5362 = vmatmul.bf16.gmra.mxu1 %v5181_v30  ;;  %v281_v30 = vld [vmem:[%s6613_s22 + $0x8] sm:$0xff]  }
 0x4c5   : > { %v5065_v54 = vadd.f32 %v10002_v53, %v4751_v14  ;;  %v5530_v7 = vadd.f32 %v5482_v17, %v768_v25  ;;  %v10004_v14 = vld [vmem:[#allocation55_spill] sm:$0xff] }
 0x4c6   : > { %v4505_v25 = vld [vmem:[#allocation2 + $0xdf] sm:$0xff] }
 0x4c7   : > { %v5379_v60 = vadd.f32 %v9072_v58, %v5065_v54  ;;  %4674 = vmatmul.bf16.gmra.mxu3 %v4541_v42  ;;  %v5578_v39 = vmax.f32 %v5530_v7, 0.0  ;;  %v5157_v42 = vld [vmem:[#allocation2 + $0x1a1] sm:$0xff]  ;;  %v770_v7 = vunpack.c.l.bf16 %v281_v30 }
 0x4c9   : > { %5626 = vxpose.xlu0.b32.start [1/16] (narrow) %v5578_v39, 8  ;;  %v5431_v41 = vmul.f32 %v9262_v29, %v5379_v60 }
 0x4ca   : > { %v4635_v21 = vpop.f32.mrf.mxu3 }
 0x4cb   : > { %v4752_v63 = vadd.f32 %v4635_v21, %v10003_v15  ;;  %v5483_v59 = vadd.f32 %v9269_v37, %v5431_v41  ;;  %v5182_v21 = vpack.c.bf16 %v5157_v42, %v9194_v51  ;;  %v9292_v15 = vpop.f32.mrf.mxu1  ;;  %v10008_v51 = vld [vmem:[#allocation30_spill] sm:$0xff] }
 0x4cc   : > { %10006 = vst [vmem:[#allocation92_spill] sm:$0xff] %v9292_v15 }
 0x4cd   : > { %v5066_v53 = vadd.f32 %v10004_v14, %v4752_v63  ;;  %v5531_v11 = vadd.f32 %v5483_v59, %v769_v31  ;;  %v10007_v31 = vld [vmem:[#allocation13_spill] sm:$0xff]  ;;  %v4542_v63 = vpack.c.bf16 %v4505_v25, %v4504_v27 }
 0x4cf   : > { %v5380_v17 = vadd.f32 %v9095_v13, %v5066_v53  ;;  %v5579_v58 = vmax.f32 %v5531_v11, 0.0  ;;  %v771_v11 = vunpack.c.h.bf16 %v281_v30  ;;  %v4506_v30 = vld [vmem:[#allocation2 + $0xe7] sm:$0xff] }
 0x4d1   : > { %5627 = vxpose.xlu0.b32.cont [2/16] (narrow) %v5579_v58, 8  ;;  %v5432_v54 = vmul.f32 %v9262_v29, %v5380_v17 }
 0x4d2   : > { %v4637_v60 = vpop.f32.mrf.mxu3 }
 0x4d3   : > { %v4753_v39 = vadd.f32 %v4637_v60, %v10005_v18  ;;  %v5484_v41 = vadd.f32 %v9269_v37, %v5432_v54  ;;  %v10009_v60 = vld [vmem:[#allocation15_spill] sm:$0xff] }
 0x4d4   : > { %5367 = vmatmul.bf16.gmra.mxu1 %v5182_v21 }
 0x4d5   : > { %v5067_v13 = vadd.f32 %v10007_v31, %v4753_v39  ;;  %v5532_v59 = vadd.f32 %v5484_v41, %v770_v7  ;;  %v283_v39 = vld [vmem:[%s6613_s22 + $0x10] sm:$0xff]   ;;  %v10010_v31 = vld [vmem:[#allocation59_spill] sm:$0xff] }
 0x4d6   : > { %v4507_v41 = vld [vmem:[#allocation2 + $0xef] sm:$0xff] }
 0x4d7   : > { %v5381_v14 = vadd.f32 %v9108_v10, %v5067_v13  ;;  %4679 = vmatmul.bf16.gmra.mxu3 %v4542_v63  ;;  %v5580_v53 = vmax.f32 %v5532_v59, 0.0  ;;  %v772_v10 = vunpack.c.l.bf16 %v283_v39  ;;  %v10011_v59 = vld [vmem:[#allocation17_spill] sm:$0xff] }
 0x4d9   : > { %5628 = vxpose.xlu0.b32.cont [3/16] (narrow) %v5580_v53, 8  ;;  %v5433_v17 = vmul.f32 %v9262_v29, %v5381_v14  ;;  %v4543_v53 = vpack.c.bf16 %v4507_v41, %v4506_v30  ;;  %v4509_v41 = vld [vmem:[#allocation2 + $0xff] sm:$0xff] }
 0x4da   : > { %v4640_v58 = vpop.f32.mrf.mxu3 }
 0x4db   : > { %v4754_v42 = vadd.f32 %v4640_v58, %v10008_v51  ;;  %v5485_v54 = vadd.f32 %v9269_v37, %v5433_v17 }
 0x4dd   : > { %v5068_v18 = vadd.f32 %v10009_v60, %v4754_v42  ;;  %v5533_v15 = vadd.f32 %v5485_v54, %v771_v11  ;;  %v10012_v42 = vld [vmem:[#allocation62_spill] sm:$0xff] }
 0x4df   : > { %v5382_v27 = vadd.f32 %v9130_v35, %v5068_v18  ;;  %v5581_v7 = vmax.f32 %v5533_v15, 0.0  ;;  %v773_v15 = vunpack.c.h.bf16 %v283_v39  ;;  %v4508_v39 = vld [vmem:[#allocation2 + $0xf7] sm:$0xff] }
 0x4e1   : > { %5629 = vxpose.xlu0.b32.cont [4/16] (narrow) %v5581_v7, 8  ;;  %v5434_v25 = vmul.f32 %v9262_v29, %v5382_v27  ;;  %v285_v7 = vld [vmem:[%s6613_s22 + $0x18] sm:$0xff]  }
 0x4e2   : > { %v4642_v21 = vpop.f32.mrf.mxu3 }
 0x4e3   : > { %v4755_v13 = vadd.f32 %v4642_v21, %v10010_v31  ;;  %v5486_v63 = vadd.f32 %v9269_v37, %v5434_v25  ;;  %v10013_v31 = vld [vmem:[#allocation66_spill] sm:$0xff] }
 0x4e5   : > { %v5069_v14 = vadd.f32 %v10011_v59, %v4755_v13  ;;  %v5534_v11 = vadd.f32 %v5486_v63, %v772_v10 }
 0x4e7   : > { %v5383_v17 = vadd.f32 %v9147_v50, %v5069_v14  ;;  %4684 = vmatmul.bf16.gmra.mxu3 %v4543_v53  ;;  %v5582_v35 = vmax.f32 %v5534_v11, 0.0  ;;  %v774_v50 = vunpack.c.l.bf16 %v285_v7  ;;  %v775_v11 = vunpack.c.h.bf16 %v285_v7  ;;  %v4510_v7 = vld [vmem:[#allocation2 + $0x107] sm:$0xff] }
 0x4e9   : > { %5630 = vxpose.xlu0.b32.cont [5/16] (narrow) %v5582_v35, 8  ;;  %v5435_v58 = vmul.f32 %v9262_v29, %v5383_v17 }
 0x4ea   : > { %v4645_v51 = vpop.f32.mrf.mxu3 }
 0x4eb   : > { %v4756_v54 = vadd.f32 %v4645_v51, %v10012_v42  ;;  %v5487_v60 = vadd.f32 %v9269_v37, %v5435_v58  ;;  %v10014_v51 = vld [vmem:[#allocation50_spill] sm:$0xff] }
 0x4ed   : > { %v5070_v18 = vadd.f32 %v8899_v57, %v4756_v54  ;;  %v5535_v27 = vadd.f32 %v5487_v60, %v773_v15  ;;  %v4544_v57 = vpack.c.bf16 %v4509_v41, %v4508_v39  ;;  %v287_v60 = vld [vmem:[%s6613_s22 + $0x20] sm:$0xff]  }
 0x4ef   : > { %v5384_v25 = vadd.f32 %v9157_v1, %v5070_v18  ;;  %v5583_v10 = vmax.f32 %v5535_v27, 0.0 }
 0x4f1   : > { %5631 = vxpose.xlu0.b32.cont [6/16] (narrow) %v5583_v10, 8  ;;  %v5436_v21 = vmul.f32 %v9262_v29, %v5384_v25  ;;  %v4511_v10 = vld [vmem:[#allocation2 + $0x10f] sm:$0xff] }
 0x4f2   : > { %v4647_v30 = vpop.f32.mrf.mxu3  ;;  %v4545_v39 = vpack.c.bf16 %v4511_v10, %v4510_v7 }
 0x4f3   : > { %v4757_v13 = vadd.f32 %v4647_v30, %v10013_v31  ;;  %v5488_v63 = vadd.f32 %v9269_v37, %v5436_v21 }
 0x4f5   : > { %v5071_v59 = vadd.f32 %v8926_v46, %v4757_v13  ;;  %v5536_v14 = vadd.f32 %v5488_v63, %v774_v50  ;;  %v10015_v50 = vld [vmem:[#allocation20_spill] sm:$0xff]  ;;  %v777_v13 = vunpack.c.h.bf16 %v287_v60 }
 0x4f7   : > { %v5385_v53 = vadd.f32 %v9167_v49, %v5071_v59  ;;  %4689 = vmatmul.bf16.gmra.mxu3 %v4544_v57  ;;  %v5584_v1 = vmax.f32 %v5536_v14, 0.0  ;;  %v776_v49 = vunpack.c.l.bf16 %v287_v60  ;;  %v10016_v57 = vld [vmem:[#allocation47_spill] sm:$0xff] }
 0x4f9   : > { %5632 = vxpose.xlu0.b32.cont [7/16] (narrow) %v5584_v1, 8  ;;  %v5437_v17 = vmul.f32 %v9262_v29, %v5385_v53 }
 0x4fa   : > { %v4650_v35 = vpop.f32.mrf.mxu3 }
 0x4fb   : > { %v4758_v15 = vadd.f32 %v4650_v35, %v8886_v36  ;;  %v5489_v58 = vadd.f32 %v9269_v37, %v5437_v17  ;;  %v289_v17 = vld [vmem:[%s6613_s22 + $0x28] sm:$0xff]  }
 0x4fd   : > { %v5072_v42 = vadd.f32 %v10014_v51, %v4758_v15  ;;  %v5537_v54 = vadd.f32 %v5489_v58, %v775_v11  ;;  %v4512_v51 = vld [vmem:[#allocation2 + $0x117] sm:$0xff] }
 0x4ff   : > { %v5386_v46 = vadd.f32 %v9176_v8, %v5072_v42  ;;  %v5585_v18 = vmax.f32 %v5537_v54, 0.0  ;;  %v4513_v42 = vld [vmem:[#allocation2 + $0x11f] sm:$0xff] }
 0x500   : > { %v10017_v54 = vld [vmem:[#allocation22_spill] sm:$0xff] }
 0x501   : > { %5633 = vxpose.xlu0.b32.cont [8/16] (narrow) %v5585_v18, 8  ;;  %v5438_v27 = vmul.f32 %v9262_v29, %v5386_v46 }
 0x502   : > { %v4652_v25 = vpop.f32.mrf.mxu3 }
 0x503   : > { %v4759_v21 = vadd.f32 %v4652_v25, %v10015_v50  ;;  %v5490_v36 = vadd.f32 %v9269_v37, %v5438_v27  ;;  %v779_v25 = vunpack.c.h.bf16 %v289_v17 }
 0x505   : > { %v5073_v30 = vadd.f32 %v8966_v40, %v4759_v21  ;;  %v5538_v41 = vadd.f32 %v5490_v36, %v776_v49 }
 0x507   : > { %v5387_v31 = vadd.f32 %v9192_v23, %v5073_v30  ;;  %4694 = vmatmul.bf16.gmra.mxu3 %v4545_v39  ;;  %v5586_v8 = vmax.f32 %v5538_v41, 0.0  ;;  %v778_v23 = vunpack.c.l.bf16 %v289_v17  ;;  %v291_v39 = vld [vmem:[%s6613_s22 + $0x30] sm:$0xff]  }
 0x509   : > { %5634 = vxpose.xlu0.b32.cont [9/16] (narrow) %v5586_v8, 8  ;;  %v5439_v63 = vmul.f32 %v9262_v29, %v5387_v31 }
 0x50a   : > { %v4655_v59 = vpop.f32.mrf.mxu3 }
 0x50b   : > { %v4760_v14 = vadd.f32 %v4655_v59, %v10016_v57  ;;  %v5491_v53 = vadd.f32 %v9269_v37, %v5439_v63  ;;  %v4515_v63 = vld [vmem:[#allocation2 + $0x12f] sm:$0xff]  ;;  %v10018_v59 = vld [vmem:[#allocation26_spill] sm:$0xff] }
 0x50d   : > { %v5074_v1 = vadd.f32 %v8995_v61, %v4760_v14  ;;  %v5539_v11 = vadd.f32 %v5491_v53, %v777_v13  ;;  %v4546_v61 = vpack.c.bf16 %v4513_v42, %v4512_v51  ;;  %v4514_v13 = vld [vmem:[#allocation2 + $0x127] sm:$0xff]  ;;  %v293_v51 = vld [vmem:[%s6613_s22 + $0x38] sm:$0xff]  }
 0x50f   : > { %v5388_v40 = vadd.f32 %v9204_v55, %v5074_v1  ;;  %v5587_v35 = vmax.f32 %v5539_v11, 0.0  ;;  %v781_v11 = vunpack.c.h.bf16 %v291_v39 }
 0x511   : > { %5635 = vxpose.xlu0.b32.cont [10/16] (narrow) %v5587_v35, 8  ;;  %v5440_v15 = vmul.f32 %v9262_v29, %v5388_v40 }
 0x512   : > { %v4657_v58 = vpop.f32.mrf.mxu3 }
 0x513   : > { %v4761_v60 = vadd.f32 %v4657_v58, %v10017_v54  ;;  %v5492_v46 = vadd.f32 %v9269_v37, %v5440_v15 }
 0x515   : > { %v5075_v18 = vadd.f32 %v9018_v3, %v4761_v60  ;;  %v5540_v49 = vadd.f32 %v5492_v46, %v778_v23  ;;  %v4516_v46 = vld [vmem:[#allocation2 + $0x137] sm:$0xff] }
 0x517   : > { %v5389_v27 = vadd.f32 %v9209_v0, %v5075_v18  ;;  %4699 = vmatmul.bf16.gmra.mxu3 %v4546_v61  ;;  %v5588_v55 = vmax.f32 %v5540_v49, 0.0  ;;  %v780_v0 = vunpack.c.l.bf16 %v291_v39  ;;  %v4517_v18 = vld [vmem:[#allocation2 + $0x13f] sm:$0xff]  ;;  %v10019_v61 = vld [vmem:[#allocation29_spill] sm:$0xff] }
 0x519   : > { %5636 = vxpose.xlu0.b32.cont [11/16] (narrow) %v5588_v55, 8  ;;  %v5441_v7 = vmul.f32 %v9262_v29, %v5389_v27 }
 0x51a   : > { %v4660_v10 = vpop.f32.mrf.mxu3 }
 0x51b   : > { %v4762_v50 = vadd.f32 %v4660_v10, %v8960_v9  ;;  %v5493_v21 = vadd.f32 %v9269_v37, %v5441_v7  ;;  %v783_v7 = vunpack.c.h.bf16 %v293_v51 }
 0x51d   : > { %v5076_v36 = vadd.f32 %v9038_v33, %v4762_v50  ;;  %v5541_v30 = vadd.f32 %v5493_v21, %v779_v25  ;;  %v4547_v33 = vpack.c.bf16 %v4515_v63, %v4514_v13  ;;  %v4518_v63 = vld [vmem:[#allocation2 + $0x147] sm:$0xff] }
 0x51f   : > { %v5390_v3 = vadd.f32 %v9215_v4, %v5076_v36  ;;  %v5589_v41 = vmax.f32 %v5541_v30, 0.0  ;;  %v9365_v30 = vpop.f32.mrf.mxu0 }
 0x521   : > { %5637 = vxpose.xlu0.b32.cont [12/16] (narrow) %v5589_v41, 8  ;;  %v5442_v31 = vmul.f32 %v9262_v29, %v5390_v3  ;;  %v9368_v3 = vpop.f32.mrf.mxu1  ;;  %v295_v41 = vld [vmem:[%s6613_s22 + $0x40] sm:$0xff]  }
 0x522   : > { %v4662_v8 = vpop.f32.mrf.mxu3 }
 0x523   : > { %v4763_v57 = vadd.f32 %v4662_v8, %v10018_v59  ;;  %v5494_v9 = vadd.f32 %v9269_v37, %v5442_v31  ;;  %v784_v31 = vunpack.c.l.bf16 %v295_v41 }
 0x525   : > { %v5077_v14 = vadd.f32 %v9062_v44, %v4763_v57  ;;  %v5542_v53 = vadd.f32 %v5494_v9, %v780_v0 }
 0x527   : > { %v5391_v1 = vadd.f32 %v9223_v28, %v5077_v14  ;;  %4704 = vmatmul.bf16.gmra.mxu3 %v4547_v33  ;;  %v5590_v4 = vmax.f32 %v5542_v53, 0.0  ;;  %v782_v28 = vunpack.c.l.bf16 %v293_v51  ;;  %v9376_v33 = vpop.f32.mrf.mxu0 }
 0x529   : > { %5638 = vxpose.xlu0.b32.cont [13/16] (narrow) %v5590_v4, 8  ;;  %v5443_v17 = vmul.f32 %v9262_v29, %v5391_v1  ;;  %v9381_v4 = vpop.f32.mrf.mxu1 }
 0x52a   : > { %v4665_v40 = vpop.f32.mrf.mxu3 }
 0x52b   : > { %v4764_v35 = vadd.f32 %v4665_v40, %v8999_v56  ;;  %v5495_v23 = vadd.f32 %v9269_v37, %v5443_v17  ;;  %v10020_v40 = vld [vmem:[#allocation31_spill] sm:$0xff] }
 0x52d   : > { %v5078_v15 = vadd.f32 %v9079_v19, %v4764_v35  ;;  %v5543_v58 = vadd.f32 %v5495_v23, %v781_v11  ;;  %v4548_v19 = vpack.c.bf16 %v4517_v18, %v4516_v46  ;;  %v785_v11 = vunpack.c.h.bf16 %v295_v41  ;;  %v4520_v18 = vld [vmem:[#allocation2 + $0x157] sm:$0xff] }
 0x52e   : > { %v299_v41 = vld [vmem:[%s6613_s22 + $0x50] sm:$0xff]  }
 0x52f   : > { %v5392_v44 = vadd.f32 %v9229_v48, %v5078_v15  ;;  %v5591_v42 = vmax.f32 %v5543_v58, 0.0  ;;  %v297_v58 = vld [vmem:[%s6613_s22 + $0x48] sm:$0xff]  }
 0x531   : > { %5639 = vxpose.xlu0.b32.cont [14/16] (narrow) %v5591_v42, 8  ;;  %v5444_v54 = vmul.f32 %v9262_v29, %v5392_v44  ;;  %v9389_v44 = vpop.f32.mrf.mxu0 }
 0x532   : > { %v4667_v60 = vpop.f32.mrf.mxu3 }
 0x533   : > { %v4765_v49 = vadd.f32 %v4667_v60, %v10019_v61  ;;  %v5496_v56 = vadd.f32 %v9269_v37, %v5444_v54  ;;  %v9394_v60 = vpop.f32.mrf.mxu1  ;;  %v4521_v61 = vld [vmem:[#allocation2 + $0x15f] sm:$0xff] }
 0x535   : > { %v5079_v27 = vadd.f32 %v9106_v47, %v4765_v49  ;;  %v5544_v55 = vadd.f32 %v5496_v56, %v782_v28  ;;  %v786_v28 = vunpack.c.l.bf16 %v297_v58  ;;  %v10021_v49 = vld [vmem:[#allocation38_spill] sm:$0xff] }
 0x537   : > { %v5393_v25 = vadd.f32 %v9235_v24, %v5079_v27  ;;  %4709 = vmatmul.bf16.gmra.mxu3 %v4548_v19  ;;  %v5592_v48 = vmax.f32 %v5544_v55, 0.0  ;;  %v4550_v27 = vpack.c.bf16 %v4521_v61, %v4520_v18 }
 0x539   : > { %5640 = vxpose.xlu0.b32.cont [15/16] (narrow) %v5592_v48, 8  ;;  %v5445_v10 = vmul.f32 %v9262_v29, %v5393_v25  ;;  %v787_v48 = vunpack.c.h.bf16 %v297_v58  ;;  %v301_v58 = vld [vmem:[%s6613_s22 + $0x58] sm:$0xff]  }
 0x53a   : > { %v4670_v50 = vpop.f32.mrf.mxu3 }
 0x53b   : > { %v4766_v21 = vadd.f32 %v4670_v50, %v9034_v12  ;;  %v5497_v36 = vadd.f32 %v9269_v37, %v5445_v10  ;;  %v4519_v12 = vld [vmem:[#allocation2 + $0x14f] sm:$0xff]  ;;  %v9401_v10 = vpop.f32.mrf.mxu0 }
 0x53c   : > { %v4549_v9 = vpack.c.bf16 %v4519_v12, %v4518_v63  ;;  %v4522_v63 = vld [vmem:[#allocation2 + $0x167] sm:$0xff]  ;;  %v4523_v12 = vld [vmem:[#allocation2 + $0x16f] sm:$0xff] }
 0x53d   : > { %v5080_v47 = vadd.f32 %v9126_v45, %v4766_v21  ;;  %v5545_v39 = vadd.f32 %v5497_v36, %v783_v7 }
 0x53f   : > { %v5394_v24 = vadd.f32 %v9240_v2, %v5080_v47  ;;  %v5593_v0 = vmax.f32 %v5545_v39, 0.0  ;;  %v9378_v2 = vpop.f32.mrf.mxu2  ;;  %v9407_v47 = vpop.f32.mrf.mxu1 }
 0x541   : > { %5641 = vxpose.xlu0.b32.end [16/16] (narrow) %v5593_v0, 8  ;;  %v5446_v8 = vmul.f32 %v9262_v29, %v5394_v24 }
 0x542   : > { %v4672_v13 = vpop.f32.mrf.mxu3 }
 0x543   : > { %v4767_v59 = vadd.f32 %v4672_v13, %v9050_v6  ;;  %v5498_v57 = vadd.f32 %v9269_v37, %v5446_v8 }
 0x545   : > { %v5081_v45 = vadd.f32 %v9139_v62, %v4767_v59  ;;  %v5546_v14 = vadd.f32 %v5498_v57, %v784_v31  ;;  %v788_v31 = vunpack.c.l.bf16 %v299_v41  ;;  %v9415_v57 = vpop.f32.mrf.mxu0 }
 0x547   : > { %v5395_v53 = vadd.f32 %v9249_v52, %v5081_v45  ;;  %4714 = vmatmul.bf16.gmra.mxu3 %v4549_v9  ;;  %v5594_v1 = vmax.f32 %v5546_v14, 0.0  ;;  %v9391_v42 = vpop.f32.mrf.mxu2  ;;  %v9420_v14 = vpop.f32.mrf.mxu1 }
 0x549   : > { %5658 = vxpose.xlu1.b32.start [1/16] (narrow) %v5594_v1, 8  ;;  %v5447_v6 = vmul.f32 %v9262_v29, %v5395_v53  ;;  %v10022_v53 = vld [vmem:[#allocation92_spill] sm:$0xff] }
 0x54a   : > { %v4675_v17 = vpop.f32.mrf.mxu3 }
 0x54b   : > { %v4768_v62 = vadd.f32 %v4675_v17, %v10020_v40  ;;  %v5499_v35 = vadd.f32 %v9269_v37, %v5447_v6  ;;  %v789_v6 = vunpack.c.h.bf16 %v299_v41  ;;  %v10023_v40 = vld [vmem:[#allocation39_spill] sm:$0xff] }
 0x54d   : > { %v5082_v23 = vadd.f32 %v9152_v22, %v4768_v62  ;;  %v5547_v15 = vadd.f32 %v5499_v35, %v785_v11 }
 0x54f   : > { %v5396_v51 = vadd.f32 %v9255_v16, %v5082_v23  ;;  %v5595_v52 = vmax.f32 %v5547_v15, 0.0  ;;  %v9403_v21 = vpop.f32.mrf.mxu2  ;;  %v9427_v15 = vpop.f32.mrf.mxu0 }
 0x551   : > { %5659 = vxpose.xlu1.b32.cont [2/16] (narrow) %v5595_v52, 8  ;;  %v5448_v54 = vmul.f32 %v9262_v29, %v5396_v51 }
 0x552   : > { %v4677_v46 = vpop.f32.mrf.mxu3 }
 0x553   : > { %v4769_v22 = vadd.f32 %v4677_v46, %v10021_v49  ;;  %v5500_v56 = vadd.f32 %v9269_v37, %v5448_v54  ;;  %v9433_v54 = vpop.f32.mrf.mxu1  ;;  %v790_v46 = vunpack.c.l.bf16 %v301_v58  ;;  %v4524_v49 = vld [vmem:[#allocation2 + $0x177] sm:$0xff] }
 0x555   : > { %v5083_v16 = vadd.f32 %v9162_v34, %v4769_v22  ;;  %v5548_v19 = vadd.f32 %v5500_v56, %v786_v28  ;;  %v4525_v22 = vld [vmem:[#allocation2 + $0x17f] sm:$0xff] }
 0x556   : > { %v10024_v56 = vld [vmem:[#allocation58_spill] sm:$0xff] }
 0x557   : > { %v5397_v55 = vadd.f32 %v9271_v5, %v5083_v16  ;;  %4719 = vmatmul.bf16.gmra.mxu3 %v4550_v27  ;;  %v5596_v25 = vmax.f32 %v5548_v19, 0.0  ;;  %v9417_v45 = vpop.f32.mrf.mxu2  ;;  %v10026_v27 = vld [vmem:[#allocation44_spill] sm:$0xff] }
 0x559   : > { %5660 = vxpose.xlu1.b32.cont [3/16] (narrow) %v5596_v25, 8  ;;  %v5449_v7 = vmul.f32 %v9262_v29, %v5397_v55 }
 0x55a   : > { %v4680_v50 = vpop.f32.mrf.mxu3 }
 0x55b   : > { %v4770_v36 = vadd.f32 %v4680_v50, %v9102_v43  ;;  %v5501_v34 = vadd.f32 %v9269_v37, %v5449_v7  ;;  %v10027_v7 = vld [vmem:[#allocation98_spill] sm:$0xff] }
 0x55d   : > { %v5084_v39 = vadd.f32 %v9172_v32, %v4770_v36  ;;  %v5549_v5 = vadd.f32 %v5501_v34, %v787_v48 }
 0x55f   : > { %v5398_v24 = vadd.f32 %v9281_v26, %v5084_v39  ;;  %v5597_v0 = vmax.f32 %v5549_v5, 0.0  ;;  %v4551_v26 = vpack.c.bf16 %v4523_v12, %v4522_v63  ;;  %v9430_v51 = vpop.f32.mrf.mxu2  ;;  %v9443_v39 = vpop.f32.mrf.mxu0 }
 0x561   : > { %5661 = vxpose.xlu1.b32.cont [4/16] (narrow) %v5597_v0, 8  ;;  %v5450_v8 = vmul.f32 %v9262_v29, %v5398_v24  ;;  %v791_v24 = vunpack.c.h.bf16 %v301_v58 }
 0x562   : > { %v4682_v13 = vpop.f32.mrf.mxu3 }
 0x563   : > { %v4771_v43 = vadd.f32 %v4682_v13, %v9116_v20  ;;  %v5502_v59 = vadd.f32 %v9269_v37, %v5450_v8  ;;  %v10028_v8 = vld [vmem:[#allocation78_spill] sm:$0xff] }
 0x564   : > { %v10029_v13 = vld [vmem:[#allocation74_spill] sm:$0xff] }
 0x565   : > { %v5085_v32 = vadd.f32 %v9187_v38, %v4771_v43  ;;  %v5550_v9 = vadd.f32 %v5502_v59, %v788_v31  ;;  %v3833_v63 = vadd.f32 %v10029_v13, %v10028_v8  ;;  %v10037_v8 = vld [vmem:[#allocation104_spill] sm:$0xff] }
 0x567   : > { %v5399_v1 = vadd.f32 %v10022_v53, %v5085_v32  ;;  %4724 = vmatmul.bf16.gmra.mxu3 %v4551_v26  ;;  %v5598_v11 = vmax.f32 %v5550_v9, 0.0  ;;  %v9446_v41 = vpop.f32.mrf.mxu2  ;;  %v303_v32 = vld [vmem:[%s6613_s22 + $0x60] sm:$0xff]  }
 0x569   : > { %5662 = vxpose.xlu1.b32.cont [5/16] (narrow) %v5598_v11, 8  ;;  %v5451_v20 = vmul.f32 %v9262_v29, %v5399_v1  ;;  %v792_v11 = vunpack.c.l.bf16 %v303_v32 }
 0x56a   : > { %v4685_v17 = vpop.f32.mrf.mxu3 }
 0x56b   : > { %v4772_v62 = vadd.f32 %v4685_v17, %v10023_v40  ;;  %v5503_v35 = vadd.f32 %v9269_v37, %v5451_v20  ;;  %v9460_v20 = vpop.f32.mrf.mxu0  ;;  %v4526_v40 = vld [vmem:[#allocation2 + $0x187] sm:$0xff] }
 0x56d   : > { %v5086_v38 = vadd.f32 %v9365_v30, %v4772_v62  ;;  %v5551_v23 = vadd.f32 %v5503_v35, %v789_v6  ;;  %v10025_v30 = vld [vmem:[#allocation71_spill] sm:$0xff]  ;;  %v4527_v62 = vld [vmem:[#allocation2 + $0x18f] sm:$0xff] }
 0x56e   : > { %v3832_v16 = vadd.f32 %v10025_v30, %v10024_v56  ;;  %v10031_v35 = vld [vmem:[#allocation32_spill] sm:$0xff]  ;;  %v10034_v56 = vld [vmem:[#allocation49_spill] sm:$0xff] }
 0x56f   : > { %v5400_v52 = vadd.f32 %v9368_v3, %v5086_v38  ;;  %v5599_v28 = vmax.f32 %v5551_v23, 0.0  ;;  %v4552_v3 = vpack.c.bf16 %v4525_v22, %v4524_v49  ;;  %v9464_v23 = vpop.f32.mrf.mxu2  ;;  %v4869_v30 = vpack.c.bf16 %v10034_v56, %v10034_v56 }
 0x570   : > { %v4146_v50 = vadd.f32 %v10027_v7, %v3832_v16  ;;  %v5158_v16 = vld [vmem:[#allocation2 + $0x1a9] sm:$0xff]  ;;  %v10036_v7 = vld [vmem:[#allocation79_spill] sm:$0xff] }
 0x571   : > { %5663 = vxpose.xlu1.b32.cont [6/16] (narrow) %v5599_v28, 8  ;;  %v5452_v18 = vmul.f32 %v9262_v29, %v5400_v52  ;;  %v4553_v28 = vpack.c.bf16 %v4527_v62, %v4526_v40  ;;  %5058 = vmatmul.bf16.gmra.mxu0 %v4869_v30  ;;  %v307_v30 = vld [vmem:[%s6613_s22 + $0x70] sm:$0xff]  }
 0x572   : > { %v4687_v61 = vpop.f32.mrf.mxu3  ;;  %v4460_v5 = vadd.f32 %v9378_v2, %v4146_v50  ;;  %v10030_v2 = vld [vmem:[#allocation100_spill] sm:$0xff] }
 0x573   : > { %v4773_v19 = vadd.f32 %v4687_v61, %v10026_v27  ;;  %v5504_v55 = vadd.f32 %v9269_v37, %v5452_v18  ;;  %v4147_v26 = vadd.f32 %v10030_v2, %v3833_v63  ;;  %v10033_v18 = vld [vmem:[#allocation102_spill] sm:$0xff] }
 0x574   : > { %v5159_v27 = vld [vmem:[#allocation2 + $0x1b1] sm:$0xff] }
 0x575   : > { %v5087_v25 = vadd.f32 %v9376_v33, %v4773_v19  ;;  %v5552_v48 = vadd.f32 %v5504_v55, %v790_v46  ;;  %v9449_v33 = vpop.f32.mrf.mxu1  ;;  %v4461_v1 = vadd.f32 %v9391_v42, %v4147_v26  ;;  %v793_v55 = vunpack.c.h.bf16 %v303_v32  ;;  %v4528_v2 = vld [vmem:[#allocation2 + $0x197] sm:$0xff]  ;;  %v4529_v26 = vld [vmem:[#allocation2 + $0x19f] sm:$0xff] }
 0x577   : > { %v5401_v36 = vadd.f32 %v9381_v4, %v5087_v25  ;;  %4729 = vmatmul.bf16.gmra.mxu3 %v4552_v3  ;;  %v5600_v34 = vmax.f32 %v5552_v48, 0.0  ;;  %v5183_v25 = vpack.c.bf16 %v5159_v27, %v5158_v16  ;;  %v10035_v48 = vld [vmem:[#allocation61_spill] sm:$0xff]  ;;  %v10043_v16 = vld [vmem:[#allocation12_spill] sm:$0xff] }
 0x579   : > { %5664 = vxpose.xlu1.b32.cont [7/16] (narrow) %v5600_v34, 8  ;;  %v5453_v0 = vmul.f32 %v9262_v29, %v5401_v36  ;;  %5372 = vmatmul.bf16.gmra.mxu1 %v5183_v25  ;;  %v9479_v34 = vpop.f32.mrf.mxu0  ;;  %v4531_v25 = vld [vmem:[#allocation2 + $0x1af] sm:$0xff] }
 0x57a   : > { %v4690_v31 = vpop.f32.mrf.mxu3 }
 0x57b   : > { %v4774_v4 = vadd.f32 %v4690_v31, %v4460_v5  ;;  %v5505_v12 = vadd.f32 %v9269_v37, %v5453_v0  ;;  %v9481_v5 = vpop.f32.mrf.mxu2  ;;  %v305_v31 = vld [vmem:[%s6613_s22 + $0x68] sm:$0xff]  }
 0x57d   : > { %v5088_v43 = vadd.f32 %v9389_v44, %v4774_v4  ;;  %v5553_v59 = vadd.f32 %v5505_v12, %v791_v24  ;;  %v10032_v44 = vld [vmem:[#allocation76_spill] sm:$0xff]  ;;  %v9467_v52 = vpop.f32.mrf.mxu1 }
 0x57e   : > { %v3834_v38 = vadd.f32 %v10032_v44, %v10031_v35 }
 0x57f   : > { %v5402_v9 = vadd.f32 %v9394_v60, %v5088_v43  ;;  %v5601_v53 = vmax.f32 %v5553_v59, 0.0  ;;  %v794_v43 = vunpack.c.l.bf16 %v305_v31 }
 0x580   : > { %v4148_v61 = vadd.f32 %v10033_v18, %v3834_v38  ;;  %v10042_v18 = vld [vmem:[#allocation83_spill] sm:$0xff] }
 0x581   : > { %5665 = vxpose.xlu1.b32.cont [8/16] (narrow) %v5601_v53, 8  ;;  %v5454_v6 = vmul.f32 %v9262_v29, %v5402_v9  ;;  %v10038_v9 = vld [vmem:[#allocation35_spill] sm:$0xff]  ;;  %v9495_v40 = vpop.f32.mrf.mxu0 }
 0x582   : > { %v4692_v17 = vpop.f32.mrf.mxu3  ;;  %v4462_v19 = vadd.f32 %v9403_v21, %v4148_v61 }
 0x583   : > { %v4775_v58 = vadd.f32 %v4692_v17, %v4461_v1  ;;  %v5506_v60 = vadd.f32 %v9269_v37, %v5454_v6  ;;  %v4554_v17 = vpack.c.bf16 %v4529_v26, %v4528_v2  ;;  %v9498_v35 = vpop.f32.mrf.mxu2 }
 0x585   : > { %v5089_v42 = vadd.f32 %v9401_v10, %v4775_v58  ;;  %v5554_v46 = vadd.f32 %v5506_v60, %v792_v11  ;;  %v9484_v0 = vpop.f32.mrf.mxu1 }
 0x587   : > { %v5403_v49 = vadd.f32 %v9407_v47, %v5089_v42  ;;  %4734 = vmatmul.bf16.gmra.mxu3 %v4553_v28  ;;  %v5602_v22 = vmax.f32 %v5554_v46, 0.0  ;;  %v3835_v47 = vadd.f32 %v10036_v7, %v10035_v48  ;;  %v795_v42 = vunpack.c.h.bf16 %v305_v31  ;;  %v10041_v46 = vld [vmem:[#allocation64_spill] sm:$0xff] }
 0x588   : > { %v3837_v61 = vadd.f32 %v10042_v18, %v10041_v46  ;;  %v796_v7 = vunpack.c.l.bf16 %v307_v30  ;;  %v10050_v46 = vld [vmem:[#allocation43_spill] sm:$0xff] }
 0x589   : > { %5666 = vxpose.xlu1.b32.cont [9/16] (narrow) %v5602_v22, 8  ;;  %v5455_v10 = vmul.f32 %v9262_v29, %v5403_v49  ;;  %v4149_v13 = vadd.f32 %v10037_v8, %v3835_v47  ;;  %v10051_v18 = vld [vmem:[#allocation87_spill] sm:$0xff] }
 0x58a   : > { %v4695_v3 = vpop.f32.mrf.mxu3  ;;  %v4151_v27 = vadd.f32 %v10043_v16, %v3837_v61  ;;  %v3840_v61 = vadd.f32 %v10051_v18, %v10050_v46  ;;  %v10052_v16 = vld [vmem:[#allocation106_spill] sm:$0xff] }
 0x58b   : > { %v4776_v50 = vadd.f32 %v4695_v3, %v4462_v19  ;;  %v5507_v36 = vadd.f32 %v9269_v37, %v5455_v10  ;;  %v4463_v12 = vadd.f32 %v9417_v45, %v4149_v13  ;;  %v10040_v45 = vld [vmem:[#allocation105_spill] sm:$0xff]  ;;  %v4530_v10 = vld [vmem:[#allocation2 + $0x1a7] sm:$0xff]  ;;  %v9513_v48 = vpop.f32.mrf.mxu2 }
 0x58c   : > { %v4465_v3 = vadd.f32 %v9446_v41, %v4151_v27  ;;  %v4555_v8 = vpack.c.bf16 %v4531_v25, %v4530_v10 }
 0x58d   : > { %v5090_v21 = vadd.f32 %v9415_v57, %v4776_v50  ;;  %v5555_v24 = vadd.f32 %v5507_v36, %v793_v55  ;;  %v10039_v57 = vld [vmem:[#allocation81_spill] sm:$0xff]  ;;  %v9501_v58 = vpop.f32.mrf.mxu1  ;;  %v5024_v55 = vpop.f32.mrf.mxu0 }
 0x58e   : > { %v3836_v53 = vadd.f32 %v10039_v57, %v10038_v9  ;;  %v10044_v36 = vld [vmem:[#allocation41_spill] sm:$0xff]  ;;  %v10047_v57 = vld [vmem:[#allocation68_spill] sm:$0xff] }
 0x58f   : > { %v5404_v63 = vadd.f32 %v9420_v14, %v5090_v21  ;;  %v5603_v4 = vmax.f32 %v5555_v24, 0.0  ;;  %v10045_v21 = vld [vmem:[#allocation85_spill] sm:$0xff] }
 0x590   : > { %v4150_v62 = vadd.f32 %v10040_v45, %v3836_v53  ;;  %v3838_v24 = vadd.f32 %v10045_v21, %v10044_v36  ;;  %v10048_v53 = vld [vmem:[#allocation86_spill] sm:$0xff] }
 0x591   : > { %5667 = vxpose.xlu1.b32.cont [10/16] (narrow) %v5603_v4, 8  ;;  %v5456_v59 = vmul.f32 %v9262_v29, %v5404_v63  ;;  %v10046_v4 = vld [vmem:[#allocation4_spill] sm:$0xff]  ;;  %v309_v45 = vld [vmem:[%s6613_s22 + $0x78] sm:$0xff]  }
 0x592   : > { %v4697_v32 = vpop.f32.mrf.mxu3  ;;  %v4464_v60 = vadd.f32 %v9430_v51, %v4150_v62  ;;  %v4152_v41 = vadd.f32 %v10046_v4, %v3838_v24  ;;  %v10049_v62 = vld [vmem:[#allocation5_spill] sm:$0xff]  ;;  %v799_v10 = vunpack.c.h.bf16 %v309_v45 }
 0x593   : > { %v4777_v1 = vadd.f32 %v4697_v32, %v4463_v12  ;;  %v5508_v11 = vadd.f32 %v9269_v37, %v5456_v59  ;;  %v797_v32 = vunpack.c.h.bf16 %v307_v30 }
 0x594   : > { %v4466_v59 = vadd.f32 %v9464_v23, %v4152_v41 }
 0x595   : > { %v5091_v6 = vadd.f32 %v9427_v15, %v4777_v1  ;;  %v5556_v14 = vadd.f32 %v5508_v11, %v794_v43  ;;  %v5338_v50 = vpop.f32.mrf.mxu1  ;;  %v5026_v26 = vpop.f32.mrf.mxu0  ;;  %v3839_v1 = vadd.f32 %v10048_v53, %v10047_v57 }
 0x597   : > { %v5405_v44 = vadd.f32 %v9433_v54, %v5091_v6  ;;  %4739 = vmatmul.bf16.gmra.mxu3 %v4554_v17  ;;  %v5604_v38 = vmax.f32 %v5556_v14, 0.0  ;;  %v4153_v23 = vadd.f32 %v10049_v62, %v3839_v1 }
 0x599   : > { %5668 = vxpose.xlu1.b32.cont [11/16] (narrow) %v5604_v38, 8  ;;  %v5457_v15 = vmul.f32 %v9262_v29, %v5405_v44 }
 0x59a   : > { %v4700_v28 = vpop.f32.mrf.mxu3 }
 0x59b   : > { %v4778_v49 = vadd.f32 %v4700_v28, %v4464_v60  ;;  %v5509_v22 = vadd.f32 %v9269_v37, %v5457_v15  ;;  %v4467_v60 = vadd.f32 %v9481_v5, %v4153_v23  ;;  %v4154_v5 = vadd.f32 %v10052_v16, %v3840_v61  ;;  %v313_v61 = vld [vmem:[%s6613_s22 + $0x88] sm:$0xff]  }
 0x59d   : > { %v5092_v56 = vadd.f32 %v9443_v39, %v4778_v49  ;;  %v5557_v54 = vadd.f32 %v5509_v22, %v795_v42  ;;  %v5340_v17 = vpop.f32.mrf.mxu1  ;;  %v798_v42 = vunpack.c.l.bf16 %v309_v45  ;;  %v5029_v22 = vpop.f32.mrf.mxu0 }
 0x59f   : > { %v5406_v19 = vadd.f32 %v9449_v33, %v5092_v56  ;;  %v5605_v51 = vmax.f32 %v5557_v54, 0.0 }
 0x5a1   : > { %5669 = vxpose.xlu1.b32.cont [12/16] (narrow) %v5605_v51, 8  ;;  %v5458_v47 = vmul.f32 %v9262_v29, %v5406_v19  ;;  %v4468_v51 = vadd.f32 %v9498_v35, %v4154_v5 }
 0x5a2   : > { %v4702_v39 = vpop.f32.mrf.mxu3 }
 0x5a3   : > { %v4779_v31 = vadd.f32 %v4702_v39, %v4465_v3  ;;  %v5510_v33 = vadd.f32 %v9269_v37, %v5458_v47  ;;  %v10054_v47 = vld [vmem:[#allocation88_spill] sm:$0xff] }
 0x5a5   : > { %v5093_v13 = vadd.f32 %v9460_v20, %v4779_v31  ;;  %v5558_v63 = vadd.f32 %v5510_v33, %v796_v7  ;;  %v4401_v20 = vpop.f32.mrf.mxu2  ;;  %v10053_v7 = vld [vmem:[#allocation70_spill] sm:$0xff]  ;;  %v5031_v31 = vpop.f32.mrf.mxu0  ;;  %v10055_v33 = vld [vmem:[#allocation57_spill] sm:$0xff] }
 0x5a6   : > { %v3841_v39 = vadd.f32 %v10054_v47, %v10053_v7  ;;  %v10064_v47 = vld [vmem:[#allocation9_spill] sm:$0xff] }
 0x5a7   : > { %v5407_v12 = vadd.f32 %v9467_v52, %v5093_v13  ;;  %4744 = vmatmul.bf16.gmra.mxu3 %v4555_v8  ;;  %v5606_v43 = vmax.f32 %v5558_v63, 0.0  ;;  %v311_v8 = vld [vmem:[%s6613_s22 + $0x80] sm:$0xff]  }
 0x5a8   : > { %v801_v62 = vunpack.c.h.bf16 %v311_v8 }
 0x5a9   : > { %5670 = vxpose.xlu1.b32.cont [13/16] (narrow) %v5606_v43, 8  ;;  %v5459_v2 = vmul.f32 %v9262_v29, %v5407_v12  ;;  %v800_v12 = vunpack.c.l.bf16 %v311_v8 }
 0x5aa   : > { %v4705_v9 = vpop.f32.mrf.mxu3 }
 0x5ab   : > { %v4780_v11 = vadd.f32 %v4705_v9, %v4466_v59  ;;  %v5511_v6 = vadd.f32 %v9269_v37, %v5459_v2  ;;  %v10057_v2 = vld [vmem:[#allocation90_spill] sm:$0xff] }
 0x5ad   : > { %v5094_v52 = vadd.f32 %v9479_v34, %v4780_v11  ;;  %v5559_v14 = vadd.f32 %v5511_v6, %v797_v32  ;;  %v4403_v56 = vpop.f32.mrf.mxu2  ;;  %v10056_v32 = vld [vmem:[#allocation46_spill] sm:$0xff]  ;;  %v10058_v11 = vld [vmem:[#allocation7_spill] sm:$0xff] }
 0x5ae   : > { %v3842_v9 = vadd.f32 %v10057_v2, %v10056_v32 }
 0x5af   : > { %v5408_v44 = vadd.f32 %v9484_v0, %v5094_v52  ;;  %v5607_v38 = vmax.f32 %v5559_v14, 0.0  ;;  %v5343_v0 = vpop.f32.mrf.mxu1  ;;  %v5034_v14 = vpop.f32.mrf.mxu0 }
 0x5b0   : > { %v4156_v6 = vadd.f32 %v10058_v11, %v3842_v9  ;;  %v315_v9 = vld [vmem:[%s6613_s22 + $0x90] sm:$0xff]  }
 0x5b1   : > { %5671 = vxpose.xlu1.b32.cont [14/16] (narrow) %v5607_v38, 8  ;;  %v5460_v15 = vmul.f32 %v9262_v29, %v5408_v44 }
 0x5b2   : > { %v4707_v28 = vpop.f32.mrf.mxu3 }
 0x5b3   : > { %v4781_v49 = vadd.f32 %v4707_v28, %v4467_v60  ;;  %v5512_v34 = vadd.f32 %v9269_v37, %v5460_v15  ;;  %v10059_v60 = vld [vmem:[#allocation72_spill] sm:$0xff] }
 0x5b5   : > { %v5095_v54 = vadd.f32 %v9495_v40, %v4781_v49  ;;  %v5560_v30 = vadd.f32 %v5512_v34, %v798_v42  ;;  %v4406_v13 = vpop.f32.mrf.mxu2  ;;  %v10060_v42 = vld [vmem:[#allocation91_spill] sm:$0xff] }
 0x5b6   : > { %v3843_v15 = vadd.f32 %v10060_v42, %v10059_v60  ;;  %v10070_v42 = vld [vmem:[#allocation33_spill] sm:$0xff] }
 0x5b7   : > { %v5409_v27 = vadd.f32 %v9501_v58, %v5095_v54  ;;  %v5608_v19 = vmax.f32 %v5560_v30, 0.0  ;;  %v4155_v58 = vadd.f32 %v10055_v33, %v3841_v39  ;;  %v5345_v4 = vpop.f32.mrf.mxu1  ;;  %v802_v30 = vunpack.c.l.bf16 %v313_v61  ;;  %v5036_v5 = vpop.f32.mrf.mxu0 }
 0x5b9   : > { %5672 = vxpose.xlu1.b32.cont [15/16] (narrow) %v5608_v19, 8  ;;  %v5461_v25 = vmul.f32 %v9262_v29, %v5409_v27  ;;  %v4469_v41 = vadd.f32 %v9513_v48, %v4155_v58  ;;  %v4470_v48 = vadd.f32 %v4401_v20, %v4156_v6  ;;  %v10065_v58 = vld [vmem:[#allocation53_spill] sm:$0xff] }
 0x5ba   : > { %v4710_v3 = vpop.f32.mrf.mxu3 }
 0x5bb   : > { %v4782_v36 = vadd.f32 %v4710_v3, %v4468_v51  ;;  %v5513_v40 = vadd.f32 %v9269_v37, %v5461_v25 }
 0x5bd   : > { %v5096_v21 = vadd.f32 %v5024_v55, %v4782_v36  ;;  %v5561_v24 = vadd.f32 %v5513_v40, %v799_v10  ;;  %v4408_v45 = vpop.f32.mrf.mxu2 }
 0x5bf   : > { %v5410_v63 = vadd.f32 %v5338_v50, %v5096_v21  ;;  %v5609_v35 = vmax.f32 %v5561_v24, 0.0  ;;  %v5348_v44 = vpop.f32.mrf.mxu1  ;;  %v803_v24 = vunpack.c.h.bf16 %v313_v61 }
 0x5c1   : > { %5673 = vxpose.xlu1.b32.end [16/16] (narrow) %v5609_v35, 8  ;;  %v5462_v43 = vmul.f32 %v9262_v29, %v5410_v63  ;;  %v10066_v63 = vld [vmem:[#allocation94_spill] sm:$0xff] }
 0x5c2   : > { %v4712_v59 = vpop.f32.mrf.mxu3  ;;  %v3845_v35 = vadd.f32 %v10066_v63, %v10065_v58  ;;  %v10076_v63 = vld [vmem:[#allocation40_spill] sm:$0xff] }
 0x5c3   : > { %v4783_v55 = vadd.f32 %v4712_v59, %v4469_v41  ;;  %v5514_v57 = vadd.f32 %v9269_v37, %v5462_v43  ;;  %v5039_v43 = vpop.f32.mrf.mxu0 }
 0x5c5   : > { %v5097_v53 = vadd.f32 %v5026_v26, %v4783_v55  ;;  %v5562_v1 = vadd.f32 %v5514_v57, %v800_v12  ;;  %v4411_v51 = vpop.f32.mrf.mxu2 }
 0x5c7   : > { %v5411_v50 = vadd.f32 %v5340_v17, %v5097_v53  ;;  %v5610_v52 = vmax.f32 %v5562_v1, 0.0  ;;  %v10061_v17 = vld [vmem:[#allocation8_spill] sm:$0xff]  ;;  %v5350_v25 = vpop.f32.mrf.mxu1  ;;  %v804_v1 = vunpack.c.l.bf16 %v315_v9 }
 0x5c8   : > { %v4157_v49 = vadd.f32 %v10061_v17, %v3843_v15 }
 0x5c9   : > { %5690 = vxpose.xlu2.b32.start [1/16] (narrow) %v5610_v52, 8  ;;  %v5463_v23 = vmul.f32 %v9262_v29, %v5411_v50  ;;  %v9561_v29 = vld [vmem:[%s9650_s5] ss:$0 sm:$0xff]  ;;  %v10068_v50 = vld [vmem:[#allocation77_spill] sm:$0xff] }
 0x5ca   : > { %v4715_v38 = vpop.f32.mrf.mxu3  ;;  %v4471_v54 = vadd.f32 %v4403_v56, %v4157_v49  ;;  %v9569_v56 = vld [vmem:[%s9651_s6] ss:$0 sm:$0xff]  ;;  %v10071_v49 = vld [vmem:[#allocation56_spill] sm:$0xff] }
 0x5cb   : > { %v4784_v28 = vadd.f32 %v4715_v38, %v4470_v48  ;;  %v5515_v26 = vadd.f32 %v9269_v37, %v5463_v23  ;;  %v10062_v37 = vld [vmem:[#allocation75_spill] sm:$0xff]  ;;  %v5041_v60 = vpop.f32.mrf.mxu0 }
 0x5cc   : > { %v10069_v52 = vld [vmem:[#allocation95_spill] sm:$0xff] }
 0x5cd   : > { %v5098_v46 = vadd.f32 %v5029_v22, %v4784_v28  ;;  %v5563_v18 = vadd.f32 %v5515_v26, %v801_v62  ;;  %v10063_v22 = vld [vmem:[#allocation93_spill] sm:$0xff]  ;;  %v3846_v48 = vadd.f32 %v10069_v52, %v10068_v50  ;;  %v319_v50 = vld [vmem:[%s6613_s22 + $0xa0] sm:$0xff]   ;;  %v10079_v52 = vld [vmem:[#allocation42_spill] sm:$0xff] }
 0x5ce   : > { %v3844_v19 = vadd.f32 %v10063_v22, %v10062_v37  ;;  %v10073_v37 = vld [vmem:[#allocation37_spill] sm:$0xff] }
 0x5cf   : > { %v5412_v34 = vadd.f32 %v5343_v0, %v5098_v46  ;;  %v5611_v20 = vmax.f32 %v5563_v18, 0.0  ;;  %v5353_v2 = vpop.f32.mrf.mxu1  ;;  %v4160_v15 = vadd.f32 %v10070_v42, %v3846_v48  ;;  %v805_v18 = vunpack.c.h.bf16 %v315_v9  ;;  %v10077_v9 = vld [vmem:[#allocation60_spill] sm:$0xff] }
 0x5d0   : > { %v4158_v39 = vadd.f32 %v10064_v47, %v3844_v19 }
 0x5d1   : > { %5691 = vxpose.xlu2.b32.cont [2/16] (narrow) %v5611_v20, 8  ;;  %v5464_v16 = vmul.f32 %v9561_v29, %v5412_v34  ;;  %v4474_v46 = vadd.f32 %v4411_v51, %v4160_v15  ;;  %v10072_v34 = vld [vmem:[#allocation97_spill] sm:$0xff]  ;;  %v10080_v15 = vld [vmem:[#allocation82_spill] sm:$0xff] }
 0x5d2   : > { %v4717_v27 = vpop.f32.mrf.mxu3  ;;  %v4472_v21 = vadd.f32 %v4406_v13, %v4158_v39  ;;  %v3847_v20 = vadd.f32 %v10072_v34, %v10071_v49  ;;  %v10082_v34 = vld [vmem:[#allocation19_spill] sm:$0xff] }
 0x5d3   : > { %v4785_v10 = vadd.f32 %v4717_v27, %v4471_v54  ;;  %v5516_v0 = vadd.f32 %v9569_v56, %v5464_v16  ;;  %v317_v27 = vld [vmem:[%s6613_s22 + $0x98] sm:$0xff]  }
 0x5d4   : > { %v4161_v22 = vadd.f32 %v10073_v37, %v3847_v20 }
 0x5d5   : > { %v5099_v3 = vadd.f32 %v5031_v31, %v4785_v10  ;;  %v5564_v7 = vadd.f32 %v5516_v0, %v802_v30  ;;  %v4413_v31 = vpop.f32.mrf.mxu2  ;;  %v5044_v0 = vpop.f32.mrf.mxu0 }
 0x5d6   : > { %v4475_v51 = vadd.f32 %v4413_v31, %v4161_v22  ;;  %v807_v31 = vunpack.c.h.bf16 %v317_v27  ;;  %v10083_v22 = vld [vmem:[#allocation63_spill] sm:$0xff] }
 0x5d7   : > { %v5413_v36 = vadd.f32 %v5345_v4, %v5099_v3  ;;  %v5612_v40 = vmax.f32 %v5564_v7, 0.0  ;;  %v10067_v4 = vld [vmem:[#allocation11_spill] sm:$0xff]  ;;  %v5355_v26 = vpop.f32.mrf.mxu1  ;;  %v806_v3 = vunpack.c.l.bf16 %v317_v27 }
 0x5d8   : > { %v4159_v55 = vadd.f32 %v10067_v4, %v3845_v35  ;;  %v10078_v4 = vld [vmem:[#allocation101_spill] sm:$0xff] }
 0x5d9   : > { %5692 = vxpose.xlu2.b32.cont [3/16] (narrow) %v5612_v40, 8  ;;  %v5465_v8 = vmul.f32 %v9561_v29, %v5413_v36  ;;  %v10074_v36 = vld [vmem:[#allocation80_spill] sm:$0xff]  ;;  %v10075_v40 = vld [vmem:[#allocation99_spill] sm:$0xff] }
 0x5da   : > { %v4720_v33 = vpop.f32.mrf.mxu3  ;;  %v4473_v53 = vadd.f32 %v4408_v45, %v4159_v55  ;;  %v3849_v55 = vadd.f32 %v10078_v4, %v10077_v9  ;;  %v10088_v9 = vld [vmem:[#allocation73_spill] sm:$0xff] }
 0x5db   : > { %v4786_v41 = vadd.f32 %v4720_v33, %v4472_v21  ;;  %v5517_v12 = vadd.f32 %v9569_v56, %v5465_v8  ;;  %v3848_v21 = vadd.f32 %v10075_v40, %v10074_v36 }
 0x5dc   : > { %v4163_v48 = vadd.f32 %v10079_v52, %v3849_v55 }
 0x5dd   : > { %v5100_v59 = vadd.f32 %v5034_v14, %v4786_v41  ;;  %v5565_v32 = vadd.f32 %v5517_v12, %v803_v24  ;;  %v4162_v35 = vadd.f32 %v10076_v63, %v3848_v21 }
 0x5df   : > { %v5414_v13 = vadd.f32 %v5348_v44, %v5100_v59  ;;  %v5613_v57 = vmax.f32 %v5565_v32, 0.0  ;;  %v4416_v44 = vpop.f32.mrf.mxu2  ;;  %v5358_v47 = vpop.f32.mrf.mxu1 }
 0x5e0   : > { %v5046_v32 = vpop.f32.mrf.mxu0 }
 0x5e1   : > { %5693 = vxpose.xlu2.b32.cont [4/16] (narrow) %v5613_v57, 8  ;;  %v5466_v11 = vmul.f32 %v9561_v29, %v5414_v13 }
 0x5e2   : > { %v4722_v6 = vpop.f32.mrf.mxu3 }
 0x5e3   : > { %v4787_v62 = vadd.f32 %v4722_v6, %v4473_v53  ;;  %v5518_v23 = vadd.f32 %v9569_v56, %v5466_v11 }
 0x5e5   : > { %v5101_v14 = vadd.f32 %v5036_v5, %v4787_v62  ;;  %v5566_v38 = vadd.f32 %v5518_v23, %v804_v1 }
 0x5e7   : > { %v5415_v28 = vadd.f32 %v5350_v25, %v5101_v14  ;;  %v5614_v45 = vmax.f32 %v5566_v38, 0.0  ;;  %v4418_v25 = vpop.f32.mrf.mxu2  ;;  %v5360_v1 = vpop.f32.mrf.mxu1  ;;  %v808_v38 = vunpack.c.l.bf16 %v319_v50 }
 0x5e8   : > { %v4477_v14 = vadd.f32 %v4418_v25, %v4163_v48  ;;  %v10089_v48 = vld [vmem:[#allocation67_spill] sm:$0xff] }
 0x5e9   : > { %5694 = vxpose.xlu2.b32.cont [5/16] (narrow) %v5614_v45, 8  ;;  %v5467_v61 = vmul.f32 %v9561_v29, %v5415_v28 }
 0x5ea   : > { %v4725_v17 = vpop.f32.mrf.mxu3 }
 0x5eb   : > { %v4788_v54 = vadd.f32 %v4725_v17, %v4474_v46  ;;  %v5519_v30 = vadd.f32 %v9569_v56, %v5467_v61  ;;  %v5049_v46 = vpop.f32.mrf.mxu0 }
 0x5ed   : > { %v5102_v16 = vadd.f32 %v5039_v43, %v4788_v54  ;;  %v5567_v5 = vadd.f32 %v5519_v30, %v805_v18  ;;  %v4476_v43 = vadd.f32 %v4416_v44, %v4162_v35  ;;  %v10081_v44 = vld [vmem:[#allocation103_spill] sm:$0xff] }
 0x5ee   : > { %v3850_v28 = vadd.f32 %v10081_v44, %v10080_v15  ;;  %v323_v15 = vld [vmem:[%s6613_s22 + $0xb0] sm:$0xff]  }
 0x5ef   : > { %v5416_v19 = vadd.f32 %v5353_v2, %v5102_v16  ;;  %v5615_v10 = vmax.f32 %v5567_v5, 0.0  ;;  %v4421_v13 = vpop.f32.mrf.mxu2  ;;  %v5363_v49 = vpop.f32.mrf.mxu1  ;;  %v809_v5 = vunpack.c.h.bf16 %v319_v50  ;;  %v10091_v44 = vld [vmem:[#allocation25_spill] sm:$0xff] }
 0x5f0   : > { %v4164_v20 = vadd.f32 %v10082_v34, %v3850_v28  ;;  %v10092_v34 = vld [vmem:[#allocation69_spill] sm:$0xff] }
 0x5f1   : > { %5695 = vxpose.xlu2.b32.cont [6/16] (narrow) %v5615_v10, 8  ;;  %v5468_v7 = vmul.f32 %v9561_v29, %v5416_v19  ;;  %v10084_v19 = vld [vmem:[#allocation65_spill] sm:$0xff] }
 0x5f2   : > { %v4727_v39 = vpop.f32.mrf.mxu3  ;;  %v4478_v16 = vadd.f32 %v4421_v13, %v4164_v20  ;;  %v3851_v10 = vadd.f32 %v10084_v19, %v10083_v22  ;;  %v10093_v20 = vld [vmem:[#allocation16_spill] sm:$0xff]  ;;  %v10094_v19 = vld [vmem:[#allocation54_spill] sm:$0xff] }
 0x5f3   : > { %v4789_v24 = vadd.f32 %v4727_v39, %v4475_v51  ;;  %v5520_v8 = vadd.f32 %v9569_v56, %v5468_v7  ;;  %v5051_v7 = vpop.f32.mrf.mxu0  ;;  %v10085_v39 = vld [vmem:[#allocation23_spill] sm:$0xff] }
 0x5f4   : > { %v4165_v36 = vadd.f32 %v10085_v39, %v3851_v10 }
 0x5f5   : > { %v5103_v33 = vadd.f32 %v5041_v60, %v4789_v24  ;;  %v5568_v58 = vadd.f32 %v5520_v8, %v806_v3 }
 0x5f7   : > { %v5417_v41 = vadd.f32 %v5355_v26, %v5103_v33  ;;  %v5616_v12 = vmax.f32 %v5568_v58, 0.0  ;;  %v4423_v18 = vpop.f32.mrf.mxu2  ;;  %v5365_v8 = vpop.f32.mrf.mxu1 }
 0x5f8   : > { %v4479_v33 = vadd.f32 %v4423_v18, %v4165_v36  ;;  %v812_v18 = vunpack.c.l.bf16 %v323_v15  ;;  %v10095_v36 = vld [vmem:[#allocation89_spill] sm:$0xff] }
 0x5f9   : > { %5696 = vxpose.xlu2.b32.cont [7/16] (narrow) %v5616_v12, 8  ;;  %v5469_v59 = vmul.f32 %v9561_v29, %v5417_v41  ;;  %v10086_v41 = vld [vmem:[#allocation84_spill] sm:$0xff]  ;;  %v10087_v12 = vld [vmem:[#allocation34_spill] sm:$0xff] }
 0x5fa   : > { %v4730_v2 = vpop.f32.mrf.mxu3 }
 0x5fb   : > { %v4790_v57 = vadd.f32 %v4730_v2, %v4476_v43  ;;  %v5521_v53 = vadd.f32 %v9569_v56, %v5469_v59  ;;  %v3852_v43 = vadd.f32 %v10087_v12, %v10086_v41  ;;  %v325_v41 = vld [vmem:[%s6613_s22 + $0xb8] sm:$0xff]   ;;  %v10097_v12 = vld [vmem:[#allocation28_spill] sm:$0xff] }
 0x5fd   : > { %v5104_v11 = vadd.f32 %v5044_v0, %v4790_v57  ;;  %v5569_v6 = vadd.f32 %v5521_v53, %v807_v31  ;;  %v4166_v4 = vadd.f32 %v10088_v9, %v3852_v43  ;;  %v5054_v57 = vpop.f32.mrf.mxu0 }
 0x5ff   : > { %v5418_v62 = vadd.f32 %v5358_v47, %v5104_v11  ;;  %v5617_v23 = vmax.f32 %v5569_v6, 0.0  ;;  %v321_v47 = vld [vmem:[%s6613_s22 + $0xa8] sm:$0xff]   ;;  %v4426_v40 = vpop.f32.mrf.mxu2  ;;  %v5368_v50 = vpop.f32.mrf.mxu1  ;;  %s6454_s22 = smul.u32 24, %s10099_s25 }
 0x600   : > { %v810_v58 = vunpack.c.l.bf16 %v321_v47  ;;  %v4480_v53 = vadd.f32 %v4426_v40, %v4166_v4  ;;  %v811_v11 = vunpack.c.h.bf16 %v321_v47  ;;  %v10096_v40 = vld [vmem:[#allocation45_spill] sm:$0xff] }
 0x601   : > { %5697 = vxpose.xlu2.b32.cont [8/16] (narrow) %v5617_v23, 8  ;;  %v5470_v60 = vmul.f32 %v9561_v29, %v5418_v62  ;;  %v10090_v62 = vld [vmem:[#allocation14_spill] sm:$0xff]  ;;  %s278_s12 = scalar_lea.vmem %s9652_s7, %s6454_s22 }
 0x602   : > { %v4732_v42 = vpop.f32.mrf.mxu3  ;;  %v3853_v23 = vadd.f32 %v10090_v62, %v10089_v48 }
 0x603   : > { %v4791_v45 = vadd.f32 %v4732_v42, %v4477_v14  ;;  %v5522_v26 = vadd.f32 %v9569_v56, %v5470_v60 }
 0x604   : > { %v4167_v28 = vadd.f32 %v10091_v44, %v3853_v23 }
 0x605   : > { %v5105_v61 = vadd.f32 %v5046_v32, %v4791_v45  ;;  %v5570_v17 = vadd.f32 %v5522_v26, %v808_v38 }
 0x607   : > { %v5419_v54 = vadd.f32 %v5360_v1, %v5105_v61  ;;  %v5618_v30 = vmax.f32 %v5570_v17, 0.0  ;;  %v4428_v1 = vpop.f32.mrf.mxu2  ;;  %v5056_v17 = vpop.f32.mrf.mxu0 }
 0x609   : > { %5698 = vxpose.xlu2.b32.cont [9/16] (narrow) %v5618_v30, 8  ;;  %v5471_v27 = vmul.f32 %v9561_v29, %v5419_v54  ;;  %v3854_v54 = vadd.f32 %v10093_v20, %v10092_v34 }
 0x60a   : > { %v4735_v37 = vpop.f32.mrf.mxu3 }
 0x60b   : > { %v4792_v0 = vadd.f32 %v4735_v37, %v4478_v16  ;;  %v5523_v51 = vadd.f32 %v9569_v56, %v5471_v27  ;;  %v5370_v27 = vpop.f32.mrf.mxu1  ;;  %v4168_v10 = vadd.f32 %v10094_v19, %v3854_v54 }
 0x60d   : > { %v5106_v25 = vadd.f32 %v5049_v46, %v4792_v0  ;;  %v5571_v3 = vadd.f32 %v5523_v51, %v809_v5  ;;  %v4481_v46 = vadd.f32 %v4428_v1, %v4167_v28 }
 0x60f   : > { %v5420_v21 = vadd.f32 %v5363_v49, %v5106_v25  ;;  %v5619_v24 = vmax.f32 %v5571_v3, 0.0  ;;  %v4431_v5 = vpop.f32.mrf.mxu2  ;;  %v813_v3 = vunpack.c.h.bf16 %v323_v15  ;;  %v5059_v47 = vpop.f32.mrf.mxu0 }
 0x610   : > { %v4482_v25 = vadd.f32 %v4431_v5, %v4168_v10 }
 0x611   : > { %5699 = vxpose.xlu2.b32.cont [10/16] (narrow) %v5619_v24, 8  ;;  %v5472_v63 = vmul.f32 %v9561_v29, %v5420_v21  ;;  %v3855_v21 = vadd.f32 %v10096_v40, %v10095_v36 }
 0x612   : > { %v4737_v35 = vpop.f32.mrf.mxu3 }
 0x613   : > { %v4793_v31 = vadd.f32 %v4737_v35, %v4479_v33  ;;  %v5524_v59 = vadd.f32 %v9569_v56, %v5472_v63  ;;  %v5373_v33 = vpop.f32.mrf.mxu1  ;;  %v4169_v43 = vadd.f32 %v10097_v12, %v3855_v21 }
 0x615   : > { %v5107_v32 = vadd.f32 %v5051_v7, %v4793_v31  ;;  %v5572_v2 = vadd.f32 %v5524_v59, %v810_v58 }
 0x617   : > { %v5421_v55 = vadd.f32 %v5365_v8, %v5107_v32  ;;  %v5620_v13 = vmax.f32 %v5572_v2, 0.0  ;;  %v4433_v35 = vpop.f32.mrf.mxu2  ;;  %v814_v2 = vunpack.c.l.bf16 %v325_v41 }
 0x618   : > { %v4483_v32 = vadd.f32 %v4433_v35, %v4169_v43 }
 0x619   : > { %5700 = vxpose.xlu2.b32.cont [11/16] (narrow) %v5620_v13, 8  ;;  %v5473_v6 = vmul.f32 %v9561_v29, %v5421_v55 }
 0x61a   : > { %v4740_v52 = vpop.f32.mrf.mxu3 }
 0x61b   : > { %v4794_v14 = vadd.f32 %v4740_v52, %v4480_v53  ;;  %v5525_v38 = vadd.f32 %v9569_v56, %v5473_v6  ;;  %v815_v52 = vunpack.c.h.bf16 %v325_v41 }
 0x61d   : > { %v5108_v60 = vadd.f32 %v5054_v57, %v4794_v14  ;;  %v5573_v42 = vadd.f32 %v5525_v38, %v811_v11  ;;  %v5061_v57 = vpop.f32.mrf.mxu0  ;;  %v5375_v11 = vpop.f32.mrf.mxu1 }
 0x61e   : > { %v5674_v38 = vpop.trf.xlu1 }
 0x61f   : > { %v5422_v45 = vadd.f32 %v5368_v50, %v5108_v60  ;;  %v5621_v26 = vmax.f32 %v5573_v42, 0.0  ;;  %v5642_v60 = vpop.trf.xlu0  ;;  %5723 = vst [vmem:[%s278_s12 + $0x8] sm:$0xff] %v5674_v38 }
 0x620   : > { %5722 = vst [vmem:[%s278_s12] sm:$0xff] %v5642_v60 }
 0x621   : > { %5701 = vxpose.xlu2.b32.cont [12/16] (narrow) %v5621_v26, 8  ;;  %v5474_v61 = vmul.f32 %v9561_v29, %v5422_v45 }
 0x622   : > { %v4742_v49 = vpop.f32.mrf.mxu3 }
 0x623   : > { %v4795_v30 = vadd.f32 %v4742_v49, %v4481_v46  ;;  %v5526_v16 = vadd.f32 %v9569_v56, %v5474_v61 }
 0x625   : > { %v5109_v37 = vadd.f32 %v5056_v17, %v4795_v30  ;;  %v5574_v22 = vadd.f32 %v5526_v16, %v812_v18 }
 0x627   : > { %v5423_v0 = vadd.f32 %v5370_v27, %v5109_v37  ;;  %v5622_v51 = vmax.f32 %v5574_v22, 0.0 }
 0x629   : > { %5702 = vxpose.xlu2.b32.cont [13/16] (narrow) %v5622_v51, 8  ;;  %v5475_v7 = vmul.f32 %v9561_v29, %v5423_v0 }
 0x62a   : > { %v4745_v39 = vpop.f32.mrf.mxu3 }
 0x62b   : > { %v4796_v24 = vadd.f32 %v4745_v39, %v4482_v25  ;;  %v5527_v8 = vadd.f32 %v9569_v56, %v5475_v7 }
 0x62d   : > { %v5110_v58 = vadd.f32 %v5059_v47, %v4796_v24  ;;  %v5575_v63 = vadd.f32 %v5527_v8, %v813_v3 }
 0x62f   : > { %v5424_v31 = vadd.f32 %v5373_v33, %v5110_v58  ;;  %v5623_v59 = vmax.f32 %v5575_v63, 0.0 }
 0x631   : > { %5703 = vxpose.xlu2.b32.cont [14/16] (narrow) %v5623_v59, 8  ;;  %v5476_v9 = vmul.f32 %v9561_v29, %v5424_v31 }
 0x632   : > { %v4747_v4 = vpop.f32.mrf.mxu3 }
 0x633   : > { %v4797_v55 = vadd.f32 %v4747_v4, %v4483_v32  ;;  %v5528_v13 = vadd.f32 %v9569_v56, %v5476_v9 }
 0x635   : > { %v5111_v53 = vadd.f32 %v5061_v57, %v4797_v55  ;;  %v5576_v1 = vadd.f32 %v5528_v13, %v814_v2 }
 0x637   : > { %v5425_v6 = vadd.f32 %v5375_v11, %v5111_v53  ;;  %v5624_v50 = vmax.f32 %v5576_v1, 0.0 }
 0x639   : > { %5704 = vxpose.xlu2.b32.cont [15/16] (narrow) %v5624_v50, 8  ;;  %v5477_v48 = vmul.f32 %v9561_v29, %v5425_v6 }
 0x63b   : > { %v5529_v62 = vadd.f32 %v9569_v56, %v5477_v48 }
 0x63d   : > { %v5577_v23 = vadd.f32 %v5529_v62, %v815_v52 }
 0x63f   : > { %v5625_v14 = vmax.f32 %v5577_v23, 0.0 }
 0x641   : > { %5705 = vxpose.xlu2.b32.end [16/16] (narrow) %v5625_v14, 8 }
 0x662   : > { %v5706_v42 = vpop.trf.xlu2 }
 0x663   : > { %5724 = vst [vmem:[%s278_s12 + $0x10] sm:$0xff] %v5706_v42 }
 0x664 PF: > { %s17_s24 = sadd.s32 1, %s6529_s24  }
 0x665   : > { %p14_p4 = scmp.ge.s32.totalorder %s17_s24, 4  }
 0x667   :  { %16 = sbr.rel (!%p14_p4) target bundleno = 1 (0x1), region = 86 }

</bundles_post_ra>
